<compile_context>
chip_gen: v6e
topology: v6e:2x2x1
jax: 0.10.0
libtpu: 0.0.40
codegen_flags: <defaults>
</compile_context>

<pallas_src>
import math

import jax
import jax.numpy as jnp
from jax.experimental import pallas as pl
from jax.experimental.pallas import tpu as pltpu


# ----------------------------------------------------------------------------
# helpers
# ----------------------------------------------------------------------------
def _ceil_to(x, m):
    return (x + m - 1) // m * m


_VMEM_LIMIT = 32 * 1024 * 1024


# ----------------------------------------------------------------------------
# Pallas kernel: fused (multi-source concat) 3x3 conv, pad=1, bias + LeakyReLU
# ----------------------------------------------------------------------------
def _make_conv3x3_kernel(n_src, H, W, Ctot, slope):
    def kernel(*refs):
        src_refs = refs[:n_src]
        w_ref, b_ref, o_ref, win_ref, patch_ref = refs[n_src:]

        # Zero-padded window in VMEM.  Border is rewritten to zero every step
        # (cheap, and safe under megacore grid partitioning); interior is the
        # channel-concat of all sources (the HBM concat is gone).
        win_ref[...] = jnp.zeros_like(win_ref)
        if n_src == 1:
            xcat = src_refs[0][0]
        else:
            xcat = jnp.concatenate([r[0] for r in src_refs], axis=-1)
        win_ref[1:H + 1, 1:W + 1, :] = xcat

        # In-VMEM im2col: 9 shifted views -> (H*W, 9*Ctot) patches.
        for dh in range(3):
            for dw in range(3):
                k0 = (dh * 3 + dw) * Ctot
                patch_ref[:, k0:k0 + Ctot] = (
                    win_ref[dh:dh + H, dw:dw + W, :].reshape(H * W, Ctot))

        # Single big-K MXU matmul with fp32 accumulation, then bias + LeakyReLU.
        y = jnp.dot(patch_ref[...], w_ref[...],
                    preferred_element_type=jnp.float32)
        y = y + b_ref[...]
        y = jnp.where(y >= 0.0, y, slope * y)
        o_ref[0] = y.reshape(H, W, y.shape[-1]).astype(o_ref.dtype)

    return kernel


def conv3x3_fused(srcs, src_logical_c, w, b, *, out_dtype,
                  negative_slope=0.01):
    """nn.Conv2d(k=3, s=1, p=1) + LeakyReLU over the channel-concat of `srcs`.

    srcs           : list of (N, H, W, C_i) bf16 arrays (extra channels beyond the
                     logical count must be exact zeros -- e.g. lane padding).
    src_logical_c  : per-source number of weight input channels (sum == w Cin).
    w              : (3, 3, sum(src_logical_c), Cout) fp32
    b              : (Cout,) fp32
    Returns (N, H, W, Coutp) with Coutp = ceil(Cout, 128); padded output channels
    are exact zeros (zero weight columns + zero bias + LeakyReLU(0) == 0).
    """
    N, H, W, _ = srcs[0].shape
    Cout = w.shape[-1]
    Coutp = _ceil_to(Cout, 128)

    # Pack the weight to match the fed (possibly channel-padded) sources:
    # K rows ordered (dh, dw, source-concat channel), columns padded to Coutp.
    parts, off = [], 0
    for s, lc in zip(srcs, src_logical_c):
        fc = s.shape[-1]
        wp = w[:, :, off:off + lc, :]
        wp = jnp.pad(wp, ((0, 0), (0, 0), (0, fc - lc), (0, Coutp - Cout)))
        parts.append(wp)
        off += lc
    wcat = jnp.concatenate(parts, axis=2)            # (3, 3, Ctot, Coutp)
    Ctot = wcat.shape[2]
    wmat = wcat.reshape(9 * Ctot, Coutp).astype(jnp.bfloat16)
    b2 = jnp.pad(b, (0, Coutp - Cout)).reshape(1, Coutp).astype(jnp.float32)

    tn = 256 if Coutp % 256 == 0 else 128
    grid = (Coutp // tn, N)                          # co outer (weight resident), n inner

    in_specs = [pl.BlockSpec((1, H, W, s.shape[-1]), lambda co, n: (n, 0, 0, 0))
                for s in srcs]
    in_specs += [
        pl.BlockSpec((9 * Ctot, tn), lambda co, n: (0, co)),
        pl.BlockSpec((1, tn), lambda co, n: (0, co)),
    ]

    return pl.pallas_call(
        _make_conv3x3_kernel(len(srcs), H, W, Ctot, negative_slope),
        out_shape=jax.ShapeDtypeStruct((N, H, W, Coutp), out_dtype),
        grid=grid,
        in_specs=in_specs,
        out_specs=pl.BlockSpec((1, H, W, tn), lambda co, n: (n, 0, 0, co)),
        scratch_shapes=[
            pltpu.VMEM((H + 2, W + 2, Ctot), jnp.bfloat16),   # padded window
            pltpu.VMEM((H * W, 9 * Ctot), jnp.bfloat16),      # im2col patches
        ],
        compiler_params=pltpu.CompilerParams(
            dimension_semantics=("parallel", "parallel"),
            vmem_limit_bytes=_VMEM_LIMIT,
        ),
    )(*srcs, wmat, b2)


# ----------------------------------------------------------------------------
# Pallas kernel: 2x2 / stride-2 transposed conv (single matmul, taps along N)
# ----------------------------------------------------------------------------
def _make_upconv_kernel(H, W, Coutp):
    def kernel(x_ref, w_ref, b_ref, o_ref):
        Cin = x_ref.shape[-1]
        x2 = x_ref[0].reshape(H * W, Cin)
        # One matmul: (H*W, Cin) x (Cin, 4*Coutp), columns ordered (dh, dw, co).
        y = jnp.dot(x2, w_ref[...], preferred_element_type=jnp.float32)
        for dh in range(2):
            z = y[:, dh * 2 * Coutp:(dh + 1) * 2 * Coutp] + b_ref[...]
            o_ref[0, :, dh, :, :] = z.reshape(H, W, 2 * Coutp).astype(o_ref.dtype)

    return kernel


def conv_transpose2x2(x, w, b):
    """nn.ConvTranspose2d(k=2, s=2).  x: (N,H,W,Cin) bf16, w: (2,2,Cin,Cout).

    Returns (N, 2H, 2W, Coutp) bf16; padded output channels are exact zeros.
    """
    N, H, W, Cin = x.shape
    Cout = w.shape[-1]
    Coutp = _ceil_to(Cout, 128)

    wp = jnp.pad(w, ((0, 0), (0, 0), (0, 0), (0, Coutp - Cout)))
    wmat = jnp.transpose(wp, (2, 0, 1, 3)).reshape(Cin, 4 * Coutp).astype(jnp.bfloat16)
    b2 = jnp.tile(jnp.pad(b, (0, Coutp - Cout)), 2).reshape(1, 2 * Coutp).astype(jnp.float32)

    x = x.astype(jnp.bfloat16)
    out = pl.pallas_call(
        _make_upconv_kernel(H, W, Coutp),
        out_shape=jax.ShapeDtypeStruct((N, H, 2, W, 2 * Coutp), jnp.bfloat16),
        grid=(N,),
        in_specs=[
            pl.BlockSpec((1, H, W, Cin), lambda n: (n, 0, 0, 0)),
            pl.BlockSpec((Cin, 4 * Coutp), lambda n: (0, 0)),
            pl.BlockSpec((1, 2 * Coutp), lambda n: (0, 0)),
        ],
        out_specs=pl.BlockSpec((1, H, 2, W, 2 * Coutp), lambda n: (n, 0, 0, 0, 0)),
        compiler_params=pltpu.CompilerParams(
            dimension_semantics=("parallel",),
            vmem_limit_bytes=_VMEM_LIMIT,
        ),
    )(x, wmat, b2)

    # (N, H, 2, W, 2*Coutp) -> (N, 2H, 2W, Coutp): pure row-major reshape.
    return out.reshape(N, 2 * H, 2 * W, Coutp)


# ----------------------------------------------------------------------------
# Upsampling module (forward) and its parameters
# ----------------------------------------------------------------------------
def init_upsampling_params(key, in_ch, out_ch):
    ks = jax.random.split(key, 6)

    def conv_init(kw, kb, k, cin, cout):
        bound = 1.0 / math.sqrt(cin * k * k)
        w = jax.random.uniform(kw, (k, k, cin, cout), jnp.float32, -bound, bound)
        b = jax.random.uniform(kb, (cout,), jnp.float32, -bound, bound)
        return w, b

    up_w, up_b = conv_init(ks[0], ks[1], 2, in_ch, out_ch)
    c1_w, c1_b = conv_init(ks[2], ks[3], 3, 2 * out_ch, out_ch)
    c2_w, c2_b = conv_init(ks[4], ks[5], 3, out_ch, out_ch)
    return {"up.w": up_w, "up.b": up_b,
            "conv1.w": c1_w, "conv1.b": c1_b,
            "conv2.w": c2_w, "conv2.b": c2_b}


def upsampling_forward(params, x_nchw, skip_nchw):
    out_ch = params["up.b"].shape[0]

    # NCHW -> NHWC with the bf16 cast fused into the same pass.
    # TODO(synk): keep the surrounding model NHWC end-to-end to drop these.
    x = jnp.transpose(x_nchw, (0, 2, 3, 1)).astype(jnp.bfloat16)
    skip = jnp.transpose(skip_nchw, (0, 2, 3, 1)).astype(jnp.bfloat16)

    up = conv_transpose2x2(x, params["up.w"], params["up.b"])      # bf16
    # conv1 with the channel concat folded in (up first, then skip — matches
    # torch.cat([x, skip], axis=1)); bf16 intermediate output.
    h = conv3x3_fused([up, skip], [out_ch, out_ch],
                      params["conv1.w"], params["conv1.b"],
                      out_dtype=jnp.bfloat16)
    # conv2: final output in f32.
    h = conv3x3_fused([h], [out_ch],
                      params["conv2.w"], params["conv2.b"],
                      out_dtype=jnp.float32)
    h = h[..., :out_ch]
    return jnp.transpose(h, (0, 3, 1, 2))                          # NHWC -> NCHW


# ----------------------------------------------------------------------------
# pure-JAX fp32 reference for a numerical sanity check
# ----------------------------------------------------------------------------
def _leaky(x, slope=0.01):
    return jnp.where(x >= 0, x, slope * x)


def _conv3x3_ref(x, w, b):
    y = jax.lax.conv_general_dilated(
        x, w, window_strides=(1, 1), padding="SAME",
        dimension_numbers=("NHWC", "HWIO", "NHWC"))
    return y + b


def _upconv_ref(x, w, b):
    N, H, W, _ = x.shape
    Cout = w.shape[-1]
    y = jnp.einsum("nhwc,ijcd->nhiwjd", x, w)          # (N,H,2,W,2,Cout)
    return y.reshape(N, 2 * H, 2 * W, Cout) + b


def reference_forward(params, x_nchw, skip_nchw):
    x = jnp.transpose(x_nchw, (0, 2, 3, 1))
    skip = jnp.transpose(skip_nchw, (0, 2, 3, 1))
    up = _upconv_ref(x, params["up.w"], params["up.b"])
    h = jnp.concatenate([up, skip], axis=-1)
    h = _leaky(_conv3x3_ref(h, params["conv1.w"], params["conv1.b"]))
    h = _leaky(_conv3x3_ref(h, params["conv2.w"], params["conv2.b"]))
    return jnp.transpose(h, (0, 3, 1, 2))


# ----------------------------------------------------------------------------
if __name__ == "__main__":
    in_ch, out_ch = 256, 128                           # lane-dense (multiples of 128)
    N, H, W = 2, 8, 8                                  # x: 8x8 -> upsampled 16x16
    key = jax.random.PRNGKey(0)
    kp, kx, ks = jax.random.split(key, 3)

    params = init_upsampling_params(kp, in_ch, out_ch)
    x = jax.random.normal(kx, (N, in_ch, H, W), jnp.float32)
    skip = jax.random.normal(ks, (N, out_ch, 2 * H, 2 * W), jnp.float32)

    fwd = jax.jit(upsampling_forward)
    out = fwd(params, x, skip)
    jax.block_until_ready(out)

    assert out.shape == (N, out_ch, 2 * H, 2 * W), out.shape
    assert out.dtype == jnp.float32

    ref = reference_forward(params, x, skip)
    max_err = float(jnp.max(jnp.abs(out - ref)))
    assert max_err < 1e-1, f"max abs err vs fp32 reference: {max_err}"

    print("KERNEL_OK")
</pallas_src>

<mosaic_0001>
module attributes {stable_mosaic.version = 11 : i64} {
  func.func @kernel(%arg0: i32, %arg1: memref<1x8x8x256xbf16, #tpu.memory_space<vmem>>, %arg2: memref<256x512xbf16, #tpu.memory_space<vmem>>, %arg3: memref<1x256xf32, #tpu.memory_space<vmem>>, %arg4: memref<1x8x2x8x256xbf16, #tpu.memory_space<vmem>>) attributes {dimension_semantics = [#tpu.dimension_semantics<parallel>], iteration_bounds = array<i64: 2>, scalar_prefetch = 0 : i64, scratch_operands = 0 : i64, tpu.core_type = #tpu.core_type<tc>, window_params = [{transform_indices = @transform_0, window_bounds = array<i64: 1, 8, 8, 256>}, {pipeline_mode = #tpu.pipeline_mode<synchronous>, transform_indices = @transform_1, window_bounds = array<i64: 256, 512>}, {pipeline_mode = #tpu.pipeline_mode<synchronous>, transform_indices = @transform_2, window_bounds = array<i64: 1, 256>}, {transform_indices = @transform_3, window_bounds = array<i64: 1, 8, 2, 8, 256>}]} {
    %c0 = arith.constant 0 : index
    %c0_0 = arith.constant 0 : index
    %c0_1 = arith.constant 0 : index
    %c0_2 = arith.constant 0 : index
    %0 = vector.load %arg1[%c0, %c0_0, %c0_1, %c0_2] : memref<1x8x8x256xbf16, #tpu.memory_space<vmem>>, vector<1x8x8x256xbf16>
    %1 = vector.shape_cast %0 : vector<1x8x8x256xbf16> to vector<8x8x256xbf16>
    %2 = vector.shape_cast %1 : vector<8x8x256xbf16> to vector<64x256xbf16>
    %c0_3 = arith.constant 0 : index
    %c0_4 = arith.constant 0 : index
    %3 = vector.load %arg2[%c0_3, %c0_4] : memref<256x512xbf16, #tpu.memory_space<vmem>>, vector<256x512xbf16>
    %cst = arith.constant dense<0.000000e+00> : vector<64x512xf32>
    %4 = tpu.matmul %2, %3, %cst {dimension_numbers = #tpu.dot_dimension_numbers<[1], [0], [0], [1], [0, 0, 1, 1], [], []>} : vector<64x256xbf16>, vector<256x512xbf16>, vector<64x512xf32> -> vector<64x512xf32>
    %5 = vector.extract_strided_slice %4 {offsets = [0, 0], sizes = [64, 256], strides = [1, 1]} : vector<64x512xf32> to vector<64x256xf32>
    %c0_5 = arith.constant 0 : index
    %c0_6 = arith.constant 0 : index
    %6 = vector.load %arg3[%c0_5, %c0_6] : memref<1x256xf32, #tpu.memory_space<vmem>>, vector<1x256xf32>
    %7 = vector.broadcast %6 : vector<1x256xf32> to vector<64x256xf32>
    %8 = arith.addf %5, %7 : vector<64x256xf32>
    %9 = vector.shape_cast %8 : vector<64x256xf32> to vector<8x8x256xf32>
    %10 = arith.truncf %9 : vector<8x8x256xf32> to vector<8x8x256xbf16>
    %c0_7 = arith.constant 0 : index
    %c0_8 = arith.constant 0 : index
    %c0_9 = arith.constant 0 : index
    %c0_10 = arith.constant 0 : index
    %c0_11 = arith.constant 0 : index
    %11 = vector.load %arg4[%c0_7, %c0_8, %c0_9, %c0_10, %c0_11] : memref<1x8x2x8x256xbf16, #tpu.memory_space<vmem>>, vector<1x8x1x8x256xbf16>
    %12 = vector.shape_cast %11 : vector<1x8x1x8x256xbf16> to vector<8x8x256xbf16>
    %13 = vector.shape_cast %10 : vector<8x8x256xbf16> to vector<1x8x1x8x256xbf16>
    tpu.vector_store %arg4[%c0_7, %c0_8, %c0_9, %c0_10, %c0_11], %13 {strides = array<i32>} : memref<1x8x2x8x256xbf16, #tpu.memory_space<vmem>>, vector<1x8x1x8x256xbf16>,
    %14 = vector.extract_strided_slice %4 {offsets = [0, 256], sizes = [64, 256], strides = [1, 1]} : vector<64x512xf32> to vector<64x256xf32>
    %c0_12 = arith.constant 0 : index
    %c0_13 = arith.constant 0 : index
    %15 = vector.load %arg3[%c0_12, %c0_13] : memref<1x256xf32, #tpu.memory_space<vmem>>, vector<1x256xf32>
    %16 = vector.broadcast %15 : vector<1x256xf32> to vector<64x256xf32>
    %17 = arith.addf %14, %16 : vector<64x256xf32>
    %18 = vector.shape_cast %17 : vector<64x256xf32> to vector<8x8x256xf32>
    %19 = arith.truncf %18 : vector<8x8x256xf32> to vector<8x8x256xbf16>
    %c0_14 = arith.constant 0 : index
    %c0_15 = arith.constant 0 : index
    %c1 = arith.constant 1 : index
    %c0_16 = arith.constant 0 : index
    %c0_17 = arith.constant 0 : index
    %20 = vector.load %arg4[%c0_14, %c0_15, %c1, %c0_16, %c0_17] : memref<1x8x2x8x256xbf16, #tpu.memory_space<vmem>>, vector<1x8x1x8x256xbf16>
    %21 = vector.shape_cast %20 : vector<1x8x1x8x256xbf16> to vector<8x8x256xbf16>
    %22 = vector.shape_cast %19 : vector<8x8x256xbf16> to vector<1x8x1x8x256xbf16>
    tpu.vector_store %arg4[%c0_14, %c0_15, %c1, %c0_16, %c0_17], %22 {strides = array<i32>} : memref<1x8x2x8x256xbf16, #tpu.memory_space<vmem>>, vector<1x8x1x8x256xbf16>,
    return
  }
  func.func @transform_0(%arg0: i32) -> (i32, i32, i32, i32) {
    %c0_i32 = arith.constant 0 : i32
    %c0_i32_0 = arith.constant 0 : i32
    %c0_i32_1 = arith.constant 0 : i32
    %c0_i32_2 = arith.constant 0 : i32
    return %arg0, %c0_i32, %c0_i32_0, %c0_i32_1 : i32, i32, i32, i32
  }
  func.func @transform_1(%arg0: i32) -> (i32, i32) {
    %c0_i32 = arith.constant 0 : i32
    %c0_i32_0 = arith.constant 0 : i32
    %c0_i32_1 = arith.constant 0 : i32
    return %c0_i32, %c0_i32_0 : i32, i32
  }
  func.func @transform_2(%arg0: i32) -> (i32, i32) {
    %c0_i32 = arith.constant 0 : i32
    %c0_i32_0 = arith.constant 0 : i32
    %c0_i32_1 = arith.constant 0 : i32
    return %c0_i32, %c0_i32_0 : i32, i32
  }
  func.func @transform_3(%arg0: i32) -> (i32, i32, i32, i32, i32) {
    %c0_i32 = arith.constant 0 : i32
    %c0_i32_0 = arith.constant 0 : i32
    %c0_i32_1 = arith.constant 0 : i32
    %c0_i32_2 = arith.constant 0 : i32
    %c0_i32_3 = arith.constant 0 : i32
    return %arg0, %c0_i32, %c0_i32_0, %c0_i32_1, %c0_i32_2 : i32, i32, i32, i32, i32
  }
}

module attributes {stable_mosaic.version = 11 : i64} {
  func.func @kernel(%arg0: i32, %arg1: i32, %arg2: memref<1x16x16x128xbf16, #tpu.memory_space<vmem>>, %arg3: memref<1x16x16x128xbf16, #tpu.memory_space<vmem>>, %arg4: memref<2304x128xbf16, #tpu.memory_space<vmem>>, %arg5: memref<1x128xf32, #tpu.memory_space<vmem>>, %arg6: memref<1x16x16x128xbf16, #tpu.memory_space<vmem>>, %arg7: memref<18x18x256xbf16, #tpu.memory_space<vmem>>, %arg8: memref<256x2304xbf16, #tpu.memory_space<vmem>>) attributes {dimension_semantics = [#tpu.dimension_semantics<parallel>, #tpu.dimension_semantics<parallel>], iteration_bounds = array<i64: 1, 2>, scalar_prefetch = 0 : i64, scratch_operands = 2 : i64, tpu.core_type = #tpu.core_type<tc>, window_params = [{transform_indices = @transform_0, window_bounds = array<i64: 1, 16, 16, 128>}, {transform_indices = @transform_1, window_bounds = array<i64: 1, 16, 16, 128>}, {transform_indices = @transform_2, window_bounds = array<i64: 2304, 128>}, {transform_indices = @transform_3, window_bounds = array<i64: 1, 128>}, {transform_indices = @transform_4, window_bounds = array<i64: 1, 16, 16, 128>}]} {
    %cst = arith.constant 0.000000e+00 : bf16
    %0 = vector.broadcast %cst : bf16 to vector<18x18x256xbf16>
    %c0 = arith.constant 0 : index
    %c0_0 = arith.constant 0 : index
    %c0_1 = arith.constant 0 : index
    %1 = vector.load %arg7[%c0, %c0_0, %c0_1] : memref<18x18x256xbf16, #tpu.memory_space<vmem>>, vector<18x18x256xbf16>
    tpu.vector_store %arg7[%c0, %c0_0, %c0_1], %0 {strides = array<i32>} : memref<18x18x256xbf16, #tpu.memory_space<vmem>>, vector<18x18x256xbf16>,
    %c0_2 = arith.constant 0 : index
    %c0_3 = arith.constant 0 : index
    %c0_4 = arith.constant 0 : index
    %c0_5 = arith.constant 0 : index
    %2 = vector.load %arg2[%c0_2, %c0_3, %c0_4, %c0_5] : memref<1x16x16x128xbf16, #tpu.memory_space<vmem>>, vector<1x16x16x128xbf16>
    %3 = vector.shape_cast %2 : vector<1x16x16x128xbf16> to vector<16x16x128xbf16>
    %c0_6 = arith.constant 0 : index
    %c0_7 = arith.constant 0 : index
    %c0_8 = arith.constant 0 : index
    %c0_9 = arith.constant 0 : index
    %4 = vector.load %arg3[%c0_6, %c0_7, %c0_8, %c0_9] : memref<1x16x16x128xbf16, #tpu.memory_space<vmem>>, vector<1x16x16x128xbf16>
    %5 = vector.shape_cast %4 : vector<1x16x16x128xbf16> to vector<16x16x128xbf16>
    %6 = tpu.concatenate %3, %5 in 2 : vector<16x16x128xbf16>, vector<16x16x128xbf16> -> vector<16x16x256xbf16>
    %c1 = arith.constant 1 : index
    %c1_10 = arith.constant 1 : index
    %c0_11 = arith.constant 0 : index
    %7 = vector.load %arg7[%c1, %c1_10, %c0_11] : memref<18x18x256xbf16, #tpu.memory_space<vmem>>, vector<16x16x256xbf16>
    tpu.vector_store %arg7[%c1, %c1_10, %c0_11], %6 {strides = array<i32>} : memref<18x18x256xbf16, #tpu.memory_space<vmem>>, vector<16x16x256xbf16>,
    %c0_12 = arith.constant 0 : index
    %c0_13 = arith.constant 0 : index
    %c0_14 = arith.constant 0 : index
    %8 = vector.load %arg7[%c0_12, %c0_13, %c0_14] : memref<18x18x256xbf16, #tpu.memory_space<vmem>>, vector<16x16x256xbf16>
    %9 = vector.shape_cast %8 : vector<16x16x256xbf16> to vector<256x256xbf16>
    %c0_15 = arith.constant 0 : index
    %c0_16 = arith.constant 0 : index
    %10 = vector.load %arg8[%c0_15, %c0_16] : memref<256x2304xbf16, #tpu.memory_space<vmem>>, vector<256x256xbf16>
    tpu.vector_store %arg8[%c0_15, %c0_16], %9 {strides = array<i32>} : memref<256x2304xbf16, #tpu.memory_space<vmem>>, vector<256x256xbf16>,
    %c0_17 = arith.constant 0 : index
    %c1_18 = arith.constant 1 : index
    %c0_19 = arith.constant 0 : index
    %11 = vector.load %arg7[%c0_17, %c1_18, %c0_19] : memref<18x18x256xbf16, #tpu.memory_space<vmem>>, vector<16x16x256xbf16>
    %12 = vector.shape_cast %11 : vector<16x16x256xbf16> to vector<256x256xbf16>
    %c0_20 = arith.constant 0 : index
    %c256 = arith.constant 256 : index
    %13 = vector.load %arg8[%c0_20, %c256] : memref<256x2304xbf16, #tpu.memory_space<vmem>>, vector<256x256xbf16>
    tpu.vector_store %arg8[%c0_20, %c256], %12 {strides = array<i32>} : memref<256x2304xbf16, #tpu.memory_space<vmem>>, vector<256x256xbf16>,
    %c0_21 = arith.constant 0 : index
    %c2 = arith.constant 2 : index
    %c0_22 = arith.constant 0 : index
    %14 = vector.load %arg7[%c0_21, %c2, %c0_22] : memref<18x18x256xbf16, #tpu.memory_space<vmem>>, vector<16x16x256xbf16>
    %15 = vector.shape_cast %14 : vector<16x16x256xbf16> to vector<256x256xbf16>
    %c0_23 = arith.constant 0 : index
    %c512 = arith.constant 512 : index
    %16 = vector.load %arg8[%c0_23, %c512] : memref<256x2304xbf16, #tpu.memory_space<vmem>>, vector<256x256xbf16>
    tpu.vector_store %arg8[%c0_23, %c512], %15 {strides = array<i32>} : memref<256x2304xbf16, #tpu.memory_space<vmem>>, vector<256x256xbf16>,
    %c1_24 = arith.constant 1 : index
    %c0_25 = arith.constant 0 : index
    %c0_26 = arith.constant 0 : index
    %17 = vector.load %arg7[%c1_24, %c0_25, %c0_26] : memref<18x18x256xbf16, #tpu.memory_space<vmem>>, vector<16x16x256xbf16>
    %18 = vector.shape_cast %17 : vector<16x16x256xbf16> to vector<256x256xbf16>
    %c0_27 = arith.constant 0 : index
    %c768 = arith.constant 768 : index
    %19 = vector.load %arg8[%c0_27, %c768] : memref<256x2304xbf16, #tpu.memory_space<vmem>>, vector<256x256xbf16>
    tpu.vector_store %arg8[%c0_27, %c768], %18 {strides = array<i32>} : memref<256x2304xbf16, #tpu.memory_space<vmem>>, vector<256x256xbf16>,
    %c1_28 = arith.constant 1 : index
    %c1_29 = arith.constant 1 : index
    %c0_30 = arith.constant 0 : index
    %20 = vector.load %arg7[%c1_28, %c1_29, %c0_30] : memref<18x18x256xbf16, #tpu.memory_space<vmem>>, vector<16x16x256xbf16>
    %21 = vector.shape_cast %20 : vector<16x16x256xbf16> to vector<256x256xbf16>
    %c0_31 = arith.constant 0 : index
    %c1024 = arith.constant 1024 : index
    %22 = vector.load %arg8[%c0_31, %c1024] : memref<256x2304xbf16, #tpu.memory_space<vmem>>, vector<256x256xbf16>
    tpu.vector_store %arg8[%c0_31, %c1024], %21 {strides = array<i32>} : memref<256x2304xbf16, #tpu.memory_space<vmem>>, vector<256x256xbf16>,
    %c1_32 = arith.constant 1 : index
    %c2_33 = arith.constant 2 : index
    %c0_34 = arith.constant 0 : index
    %23 = vector.load %arg7[%c1_32, %c2_33, %c0_34] : memref<18x18x256xbf16, #tpu.memory_space<vmem>>, vector<16x16x256xbf16>
    %24 = vector.shape_cast %23 : vector<16x16x256xbf16> to vector<256x256xbf16>
    %c0_35 = arith.constant 0 : index
    %c1280 = arith.constant 1280 : index
    %25 = vector.load %arg8[%c0_35, %c1280] : memref<256x2304xbf16, #tpu.memory_space<vmem>>, vector<256x256xbf16>
    tpu.vector_store %arg8[%c0_35, %c1280], %24 {strides = array<i32>} : memref<256x2304xbf16, #tpu.memory_space<vmem>>, vector<256x256xbf16>,
    %c2_36 = arith.constant 2 : index
    %c0_37 = arith.constant 0 : index
    %c0_38 = arith.constant 0 : index
    %26 = vector.load %arg7[%c2_36, %c0_37, %c0_38] : memref<18x18x256xbf16, #tpu.memory_space<vmem>>, vector<16x16x256xbf16>
    %27 = vector.shape_cast %26 : vector<16x16x256xbf16> to vector<256x256xbf16>
    %c0_39 = arith.constant 0 : index
    %c1536 = arith.constant 1536 : index
    %28 = vector.load %arg8[%c0_39, %c1536] : memref<256x2304xbf16, #tpu.memory_space<vmem>>, vector<256x256xbf16>
    tpu.vector_store %arg8[%c0_39, %c1536], %27 {strides = array<i32>} : memref<256x2304xbf16, #tpu.memory_space<vmem>>, vector<256x256xbf16>,
    %c2_40 = arith.constant 2 : index
    %c1_41 = arith.constant 1 : index
    %c0_42 = arith.constant 0 : index
    %29 = vector.load %arg7[%c2_40, %c1_41, %c0_42] : memref<18x18x256xbf16, #tpu.memory_space<vmem>>, vector<16x16x256xbf16>
    %30 = vector.shape_cast %29 : vector<16x16x256xbf16> to vector<256x256xbf16>
    %c0_43 = arith.constant 0 : index
    %c1792 = arith.constant 1792 : index
    %31 = vector.load %arg8[%c0_43, %c1792] : memref<256x2304xbf16, #tpu.memory_space<vmem>>, vector<256x256xbf16>
    tpu.vector_store %arg8[%c0_43, %c1792], %30 {strides = array<i32>} : memref<256x2304xbf16, #tpu.memory_space<vmem>>, vector<256x256xbf16>,
    %c2_44 = arith.constant 2 : index
    %c2_45 = arith.constant 2 : index
    %c0_46 = arith.constant 0 : index
    %32 = vector.load %arg7[%c2_44, %c2_45, %c0_46] : memref<18x18x256xbf16, #tpu.memory_space<vmem>>, vector<16x16x256xbf16>
    %33 = vector.shape_cast %32 : vector<16x16x256xbf16> to vector<256x256xbf16>
    %c0_47 = arith.constant 0 : index
    %c2048 = arith.constant 2048 : index
    %34 = vector.load %arg8[%c0_47, %c2048] : memref<256x2304xbf16, #tpu.memory_space<vmem>>, vector<256x256xbf16>
    tpu.vector_store %arg8[%c0_47, %c2048], %33 {strides = array<i32>} : memref<256x2304xbf16, #tpu.memory_space<vmem>>, vector<256x256xbf16>,
    %c0_48 = arith.constant 0 : index
    %c0_49 = arith.constant 0 : index
    %35 = vector.load %arg8[%c0_48, %c0_49] : memref<256x2304xbf16, #tpu.memory_space<vmem>>, vector<256x2304xbf16>
    %c0_50 = arith.constant 0 : index
    %c0_51 = arith.constant 0 : index
    %36 = vector.load %arg4[%c0_50, %c0_51] : memref<2304x128xbf16, #tpu.memory_space<vmem>>, vector<2304x128xbf16>
    %cst_52 = arith.constant dense<0.000000e+00> : vector<256x128xf32>
    %37 = tpu.matmul %35, %36, %cst_52 {dimension_numbers = #tpu.dot_dimension_numbers<[1], [0], [0], [1], [0, 0, 1, 1], [], []>} : vector<256x2304xbf16>, vector<2304x128xbf16>, vector<256x128xf32> -> vector<256x128xf32>
    %c0_53 = arith.constant 0 : index
    %c0_54 = arith.constant 0 : index
    %38 = vector.load %arg5[%c0_53, %c0_54] : memref<1x128xf32, #tpu.memory_space<vmem>>, vector<1x128xf32>
    %39 = vector.broadcast %38 : vector<1x128xf32> to vector<256x128xf32>
    %40 = arith.addf %37, %39 : vector<256x128xf32>
    %cst_55 = arith.constant 0.000000e+00 : f32
    %41 = vector.broadcast %cst_55 : f32 to vector<256x128xf32>
    %42 = arith.cmpf oge, %40, %41 : vector<256x128xf32>
    %cst_56 = arith.constant 0.00999999977 : f32
    %43 = vector.broadcast %cst_56 : f32 to vector<256x128xf32>
    %44 = arith.mulf %43, %40 : vector<256x128xf32>
    %45 = arith.select %42, %40, %44 : vector<256x128xi1>, vector<256x128xf32>
    %46 = vector.shape_cast %45 : vector<256x128xf32> to vector<16x16x128xf32>
    %47 = arith.truncf %46 : vector<16x16x128xf32> to vector<16x16x128xbf16>
    %c0_57 = arith.constant 0 : index
    %c0_58 = arith.constant 0 : index
    %c0_59 = arith.constant 0 : index
    %c0_60 = arith.constant 0 : index
    %48 = vector.load %arg6[%c0_57, %c0_58, %c0_59, %c0_60] : memref<1x16x16x128xbf16, #tpu.memory_space<vmem>>, vector<1x16x16x128xbf16>
    %49 = vector.shape_cast %48 : vector<1x16x16x128xbf16> to vector<16x16x128xbf16>
    %50 = vector.shape_cast %47 : vector<16x16x128xbf16> to vector<1x16x16x128xbf16>
    tpu.vector_store %arg6[%c0_57, %c0_58, %c0_59, %c0_60], %50 {strides = array<i32>} : memref<1x16x16x128xbf16, #tpu.memory_space<vmem>>, vector<1x16x16x128xbf16>,
    return
  }
  func.func @transform_0(%arg0: i32, %arg1: i32) -> (i32, i32, i32, i32) {
    %c0_i32 = arith.constant 0 : i32
    %c0_i32_0 = arith.constant 0 : i32
    %c0_i32_1 = arith.constant 0 : i32
    %c0_i32_2 = arith.constant 0 : i32
    return %arg1, %c0_i32, %c0_i32_0, %c0_i32_1 : i32, i32, i32, i32
  }
  func.func @transform_1(%arg0: i32, %arg1: i32) -> (i32, i32, i32, i32) {
    %c0_i32 = arith.constant 0 : i32
    %c0_i32_0 = arith.constant 0 : i32
    %c0_i32_1 = arith.constant 0 : i32
    %c0_i32_2 = arith.constant 0 : i32
    return %arg1, %c0_i32, %c0_i32_0, %c0_i32_1 : i32, i32, i32, i32
  }
  func.func @transform_2(%arg0: i32, %arg1: i32) -> (i32, i32) {
    %c0_i32 = arith.constant 0 : i32
    %c0_i32_0 = arith.constant 0 : i32
    return %c0_i32, %arg0 : i32, i32
  }
  func.func @transform_3(%arg0: i32, %arg1: i32) -> (i32, i32) {
    %c0_i32 = arith.constant 0 : i32
    %c0_i32_0 = arith.constant 0 : i32
    return %c0_i32, %arg0 : i32, i32
  }
  func.func @transform_4(%arg0: i32, %arg1: i32) -> (i32, i32, i32, i32) {
    %c0_i32 = arith.constant 0 : i32
    %c0_i32_0 = arith.constant 0 : i32
    %c0_i32_1 = arith.constant 0 : i32
    return %arg1, %c0_i32, %c0_i32_0, %arg0 : i32, i32, i32, i32
  }
}

module attributes {stable_mosaic.version = 11 : i64} {
  func.func @kernel(%arg0: i32, %arg1: i32, %arg2: memref<1x16x16x128xbf16, #tpu.memory_space<vmem>>, %arg3: memref<1152x128xbf16, #tpu.memory_space<vmem>>, %arg4: memref<1x128xf32, #tpu.memory_space<vmem>>, %arg5: memref<1x16x16x128xf32, #tpu.memory_space<vmem>>, %arg6: memref<18x18x128xbf16, #tpu.memory_space<vmem>>, %arg7: memref<256x1152xbf16, #tpu.memory_space<vmem>>) attributes {dimension_semantics = [#tpu.dimension_semantics<parallel>, #tpu.dimension_semantics<parallel>], iteration_bounds = array<i64: 1, 2>, scalar_prefetch = 0 : i64, scratch_operands = 2 : i64, tpu.core_type = #tpu.core_type<tc>, window_params = [{transform_indices = @transform_0, window_bounds = array<i64: 1, 16, 16, 128>}, {transform_indices = @transform_1, window_bounds = array<i64: 1152, 128>}, {transform_indices = @transform_2, window_bounds = array<i64: 1, 128>}, {transform_indices = @transform_3, window_bounds = array<i64: 1, 16, 16, 128>}]} {
    %cst = arith.constant 0.000000e+00 : bf16
    %0 = vector.broadcast %cst : bf16 to vector<18x18x128xbf16>
    %c0 = arith.constant 0 : index
    %c0_0 = arith.constant 0 : index
    %c0_1 = arith.constant 0 : index
    %1 = vector.load %arg6[%c0, %c0_0, %c0_1] : memref<18x18x128xbf16, #tpu.memory_space<vmem>>, vector<18x18x128xbf16>
    tpu.vector_store %arg6[%c0, %c0_0, %c0_1], %0 {strides = array<i32>} : memref<18x18x128xbf16, #tpu.memory_space<vmem>>, vector<18x18x128xbf16>,
    %c0_2 = arith.constant 0 : index
    %c0_3 = arith.constant 0 : index
    %c0_4 = arith.constant 0 : index
    %c0_5 = arith.constant 0 : index
    %2 = vector.load %arg2[%c0_2, %c0_3, %c0_4, %c0_5] : memref<1x16x16x128xbf16, #tpu.memory_space<vmem>>, vector<1x16x16x128xbf16>
    %3 = vector.shape_cast %2 : vector<1x16x16x128xbf16> to vector<16x16x128xbf16>
    %c1 = arith.constant 1 : index
    %c1_6 = arith.constant 1 : index
    %c0_7 = arith.constant 0 : index
    %4 = vector.load %arg6[%c1, %c1_6, %c0_7] : memref<18x18x128xbf16, #tpu.memory_space<vmem>>, vector<16x16x128xbf16>
    tpu.vector_store %arg6[%c1, %c1_6, %c0_7], %3 {strides = array<i32>} : memref<18x18x128xbf16, #tpu.memory_space<vmem>>, vector<16x16x128xbf16>,
    %c0_8 = arith.constant 0 : index
    %c0_9 = arith.constant 0 : index
    %c0_10 = arith.constant 0 : index
    %5 = vector.load %arg6[%c0_8, %c0_9, %c0_10] : memref<18x18x128xbf16, #tpu.memory_space<vmem>>, vector<16x16x128xbf16>
    %6 = vector.shape_cast %5 : vector<16x16x128xbf16> to vector<256x128xbf16>
    %c0_11 = arith.constant 0 : index
    %c0_12 = arith.constant 0 : index
    %7 = vector.load %arg7[%c0_11, %c0_12] : memref<256x1152xbf16, #tpu.memory_space<vmem>>, vector<256x128xbf16>
    tpu.vector_store %arg7[%c0_11, %c0_12], %6 {strides = array<i32>} : memref<256x1152xbf16, #tpu.memory_space<vmem>>, vector<256x128xbf16>,
    %c0_13 = arith.constant 0 : index
    %c1_14 = arith.constant 1 : index
    %c0_15 = arith.constant 0 : index
    %8 = vector.load %arg6[%c0_13, %c1_14, %c0_15] : memref<18x18x128xbf16, #tpu.memory_space<vmem>>, vector<16x16x128xbf16>
    %9 = vector.shape_cast %8 : vector<16x16x128xbf16> to vector<256x128xbf16>
    %c0_16 = arith.constant 0 : index
    %c128 = arith.constant 128 : index
    %10 = vector.load %arg7[%c0_16, %c128] : memref<256x1152xbf16, #tpu.memory_space<vmem>>, vector<256x128xbf16>
    tpu.vector_store %arg7[%c0_16, %c128], %9 {strides = array<i32>} : memref<256x1152xbf16, #tpu.memory_space<vmem>>, vector<256x128xbf16>,
    %c0_17 = arith.constant 0 : index
    %c2 = arith.constant 2 : index
    %c0_18 = arith.constant 0 : index
    %11 = vector.load %arg6[%c0_17, %c2, %c0_18] : memref<18x18x128xbf16, #tpu.memory_space<vmem>>, vector<16x16x128xbf16>
    %12 = vector.shape_cast %11 : vector<16x16x128xbf16> to vector<256x128xbf16>
    %c0_19 = arith.constant 0 : index
    %c256 = arith.constant 256 : index
    %13 = vector.load %arg7[%c0_19, %c256] : memref<256x1152xbf16, #tpu.memory_space<vmem>>, vector<256x128xbf16>
    tpu.vector_store %arg7[%c0_19, %c256], %12 {strides = array<i32>} : memref<256x1152xbf16, #tpu.memory_space<vmem>>, vector<256x128xbf16>,
    %c1_20 = arith.constant 1 : index
    %c0_21 = arith.constant 0 : index
    %c0_22 = arith.constant 0 : index
    %14 = vector.load %arg6[%c1_20, %c0_21, %c0_22] : memref<18x18x128xbf16, #tpu.memory_space<vmem>>, vector<16x16x128xbf16>
    %15 = vector.shape_cast %14 : vector<16x16x128xbf16> to vector<256x128xbf16>
    %c0_23 = arith.constant 0 : index
    %c384 = arith.constant 384 : index
    %16 = vector.load %arg7[%c0_23, %c384] : memref<256x1152xbf16, #tpu.memory_space<vmem>>, vector<256x128xbf16>
    tpu.vector_store %arg7[%c0_23, %c384], %15 {strides = array<i32>} : memref<256x1152xbf16, #tpu.memory_space<vmem>>, vector<256x128xbf16>,
    %c1_24 = arith.constant 1 : index
    %c1_25 = arith.constant 1 : index
    %c0_26 = arith.constant 0 : index
    %17 = vector.load %arg6[%c1_24, %c1_25, %c0_26] : memref<18x18x128xbf16, #tpu.memory_space<vmem>>, vector<16x16x128xbf16>
    %18 = vector.shape_cast %17 : vector<16x16x128xbf16> to vector<256x128xbf16>
    %c0_27 = arith.constant 0 : index
    %c512 = arith.constant 512 : index
    %19 = vector.load %arg7[%c0_27, %c512] : memref<256x1152xbf16, #tpu.memory_space<vmem>>, vector<256x128xbf16>
    tpu.vector_store %arg7[%c0_27, %c512], %18 {strides = array<i32>} : memref<256x1152xbf16, #tpu.memory_space<vmem>>, vector<256x128xbf16>,
    %c1_28 = arith.constant 1 : index
    %c2_29 = arith.constant 2 : index
    %c0_30 = arith.constant 0 : index
    %20 = vector.load %arg6[%c1_28, %c2_29, %c0_30] : memref<18x18x128xbf16, #tpu.memory_space<vmem>>, vector<16x16x128xbf16>
    %21 = vector.shape_cast %20 : vector<16x16x128xbf16> to vector<256x128xbf16>
    %c0_31 = arith.constant 0 : index
    %c640 = arith.constant 640 : index
    %22 = vector.load %arg7[%c0_31, %c640] : memref<256x1152xbf16, #tpu.memory_space<vmem>>, vector<256x128xbf16>
    tpu.vector_store %arg7[%c0_31, %c640], %21 {strides = array<i32>} : memref<256x1152xbf16, #tpu.memory_space<vmem>>, vector<256x128xbf16>,
    %c2_32 = arith.constant 2 : index
    %c0_33 = arith.constant 0 : index
    %c0_34 = arith.constant 0 : index
    %23 = vector.load %arg6[%c2_32, %c0_33, %c0_34] : memref<18x18x128xbf16, #tpu.memory_space<vmem>>, vector<16x16x128xbf16>
    %24 = vector.shape_cast %23 : vector<16x16x128xbf16> to vector<256x128xbf16>
    %c0_35 = arith.constant 0 : index
    %c768 = arith.constant 768 : index
    %25 = vector.load %arg7[%c0_35, %c768] : memref<256x1152xbf16, #tpu.memory_space<vmem>>, vector<256x128xbf16>
    tpu.vector_store %arg7[%c0_35, %c768], %24 {strides = array<i32>} : memref<256x1152xbf16, #tpu.memory_space<vmem>>, vector<256x128xbf16>,
    %c2_36 = arith.constant 2 : index
    %c1_37 = arith.constant 1 : index
    %c0_38 = arith.constant 0 : index
    %26 = vector.load %arg6[%c2_36, %c1_37, %c0_38] : memref<18x18x128xbf16, #tpu.memory_space<vmem>>, vector<16x16x128xbf16>
    %27 = vector.shape_cast %26 : vector<16x16x128xbf16> to vector<256x128xbf16>
    %c0_39 = arith.constant 0 : index
    %c896 = arith.constant 896 : index
    %28 = vector.load %arg7[%c0_39, %c896] : memref<256x1152xbf16, #tpu.memory_space<vmem>>, vector<256x128xbf16>
    tpu.vector_store %arg7[%c0_39, %c896], %27 {strides = array<i32>} : memref<256x1152xbf16, #tpu.memory_space<vmem>>, vector<256x128xbf16>,
    %c2_40 = arith.constant 2 : index
    %c2_41 = arith.constant 2 : index
    %c0_42 = arith.constant 0 : index
    %29 = vector.load %arg6[%c2_40, %c2_41, %c0_42] : memref<18x18x128xbf16, #tpu.memory_space<vmem>>, vector<16x16x128xbf16>
    %30 = vector.shape_cast %29 : vector<16x16x128xbf16> to vector<256x128xbf16>
    %c0_43 = arith.constant 0 : index
    %c1024 = arith.constant 1024 : index
    %31 = vector.load %arg7[%c0_43, %c1024] : memref<256x1152xbf16, #tpu.memory_space<vmem>>, vector<256x128xbf16>
    tpu.vector_store %arg7[%c0_43, %c1024], %30 {strides = array<i32>} : memref<256x1152xbf16, #tpu.memory_space<vmem>>, vector<256x128xbf16>,
    %c0_44 = arith.constant 0 : index
    %c0_45 = arith.constant 0 : index
    %32 = vector.load %arg7[%c0_44, %c0_45] : memref<256x1152xbf16, #tpu.memory_space<vmem>>, vector<256x1152xbf16>
    %c0_46 = arith.constant 0 : index
    %c0_47 = arith.constant 0 : index
    %33 = vector.load %arg3[%c0_46, %c0_47] : memref<1152x128xbf16, #tpu.memory_space<vmem>>, vector<1152x128xbf16>
    %cst_48 = arith.constant dense<0.000000e+00> : vector<256x128xf32>
    %34 = tpu.matmul %32, %33, %cst_48 {dimension_numbers = #tpu.dot_dimension_numbers<[1], [0], [0], [1], [0, 0, 1, 1], [], []>} : vector<256x1152xbf16>, vector<1152x128xbf16>, vector<256x128xf32> -> vector<256x128xf32>
    %c0_49 = arith.constant 0 : index
    %c0_50 = arith.constant 0 : index
    %35 = vector.load %arg4[%c0_49, %c0_50] : memref<1x128xf32, #tpu.memory_space<vmem>>, vector<1x128xf32>
    %36 = vector.broadcast %35 : vector<1x128xf32> to vector<256x128xf32>
    %37 = arith.addf %34, %36 : vector<256x128xf32>
    %cst_51 = arith.constant 0.000000e+00 : f32
    %38 = vector.broadcast %cst_51 : f32 to vector<256x128xf32>
    %39 = arith.cmpf oge, %37, %38 : vector<256x128xf32>
    %cst_52 = arith.constant 0.00999999977 : f32
    %40 = vector.broadcast %cst_52 : f32 to vector<256x128xf32>
    %41 = arith.mulf %40, %37 : vector<256x128xf32>
    %42 = arith.select %39, %37, %41 : vector<256x128xi1>, vector<256x128xf32>
    %43 = vector.shape_cast %42 : vector<256x128xf32> to vector<16x16x128xf32>
    %c0_53 = arith.constant 0 : index
    %c0_54 = arith.constant 0 : index
    %c0_55 = arith.constant 0 : index
    %c0_56 = arith.constant 0 : index
    %44 = vector.load %arg5[%c0_53, %c0_54, %c0_55, %c0_56] : memref<1x16x16x128xf32, #tpu.memory_space<vmem>>, vector<1x16x16x128xf32>
    %45 = vector.shape_cast %44 : vector<1x16x16x128xf32> to vector<16x16x128xf32>
    %46 = vector.shape_cast %43 : vector<16x16x128xf32> to vector<1x16x16x128xf32>
    tpu.vector_store %arg5[%c0_53, %c0_54, %c0_55, %c0_56], %46 {strides = array<i32>} : memref<1x16x16x128xf32, #tpu.memory_space<vmem>>, vector<1x16x16x128xf32>,
    return
  }
  func.func @transform_0(%arg0: i32, %arg1: i32) -> (i32, i32, i32, i32) {
    %c0_i32 = arith.constant 0 : i32
    %c0_i32_0 = arith.constant 0 : i32
    %c0_i32_1 = arith.constant 0 : i32
    %c0_i32_2 = arith.constant 0 : i32
    return %arg1, %c0_i32, %c0_i32_0, %c0_i32_1 : i32, i32, i32, i32
  }
  func.func @transform_1(%arg0: i32, %arg1: i32) -> (i32, i32) {
    %c0_i32 = arith.constant 0 : i32
    %c0_i32_0 = arith.constant 0 : i32
    return %c0_i32, %arg0 : i32, i32
  }
  func.func @transform_2(%arg0: i32, %arg1: i32) -> (i32, i32) {
    %c0_i32 = arith.constant 0 : i32
    %c0_i32_0 = arith.constant 0 : i32
    return %c0_i32, %arg0 : i32, i32
  }
  func.func @transform_3(%arg0: i32, %arg1: i32) -> (i32, i32, i32, i32) {
    %c0_i32 = arith.constant 0 : i32
    %c0_i32_0 = arith.constant 0 : i32
    %c0_i32_1 = arith.constant 0 : i32
    return %arg1, %c0_i32, %c0_i32_0, %arg0 : i32, i32, i32, i32
  }
}

</mosaic_0001>

<bundles_post_ra>
// kernel: tile.8
= control target key start
LH: loop header
LB: loop body
LE: loop exit
PB: predicated region body
PF: predicated region fallthrough
CT: control target
= control target key end

     0   :  { %s22_s0 = inlined_call_operand.vmem [shape: f32[128], index: 0, kind: input, shape index: {}]   ;;  %s23_s1 = inlined_call_operand.vmem [shape: f32[2,128], index: 1, kind: output, shape index: {}]  }
   0x1   :  { %v4_v0 = vld [vmem:[%s22_s0] ss:$0 sm:$0xff] }
   0x2   :  { %5 = vst [vmem:[%s23_s1] sm:$0x3] %v4_v0 }

// kernel: upsampling_forward.3
= control target key start
LH: loop header
LB: loop body
LE: loop exit
PB: predicated region body
PF: predicated region fallthrough
CT: control target
= control target key end

     0   :  { %s1274_s12 = smov 0   ;;  %s1565_s0 = inlined_call_operand.vmem [shape: bf16[2,8,8,256], index: 0, kind: input, shape index: {}]   ;;  %s1566_s1 = inlined_call_operand.vmem [shape: bf16[256,512], index: 1, kind: input, shape index: {}]   ;;  %s1567_s2 = inlined_call_operand.vmem [shape: f32[1,256], index: 2, kind: input, shape index: {}]   ;;  %s1568_s3 = inlined_call_operand.vmem [shape: bf16[2,8,2,8,256], index: 3, kind: output, shape index: {}]  }
   0x1 LB: > { %s1005_s13 = sadd.s32 4294967295, %s1252_s12   ;;  %p1009_p0 = scmp.ge.s32.totalorder %s1252_s12, 1  ;;  %s1252_s12 = sphi %s1274_s12, %s13_s12  }
   0x2   : > { %p137_p1 = scmp.lt.s32.totalorder %s1252_s12, 3 }
   0x4   : > { %p138_p2 = pnand %p1009_p0, %p137_p1 }
   0x5   : > { %p161_p3 = scmp.lt.s32.totalorder (!%p138_p2), %s1005_s13, 1 }
   0x6   : > { %141 = sbr.rel (%p138_p2) target bundleno = 304 (0x130), region = 32 }
   0xb   : > { %v1138_v0 = vld [vmem:[%s1566_s1 + $0xe4] ss:$16 sps:$4 sm:$0xff]   ;;  %v1140_v1 = vld [vmem:[%s1566_s1 + $0xec] ss:$16 sps:$4 sm:$0xff]   ;;  %v1142_v2 = vld [vmem:[%s1566_s1 + $0xe0] ss:$16 sps:$4 sm:$0xff]  }
   0xc   : > { %603 = vmatprep.subr.bf16.mxu0 %v1138_v0  ;;  %v1143_v3 = vld [vmem:[%s1566_s1 + $0xe8] ss:$16 sps:$4 sm:$0xff]   ;;  %676 = vmatprep.subr.bf16.mxu1 %v1140_v1  ;;  %v1144_v4 = vld [vmem:[%s1566_s1 + $0xc4] ss:$16 sps:$4 sm:$0xff]   ;;  %v1146_v5 = vld [vmem:[%s1566_s1 + $0xcc] ss:$16 sps:$4 sm:$0xff]  }
   0xd   : > { %604 = vmatpush1.bf16.msra.mxu0 %v1142_v2  ;;  %677 = vmatpush1.bf16.msra.mxu1 %v1143_v3  ;;  %v1148_v6 = vld [vmem:[%s1566_s1 + $0xc0] ss:$16 sps:$4 sm:$0xff]   ;;  %v1149_v7 = vld [vmem:[%s1566_s1 + $0xc8] ss:$16 sps:$4 sm:$0xff]   ;;  %v1150_v8 = vld [vmem:[%s1566_s1 + $0xa4] ss:$16 sps:$4 sm:$0xff]  }
   0xe   : > { %605 = vmatprep.subr.bf16.mxu0 %v1144_v4  ;;  %678 = vmatprep.subr.bf16.mxu1 %v1146_v5  ;;  %v1152_v9 = vld [vmem:[%s1566_s1 + $0xac] ss:$16 sps:$4 sm:$0xff]   ;;  %v1154_v10 = vld [vmem:[%s1566_s1 + $0xa0] ss:$16 sps:$4 sm:$0xff]   ;;  %v1155_v11 = vld [vmem:[%s1566_s1 + $0xa8] ss:$16 sps:$4 sm:$0xff]  }
   0xf   : > { %v1156_v12 = vld [vmem:[%s1566_s1 + $0x84] ss:$16 sps:$4 sm:$0xff]   ;;  %v1158_v13 = vld [vmem:[%s1566_s1 + $0x8c] ss:$16 sps:$4 sm:$0xff]   ;;  %v1160_v14 = vld [vmem:[%s1566_s1 + $0x80] ss:$16 sps:$4 sm:$0xff]  }
  0x10   : > { %v1161_v15 = vld [vmem:[%s1566_s1 + $0x88] ss:$16 sps:$4 sm:$0xff]   ;;  %v1162_v16 = vld [vmem:[%s1566_s1 + $0x64] ss:$16 sps:$4 sm:$0xff]   ;;  %v1164_v17 = vld [vmem:[%s1566_s1 + $0x6c] ss:$16 sps:$4 sm:$0xff]  }
  0x11   : > { %606 = vmatpush1.bf16.msra.mxu0 %v1148_v6  ;;  %679 = vmatpush1.bf16.msra.mxu1 %v1149_v7  ;;  %v1166_v18 = vld [vmem:[%s1566_s1 + $0x60] ss:$16 sps:$4 sm:$0xff]   ;;  %v1167_v19 = vld [vmem:[%s1566_s1 + $0x68] ss:$16 sps:$4 sm:$0xff]   ;;  %v1168_v20 = vld [vmem:[%s1566_s1 + $0x44] ss:$16 sps:$4 sm:$0xff]  }
  0x12   : > { %607 = vmatprep.subr.bf16.mxu0 %v1150_v8  ;;  %680 = vmatprep.subr.bf16.mxu1 %v1152_v9  ;;  %v1170_v21 = vld [vmem:[%s1566_s1 + $0x4c] ss:$16 sps:$4 sm:$0xff]   ;;  %v1172_v22 = vld [vmem:[%s1566_s1 + $0x40] ss:$16 sps:$4 sm:$0xff]   ;;  %v1173_v23 = vld [vmem:[%s1566_s1 + $0x48] ss:$16 sps:$4 sm:$0xff]   ;;  %v751_v8 = vlaneseq }
  0x13   : > { %v1174_v24 = vld [vmem:[%s1566_s1 + $0x24] ss:$16 sps:$4 sm:$0xff]   ;;  %v1176_v25 = vld [vmem:[%s1566_s1 + $0x2c] ss:$16 sps:$4 sm:$0xff]   ;;  %v1178_v26 = vld [vmem:[%s1566_s1 + $0x20] ss:$16 sps:$4 sm:$0xff]  }
  0x14   : > { %v1179_v27 = vld [vmem:[%s1566_s1 + $0x28] ss:$16 sps:$4 sm:$0xff]   ;;  %v1180_v28 = vld [vmem:[%s1566_s1 + $0x4] ss:$16 sps:$4 sm:$0xff]   ;;  %v1182_v29 = vld [vmem:[%s1566_s1 + $0xc] ss:$16 sps:$4 sm:$0xff]  }
  0x15   : > { %608 = vmatpush1.bf16.msra.mxu0 %v1154_v10  ;;  %681 = vmatpush1.bf16.msra.mxu1 %v1155_v11  ;;  %v1184_v30 = vld [vmem:[%s1566_s1] ss:$16 sps:$4 sm:$0xff]   ;;  %v1185_v31 = vld [vmem:[%s1566_s1 + $0x8] ss:$16 sps:$4 sm:$0xff]   ;;  %v1186_v32 = vld [vmem:[%s1566_s1 + $0x1e4] ss:$16 sps:$4 sm:$0xff]  }
  0x16   : > { %609 = vmatprep.subr.bf16.mxu0 %v1156_v12  ;;  %682 = vmatprep.subr.bf16.mxu1 %v1158_v13  ;;  %v1188_v33 = vld [vmem:[%s1566_s1 + $0x1ec] ss:$16 sps:$4 sm:$0xff]   ;;  %v1190_v34 = vld [vmem:[%s1566_s1 + $0x1e0] ss:$16 sps:$4 sm:$0xff]   ;;  %v1191_v35 = vld [vmem:[%s1566_s1 + $0x1e8] ss:$16 sps:$4 sm:$0xff]  }
  0x17   : > { %v1192_v36 = vld [vmem:[%s1566_s1 + $0x1c4] ss:$16 sps:$4 sm:$0xff]   ;;  %v1194_v37 = vld [vmem:[%s1566_s1 + $0x1cc] ss:$16 sps:$4 sm:$0xff]   ;;  %s1570_s13 = smov (!%p161_p3, %s1005_s13), 1  ;;  %v752_v9 = vshrl.u32 %v751_v8, 7 }
  0x18   : > { %v1196_v38 = vld [vmem:[%s1566_s1 + $0x1c0] ss:$16 sps:$4 sm:$0xff]   ;;  %v1197_v39 = vld [vmem:[%s1566_s1 + $0x1c8] ss:$16 sps:$4 sm:$0xff]   ;;  %v1198_v40 = vld [vmem:[%s1566_s1 + $0x1a4] ss:$16 sps:$4 sm:$0xff]  }
  0x19   : > { %610 = vmatpush1.bf16.msra.mxu0 %v1160_v14  ;;  %683 = vmatpush1.bf16.msra.mxu1 %v1161_v15  ;;  %v1200_v41 = vld [vmem:[%s1566_s1 + $0x1ac] ss:$16 sps:$4 sm:$0xff]   ;;  %s1112_s23 = sshll.u32 %s1570_s13, 6  ;;  %v1202_v42 = vld [vmem:[%s1566_s1 + $0x1a0] ss:$16 sps:$4 sm:$0xff]   ;;  %v753_v10 = vsub.s32 0, %v752_v9 }
  0x1a   : > { %611 = vmatprep.subr.bf16.mxu0 %v1162_v16  ;;  %684 = vmatprep.subr.bf16.mxu1 %v1164_v17  ;;  %v1203_v43 = vld [vmem:[%s1566_s1 + $0x1a8] ss:$16 sps:$4 sm:$0xff]   ;;  %v1204_v44 = vld [vmem:[%s1566_s1 + $0x184] ss:$16 sps:$4 sm:$0xff]   ;;  %s1427_s5 = scalar_lea.vmem %s1565_s0, %s1112_s23  ;;  %v1206_v45 = vld [vmem:[%s1566_s1 + $0x18c] ss:$16 sps:$4 sm:$0xff]  }
  0x1b   : > { %v1208_v46 = vld [vmem:[%s1566_s1 + $0x180] ss:$16 sps:$4 sm:$0xff]   ;;  %v1209_v47 = vld [vmem:[%s1566_s1 + $0x188] ss:$16 sps:$4 sm:$0xff]   ;;  %v1236_v48 = vld [vmem:[%s1427_s5 + $0x4] ss:$8 sps:$4 sm:$0xff]  }
  0x1c   : > { %v1210_v49 = vld [vmem:[%s1566_s1 + $0x164] ss:$16 sps:$4 sm:$0xff]   ;;  %v1212_v50 = vld [vmem:[%s1566_s1 + $0x16c] ss:$16 sps:$4 sm:$0xff]   ;;  %635 = vmatprep.mubr.bf16.mxu0 %v1236_v48  ;;  %708 = vmatprep.mubr.bf16.mxu1 %v1236_v48  ;;  %v1214_v51 = vld [vmem:[%s1566_s1 + $0x160] ss:$16 sps:$4 sm:$0xff]  }
  0x1d   : > { %612 = vmatpush1.bf16.msra.mxu0 %v1166_v18  ;;  %685 = vmatpush1.bf16.msra.mxu1 %v1167_v19  ;;  %v1215_v52 = vld [vmem:[%s1566_s1 + $0x168] ss:$16 sps:$4 sm:$0xff]   ;;  %v1216_v53 = vld [vmem:[%s1566_s1 + $0x144] ss:$16 sps:$4 sm:$0xff]   ;;  %v1218_v54 = vld [vmem:[%s1566_s1 + $0x14c] ss:$16 sps:$4 sm:$0xff]  }
  0x1e   : > { %613 = vmatprep.subr.bf16.mxu0 %v1168_v20  ;;  %686 = vmatprep.subr.bf16.mxu1 %v1170_v21  ;;  %v1220_v55 = vld [vmem:[%s1566_s1 + $0x140] ss:$16 sps:$4 sm:$0xff]   ;;  %v1221_v56 = vld [vmem:[%s1566_s1 + $0x148] ss:$16 sps:$4 sm:$0xff]   ;;  %v1222_v57 = vld [vmem:[%s1566_s1 + $0x124] ss:$16 sps:$4 sm:$0xff]  }
  0x1f   : > { %v1224_v58 = vld [vmem:[%s1566_s1 + $0x12c] ss:$16 sps:$4 sm:$0xff]   ;;  %v1226_v59 = vld [vmem:[%s1566_s1 + $0x120] ss:$16 sps:$4 sm:$0xff]   ;;  %v1227_v60 = vld [vmem:[%s1566_s1 + $0x128] ss:$16 sps:$4 sm:$0xff]  }
  0x20   : > { %v1228_v61 = vld [vmem:[%s1566_s1 + $0x104] ss:$16 sps:$4 sm:$0xff]   ;;  %v1230_v62 = vld [vmem:[%s1566_s1 + $0x10c] ss:$16 sps:$4 sm:$0xff]   ;;  %v1232_v63 = vld [vmem:[%s1566_s1 + $0x100] ss:$16 sps:$4 sm:$0xff]  }
  0x21   : > { %614 = vmatpush1.bf16.msra.mxu0 %v1172_v22  ;;  %687 = vmatpush1.bf16.msra.mxu1 %v1173_v23  ;;  %v1233_v0 = vld [vmem:[%s1566_s1 + $0x108] ss:$16 sps:$4 sm:$0xff]   ;;  %v1237_v2 = vld [vmem:[%s1427_s5 + $0x14] ss:$8 sps:$4 sm:$0xff]   ;;  %v1240_v4 = vld [vmem:[%s1427_s5 + $0x24] ss:$8 sps:$4 sm:$0xff]  }
  0x22   : > { %615 = vmatprep.subr.bf16.mxu0 %v1174_v24  ;;  %688 = vmatprep.subr.bf16.mxu1 %v1176_v25  ;;  %v1234_v1 = vld [vmem:[%s1427_s5] ss:$8 sps:$4 sm:$0xff]   ;;  %v1239_v3 = vld [vmem:[%s1427_s5 + $0x10] ss:$8 sps:$4 sm:$0xff]   ;;  %v1243_v6 = vld [vmem:[%s1427_s5 + $0x34] ss:$8 sps:$4 sm:$0xff]  }
  0x23   : > { %v1242_v5 = vld [vmem:[%s1427_s5 + $0x20] ss:$8 sps:$4 sm:$0xff]   ;;  %v1245_v7 = vld [vmem:[%s1427_s5 + $0x30] ss:$8 sps:$4 sm:$0xff]   ;;  %v757_v11 = vsub.s32 1, %v752_v9  ;;  %s1113_s5 = sshll.u32 %s1570_s13, 7 }
  0x24   : > { %v749_v12 = vld [vmem:[%s1567_s2] sm:$0x3]  ;;  %s1516_s28 = scalar_lea.vmem %s1568_s3, %s1113_s5 }
  0x25   : > { %616 = vmatpush1.bf16.msra.mxu0 %v1178_v26  ;;  %689 = vmatpush1.bf16.msra.mxu1 %v1179_v27  ;;  %v849_v13 = vld [vmem:[%s1567_s2] sm:$0x3]  ;;  %v1500_v14 = vrot.slane %v749_v12, %v753_v10  ;;  %v1504_v16 = vrot.slane %v749_v12, %v757_v11 }
  0x26   : > { %617 = vmatprep.subr.bf16.mxu0 %v1180_v28  ;;  %690 = vmatprep.subr.bf16.mxu1 %v1182_v29  ;;  %v1502_v15 = vrot.slane %v849_v13, %v753_v10  ;;  %v1506_v17 = vrot.slane %v849_v13, %v757_v11 }
  0x29   : > { %618 = vmatpush1.bf16.msra.mxu0 %v1184_v30  ;;  %691 = vmatpush1.bf16.msra.mxu1 %v1185_v31 }
  0x2a   : > { %619 = vmatprep.subr.bf16.mxu0 %v1186_v32  ;;  %692 = vmatprep.subr.bf16.mxu1 %v1188_v33 }
  0x2d   : > { %620 = vmatpush2.bf16.msra.mxu0 %v1190_v34  ;;  %693 = vmatpush2.bf16.msra.mxu1 %v1191_v35 }
  0x2e   : > { %621 = vmatprep.subr.bf16.mxu0 %v1192_v36  ;;  %694 = vmatprep.subr.bf16.mxu1 %v1194_v37 }
  0x31   : > { %622 = vmatpush2.bf16.msra.mxu0 %v1196_v38  ;;  %695 = vmatpush2.bf16.msra.mxu1 %v1197_v39 }
  0x32   : > { %623 = vmatprep.subr.bf16.mxu0 %v1198_v40  ;;  %696 = vmatprep.subr.bf16.mxu1 %v1200_v41 }
  0x35   : > { %624 = vmatpush2.bf16.msra.mxu0 %v1202_v42  ;;  %697 = vmatpush2.bf16.msra.mxu1 %v1203_v43 }
  0x36   : > { %625 = vmatprep.subr.bf16.mxu0 %v1204_v44  ;;  %698 = vmatprep.subr.bf16.mxu1 %v1206_v45 }
  0x39   : > { %626 = vmatpush2.bf16.msra.mxu0 %v1208_v46  ;;  %699 = vmatpush2.bf16.msra.mxu1 %v1209_v47 }
  0x3a   : > { %627 = vmatprep.subr.bf16.mxu0 %v1210_v49  ;;  %700 = vmatprep.subr.bf16.mxu1 %v1212_v50 }
  0x3d   : > { %628 = vmatpush2.bf16.msra.mxu0 %v1214_v51  ;;  %701 = vmatpush2.bf16.msra.mxu1 %v1215_v52 }
  0x3e   : > { %629 = vmatprep.subr.bf16.mxu0 %v1216_v53  ;;  %702 = vmatprep.subr.bf16.mxu1 %v1218_v54 }
  0x41   : > { %630 = vmatpush2.bf16.msra.mxu0 %v1220_v55  ;;  %703 = vmatpush2.bf16.msra.mxu1 %v1221_v56 }
  0x42   : > { %631 = vmatprep.subr.bf16.mxu0 %v1222_v57  ;;  %704 = vmatprep.subr.bf16.mxu1 %v1224_v58 }
  0x45   : > { %632 = vmatpush2.bf16.msra.mxu0 %v1226_v59  ;;  %705 = vmatpush2.bf16.msra.mxu1 %v1227_v60 }
  0x46   : > { %633 = vmatprep.subr.bf16.mxu0 %v1228_v61  ;;  %706 = vmatprep.subr.bf16.mxu1 %v1230_v62 }
  0x49   : > { %634 = vmatpush2.bf16.msra.mxu0 %v1232_v63  ;;  %707 = vmatpush2.bf16.msra.mxu1 %v1233_v0 }
  0x4c   : > { %636 = vmatmul.mubr.bf16.vlgmr.msra.gmra.mxu0 %v1234_v1  ;;  %709 = vmatmul.mubr.bf16.vlgmr.msra.gmra.mxu1 %v1234_v1 }
  0x4d   : > { %645 = vmatprep.mubr.bf16.mxu0 %v1237_v2  ;;  %718 = vmatprep.mubr.bf16.mxu1 %v1237_v2 }
  0x54   : > { %646 = vmatmul.mubr.bf16.gmra.mxu0 %v1239_v3  ;;  %719 = vmatmul.mubr.bf16.gmra.mxu1 %v1239_v3 }
  0x55   : > { %655 = vmatprep.mubr.bf16.mxu0 %v1240_v4  ;;  %728 = vmatprep.mubr.bf16.mxu1 %v1240_v4 }
  0x5c   : > { %656 = vmatmul.mubr.bf16.gmra.mxu0 %v1242_v5  ;;  %729 = vmatmul.mubr.bf16.gmra.mxu1 %v1242_v5 }
  0x5d   : > { %665 = vmatprep.mubr.bf16.mxu0 %v1243_v6  ;;  %738 = vmatprep.mubr.bf16.mxu1 %v1243_v6 }
  0x64   : > { %666 = vmatmul.mubr.bf16.gmra.mxu0 %v1245_v7  ;;  %739 = vmatmul.mubr.bf16.gmra.mxu1 %v1245_v7 }
 0x10c   : > { %v637_v18 = vpop.f32.mrf.mxu0  ;;  %v710_v19 = vpop.f32.mrf.mxu1 }
 0x10d   : > { %v761_v22 = vadd.f32 %v1500_v14, %v637_v18  ;;  %v861_v23 = vadd.f32 %v1502_v15, %v710_v19 }
 0x10e   : > { %v639_v20 = vpop.f32.mrf.mxu0  ;;  %v712_v21 = vpop.f32.mrf.mxu1 }
 0x10f   : > { %v762_v24 = vadd.f32 %v1504_v16, %v639_v20  ;;  %v862_v25 = vadd.f32 %v1506_v17, %v712_v21 }
 0x110   : > { %v641_v26 = vpop.f32.mrf.mxu0  ;;  %v714_v27 = vpop.f32.mrf.mxu1 }
 0x111   : > { %v1114_v28 = vpack.c.bf16 %v762_v24, %v761_v22  ;;  %v1122_v29 = vpack.c.bf16 %v862_v25, %v861_v23  ;;  %v763_v32 = vadd.f32 %v1500_v14, %v641_v26  ;;  %v863_v33 = vadd.f32 %v1502_v15, %v714_v27 }
 0x112   : > { %v643_v30 = vpop.f32.mrf.mxu0  ;;  %v716_v31 = vpop.f32.mrf.mxu1 }
 0x113   : > { %841 = vst [vmem:[%s1516_s28] sm:$0xff] %v1114_v28  ;;  %1102 = vst [vmem:[%s1516_s28 + $0x8] sm:$0xff] %v1122_v29  ;;  %v764_v34 = vadd.f32 %v1504_v16, %v643_v30  ;;  %v864_v35 = vadd.f32 %v1506_v17, %v716_v31 }
 0x114   : > { %v647_v36 = vpop.f32.mrf.mxu0  ;;  %v720_v37 = vpop.f32.mrf.mxu1 }
 0x115   : > { %v1115_v38 = vpack.c.bf16 %v764_v34, %v763_v32  ;;  %v1123_v39 = vpack.c.bf16 %v864_v35, %v863_v33  ;;  %v765_v42 = vadd.f32 %v1500_v14, %v647_v36  ;;  %v865_v43 = vadd.f32 %v1502_v15, %v720_v37 }
 0x116   : > { %v649_v40 = vpop.f32.mrf.mxu0  ;;  %v722_v41 = vpop.f32.mrf.mxu1 }
 0x117   : > { %842 = vst [vmem:[%s1516_s28 + $0x10] sm:$0xff] %v1115_v38  ;;  %1103 = vst [vmem:[%s1516_s28 + $0x18] sm:$0xff] %v1123_v39  ;;  %v766_v44 = vadd.f32 %v1504_v16, %v649_v40  ;;  %v866_v45 = vadd.f32 %v1506_v17, %v722_v41 }
 0x118   : > { %v651_v46 = vpop.f32.mrf.mxu0  ;;  %v724_v47 = vpop.f32.mrf.mxu1 }
 0x119   : > { %v1116_v48 = vpack.c.bf16 %v766_v44, %v765_v42  ;;  %v1124_v49 = vpack.c.bf16 %v866_v45, %v865_v43  ;;  %v767_v52 = vadd.f32 %v1500_v14, %v651_v46  ;;  %v867_v53 = vadd.f32 %v1502_v15, %v724_v47 }
 0x11a   : > { %v653_v50 = vpop.f32.mrf.mxu0  ;;  %v726_v51 = vpop.f32.mrf.mxu1 }
 0x11b   : > { %843 = vst [vmem:[%s1516_s28 + $0x20] sm:$0xff] %v1116_v48  ;;  %1104 = vst [vmem:[%s1516_s28 + $0x28] sm:$0xff] %v1124_v49  ;;  %v768_v54 = vadd.f32 %v1504_v16, %v653_v50  ;;  %v868_v55 = vadd.f32 %v1506_v17, %v726_v51 }
 0x11c   : > { %v657_v56 = vpop.f32.mrf.mxu0  ;;  %v730_v57 = vpop.f32.mrf.mxu1 }
 0x11d   : > { %v1117_v58 = vpack.c.bf16 %v768_v54, %v767_v52  ;;  %v1125_v59 = vpack.c.bf16 %v868_v55, %v867_v53  ;;  %v769_v62 = vadd.f32 %v1500_v14, %v657_v56  ;;  %v869_v63 = vadd.f32 %v1502_v15, %v730_v57 }
 0x11e   : > { %v659_v60 = vpop.f32.mrf.mxu0  ;;  %v732_v61 = vpop.f32.mrf.mxu1 }
 0x11f   : > { %844 = vst [vmem:[%s1516_s28 + $0x30] sm:$0xff] %v1117_v58  ;;  %1105 = vst [vmem:[%s1516_s28 + $0x38] sm:$0xff] %v1125_v59  ;;  %v770_v0 = vadd.f32 %v1504_v16, %v659_v60  ;;  %v870_v1 = vadd.f32 %v1506_v17, %v732_v61 }
 0x120   : > { %v661_v2 = vpop.f32.mrf.mxu0  ;;  %v734_v3 = vpop.f32.mrf.mxu1 }
 0x121   : > { %v1118_v4 = vpack.c.bf16 %v770_v0, %v769_v62  ;;  %v1126_v5 = vpack.c.bf16 %v870_v1, %v869_v63  ;;  %v771_v8 = vadd.f32 %v1500_v14, %v661_v2  ;;  %v871_v9 = vadd.f32 %v1502_v15, %v734_v3 }
 0x122   : > { %v663_v6 = vpop.f32.mrf.mxu0  ;;  %v736_v7 = vpop.f32.mrf.mxu1 }
 0x123   : > { %845 = vst [vmem:[%s1516_s28 + $0x40] sm:$0xff] %v1118_v4  ;;  %1106 = vst [vmem:[%s1516_s28 + $0x48] sm:$0xff] %v1126_v5  ;;  %v772_v10 = vadd.f32 %v1504_v16, %v663_v6  ;;  %v872_v11 = vadd.f32 %v1506_v17, %v736_v7 }
 0x124   : > { %v667_v12 = vpop.f32.mrf.mxu0  ;;  %v740_v13 = vpop.f32.mrf.mxu1 }
 0x125   : > { %v1119_v18 = vpack.c.bf16 %v772_v10, %v771_v8  ;;  %v1127_v19 = vpack.c.bf16 %v872_v11, %v871_v9  ;;  %v773_v22 = vadd.f32 %v1500_v14, %v667_v12  ;;  %v873_v23 = vadd.f32 %v1502_v15, %v740_v13 }
 0x126   : > { %v669_v20 = vpop.f32.mrf.mxu0  ;;  %v742_v21 = vpop.f32.mrf.mxu1 }
 0x127   : > { %846 = vst [vmem:[%s1516_s28 + $0x50] sm:$0xff] %v1119_v18  ;;  %1107 = vst [vmem:[%s1516_s28 + $0x58] sm:$0xff] %v1127_v19  ;;  %v774_v24 = vadd.f32 %v1504_v16, %v669_v20  ;;  %v874_v25 = vadd.f32 %v1506_v17, %v742_v21 }
 0x128   : > { %v671_v26 = vpop.f32.mrf.mxu0  ;;  %v744_v27 = vpop.f32.mrf.mxu1 }
 0x129   : > { %v1120_v28 = vpack.c.bf16 %v774_v24, %v773_v22  ;;  %v1128_v29 = vpack.c.bf16 %v874_v25, %v873_v23  ;;  %v775_v32 = vadd.f32 %v1500_v14, %v671_v26  ;;  %v875_v33 = vadd.f32 %v1502_v15, %v744_v27 }
 0x12a   : > { %v673_v30 = vpop.f32.mrf.mxu0  ;;  %v746_v31 = vpop.f32.mrf.mxu1 }
 0x12b   : > { %847 = vst [vmem:[%s1516_s28 + $0x60] sm:$0xff] %v1120_v28  ;;  %1108 = vst [vmem:[%s1516_s28 + $0x68] sm:$0xff] %v1128_v29  ;;  %v776_v34 = vadd.f32 %v1504_v16, %v673_v30  ;;  %v876_v35 = vadd.f32 %v1506_v17, %v746_v31 }
 0x12d   : > { %v1121_v36 = vpack.c.bf16 %v776_v34, %v775_v32  ;;  %v1129_v37 = vpack.c.bf16 %v876_v35, %v875_v33 }
 0x12f   : > { %848 = vst [vmem:[%s1516_s28 + $0x70] sm:$0xff] %v1121_v36  ;;  %1109 = vst [vmem:[%s1516_s28 + $0x78] sm:$0xff] %v1129_v37 }
 0x130 PF: > { %s13_s12 = sadd.s32 1, %s1252_s12  }
 0x131   : > { %p10_p4 = scmp.ge.s32.totalorder %s13_s12, 4  }
 0x133   :  { %12 = sbr.rel (!%p10_p4) target bundleno = 1 (0x1), region = 63 }

// kernel: upsampling_forward.5
= control target key start
LH: loop header
LB: loop body
LE: loop exit
PB: predicated region body
PF: predicated region fallthrough
CT: control target
= control target key end

     0   :  { %8 = vsyncpa [#allocation5], 0  ;;  %s8588_s0 = inlined_call_operand.vmem [shape: bf16[2,16,16,128], index: 0, kind: input, shape index: {}]   ;;  %s8589_s1 = inlined_call_operand.vmem [shape: bf16[1152,128], index: 1, kind: input, shape index: {}]   ;;  %s8590_s2 = inlined_call_operand.vmem [shape: f32[1,128], index: 2, kind: input, shape index: {}]   ;;  %s8591_s3 = inlined_call_operand.hbm [shape: f32[2,16,16,128], index: 3, kind: output, shape index: {}]  }
   0x1   :  { %10 = vsyncpa [#allocation5 + $0x1], 0  ;;  %s7031_s12 = smov 0   ;;  %s7033_s13 = smov 0  }
   0x2   :  { %s7035_s14 = smov 0   ;;  %s7037_s15 = smov 0  }
   0x3   :  { %s7039_s16 = smov 0   ;;  %s7041_s17 = smov 0  }
   0x4 LB: > { %s5771_s18 = sadd.s32 4294967295, %s7005_s17   ;;  %s5772_s19 = sadd.s32 4294967294, %s7005_s17   ;;  %s7005_s17 = sphi %s7041_s17, %s16_s17   ;;  %s7001_s16 = sphi %s7039_s16, %s8653_s16   ;;  %s6997_s15 = sphi %s7037_s15, %s8652_s15   ;;  %s6993_s14 = sphi %s7035_s14, %s8651_s14   ;;  %s6989_s13 = sphi %s7033_s13, %s8650_s13   ;;  %s6985_s12 = sphi %s7031_s12, %s8649_s12  }
   0x5   : > { %s25_s20 = sadd.s32 1, %s7001_s16  ;;  %s115_s21 = sadd.s32 1, %s6993_s14 }
   0x6   : > { %p26_p0 = scmp.ge.s32.totalorder %s25_s20, 2  ;;  %p125_p1 = scmp.ne.s32.totalorder %s6993_s14, %s6989_s13 }
   0x7   : > { %p126_p2 = scmp.eq.s32.totalorder %s5771_s18, 1  ;;  %p131_p3 = scmp.ne.s32.totalorder %s6989_s13, %s6985_s12 }
   0x8   : > { %s8655_s20 = smov (%p26_p0, %s25_s20), 0  ;;  %p132_p5 = scmp.eq.s32.totalorder %s5772_s19, 1 }
   0x9   : > { %p7071_p4 = por %p126_p2, %p125_p1  ;;  %s110_s23 = ssub.s32 %s7001_s16, %s8655_s20 }
   0xa   : > { %p5777_p6 = scmp.ge.s32.totalorder %s7005_s17, 1  ;;  %p113_p7 = scmp.eq.s32.totalorder %s110_s23, 0 }
   0xb   : > { %p7078_p8 = por %p132_p5, %p131_p3  ;;  %p171_p9 = scmp.lt.s32.totalorder %s7005_s17, 3 }
   0xc   : > { %s7084_s25 = scalar_select %p113_p7, %s6993_s14, %s115_s21  }
   0xd   : > { %p172_p10 = pnand %p5777_p6, %p171_p9 }
   0xf   : > { %175 = sbr.rel (%p172_p10) target bundleno = 762 (0x2fa), region = 32 }
  0x14   : > { %v6647_v0 = vld [vmem:[%s8589_s1 + $0x78] sm:$0xff]   ;;  %v7007_v2 = vmov 0   ;;  %v6649_v3 = vld [vmem:[%s8589_s1 + $0x70] sm:$0xff]   ;;  %v6651_v5 = vld [vmem:[%s8589_s1 + $0x68] sm:$0xff]   ;;  %p202_p11 = scmp.lt.s32.totalorder %s6997_s15, 1  ;;  %vm625_vm0 = vcmask 1043456  }
  0x15   : > { %v6648_v1 = vld [vmem:[%s8589_s1 + $0x38] sm:$0xff]   ;;  %215 = vst [vmem:[#allocation2] sm:$0xf] %v7007_v2  ;;  %216 = vst [vmem:[#allocation2 + $0x4] sm:$0xf] %v7007_v2  ;;  %6053 = vmatprep.subr.bf16.mxu0 %v6647_v0  ;;  %6573 = vmatprep.subr.bf16.mxu1 %v6647_v0  ;;  %v6650_v4 = vld [vmem:[%s8589_s1 + $0x30] sm:$0xff]  }
  0x16   : > { %217 = vst [vmem:[#allocation2 + $0x8] sm:$0x1] %v7007_v2  ;;  %218 = vst [vmem:[#allocation2 + $0xc] sm:$0xf] %v7007_v2  ;;  %6054 = vmatpush3.bf16.msra.mxu0 %v6648_v1  ;;  %6581 = vmatpush3.bf16.msra.mxu1 %v6648_v1  ;;  %v6652_v6 = vld [vmem:[%s8589_s1 + $0x28] sm:$0xff]   ;;  %v6653_v7 = vld [vmem:[%s8589_s1 + $0x60] sm:$0xff]  }
  0x17   : > { %219 = vst [vmem:[#allocation2 + $0x10] sm:$0xf] %v7007_v2  ;;  %220 = vst [vmem:[#allocation2 + $0x14] sm:$0x1] %v7007_v2  ;;  %6055 = vmatprep.subr.bf16.mxu0 %v6649_v3  ;;  %6574 = vmatprep.subr.bf16.mxu1 %v6649_v3  ;;  %s203_s19 = scalar_select %p202_p11, %s6997_s15, 1  ;;  %v6654_v8 = vld [vmem:[%s8589_s1 + $0x20] sm:$0xff]  }
  0x18   : > { %221 = vst [vmem:[#allocation2 + $0x18] sm:$0xf] %v7007_v2  ;;  %222 = vst [vmem:[#allocation2 + $0x1c] sm:$0xf] %v7007_v2  ;;  %v6655_v9 = vld [vmem:[%s8589_s1 + $0x58] sm:$0xff]   ;;  %v6657_v11 = vld [vmem:[%s8589_s1 + $0x50] sm:$0xff]  }
  0x19   : > { %223 = vst [vmem:[#allocation2 + $0x20] sm:$0x1] %v7007_v2  ;;  %224 = vst [vmem:[#allocation2 + $0x24] sm:$0xf] %v7007_v2  ;;  %s6051_s28 = sshll.u32 %s203_s19, 7  ;;  %v6656_v10 = vld [vmem:[%s8589_s1 + $0x18] sm:$0xff]  }
  0x1a   : > { %225 = vst [vmem:[#allocation2 + $0x28] sm:$0xf] %v7007_v2  ;;  %226 = vst [vmem:[#allocation2 + $0x2c] sm:$0x1] %v7007_v2  ;;  %6056 = vmatpush3.bf16.msra.mxu0 %v6650_v4  ;;  %6582 = vmatpush3.bf16.msra.mxu1 %v6650_v4  ;;  %s7124_s8 = scalar_lea.vmem %s8588_s0, %s6051_s28  ;;  %vm854_vm1 = vsmask.f32 3328 }
  0x1b   : > { %227 = vst [vmem:[#allocation2 + $0x30] sm:$0xf] %v7007_v2  ;;  %228 = vst [vmem:[#allocation2 + $0x34] sm:$0xf] %v7007_v2  ;;  %6057 = vmatprep.subr.bf16.mxu0 %v6651_v5  ;;  %6575 = vmatprep.subr.bf16.mxu1 %v6651_v5  ;;  %v6658_v17 = vld [vmem:[%s8589_s1 + $0x10] sm:$0xff]   ;;  %v6659_v25 = vld [vmem:[%s8589_s1 + $0x48] sm:$0xff]  }
  0x1c   : > { %229 = vst [vmem:[#allocation2 + $0x38] sm:$0x1] %v7007_v2  ;;  %230 = vst [vmem:[#allocation2 + $0x3c] sm:$0xf] %v7007_v2  ;;  %v742_v12 = vld [vmem:[#allocation2] sm:$0xf] }
  0x1d   : > { %231 = vst [vmem:[#allocation2 + $0x40] sm:$0xf] %v7007_v2  ;;  %232 = vst [vmem:[#allocation2 + $0x44] sm:$0x1] %v7007_v2  ;;  %v743_v13 = vld [vmem:[#allocation2 + $0x4] sm:$0xf] }
  0x1e   : > { %233 = vst [vmem:[#allocation2 + $0x48] sm:$0xf] %v7007_v2  ;;  %234 = vst [vmem:[#allocation2 + $0x4c] sm:$0xf] %v7007_v2  ;;  %6058 = vmatpush3.bf16.msra.mxu0 %v6652_v6  ;;  %6583 = vmatpush3.bf16.msra.mxu1 %v6652_v6  ;;  %v806_v14 = vld [vmem:[#allocation2] sm:$0xf] }
  0x1f   : > { %235 = vst [vmem:[#allocation2 + $0x50] sm:$0x1] %v7007_v2  ;;  %236 = vst [vmem:[#allocation2 + $0x54] sm:$0xf] %v7007_v2  ;;  %6059 = vmatprep.subr.bf16.mxu0 %v6653_v7  ;;  %6576 = vmatprep.subr.bf16.mxu1 %v6653_v7  ;;  %v807_v15 = vld [vmem:[#allocation2 + $0x4] sm:$0xf] }
  0x20   : > { %237 = vst [vmem:[#allocation2 + $0x58] sm:$0xf] %v7007_v2  ;;  %238 = vst [vmem:[#allocation2 + $0x5c] sm:$0x1] %v7007_v2  ;;  %v808_v16 = vld [vmem:[#allocation2 + $0x8] sm:$0x1] }
  0x21   : > { %239 = vst [vmem:[#allocation2 + $0x60] sm:$0xf] %v7007_v2  ;;  %240 = vst [vmem:[#allocation2 + $0x64] sm:$0xf] %v7007_v2  ;;  %vm855_vm2 = vsmask.f32 7440 }
  0x22   : > { %241 = vst [vmem:[#allocation2 + $0x68] sm:$0x1] %v7007_v2  ;;  %242 = vst [vmem:[#allocation2 + $0x6c] sm:$0xf] %v7007_v2  ;;  %6060 = vmatpush3.bf16.msra.mxu0 %v6654_v8  ;;  %6584 = vmatpush3.bf16.msra.mxu1 %v6654_v8  ;;  %v858_v18 = vshrl.u32 %v806_v14, 16  ;;  %v861_v19 = vshll.u32 %v806_v14, 16 }
  0x23   : > { %243 = vst [vmem:[#allocation2 + $0x70] sm:$0xf] %v7007_v2  ;;  %244 = vst [vmem:[#allocation2 + $0x74] sm:$0x1] %v7007_v2  ;;  %6061 = vmatprep.subr.bf16.mxu0 %v6655_v9  ;;  %6577 = vmatprep.subr.bf16.mxu1 %v6655_v9  ;;  %v867_v20 = vshll.u32 %v807_v15, 16  ;;  %v871_v21 = vshrl.u32 %v807_v15, 16 }
  0x24   : > { %245 = vst [vmem:[#allocation2 + $0x78] sm:$0xf] %v7007_v2  ;;  %246 = vst [vmem:[#allocation2 + $0x7c] sm:$0xf] %v7007_v2  ;;  %v877_v22 = vshll.u32 %v808_v16, 16  ;;  %v860_v26 = vrot.slane %v858_v18, 4 }
  0x25   : > { %247 = vst [vmem:[#allocation2 + $0x80] sm:$0x1] %v7007_v2  ;;  %248 = vst [vmem:[#allocation2 + $0x84] sm:$0xf] %v7007_v2  ;;  %v291_v23 = vld [vmem:[%s7124_s8 + $0x58] sm:$0xf] }
  0x26   : > { %249 = vst [vmem:[#allocation2 + $0x88] sm:$0xf] %v7007_v2  ;;  %250 = vst [vmem:[#allocation2 + $0x8c] sm:$0x1] %v7007_v2  ;;  %6062 = vmatpush3.bf16.msra.mxu0 %v6656_v10  ;;  %6585 = vmatpush3.bf16.msra.mxu1 %v6656_v10  ;;  %v292_v24 = vld [vmem:[%s7124_s8 + $0x5c] sm:$0xf] }
  0x27   : > { %251 = vst [vmem:[#allocation2 + $0x90] sm:$0xf] %v7007_v2  ;;  %252 = vst [vmem:[#allocation2 + $0x94] sm:$0xf] %v7007_v2  ;;  %6063 = vmatprep.subr.bf16.mxu0 %v6657_v11  ;;  %6578 = vmatprep.subr.bf16.mxu1 %v6657_v11  ;;  %v863_v27 = vrot.slane %v861_v19, 5  ;;  %v869_v28 = vrot.slane %v867_v20, 5 }
  0x28   : > { %253 = vst [vmem:[#allocation2 + $0x98] sm:$0x1] %v7007_v2  ;;  %254 = vst [vmem:[#allocation2 + $0x9c] sm:$0xf] %v7007_v2  ;;  %vm632_vm3 = vcmask 1040384   ;;  %v6660_v29 = vld [vmem:[%s8589_s1 + $0x8] sm:$0xff]  }
  0x29   : > { %255 = vst [vmem:[#allocation2 + $0xa0] sm:$0xf] %v7007_v2  ;;  %256 = vst [vmem:[#allocation2 + $0xa4] sm:$0x1] %v7007_v2  ;;  %v873_v30 = vrot.slane %v871_v21, 4  ;;  %v492_v31 = vshrl.u32 %v291_v23, 16  ;;  %v864_v34 = vor.u32 %v863_v27, %v860_v26 }
  0x2a   : > { %257 = vst [vmem:[#allocation2 + $0xa8] sm:$0xf] %v7007_v2  ;;  %258 = vst [vmem:[#allocation2 + $0xac] sm:$0xf] %v7007_v2  ;;  %vm301_vm4 = vsmask.f32 256  ;;  %6064 = vmatpush3.bf16.msra.mxu0 %v6658_v17  ;;  %6586 = vmatpush3.bf16.msra.mxu1 %v6658_v17 }
  0x2b   : > { %259 = vst [vmem:[#allocation2 + $0xb0] sm:$0x1] %v7007_v2  ;;  %260 = vst [vmem:[#allocation2 + $0xb4] sm:$0xf] %v7007_v2  ;;  %vm302_vm5 = vsmask.f32 4368  ;;  %v874_v39 = vor.u32 %v873_v30, %v869_v28  ;;  %6065 = vmatprep.subr.bf16.mxu0 %v6659_v25  ;;  %6579 = vmatprep.subr.bf16.mxu1 %v6659_v25 }
  0x2c   : > { %261 = vst [vmem:[#allocation2 + $0xb8] sm:$0xf] %v7007_v2  ;;  %262 = vst [vmem:[#allocation2 + $0xbc] sm:$0x1] %v7007_v2  ;;  %v6661_v32 = vld [vmem:[%s8589_s1 + $0x40] sm:$0xff]   ;;  %v495_v35 = vshll.u32 %v291_v23, 16 }
  0x2d   : > { %263 = vst [vmem:[#allocation2 + $0xc0] sm:$0xf] %v7007_v2  ;;  %264 = vst [vmem:[#allocation2 + $0xc4] sm:$0xf] %v7007_v2  ;;  %v500_v36 = vshrl.u32 %v292_v24, 16  ;;  %v503_v37 = vshll.u32 %v292_v24, 16 }
  0x2e   : > { %265 = vst [vmem:[#allocation2 + $0xc8] sm:$0x1] %v7007_v2  ;;  %266 = vst [vmem:[#allocation2 + $0xcc] sm:$0xf] %v7007_v2  ;;  %v707_v38 = vld [vmem:[#allocation2 + $0x90] sm:$0xf]  ;;  %6066 = vmatpush3.bf16.msra.mxu0 %v6660_v29  ;;  %6587 = vmatpush3.bf16.msra.mxu1 %v6660_v29 }
  0x2f   : > { %267 = vst [vmem:[#allocation2 + $0xd0] sm:$0xf] %v7007_v2  ;;  %268 = vst [vmem:[#allocation2 + $0xd4] sm:$0x1] %v7007_v2  ;;  %v879_v40 = vrot.slane %v877_v22, 5  ;;  %v494_v41 = vrot.slane %v492_v31, 7  ;;  %6067 = vmatprep.subr.bf16.mxu0 %v6661_v32  ;;  %6580 = vmatprep.subr.bf16.mxu1 %v6661_v32 }
  0x30   : > { %774 = vst [vmem:[#allocation3] sm:$0xf] %v742_v12  ;;  %775 = vst [vmem:[#allocation3 + $0x24] sm:$0xf] %v743_v13  ;;  %vm626_vm7 = vsmask.f32 7938 }
  0x31   : > { %vm7142_vm6 = vmor %vm854_vm1, %vm855_vm2  ;;  %v711_v43 = vld [vmem:[#allocation2 + $0x98] sm:$0x1]  ;;  %v865_v44 = vrot.slane %v864_v34, 4  ;;  %v502_v45 = vrot.slane %v500_v36, 7  ;;  %v875_v47 = vrot.slane %v874_v39, 4  ;;  %v497_v49 = vor.u32 %v495_v35, %v494_v41  ;;  %v6662_v53 = vld [vmem:[%s8589_s1] sm:$0xff]  }
  0x32   : > { %vm7148_vm8 = vmand %vm632_vm3, %vm301_vm4  ;;  %v498_v50 = vrot.slane %v494_v41, 4  ;;  %v269_v51 = vld [vmem:[%s7124_s8] sm:$0xf]  ;;  %v270_v52 = vld [vmem:[%s7124_s8 + $0x4] sm:$0xf]  ;;  %6068 = vmatpush3.bf16.msra.mxu0 %v6662_v53  ;;  %6588 = vmatpush3.bf16.msra.mxu1 %v6662_v53  ;;  %vm1401_vm11 = vcmask 1042432  }
  0x33   : > { %vm7153_vm9 = vmand %vm625_vm0, %vm626_vm7  ;;  %v870_v54 = vsel %vm7142_vm6, %v865_v44, %v869_v28  ;;  %v505_v55 = vor.u32 %v503_v37, %v502_v45  ;;  %v507_v56 = vrot.slane %v502_v45, 4  ;;  %v6669_v57 = vld [vmem:[%s8589_s1 + $0xf8] sm:$0xff]   ;;  %v305_v58 = vshrl.u32 %v269_v51, 16  ;;  %v628_v0 = vld [vmem:[#allocation2 + $0xc] sm:$0xf]  ;;  %s199_s7 = sand.u32 1, %s6989_s13  }
  0x34   : > { %vm7159_vm10 = vmor %vm301_vm4, %vm302_vm5  ;;  %v6675_v59 = vld [vmem:[%s8589_s1 + $0x178] sm:$0xff]   ;;  %v880_v60 = vsel %vm7142_vm6, %v875_v47, %v879_v40  ;;  %1273 = vst [vmem:[#allocation3 + $0x4] sm:$0xf] %v870_v54  ;;  %v708_v61 = vsel %vm7153_vm9, %v497_v49, %v707_v38  ;;  %v308_v62 = vshll.u32 %v269_v51, 16  ;;  %v313_v63 = vshrl.u32 %v270_v52, 16  ;;  %6165 = vmatprep.subr.bf16.mxu1 %v6669_v57  ;;  %s5778_s9 = sshll.u32 %s199_s7, 8 }
  0x35   : > { %1274 = vst [vmem:[#allocation3 + $0x28] sm:$0xf] %v880_v60  ;;  %v506_v1 = vsel %vm7159_vm10, %v498_v50, %v505_v55  ;;  %709 = vst [vmem:[#allocation2 + $0x90] sm:$0xf] %v708_v61  ;;  %v712_v2 = vsel %vm7148_vm8, %v507_v56, %v711_v43  ;;  %v307_v3 = vrot.slane %v305_v58, 7  ;;  %v316_v4 = vshll.u32 %v270_v52, 16  ;;  %6277 = vmatprep.subr.bf16.mxu0 %v6675_v59 }
  0x36   : > { %v634_v5 = vld [vmem:[#allocation2 + $0x14] sm:$0x1]  ;;  %710 = vst [vmem:[#allocation2 + $0x94] sm:$0xf] %v506_v1  ;;  %713 = vst [vmem:[#allocation2 + $0x98] sm:$0x1] %v712_v2 }
  0x37   : > { %v315_v6 = vrot.slane %v313_v63, 7  ;;  %v310_v7 = vor.u32 %v308_v62, %v307_v3  ;;  %v311_v8 = vrot.slane %v307_v3, 4  ;;  %v293_v12 = vld [vmem:[%s7124_s8 + $0x60] sm:$0xf]  ;;  %v294_v13 = vld [vmem:[%s7124_s8 + $0x64] sm:$0xf] }
  0x38   : > { %v509_v16 = vshrl.u32 %v293_v12, 16  ;;  %v512_v17 = vshll.u32 %v293_v12, 16  ;;  %v6677_v18 = vld [vmem:[%s8589_s1 + $0x138] sm:$0xff]   ;;  %v517_v19 = vshrl.u32 %v294_v13, 16  ;;  %v520_v20 = vshll.u32 %v294_v13, 16  ;;  %v6691_v2 = vld [vmem:[%s8589_s1 + $0x170] sm:$0xff]  }
  0x39   : > { %v318_v9 = vor.u32 %v316_v4, %v315_v6  ;;  %v320_v10 = vrot.slane %v315_v6, 4  ;;  %v629_v11 = vsel %vm7153_vm9, %v310_v7, %v628_v0  ;;  %v714_v21 = vld [vmem:[#allocation2 + $0x9c] sm:$0xf]  ;;  %v271_v38 = vld [vmem:[%s7124_s8 + $0x8] sm:$0xf]  ;;  %vm1402_vm12 = vcmask 1046532  }
  0x3a   : > { %630 = vst [vmem:[#allocation2 + $0xc] sm:$0xf] %v629_v11  ;;  %v6663_v22 = vld [vmem:[#allocation3] ss:$36 sps:$4 sm:$0xff]   ;;  %v511_v24 = vrot.slane %v509_v16, 7  ;;  %v519_v41 = vrot.slane %v517_v19, 7  ;;  %vm7354_vm13 = vmor %vm1401_vm11, %vm1402_vm12 }
  0x3b   : > { %v319_v14 = vsel %vm7159_vm10, %v311_v8, %v318_v9  ;;  %v635_v15 = vsel %vm7148_vm8, %v320_v10, %v634_v5  ;;  %v322_v50 = vshrl.u32 %v271_v38, 16  ;;  %v718_v1 = vld [vmem:[#allocation2 + $0xa4] sm:$0x1]  ;;  %v272_v7 = vld [vmem:[%s7124_s8 + $0xc] sm:$0xf]  ;;  %v325_v16 = vshll.u32 %v271_v38, 16 }
  0x3c   : > { %631 = vst [vmem:[#allocation2 + $0x10] sm:$0xf] %v319_v14  ;;  %636 = vst [vmem:[#allocation2 + $0x14] sm:$0x1] %v635_v15  ;;  %v6665_v23 = vld [vmem:[#allocation3 + $0x4] ss:$36 sps:$4 sm:$0xff]   ;;  %v514_v32 = vor.u32 %v512_v17, %v511_v24  ;;  %v522_v55 = vor.u32 %v520_v20, %v519_v41 }
  0x3d   : > { %v766_v25 = vld [vmem:[#allocation2 + $0x90] sm:$0xf]  ;;  %v767_v26 = vld [vmem:[#allocation2 + $0x94] sm:$0xf]  ;;  %4756 = vmatprep.mubr.bf16.mxu0 %v6665_v23  ;;  %v844_v29 = vld [vmem:[#allocation2 + $0x98] sm:$0x1] }
  0x3e   : > { %v842_v27 = vld [vmem:[#allocation2 + $0x90] sm:$0xf]  ;;  %798 = vst [vmem:[#allocation3 + $0x360] sm:$0xf] %v766_v25  ;;  %799 = vst [vmem:[#allocation3 + $0x384] sm:$0xf] %v767_v26  ;;  %4757 = vmatmul.mubr.bf16.vlgmr.msra.gmra.mxu0 %v6663_v22  ;;  %v715_v43 = vsel %vm7153_vm9, %v514_v32, %v714_v21 }
  0x3f   : > { %v843_v28 = vld [vmem:[#allocation2 + $0x94] sm:$0xf]  ;;  %v1146_v30 = vshrl.u32 %v842_v27, 16  ;;  %v1149_v31 = vshll.u32 %v842_v27, 16  ;;  %v1165_v36 = vshll.u32 %v844_v29, 16  ;;  %v515_v37 = vrot.slane %v511_v24, 4  ;;  %6278 = vmatpush3.bf16.msra.mxu0 %v6677_v18 }
  0x40   : > { %v1155_v34 = vshll.u32 %v843_v28, 16  ;;  %v1159_v35 = vshrl.u32 %v843_v28, 16  ;;  %716 = vst [vmem:[#allocation2 + $0x9c] sm:$0xf] %v715_v43  ;;  %v524_v11 = vrot.slane %v519_v41, 4  ;;  %6279 = vmatprep.subr.bf16.mxu0 %v6691_v2  ;;  %v324_v15 = vrot.slane %v322_v50, 7 }
  0x41   : > { %v1148_v39 = vrot.slane %v1146_v30, 4  ;;  %v1151_v40 = vrot.slane %v1149_v31, 5  ;;  %v1167_v47 = vrot.slane %v1165_v36, 5  ;;  %v744_v49 = vld [vmem:[#allocation2 + $0xc] sm:$0xf]  ;;  %v523_v0 = vsel %vm7159_vm10, %v515_v37, %v522_v55  ;;  %v6696_v28 = vld [vmem:[%s8589_s1 + $0x130] sm:$0xff]  }
  0x42   : > { %v1157_v44 = vrot.slane %v1155_v34, 5  ;;  %v1161_v45 = vrot.slane %v1159_v35, 4  ;;  %776 = vst [vmem:[#allocation3 + $0x48] sm:$0xf] %v744_v49  ;;  %v809_v53 = vld [vmem:[#allocation2 + $0xc] sm:$0xf]  ;;  %v719_v18 = vsel %vm7148_vm8, %v524_v11, %v718_v1  ;;  %v327_v26 = vor.u32 %v325_v16, %v324_v15 }
  0x43   : > { %v1152_v51 = vor.u32 %v1151_v40, %v1148_v39  ;;  %v745_v52 = vld [vmem:[#allocation2 + $0x10] sm:$0xf]  ;;  %v811_v57 = vld [vmem:[#allocation2 + $0x14] sm:$0x1]  ;;  %v882_v58 = vshrl.u32 %v809_v53, 16  ;;  %v885_v59 = vshll.u32 %v809_v53, 16  ;;  %6280 = vmatpush3.bf16.msra.mxu0 %v6696_v28 }
  0x44   : > { %v810_v54 = vld [vmem:[#allocation2 + $0x10] sm:$0xf]  ;;  %v1162_v56 = vor.u32 %v1161_v45, %v1157_v44  ;;  %777 = vst [vmem:[#allocation3 + $0x6c] sm:$0xf] %v745_v52  ;;  %v901_v63 = vshll.u32 %v811_v57, 16  ;;  %v330_v21 = vshrl.u32 %v272_v7, 16 }
  0x45   : > { %v891_v60 = vshll.u32 %v810_v54, 16  ;;  %v1153_v61 = vrot.slane %v1152_v51, 4  ;;  %v895_v62 = vshrl.u32 %v810_v54, 16  ;;  %v884_v4 = vrot.slane %v882_v58, 4  ;;  %717 = vst [vmem:[#allocation2 + $0xa0] sm:$0xf] %v523_v0 }
  0x46   : > { %v1163_v3 = vrot.slane %v1162_v56, 4  ;;  %v887_v5 = vrot.slane %v885_v59, 5  ;;  %v903_v10 = vrot.slane %v901_v63, 5  ;;  %v637_v12 = vld [vmem:[#allocation2 + $0x18] sm:$0xf]  ;;  %v333_v22 = vshll.u32 %v272_v7, 16 }
  0x47   : > { %v893_v6 = vrot.slane %v891_v60, 5  ;;  %v1158_v8 = vsel %vm7142_vm6, %v1153_v61, %v1157_v44  ;;  %v897_v9 = vrot.slane %v895_v62, 4  ;;  %v768_v19 = vld [vmem:[#allocation2 + $0x9c] sm:$0xf]  ;;  %720 = vst [vmem:[#allocation2 + $0xa4] sm:$0x1] %v719_v18  ;;  %v638_v36 = vsel %vm7153_vm9, %v327_v26, %v637_v12 }
  0x48   : > { %v1168_v13 = vsel %vm7142_vm6, %v1163_v3, %v1167_v47  ;;  %1297 = vst [vmem:[#allocation3 + $0x364] sm:$0xf] %v1158_v8  ;;  %v888_v14 = vor.u32 %v887_v5, %v884_v4  ;;  %v845_v20 = vld [vmem:[#allocation2 + $0x9c] sm:$0xf]  ;;  %800 = vst [vmem:[#allocation3 + $0x3a8] sm:$0xf] %v768_v19 }
  0x49   : > { %1298 = vst [vmem:[#allocation3 + $0x388] sm:$0xf] %v1168_v13  ;;  %v898_v17 = vor.u32 %v897_v9, %v893_v6  ;;  %v1170_v24 = vshrl.u32 %v845_v20, 16  ;;  %v1173_v25 = vshll.u32 %v845_v20, 16  ;;  %v641_v27 = vld [vmem:[#allocation2 + $0x20] sm:$0x1] }
  0x4a   : > { %v889_v23 = vrot.slane %v888_v14, 4  ;;  %v328_v30 = vrot.slane %v324_v15, 4  ;;  %v332_v31 = vrot.slane %v330_v21, 7  ;;  %v295_v37 = vld [vmem:[%s7124_s8 + $0x68] sm:$0xf]  ;;  %v6672_v52 = vld [vmem:[%s8589_s1 + $0xb8] sm:$0xff]  }
  0x4b   : > { %v899_v29 = vrot.slane %v898_v17, 4  ;;  %v1172_v34 = vrot.slane %v1170_v24, 4  ;;  %v1175_v35 = vrot.slane %v1173_v25, 5  ;;  %639 = vst [vmem:[#allocation2 + $0x18] sm:$0xf] %v638_v36  ;;  %v526_v44 = vshrl.u32 %v295_v37, 16 }
  0x4c   : > { %v894_v32 = vsel %vm7142_vm6, %v889_v23, %v893_v6  ;;  %v769_v39 = vld [vmem:[#allocation2 + $0xa0] sm:$0xf]  ;;  %v335_v41 = vor.u32 %v333_v22, %v332_v31  ;;  %v337_v43 = vrot.slane %v332_v31, 4  ;;  %v296_v50 = vld [vmem:[%s7124_s8 + $0x6c] sm:$0xf]  ;;  %v529_v51 = vshll.u32 %v295_v37, 16 }
  0x4d   : > { %v904_v38 = vsel %vm7142_vm6, %v899_v29, %v903_v10  ;;  %1275 = vst [vmem:[#allocation3 + $0x4c] sm:$0xf] %v894_v32  ;;  %v846_v40 = vld [vmem:[#allocation2 + $0xa0] sm:$0xf]  ;;  %801 = vst [vmem:[#allocation3 + $0x3cc] sm:$0xf] %v769_v39  ;;  %v1176_v45 = vor.u32 %v1175_v35, %v1172_v34 }
  0x4e   : > { %1276 = vst [vmem:[#allocation3 + $0x70] sm:$0xf] %v904_v38  ;;  %v1179_v47 = vshll.u32 %v846_v40, 16  ;;  %v1183_v49 = vshrl.u32 %v846_v40, 16  ;;  %v336_v53 = vsel %vm7159_vm10, %v328_v30, %v335_v41  ;;  %v642_v54 = vsel %vm7148_vm8, %v337_v43, %v641_v27  ;;  %v721_v57 = vld [vmem:[#allocation2 + $0xa8] sm:$0xf] }
  0x4f   : > { %v528_v55 = vrot.slane %v526_v44, 7  ;;  %v534_v56 = vshrl.u32 %v296_v50, 16  ;;  %v6666_v58 = vld [vmem:[#allocation3 + $0x360] ss:$36 sps:$4 sm:$0xff]   ;;  %v1177_v60 = vrot.slane %v1176_v45, 4  ;;  %v6674_v61 = vld [vmem:[%s8589_s1 + $0xf0] sm:$0xff]  }
  0x50   : > { %v6668_v59 = vld [vmem:[#allocation3 + $0x364] ss:$36 sps:$4 sm:$0xff]   ;;  %640 = vst [vmem:[#allocation2 + $0x1c] sm:$0xf] %v336_v53  ;;  %643 = vst [vmem:[#allocation2 + $0x20] sm:$0x1] %v642_v54 }
  0x51   : > { %v847_v62 = vld [vmem:[#allocation2 + $0xa4] sm:$0x1]  ;;  %v1181_v63 = vrot.slane %v1179_v47, 5  ;;  %v1185_v0 = vrot.slane %v1183_v49, 4  ;;  %v531_v1 = vor.u32 %v529_v51, %v528_v55  ;;  %4852 = vmatprep.mubr.bf16.mxu1 %v6668_v59  ;;  %v6676_v2 = vld [vmem:[%s8589_s1 + $0xb0] sm:$0xff]   ;;  %v532_v4 = vrot.slane %v528_v55, 4 }
  0x52   : > { %v1189_v3 = vshll.u32 %v847_v62, 16  ;;  %v536_v5 = vrot.slane %v534_v56, 7  ;;  %v537_v6 = vshll.u32 %v296_v50, 16  ;;  %4853 = vmatmul.mubr.bf16.vlgmr.msra.gmra.mxu1 %v6666_v58  ;;  %v6680_v9 = vld [vmem:[%s8589_s1 + $0xe8] sm:$0xff]   ;;  %v746_v12 = vld [vmem:[#allocation2 + $0x18] sm:$0xf] }
  0x53   : > { %v1182_v7 = vsel %vm7142_vm6, %v1177_v60, %v1181_v63  ;;  %v1186_v8 = vor.u32 %v1185_v0, %v1181_v63  ;;  %v722_v10 = vsel %vm7153_vm9, %v531_v1, %v721_v57  ;;  %6166 = vmatpush3.bf16.msra.mxu1 %v6672_v52  ;;  %v812_v13 = vld [vmem:[#allocation2 + $0x18] sm:$0xf]  ;;  %v725_v15 = vld [vmem:[#allocation2 + $0xb0] sm:$0x1]  ;;  %v6673_v17 = vld [vmem:[#allocation3 + $0x48] ss:$36 sps:$4 sm:$0xff]  }
  0x54   : > { %v1191_v11 = vrot.slane %v1189_v3, 5  ;;  %1299 = vst [vmem:[#allocation3 + $0x3ac] sm:$0xf] %v1182_v7  ;;  %v539_v14 = vor.u32 %v537_v6, %v536_v5  ;;  %723 = vst [vmem:[#allocation2 + $0xa8] sm:$0xf] %v722_v10  ;;  %6167 = vmatprep.subr.bf16.mxu1 %v6674_v61  ;;  %v906_v19 = vshrl.u32 %v812_v13, 16 }
  0x55   : > { %v6670_v16 = vld [vmem:[#allocation3 + $0x4c] ss:$36 sps:$4 sm:$0xff]   ;;  %v1187_v18 = vrot.slane %v1186_v8, 4  ;;  %778 = vst [vmem:[#allocation3 + $0x90] sm:$0xf] %v746_v12  ;;  %v909_v20 = vshll.u32 %v812_v13, 16 }
  0x56   : > { %v6684_v21 = vld [vmem:[%s8589_s1 + $0xa8] sm:$0xff]   ;;  %v540_v22 = vsel %vm7159_vm10, %v532_v4, %v539_v14  ;;  %v541_v23 = vrot.slane %v536_v5, 4  ;;  %4764 = vmatprep.mubr.bf16.mxu0 %v6670_v16  ;;  %v908_v29 = vrot.slane %v906_v19, 4  ;;  %v273_v34 = vld [vmem:[%s7124_s8 + $0x10] sm:$0xf]  ;;  %v6686_v36 = vld [vmem:[%s8589_s1 + $0xe0] sm:$0xff]  }
  0x57   : > { %v6709_v24 = vld [vmem:[%s8589_s1 + $0x168] sm:$0xff]   ;;  %v1192_v25 = vsel %vm7142_vm6, %v1187_v18, %v1191_v11  ;;  %v747_v26 = vld [vmem:[#allocation2 + $0x1c] sm:$0xf]  ;;  %v814_v28 = vld [vmem:[#allocation2 + $0x20] sm:$0x1]  ;;  %4765 = vmatmul.mubr.bf16.gmra.mxu0 %v6673_v17  ;;  %6168 = vmatpush3.bf16.msra.mxu1 %v6676_v2  ;;  %v911_v30 = vrot.slane %v909_v20, 5 }
  0x58   : > { %v813_v27 = vld [vmem:[#allocation2 + $0x1c] sm:$0xf]  ;;  %724 = vst [vmem:[#allocation2 + $0xac] sm:$0xf] %v540_v22  ;;  %1300 = vst [vmem:[#allocation3 + $0x3d0] sm:$0xf] %v1192_v25  ;;  %6169 = vmatprep.subr.bf16.mxu1 %v6680_v9  ;;  %v726_v37 = vsel %vm7148_vm8, %v541_v23, %v725_v15  ;;  %6281 = vmatprep.subr.bf16.mxu0 %v6709_v24 }
  0x59   : > { %779 = vst [vmem:[#allocation3 + $0xb4] sm:$0xf] %v747_v26  ;;  %v915_v31 = vshll.u32 %v813_v27, 16  ;;  %v919_v32 = vshrl.u32 %v813_v27, 16  ;;  %v925_v35 = vshll.u32 %v814_v28, 16  ;;  %v339_v39 = vshrl.u32 %v273_v34, 16 }
  0x5a   : > { %v274_v38 = vld [vmem:[%s7124_s8 + $0x14] sm:$0xf]  ;;  %v342_v40 = vshll.u32 %v273_v34, 16  ;;  %v912_v41 = vor.u32 %v911_v30, %v908_v29  ;;  %727 = vst [vmem:[#allocation2 + $0xb0] sm:$0x1] %v726_v37  ;;  %v6711_v47 = vld [vmem:[%s8589_s1 + $0x128] sm:$0xff]  }
  0x5b   : > { %v917_v43 = vrot.slane %v915_v31, 5  ;;  %v921_v44 = vrot.slane %v919_v32, 4  ;;  %v347_v45 = vshrl.u32 %v274_v38, 16  ;;  %v927_v49 = vrot.slane %v925_v35, 5  ;;  %v770_v50 = vld [vmem:[#allocation2 + $0xa8] sm:$0xf]  ;;  %6170 = vmatpush3.bf16.msra.mxu1 %v6684_v21  ;;  %6282 = vmatpush3.bf16.msra.mxu0 %v6711_v47 }
  0x5c   : > { %v848_v51 = vld [vmem:[#allocation2 + $0xa8] sm:$0xf]  ;;  %v913_v52 = vrot.slane %v912_v41, 4  ;;  %v6687_v54 = vld [vmem:[%s8589_s1 + $0xa0] sm:$0xff]   ;;  %802 = vst [vmem:[#allocation3 + $0x3f0] sm:$0xf] %v770_v50  ;;  %6171 = vmatprep.subr.bf16.mxu1 %v6686_v36 }
  0x5d   : > { %v922_v53 = vor.u32 %v921_v44, %v917_v43  ;;  %v1194_v55 = vshrl.u32 %v848_v51, 16  ;;  %v1197_v56 = vshll.u32 %v848_v51, 16  ;;  %v644_v57 = vld [vmem:[#allocation2 + $0x24] sm:$0xf]  ;;  %v6690_v58 = vld [vmem:[%s8589_s1 + $0xd8] sm:$0xff]   ;;  %v341_v59 = vrot.slane %v339_v39, 7 }
  0x5e   : > { %v349_v60 = vrot.slane %v347_v45, 7  ;;  %v350_v61 = vshll.u32 %v274_v38, 16  ;;  %v918_v62 = vsel %vm7142_vm6, %v913_v52, %v917_v43  ;;  %v648_v3 = vld [vmem:[#allocation2 + $0x2c] sm:$0x1]  ;;  %v6695_v4 = vld [vmem:[%s8589_s1 + $0x98] sm:$0xff]   ;;  %v6698_v10 = vld [vmem:[%s8589_s1 + $0xd0] sm:$0xff]  }
  0x5f   : > { %v923_v63 = vrot.slane %v922_v53, 4  ;;  %v771_v0 = vld [vmem:[#allocation2 + $0xac] sm:$0xf]  ;;  %v1196_v2 = vrot.slane %v1194_v55, 4  ;;  %v6678_v5 = vld [vmem:[#allocation3 + $0x3ac] ss:$36 sps:$4 sm:$0xff]   ;;  %v344_v8 = vor.u32 %v342_v40, %v341_v59  ;;  %6172 = vmatpush3.bf16.msra.mxu1 %v6687_v54 }
  0x60   : > { %v849_v1 = vld [vmem:[#allocation2 + $0xac] sm:$0xf]  ;;  %1277 = vst [vmem:[#allocation3 + $0x94] sm:$0xf] %v918_v62  ;;  %v6683_v6 = vld [vmem:[#allocation3 + $0x3a8] ss:$36 sps:$4 sm:$0xff]   ;;  %v352_v9 = vor.u32 %v350_v61, %v349_v60  ;;  %4860 = vmatprep.mubr.bf16.mxu1 %v6678_v5  ;;  %6173 = vmatprep.subr.bf16.mxu1 %v6690_v58 }
  0x61   : > { %803 = vst [vmem:[#allocation3 + $0x414] sm:$0xf] %v771_v0  ;;  %v1199_v7 = vrot.slane %v1197_v56, 5  ;;  %v928_v11 = vsel %vm7142_vm6, %v923_v63, %v927_v49  ;;  %v1203_v12 = vshll.u32 %v849_v1, 16  ;;  %v1207_v13 = vshrl.u32 %v849_v1, 16  ;;  %v6722_v15 = vld [vmem:[%s8589_s1 + $0x160] sm:$0xff]   ;;  %4861 = vmatmul.mubr.bf16.gmra.mxu1 %v6683_v6 }
  0x62   : > { %v345_v14 = vrot.slane %v341_v59, 4  ;;  %1278 = vst [vmem:[#allocation3 + $0xb8] sm:$0xf] %v928_v11  ;;  %v850_v16 = vld [vmem:[#allocation2 + $0xb0] sm:$0x1]  ;;  %v354_v18 = vrot.slane %v349_v60, 4  ;;  %v645_v19 = vsel %vm7153_vm9, %v344_v8, %v644_v57  ;;  %6283 = vmatprep.subr.bf16.mxu0 %v6722_v15 }
  0x63   : > { %v1200_v17 = vor.u32 %v1199_v7, %v1196_v2  ;;  %v6726_v20 = vld [vmem:[%s8589_s1 + $0x120] sm:$0xff]   ;;  %v1205_v21 = vrot.slane %v1203_v12, 5  ;;  %v1209_v22 = vrot.slane %v1207_v13, 4  ;;  %v1213_v23 = vshll.u32 %v850_v16, 16  ;;  %646 = vst [vmem:[#allocation2 + $0x24] sm:$0xf] %v645_v19  ;;  %6174 = vmatpush3.bf16.msra.mxu1 %v6695_v4 }
  0x64   : > { %v353_v24 = vsel %vm7159_vm10, %v345_v14, %v352_v9  ;;  %v649_v26 = vsel %vm7148_vm8, %v354_v18, %v648_v3  ;;  %v6699_v27 = vld [vmem:[%s8589_s1 + $0x90] sm:$0xff]   ;;  %6284 = vmatpush3.bf16.msra.mxu0 %v6726_v20  ;;  %v6736_v30 = vld [vmem:[%s8589_s1 + $0x158] sm:$0xff]   ;;  %6175 = vmatprep.subr.bf16.mxu1 %v6698_v10  ;;  %v6702_v35 = vld [vmem:[%s8589_s1 + $0xc8] sm:$0xff]   ;;  %s8434_s10 = scalar_lea.vmem [#allocation4], %s5778_s9  ;;  %s6052_s11 = sshll.u32 %s6997_s15, 12 }
  0x65   : > { %v1201_v25 = vrot.slane %v1200_v17, 4  ;;  %647 = vst [vmem:[#allocation2 + $0x28] sm:$0xf] %v353_v24  ;;  %v1210_v28 = vor.u32 %v1209_v22, %v1205_v21  ;;  %v1215_v29 = vrot.slane %v1213_v23, 5  ;;  %650 = vst [vmem:[#allocation2 + $0x2c] sm:$0x1] %v649_v26  ;;  %6285 = vmatprep.subr.bf16.mxu0 %v6736_v30  ;;  %s8536_s23 = scalar_lea.hbm %s8591_s3, %s6052_s11 }
  0x66   : > { %v297_v32 = vld [vmem:[%s7124_s8 + $0x70] sm:$0xf]  ;;  %v298_v34 = vld [vmem:[%s7124_s8 + $0x74] sm:$0xf]  ;;  %v6737_v40 = vld [vmem:[%s8589_s1 + $0x118] sm:$0xff]   ;;  %s5672_s18 = sshll.u32 %s8434_s10, 4  ;;  %s8538_s18 = int_to_ptr.vmem [resolvable:$true] %s5672_s18 }
  0x67   : > { %v1206_v31 = vsel %vm7142_vm6, %v1201_v25, %v1205_v21  ;;  %v1211_v36 = vrot.slane %v1210_v28, 4  ;;  %v543_v37 = vshrl.u32 %v297_v32, 16  ;;  %v546_v38 = vshll.u32 %v297_v32, 16  ;;  %v6706_v43 = vld [vmem:[%s8589_s1 + $0x88] sm:$0xff]   ;;  %v6746_v44 = vld [vmem:[%s8589_s1 + $0x150] sm:$0xff]   ;;  %6176 = vmatpush3.bf16.msra.mxu1 %v6699_v27  ;;  %v6708_v56 = vld [vmem:[%s8589_s1 + $0xc0] sm:$0xff]  }
  0x68   : > { %1301 = vst [vmem:[#allocation3 + $0x3f4] sm:$0xf] %v1206_v31  ;;  %v551_v39 = vshrl.u32 %v298_v34, 16  ;;  %v554_v41 = vshll.u32 %v298_v34, 16  ;;  %v6685_v47 = vld [vmem:[#allocation3 + $0x90] ss:$36 sps:$4 sm:$0xff]   ;;  %6286 = vmatpush3.bf16.msra.mxu0 %v6737_v40  ;;  %6177 = vmatprep.subr.bf16.mxu1 %v6702_v35 }
  0x69   : > { %v6681_v45 = vld [vmem:[#allocation3 + $0x94] ss:$36 sps:$4 sm:$0xff]   ;;  %v1216_v49 = vsel %vm7142_vm6, %v1211_v36, %v1215_v29  ;;  %v545_v50 = vrot.slane %v543_v37, 7  ;;  %v728_v51 = vld [vmem:[#allocation2 + $0xb4] sm:$0xf]  ;;  %6287 = vmatprep.subr.bf16.mxu0 %v6746_v44  ;;  %v6710_v62 = vld [vmem:[%s8589_s1 + $0x80] sm:$0xff]  }
  0x6a   : > { %1302 = vst [vmem:[#allocation3 + $0x418] sm:$0xf] %v1216_v49  ;;  %v748_v52 = vld [vmem:[#allocation2 + $0x24] sm:$0xf]  ;;  %v553_v54 = vrot.slane %v551_v39, 7  ;;  %4772 = vmatprep.mubr.bf16.mxu0 %v6681_v45  ;;  %v6751_v4 = vld [vmem:[%s8589_s1 + $0x110] sm:$0xff]  }
  0x6b   : > { %v815_v53 = vld [vmem:[#allocation2 + $0x24] sm:$0xf]  ;;  %v732_v55 = vld [vmem:[#allocation2 + $0xbc] sm:$0x1]  ;;  %780 = vst [vmem:[#allocation3 + $0xd8] sm:$0xf] %v748_v52  ;;  %v548_v61 = vor.u32 %v546_v38, %v545_v50  ;;  %4773 = vmatmul.mubr.bf16.gmra.mxu0 %v6685_v47  ;;  %6178 = vmatpush3.bf16.msra.mxu1 %v6706_v43 }
  0x6c   : > { %v749_v57 = vld [vmem:[#allocation2 + $0x28] sm:$0xf]  ;;  %v930_v59 = vshrl.u32 %v815_v53, 16  ;;  %v933_v60 = vshll.u32 %v815_v53, 16  ;;  %v817_v63 = vld [vmem:[#allocation2 + $0x2c] sm:$0x1]  ;;  %v556_v3 = vor.u32 %v554_v41, %v553_v54  ;;  %6179 = vmatprep.subr.bf16.mxu1 %v6708_v56  ;;  %6288 = vmatpush3.bf16.msra.mxu0 %v6751_v4 }
  0x6d   : > { %v816_v58 = vld [vmem:[#allocation2 + $0x28] sm:$0xf]  ;;  %781 = vst [vmem:[#allocation3 + $0xfc] sm:$0xf] %v749_v57  ;;  %v549_v2 = vrot.slane %v545_v50, 4  ;;  %v949_v7 = vshll.u32 %v817_v63, 16  ;;  %v729_v12 = vsel %vm7153_vm9, %v548_v61, %v728_v51 }
  0x6e   : > { %v939_v0 = vshll.u32 %v816_v58, 16  ;;  %v943_v1 = vshrl.u32 %v816_v58, 16  ;;  %v932_v5 = vrot.slane %v930_v59, 4  ;;  %v935_v6 = vrot.slane %v933_v60, 5  ;;  %v275_v13 = vld [vmem:[%s7124_s8 + $0x18] sm:$0xf] }
  0x6f   : > { %v558_v8 = vrot.slane %v553_v54, 4  ;;  %v557_v11 = vsel %vm7159_vm10, %v549_v2, %v556_v3  ;;  %v6715_v14 = vld [vmem:[%s8589_s1 + $0x1f8] sm:$0xff]   ;;  %v951_v16 = vrot.slane %v949_v7, 5  ;;  %730 = vst [vmem:[#allocation2 + $0xb4] sm:$0xf] %v729_v12  ;;  %v356_v19 = vshrl.u32 %v275_v13, 16  ;;  %6180 = vmatpush3.bf16.msra.mxu1 %v6710_v62 }
  0x70   : > { %v941_v9 = vrot.slane %v939_v0, 5  ;;  %v945_v10 = vrot.slane %v943_v1, 4  ;;  %v936_v15 = vor.u32 %v935_v6, %v932_v5  ;;  %731 = vst [vmem:[#allocation2 + $0xb8] sm:$0xf] %v557_v11  ;;  %v276_v18 = vld [vmem:[%s7124_s8 + $0x1c] sm:$0xf]  ;;  %6389 = vmatprep.subr.bf16.mxu1 %v6715_v14 }
  0x71   : > { %v733_v17 = vsel %vm7148_vm8, %v558_v8, %v732_v55  ;;  %v359_v21 = vshll.u32 %v275_v13, 16  ;;  %v364_v22 = vshrl.u32 %v276_v18, 16  ;;  %v367_v23 = vshll.u32 %v276_v18, 16  ;;  %v6760_v24 = vld [vmem:[%s8589_s1 + $0x148] sm:$0xff]   ;;  %v651_v28 = vld [vmem:[#allocation2 + $0x30] sm:$0xf] }
  0x72   : > { %v946_v20 = vor.u32 %v945_v10, %v941_v9  ;;  %734 = vst [vmem:[#allocation2 + $0xbc] sm:$0x1] %v733_v17  ;;  %v6688_v25 = vld [vmem:[#allocation3 + $0x3f4] ss:$36 sps:$4 sm:$0xff]   ;;  %v937_v26 = vrot.slane %v936_v15, 4  ;;  %v358_v30 = vrot.slane %v356_v19, 7  ;;  %6289 = vmatprep.subr.bf16.mxu0 %v6760_v24 }
  0x73   : > { %v6694_v27 = vld [vmem:[#allocation3 + $0x3f0] ss:$36 sps:$4 sm:$0xff]   ;;  %v366_v31 = vrot.slane %v364_v22, 7  ;;  %v655_v32 = vld [vmem:[#allocation2 + $0x38] sm:$0x1]  ;;  %4868 = vmatprep.mubr.bf16.mxu1 %v6688_v25  ;;  %v6770_v57 = vld [vmem:[%s8589_s1 + $0x140] sm:$0xff]  }
  0x74   : > { %v947_v29 = vrot.slane %v946_v20, 4  ;;  %v6761_v34 = vld [vmem:[%s8589_s1 + $0x108] sm:$0xff]   ;;  %v942_v35 = vsel %vm7142_vm6, %v937_v26, %v941_v9  ;;  %4869 = vmatmul.mubr.bf16.gmra.mxu1 %v6694_v27  ;;  %v361_v37 = vor.u32 %v359_v21, %v358_v30  ;;  %v362_v38 = vrot.slane %v358_v30, 4  ;;  %v1305_v60 = vld [vmem:[#allocation2] sm:$0xe]  ;;  %s8543_s15 = scalar_lea.sflag [#allocation5], %s199_s7 }
  0x75   : > { %1279 = vst [vmem:[#allocation3 + $0xdc] sm:$0xf] %v942_v35  ;;  %v369_v39 = vor.u32 %v367_v23, %v366_v31  ;;  %6290 = vmatpush3.bf16.msra.mxu0 %v6761_v34  ;;  %v371_v40 = vrot.slane %v366_v31, 4  ;;  %v1306_v0 = vld [vmem:[#allocation2 + $0x4] sm:$0xf]  ;;  %v5781_v2 = vrot.slane %v1305_v60, 9 }
  0x76   : > { %v952_v36 = vsel %vm7142_vm6, %v947_v29, %v951_v16  ;;  %v772_v41 = vld [vmem:[#allocation2 + $0xb4] sm:$0xf]  ;;  %v652_v47 = vsel %vm7153_vm9, %v361_v37, %v651_v28  ;;  %6291 = vmatprep.subr.bf16.mxu0 %v6770_v57  ;;  %v1307_v4 = vld [vmem:[#allocation2 + $0x8] sm:$0x1]  ;;  %v1406_v5 = vrot.slane %v1306_v0, 5  ;;  %v6771_v18 = vld [vmem:[%s8589_s1 + $0x100] sm:$0xff]  }
  0x77   : > { %1280 = vst [vmem:[#allocation3 + $0x100] sm:$0xf] %v952_v36  ;;  %v773_v43 = vld [vmem:[#allocation2 + $0xb8] sm:$0xf]  ;;  %v851_v44 = vld [vmem:[#allocation2 + $0xb4] sm:$0xf]  ;;  %v370_v45 = vsel %vm7159_vm10, %v362_v38, %v369_v39  ;;  %v656_v53 = vsel %vm7148_vm8, %v371_v40, %v655_v32 }
  0x78   : > { %804 = vst [vmem:[#allocation3 + $0x438] sm:$0xf] %v772_v41  ;;  %805 = vst [vmem:[#allocation3 + $0x45c] sm:$0xf] %v773_v43  ;;  %v852_v49 = vld [vmem:[#allocation2 + $0xb8] sm:$0xf]  ;;  %v1407_v12 = vsel %vm7354_vm13, %v5781_v2, %v1406_v5 }
  0x79   : > { %v853_v50 = vld [vmem:[#allocation2 + $0xbc] sm:$0x1]  ;;  %v1218_v51 = vshrl.u32 %v851_v44, 16  ;;  %v1221_v52 = vshll.u32 %v851_v44, 16  ;;  %653 = vst [vmem:[#allocation2 + $0x30] sm:$0xf] %v652_v47  ;;  %6292 = vmatpush3.bf16.msra.mxu0 %v6771_v18 }
  0x7a   : > { %654 = vst [vmem:[#allocation2 + $0x34] sm:$0xf] %v370_v45  ;;  %v1227_v54 = vshll.u32 %v852_v49, 16  ;;  %v1231_v55 = vshrl.u32 %v852_v49, 16  ;;  %v1237_v56 = vshll.u32 %v853_v50, 16  ;;  %v1409_v10 = vrot.slane %v1307_v4, 5 }
  0x7b   : > { %657 = vst [vmem:[#allocation2 + $0x38] sm:$0x1] %v656_v53  ;;  %v1220_v58 = vrot.slane %v1218_v51, 4  ;;  %v1223_v59 = vrot.slane %v1221_v52, 5  ;;  %v1580_v6 = vld [vmem:[#allocation2 + $0xc] sm:$0xf] }
  0x7c   : > { %v1229_v61 = vrot.slane %v1227_v54, 5  ;;  %v1233_v62 = vrot.slane %v1231_v55, 4  ;;  %v1239_v63 = vrot.slane %v1237_v56, 5  ;;  %v6697_v8 = vld [vmem:[#allocation3 + $0xd8] ss:$36 sps:$4 sm:$0xff]   ;;  %v1408_v13 = vrot.slane %v1406_v5, 4 }
  0x7d   : > { %v1224_v3 = vor.u32 %v1223_v59, %v1220_v58  ;;  %1612 = vst [vmem:[#allocation3 + $0xc] sm:$0xf] %v1580_v6  ;;  %v1581_v14 = vld [vmem:[#allocation2 + $0x10] sm:$0xf]  ;;  %1548 = vst [vmem:[#allocation3 + $0x8] sm:$0xf] %v1407_v12 }
  0x7e   : > { %v6692_v7 = vld [vmem:[#allocation3 + $0xdc] ss:$36 sps:$4 sm:$0xff]   ;;  %v1234_v9 = vor.u32 %v1233_v62, %v1229_v61  ;;  %1613 = vst [vmem:[#allocation3 + $0x30] sm:$0xf] %v1581_v14  ;;  %v1410_v23 = vsel %vm7354_vm13, %v1408_v13, %v1409_v10  ;;  %v277_v30 = vld [vmem:[%s7124_s8 + $0x20] sm:$0xf] }
  0x7f   : > { %v1225_v11 = vrot.slane %v1224_v3, 4  ;;  %4780 = vmatprep.mubr.bf16.mxu0 %v6692_v7  ;;  %1549 = vst [vmem:[#allocation3 + $0x2c] sm:$0xf] %v1410_v23  ;;  %v278_v31 = vld [vmem:[%s7124_s8 + $0x24] sm:$0xf]  ;;  %v373_v36 = vshrl.u32 %v277_v30, 16 }
  0x80   : > { %v1235_v15 = vrot.slane %v1234_v9, 4  ;;  %v750_v16 = vld [vmem:[#allocation2 + $0x30] sm:$0xf]  ;;  %4781 = vmatmul.mubr.bf16.gmra.mxu0 %v6697_v8  ;;  %v376_v39 = vshll.u32 %v277_v30, 16  ;;  %v381_v40 = vshrl.u32 %v278_v31, 16  ;;  %v384_v45 = vshll.u32 %v278_v31, 16 }
  0x81   : > { %v751_v17 = vld [vmem:[#allocation2 + $0x34] sm:$0xf]  ;;  %v1230_v19 = vsel %vm7142_vm6, %v1225_v11, %v1229_v61  ;;  %782 = vst [vmem:[#allocation3 + $0x120] sm:$0xf] %v750_v16  ;;  %v818_v20 = vld [vmem:[#allocation2 + $0x30] sm:$0xf] }
  0x82   : > { %783 = vst [vmem:[#allocation3 + $0x144] sm:$0xf] %v751_v17  ;;  %v819_v21 = vld [vmem:[#allocation2 + $0x34] sm:$0xf]  ;;  %v820_v22 = vld [vmem:[#allocation2 + $0x38] sm:$0x1]  ;;  %v1240_v24 = vsel %vm7142_vm6, %v1235_v15, %v1239_v63 }
  0x83   : > { %1303 = vst [vmem:[#allocation3 + $0x43c] sm:$0xf] %v1230_v19  ;;  %v954_v25 = vshrl.u32 %v818_v20, 16  ;;  %v957_v26 = vshll.u32 %v818_v20, 16  ;;  %v963_v27 = vshll.u32 %v819_v21, 16  ;;  %v967_v28 = vshrl.u32 %v819_v21, 16 }
  0x84   : > { %1304 = vst [vmem:[#allocation3 + $0x460] sm:$0xf] %v1240_v24  ;;  %v973_v29 = vshll.u32 %v820_v22, 16  ;;  %v658_v41 = vld [vmem:[#allocation2 + $0x3c] sm:$0xf]  ;;  %v375_v44 = vrot.slane %v373_v36, 7 }
  0x85   : > { %v956_v32 = vrot.slane %v954_v25, 4  ;;  %v959_v34 = vrot.slane %v957_v26, 5  ;;  %v965_v35 = vrot.slane %v963_v27, 5  ;;  %v969_v37 = vrot.slane %v967_v28, 4  ;;  %v662_v47 = vld [vmem:[#allocation2 + $0x44] sm:$0x1] }
  0x86   : > { %v975_v38 = vrot.slane %v973_v29, 5  ;;  %v383_v50 = vrot.slane %v381_v40, 7  ;;  %v1308_v51 = vld [vmem:[#allocation2 + $0xc] sm:$0xe]  ;;  %v1309_v52 = vld [vmem:[#allocation2 + $0x10] sm:$0xf]  ;;  %v378_v54 = vor.u32 %v376_v39, %v375_v44 }
  0x87   : > { %v960_v43 = vor.u32 %v959_v34, %v956_v32  ;;  %v970_v49 = vor.u32 %v969_v37, %v965_v35  ;;  %v379_v55 = vrot.slane %v375_v44, 4  ;;  %v1310_v56 = vld [vmem:[#allocation2 + $0x14] sm:$0x1]  ;;  %v5782_v57 = vrot.slane %v1308_v51, 9  ;;  %v6714_v4 = vld [vmem:[#allocation3 + $0xc] ss:$36 sps:$4 sm:$0xff]  }
  0x88   : > { %v386_v59 = vor.u32 %v384_v45, %v383_v50  ;;  %v388_v60 = vrot.slane %v383_v50, 4  ;;  %v6705_v63 = vld [vmem:[#allocation3 + $0x438] ss:$36 sps:$4 sm:$0xff]   ;;  %v659_v0 = vsel %vm7153_vm9, %v378_v54, %v658_v41  ;;  %v1413_v2 = vrot.slane %v1309_v52, 5  ;;  %v1582_v8 = vld [vmem:[#allocation2 + $0x18] sm:$0xf] }
  0x89   : > { %v961_v53 = vrot.slane %v960_v43, 4  ;;  %v971_v58 = vrot.slane %v970_v49, 4  ;;  %660 = vst [vmem:[#allocation2 + $0x3c] sm:$0xf] %v659_v0  ;;  %v1416_v7 = vrot.slane %v1310_v56, 5  ;;  %v6786_v9 = vld [vmem:[%s8589_s1 + $0x238] sm:$0xff]  }
  0x8a   : > { %v387_v5 = vsel %vm7159_vm10, %v379_v55, %v386_v59  ;;  %v663_v6 = vsel %vm7148_vm8, %v388_v60, %v662_v47  ;;  %v1414_v10 = vsel %vm7354_vm13, %v5782_v57, %v1413_v2  ;;  %v1415_v11 = vrot.slane %v1413_v2, 4  ;;  %v1583_v12 = vld [vmem:[#allocation2 + $0x1c] sm:$0xf]  ;;  %1614 = vst [vmem:[#allocation3 + $0x54] sm:$0xf] %v1582_v8  ;;  %6525 = vmatprep.subr.bf16.mxu0 %v6786_v9  ;;  %v6730_v28 = vld [vmem:[%s8589_s1 + $0x1f0] sm:$0xff]  }
  0x8b   : > { %v6700_v61 = vld [vmem:[#allocation3 + $0x43c] ss:$36 sps:$4 sm:$0xff]   ;;  %v966_v62 = vsel %vm7142_vm6, %v961_v53, %v965_v35  ;;  %v976_v3 = vsel %vm7142_vm6, %v971_v58, %v975_v38  ;;  %661 = vst [vmem:[#allocation2 + $0x40] sm:$0xf] %v387_v5  ;;  %664 = vst [vmem:[#allocation2 + $0x44] sm:$0x1] %v663_v6 }
  0x8c   : > { %1281 = vst [vmem:[#allocation3 + $0x124] sm:$0xf] %v966_v62  ;;  %4876 = vmatprep.mubr.bf16.mxu1 %v6700_v61  ;;  %1282 = vst [vmem:[#allocation3 + $0x148] sm:$0xf] %v976_v3  ;;  %v279_v13 = vld [vmem:[%s7124_s8 + $0x28] sm:$0xf]  ;;  %v1417_v15 = vsel %vm7354_vm13, %v1415_v11, %v1416_v7 }
  0x8d   : > { %4877 = vmatmul.mubr.bf16.gmra.mxu1 %v6705_v63  ;;  %1550 = vst [vmem:[#allocation3 + $0x50] sm:$0xf] %v1414_v10  ;;  %1615 = vst [vmem:[#allocation3 + $0x78] sm:$0xf] %v1583_v12  ;;  %v280_v14 = vld [vmem:[%s7124_s8 + $0x2c] sm:$0xf] }
  0x8e   : > { %4917 = vmatprep.mubr.bf16.mxu1 %v6714_v4  ;;  %v390_v16 = vshrl.u32 %v279_v13, 16  ;;  %v393_v17 = vshll.u32 %v279_v13, 16  ;;  %v398_v18 = vshrl.u32 %v280_v14, 16  ;;  %v6712_v19 = vld [vmem:[#allocation3 + $0x8] ss:$36 sps:$4 sm:$0xff]   ;;  %v401_v20 = vshll.u32 %v280_v14, 16 }
  0x8f   : > { %1551 = vst [vmem:[#allocation3 + $0x74] sm:$0xf] %v1417_v15  ;;  %v6718_v21 = vld [vmem:[%s8589_s1 + $0x1b8] sm:$0xff]   ;;  %v665_v25 = vld [vmem:[#allocation2 + $0x48] sm:$0xf]  ;;  %v6734_v47 = vld [vmem:[%s8589_s1 + $0x1b0] sm:$0xff]  }
  0x90   : > { %v392_v22 = vrot.slane %v390_v16, 7  ;;  %v400_v23 = vrot.slane %v398_v18, 7  ;;  %v1311_v24 = vld [vmem:[#allocation2 + $0x18] sm:$0xe]  ;;  %v1312_v26 = vld [vmem:[#allocation2 + $0x1c] sm:$0xf] }
  0x91   : > { %v5783_v27 = vrot.slane %v1311_v24, 9  ;;  %v752_v29 = vld [vmem:[#allocation2 + $0x3c] sm:$0xf]  ;;  %v1313_v35 = vld [vmem:[#allocation2 + $0x20] sm:$0x1]  ;;  %v6747_v53 = vld [vmem:[%s8589_s1 + $0x1e8] sm:$0xff]  }
  0x92   : > { %v821_v30 = vld [vmem:[#allocation2 + $0x3c] sm:$0xf]  ;;  %v395_v31 = vor.u32 %v393_v17, %v392_v22  ;;  %v396_v32 = vrot.slane %v392_v22, 4  ;;  %v403_v34 = vor.u32 %v401_v20, %v400_v23  ;;  %784 = vst [vmem:[#allocation3 + $0x168] sm:$0xf] %v752_v29  ;;  %v405_v56 = vrot.slane %v400_v23, 4 }
  0x93   : > { %v6703_v36 = vld [vmem:[#allocation3 + $0x124] ss:$36 sps:$4 sm:$0xff]   ;;  %v978_v38 = vshrl.u32 %v821_v30, 16  ;;  %v669_v39 = vld [vmem:[#allocation2 + $0x50] sm:$0x1]  ;;  %v981_v50 = vshll.u32 %v821_v30, 16 }
  0x94   : > { %v6707_v37 = vld [vmem:[#allocation3 + $0x120] ss:$36 sps:$4 sm:$0xff]   ;;  %v753_v40 = vld [vmem:[#allocation2 + $0x40] sm:$0xf]  ;;  %v823_v43 = vld [vmem:[#allocation2 + $0x44] sm:$0x1]  ;;  %v404_v44 = vsel %vm7159_vm10, %v396_v32, %v403_v34  ;;  %v666_v45 = vsel %vm7153_vm9, %v395_v31, %v665_v25  ;;  %4788 = vmatprep.mubr.bf16.mxu0 %v6703_v36  ;;  %v670_v0 = vsel %vm7148_vm8, %v405_v56, %v669_v39 }
  0x95   : > { %v822_v41 = vld [vmem:[#allocation2 + $0x40] sm:$0xf]  ;;  %785 = vst [vmem:[#allocation3 + $0x18c] sm:$0xf] %v753_v40  ;;  %v980_v49 = vrot.slane %v978_v38, 4  ;;  %4918 = vmatmul.mubr.bf16.vlgmr.msra.gmra.mxu1 %v6712_v19  ;;  %4789 = vmatmul.mubr.bf16.gmra.mxu0 %v6707_v37  ;;  %v997_v54 = vshll.u32 %v823_v43, 16 }
  0x96   : > { %v987_v51 = vshll.u32 %v822_v41, 16  ;;  %v991_v52 = vshrl.u32 %v822_v41, 16  ;;  %667 = vst [vmem:[#allocation2 + $0x48] sm:$0xf] %v666_v45  ;;  %668 = vst [vmem:[#allocation2 + $0x4c] sm:$0xf] %v404_v44  ;;  %6390 = vmatpush3.bf16.msra.mxu1 %v6718_v21 }
  0x97   : > { %v6720_v55 = vld [vmem:[#allocation3 + $0x54] ss:$36 sps:$4 sm:$0xff]   ;;  %v1420_v57 = vrot.slane %v1312_v26, 5  ;;  %v983_v58 = vrot.slane %v981_v50, 5  ;;  %v1423_v62 = vrot.slane %v1313_v35, 5  ;;  %6391 = vmatprep.subr.bf16.mxu1 %v6730_v28  ;;  %v999_v63 = vrot.slane %v997_v54, 5 }
  0x98   : > { %v989_v59 = vrot.slane %v987_v51, 5  ;;  %v993_v60 = vrot.slane %v991_v52, 4  ;;  %v6725_v61 = vld [vmem:[#allocation3 + $0x50] ss:$36 sps:$4 sm:$0xff]   ;;  %4925 = vmatprep.mubr.bf16.mxu1 %v6720_v55  ;;  %v1584_v4 = vld [vmem:[#allocation2 + $0x24] sm:$0xf] }
  0x99   : > { %v1421_v2 = vsel %vm7354_vm13, %v5783_v27, %v1420_v57  ;;  %v1422_v3 = vrot.slane %v1420_v57, 4  ;;  %v1585_v5 = vld [vmem:[#allocation2 + $0x28] sm:$0xf]  ;;  %v984_v6 = vor.u32 %v983_v58, %v980_v49  ;;  %671 = vst [vmem:[#allocation2 + $0x50] sm:$0x1] %v670_v0  ;;  %v6764_v18 = vld [vmem:[%s8589_s1 + $0x1e0] sm:$0xff]  }
  0x9a   : > { %v994_v7 = vor.u32 %v993_v60, %v989_v59  ;;  %1552 = vst [vmem:[#allocation3 + $0x98] sm:$0xf] %v1421_v2  ;;  %1616 = vst [vmem:[#allocation3 + $0x9c] sm:$0xf] %v1584_v4  ;;  %v281_v8 = vld [vmem:[%s7124_s8 + $0x30] sm:$0xf]  ;;  %6392 = vmatpush3.bf16.msra.mxu1 %v6734_v47 }
  0x9b   : > { %1617 = vst [vmem:[#allocation3 + $0xc0] sm:$0xf] %v1585_v5  ;;  %v1424_v9 = vsel %vm7354_vm13, %v1422_v3, %v1423_v62  ;;  %v282_v10 = vld [vmem:[%s7124_s8 + $0x34] sm:$0xf]  ;;  %v407_v11 = vshrl.u32 %v281_v8, 16  ;;  %v410_v12 = vshll.u32 %v281_v8, 16  ;;  %6393 = vmatprep.subr.bf16.mxu1 %v6747_v53 }
  0x9c   : > { %v6752_v13 = vld [vmem:[%s8589_s1 + $0x1a8] sm:$0xff]   ;;  %v985_v14 = vrot.slane %v984_v6, 4  ;;  %v995_v15 = vrot.slane %v994_v7, 4  ;;  %1553 = vst [vmem:[#allocation3 + $0xbc] sm:$0xf] %v1424_v9  ;;  %v415_v16 = vshrl.u32 %v282_v10, 16 }
  0x9d   : > { %v418_v17 = vshll.u32 %v282_v10, 16  ;;  %v754_v19 = vld [vmem:[#allocation2 + $0x48] sm:$0xf]  ;;  %v755_v20 = vld [vmem:[#allocation2 + $0x4c] sm:$0xf]  ;;  %v6768_v22 = vld [vmem:[%s8589_s1 + $0x1a0] sm:$0xff]   ;;  %4926 = vmatmul.mubr.bf16.gmra.mxu1 %v6725_v61 }
  0x9e   : > { %v824_v21 = vld [vmem:[#allocation2 + $0x48] sm:$0xf]  ;;  %v990_v23 = vsel %vm7142_vm6, %v985_v14, %v989_v59  ;;  %v1000_v24 = vsel %vm7142_vm6, %v995_v15, %v999_v63  ;;  %786 = vst [vmem:[#allocation3 + $0x1b0] sm:$0xf] %v754_v19  ;;  %787 = vst [vmem:[#allocation3 + $0x1d4] sm:$0xf] %v755_v20  ;;  %6394 = vmatpush3.bf16.msra.mxu1 %v6752_v13 }
  0x9f   : > { %v825_v25 = vld [vmem:[#allocation2 + $0x4c] sm:$0xf]  ;;  %v1002_v26 = vshrl.u32 %v824_v21, 16  ;;  %v1005_v27 = vshll.u32 %v824_v21, 16  ;;  %v672_v28 = vld [vmem:[#allocation2 + $0x54] sm:$0xf]  ;;  %6395 = vmatprep.subr.bf16.mxu1 %v6764_v18 }
  0xa0   : > { %v6780_v29 = vld [vmem:[%s8589_s1 + $0x1d8] sm:$0xff]   ;;  %1283 = vst [vmem:[#allocation3 + $0x16c] sm:$0xf] %v990_v23  ;;  %1284 = vst [vmem:[#allocation3 + $0x190] sm:$0xf] %v1000_v24  ;;  %v1011_v30 = vshll.u32 %v825_v25, 16 }
  0xa1   : > { %v1015_v31 = vshrl.u32 %v825_v25, 16  ;;  %v409_v32 = vrot.slane %v407_v11, 7  ;;  %v417_v34 = vrot.slane %v415_v16, 7  ;;  %v676_v35 = vld [vmem:[#allocation2 + $0x5c] sm:$0x1]  ;;  %v1004_v36 = vrot.slane %v1002_v26, 4 }
  0xa2   : > { %v1007_v37 = vrot.slane %v1005_v27, 5  ;;  %v826_v38 = vld [vmem:[#allocation2 + $0x50] sm:$0x1]  ;;  %v1013_v39 = vrot.slane %v1011_v30, 5  ;;  %v6784_v44 = vld [vmem:[%s8589_s1 + $0x198] sm:$0xff]   ;;  %6396 = vmatpush3.bf16.msra.mxu1 %v6768_v22  ;;  %v6814_v21 = vld [vmem:[%s8589_s1 + $0x188] sm:$0xff]  }
  0xa3   : > { %v1017_v40 = vrot.slane %v1015_v31, 4  ;;  %v412_v41 = vor.u32 %v410_v12, %v409_v32  ;;  %v413_v43 = vrot.slane %v409_v32, 4  ;;  %v1021_v47 = vshll.u32 %v826_v38, 16  ;;  %v6795_v51 = vld [vmem:[%s8589_s1 + $0x1d0] sm:$0xff]   ;;  %v1314_v60 = vld [vmem:[#allocation2 + $0x24] sm:$0xe]  ;;  %6397 = vmatprep.subr.bf16.mxu1 %v6780_v29 }
  0xa4   : > { %v1008_v45 = vor.u32 %v1007_v37, %v1004_v36  ;;  %v420_v49 = vor.u32 %v418_v17, %v417_v34  ;;  %v422_v50 = vrot.slane %v417_v34, 4  ;;  %v6728_v53 = vld [vmem:[#allocation3 + $0x9c] ss:$36 sps:$4 sm:$0xff]   ;;  %v1315_v61 = vld [vmem:[#allocation2 + $0x28] sm:$0xf]  ;;  %v5784_v0 = vrot.slane %v1314_v60, 9 }
  0xa5   : > { %v1018_v52 = vor.u32 %v1017_v40, %v1013_v39  ;;  %v673_v54 = vsel %vm7153_vm9, %v412_v41, %v672_v28  ;;  %v6733_v55 = vld [vmem:[#allocation3 + $0x98] ss:$36 sps:$4 sm:$0xff]   ;;  %v1023_v57 = vrot.slane %v1021_v47, 5  ;;  %4933 = vmatprep.mubr.bf16.mxu1 %v6728_v53  ;;  %v1316_v63 = vld [vmem:[#allocation2 + $0x2c] sm:$0x1]  ;;  %v1427_v2 = vrot.slane %v1315_v61, 5 }
  0xa6   : > { %v1009_v56 = vrot.slane %v1008_v45, 4  ;;  %v421_v58 = vsel %vm7159_vm10, %v413_v43, %v420_v49  ;;  %674 = vst [vmem:[#allocation2 + $0x54] sm:$0xf] %v673_v54  ;;  %v677_v59 = vsel %vm7148_vm8, %v422_v50, %v676_v35  ;;  %v6799_v3 = vld [vmem:[%s8589_s1 + $0x190] sm:$0xff]   ;;  %4934 = vmatmul.mubr.bf16.gmra.mxu1 %v6733_v55  ;;  %v1430_v6 = vrot.slane %v1316_v63, 5  ;;  %v6810_v12 = vld [vmem:[%s8589_s1 + $0x1c8] sm:$0xff]  }
  0xa7   : > { %v1019_v62 = vrot.slane %v1018_v52, 4  ;;  %675 = vst [vmem:[#allocation2 + $0x58] sm:$0xf] %v421_v58  ;;  %678 = vst [vmem:[#allocation2 + $0x5c] sm:$0x1] %v677_v59  ;;  %v1428_v9 = vsel %vm7354_vm13, %v5784_v0, %v1427_v2  ;;  %v1429_v10 = vrot.slane %v1427_v2, 4  ;;  %6398 = vmatpush3.bf16.msra.mxu1 %v6784_v44 }
  0xa8   : > { %v6716_v4 = vld [vmem:[#allocation3 + $0x16c] ss:$36 sps:$4 sm:$0xff]   ;;  %v1014_v5 = vsel %vm7142_vm6, %v1009_v56, %v1013_v39  ;;  %v1586_v11 = vld [vmem:[#allocation2 + $0x30] sm:$0xf]  ;;  %1554 = vst [vmem:[#allocation3 + $0xe0] sm:$0xf] %v1428_v9  ;;  %6399 = vmatprep.subr.bf16.mxu1 %v6795_v51 }
  0xa9   : > { %v6719_v7 = vld [vmem:[#allocation3 + $0x168] ss:$36 sps:$4 sm:$0xff]   ;;  %v1024_v8 = vsel %vm7142_vm6, %v1019_v62, %v1023_v57  ;;  %1285 = vst [vmem:[#allocation3 + $0x1b4] sm:$0xf] %v1014_v5  ;;  %4796 = vmatprep.mubr.bf16.mxu0 %v6716_v4  ;;  %v1587_v13 = vld [vmem:[#allocation2 + $0x34] sm:$0xf]  ;;  %v1431_v16 = vsel %vm7354_vm13, %v1429_v10, %v1430_v6 }
  0xaa   : > { %1286 = vst [vmem:[#allocation3 + $0x1d8] sm:$0xf] %v1024_v8  ;;  %1618 = vst [vmem:[#allocation3 + $0xe4] sm:$0xf] %v1586_v11  ;;  %v283_v14 = vld [vmem:[%s7124_s8 + $0x38] sm:$0xf]  ;;  %4797 = vmatmul.mubr.bf16.gmra.mxu0 %v6719_v7 }
  0xab   : > { %v284_v15 = vld [vmem:[%s7124_s8 + $0x3c] sm:$0xf]  ;;  %1619 = vst [vmem:[#allocation3 + $0x108] sm:$0xf] %v1587_v13  ;;  %v424_v17 = vshrl.u32 %v283_v14, 16  ;;  %v427_v19 = vshll.u32 %v283_v14, 16  ;;  %6400 = vmatpush3.bf16.msra.mxu1 %v6799_v3 }
  0xac   : > { %v432_v18 = vshrl.u32 %v284_v15, 16  ;;  %1555 = vst [vmem:[#allocation3 + $0x104] sm:$0xf] %v1431_v16  ;;  %v435_v20 = vshll.u32 %v284_v15, 16  ;;  %v679_v29 = vld [vmem:[#allocation2 + $0x60] sm:$0xf]  ;;  %6401 = vmatprep.subr.bf16.mxu1 %v6810_v12 }
  0xad   : > { %v756_v22 = vld [vmem:[#allocation2 + $0x54] sm:$0xf]  ;;  %v426_v24 = vrot.slane %v424_v17, 7  ;;  %v1317_v35 = vld [vmem:[#allocation2 + $0x30] sm:$0xe]  ;;  %v6825_v13 = vld [vmem:[%s8589_s1 + $0x1c0] sm:$0xff]  }
  0xae   : > { %v827_v23 = vld [vmem:[#allocation2 + $0x54] sm:$0xf]  ;;  %v434_v25 = vrot.slane %v432_v18, 7  ;;  %v757_v26 = vld [vmem:[#allocation2 + $0x58] sm:$0xf]  ;;  %v5785_v60 = vrot.slane %v1317_v35, 9 }
  0xaf   : > { %788 = vst [vmem:[#allocation3 + $0x1f8] sm:$0xf] %v756_v22  ;;  %v828_v27 = vld [vmem:[#allocation2 + $0x58] sm:$0xf]  ;;  %v829_v28 = vld [vmem:[#allocation2 + $0x5c] sm:$0x1]  ;;  %v429_v38 = vor.u32 %v427_v19, %v426_v24  ;;  %6402 = vmatpush3.bf16.msra.mxu1 %v6814_v21 }
  0xb0   : > { %789 = vst [vmem:[#allocation3 + $0x21c] sm:$0xf] %v757_v26  ;;  %v1026_v30 = vshrl.u32 %v827_v23, 16  ;;  %v1029_v31 = vshll.u32 %v827_v23, 16  ;;  %v1035_v32 = vshll.u32 %v828_v27, 16  ;;  %v1039_v34 = vshrl.u32 %v828_v27, 16  ;;  %6403 = vmatprep.subr.bf16.mxu1 %v6825_v13 }
  0xb1   : > { %v1318_v36 = vld [vmem:[#allocation2 + $0x34] sm:$0xf]  ;;  %v1045_v37 = vshll.u32 %v829_v28, 16  ;;  %v430_v39 = vrot.slane %v426_v24, 4  ;;  %v437_v40 = vor.u32 %v435_v20, %v434_v25  ;;  %v683_v41 = vld [vmem:[#allocation2 + $0x68] sm:$0x1]  ;;  %v680_v56 = vsel %vm7153_vm9, %v429_v38, %v679_v29 }
  0xb2   : > { %v1319_v43 = vld [vmem:[#allocation2 + $0x38] sm:$0x1]  ;;  %v6723_v44 = vld [vmem:[#allocation3 + $0x1b4] ss:$36 sps:$4 sm:$0xff]   ;;  %v1028_v47 = vrot.slane %v1026_v30, 4  ;;  %v1031_v49 = vrot.slane %v1029_v31, 5 }
  0xb3   : > { %v6727_v45 = vld [vmem:[#allocation3 + $0x1b0] ss:$36 sps:$4 sm:$0xff]   ;;  %v1037_v50 = vrot.slane %v1035_v32, 5  ;;  %v1041_v51 = vrot.slane %v1039_v34, 4  ;;  %v1047_v52 = vrot.slane %v1045_v37, 5  ;;  %4804 = vmatprep.mubr.bf16.mxu0 %v6723_v44  ;;  %v438_v54 = vsel %vm7159_vm10, %v430_v39, %v437_v40  ;;  %s6929_s26 = scalar_lea.vmem %s8538_s18, 4096 }
  0xb4   : > { %v6738_v53 = vld [vmem:[#allocation3 + $0xe4] ss:$36 sps:$4 sm:$0xff]   ;;  %v439_v55 = vrot.slane %v434_v25, 4  ;;  %4805 = vmatmul.mubr.bf16.gmra.mxu0 %v6727_v45  ;;  %v1032_v58 = vor.u32 %v1031_v49, %v1028_v47  ;;  %681 = vst [vmem:[#allocation2 + $0x60] sm:$0xf] %v680_v56  ;;  %v1434_v61 = vrot.slane %v1318_v36, 5  ;;  %p6930_p12 = scmp.ne.s32.totalorder %s8538_s18, %s6929_s26 }
  0xb5   : > { %v6742_v57 = vld [vmem:[#allocation3 + $0xe0] ss:$36 sps:$4 sm:$0xff]   ;;  %v1042_v59 = vor.u32 %v1041_v51, %v1037_v50  ;;  %682 = vst [vmem:[#allocation2 + $0x64] sm:$0xf] %v438_v54  ;;  %v1589_v63 = vld [vmem:[#allocation2 + $0x40] sm:$0xf]  ;;  %4941 = vmatprep.mubr.bf16.mxu1 %v6738_v53 }
  0xb6   : > { %v1588_v62 = vld [vmem:[#allocation2 + $0x3c] sm:$0xf]  ;;  %v684_v0 = vsel %vm7148_vm8, %v439_v55, %v683_v41  ;;  %v1437_v2 = vrot.slane %v1319_v43, 5  ;;  %1621 = vst [vmem:[#allocation3 + $0x150] sm:$0xf] %v1589_v63  ;;  %v1033_v3 = vrot.slane %v1032_v58, 4  ;;  %4942 = vmatmul.mubr.bf16.gmra.mxu1 %v6742_v57  ;;  %v1435_v5 = vsel %vm7354_vm13, %v5785_v60, %v1434_v61  ;;  %p6931_p13 = pnand %p6930_p12, %p7071_p4 }
  0xb7   : > { %1620 = vst [vmem:[#allocation3 + $0x12c] sm:$0xf] %v1588_v62  ;;  %v1043_v4 = vrot.slane %v1042_v59, 4  ;;  %685 = vst [vmem:[#allocation2 + $0x68] sm:$0x1] %v684_v0  ;;  %v1436_v6 = vrot.slane %v1434_v61, 4 }
  0xb8   : > { %1556 = vst [vmem:[#allocation3 + $0x128] sm:$0xf] %v1435_v5  ;;  %v285_v7 = vld [vmem:[%s7124_s8 + $0x40] sm:$0xf]  ;;  %v286_v8 = vld [vmem:[%s7124_s8 + $0x44] sm:$0xf]  ;;  %v1038_v9 = vsel %vm7142_vm6, %v1033_v3, %v1037_v50  ;;  %p6932_p0 = pneg %p6931_p13 }
  0xb9   : > { %v1048_v10 = vsel %vm7142_vm6, %v1043_v4, %v1047_v52  ;;  %v1438_v11 = vsel %vm7354_vm13, %v1436_v6, %v1437_v2  ;;  %v441_v12 = vshrl.u32 %v285_v7, 16  ;;  %1287 = vst [vmem:[#allocation3 + $0x1fc] sm:$0xf] %v1038_v9  ;;  %v444_v14 = vshll.u32 %v285_v7, 16  ;;  %v686_v16 = vld [vmem:[#allocation2 + $0x6c] sm:$0xf] }
  0xba   : > { %1288 = vst [vmem:[#allocation3 + $0x220] sm:$0xf] %v1048_v10  ;;  %1557 = vst [vmem:[#allocation3 + $0x14c] sm:$0xf] %v1438_v11  ;;  %v449_v15 = vshrl.u32 %v286_v8, 16  ;;  %v452_v18 = vshll.u32 %v286_v8, 16 }
  0xbb   : > { %v443_v17 = vrot.slane %v441_v12, 7  ;;  %v758_v19 = vld [vmem:[#allocation2 + $0x60] sm:$0xf]  ;;  %v690_v26 = vld [vmem:[#allocation2 + $0x74] sm:$0x1]  ;;  %s7008_s27 = smov [#allocation4]  }
  0xbc   : > { %v759_v20 = vld [vmem:[#allocation2 + $0x64] sm:$0xf]  ;;  %v830_v21 = vld [vmem:[#allocation2 + $0x60] sm:$0xf]  ;;  %790 = vst [vmem:[#allocation3 + $0x240] sm:$0xf] %v758_v19 }
  0xbd   : > { %791 = vst [vmem:[#allocation3 + $0x264] sm:$0xf] %v759_v20  ;;  %v831_v22 = vld [vmem:[#allocation2 + $0x64] sm:$0xf]  ;;  %v1050_v23 = vshrl.u32 %v830_v21, 16  ;;  %v1053_v24 = vshll.u32 %v830_v21, 16  ;;  %v446_v25 = vor.u32 %v444_v14, %v443_v17 }
  0xbe   : > { %v832_v27 = vld [vmem:[#allocation2 + $0x68] sm:$0x1]  ;;  %v1059_v28 = vshll.u32 %v831_v22, 16  ;;  %v1063_v29 = vshrl.u32 %v831_v22, 16  ;;  %v447_v30 = vrot.slane %v443_v17, 4  ;;  %v451_v31 = vrot.slane %v449_v15, 7 }
  0xbf   : > { %v1052_v32 = vrot.slane %v1050_v23, 4  ;;  %v1055_v34 = vrot.slane %v1053_v24, 5  ;;  %v1069_v35 = vshll.u32 %v832_v27, 16  ;;  %v687_v36 = vsel %vm7153_vm9, %v446_v25, %v686_v16  ;;  %v1320_v41 = vld [vmem:[#allocation2 + $0x3c] sm:$0xe]  ;;  %v6829_v57 = vld [vmem:[%s8589_s1 + $0x180] sm:$0xff]  }
  0xc0   : > { %v1061_v37 = vrot.slane %v1059_v28, 5  ;;  %v1065_v38 = vrot.slane %v1063_v29, 4  ;;  %v454_v39 = vor.u32 %v452_v18, %v451_v31  ;;  %v456_v40 = vrot.slane %v451_v31, 4  ;;  %688 = vst [vmem:[#allocation2 + $0x6c] sm:$0xf] %v687_v36  ;;  %6404 = vmatpush3.bf16.msra.mxu1 %v6829_v57  ;;  %s6933_s28 = sshll.u32 %s7008_s27, 4  ;;  %s6934_s28 = int_to_ptr.vmem [resolvable:$false] %s6933_s28 }
  0xc1   : > { %v6731_v43 = vld [vmem:[#allocation3 + $0x1fc] ss:$36 sps:$4 sm:$0xff]   ;;  %v1056_v44 = vor.u32 %v1055_v34, %v1052_v32  ;;  %v1071_v45 = vrot.slane %v1069_v35, 5  ;;  %v6744_v50 = vld [vmem:[#allocation3 + $0x12c] ss:$36 sps:$4 sm:$0xff]   ;;  %v5786_v53 = vrot.slane %v1320_v41, 9  ;;  %p6936_p1 = scmp.lt.s32.totalorder %s8538_s18, %s6934_s28 }
  0xc2   : > { %v6735_v47 = vld [vmem:[#allocation3 + $0x1f8] ss:$36 sps:$4 sm:$0xff]   ;;  %v1066_v49 = vor.u32 %v1065_v38, %v1061_v37  ;;  %v455_v51 = vsel %vm7159_vm10, %v447_v30, %v454_v39  ;;  %v691_v52 = vsel %vm7148_vm8, %v456_v40, %v690_v26  ;;  %4812 = vmatprep.mubr.bf16.mxu0 %v6731_v43  ;;  %v6750_v55 = vld [vmem:[#allocation3 + $0x128] ss:$36 sps:$4 sm:$0xff]   ;;  %4949 = vmatprep.mubr.bf16.mxu1 %v6744_v50  ;;  %v1590_v61 = vld [vmem:[#allocation2 + $0x48] sm:$0xf] }
  0xc3   : > { %v1057_v54 = vrot.slane %v1056_v44, 4  ;;  %689 = vst [vmem:[#allocation2 + $0x70] sm:$0xf] %v455_v51  ;;  %692 = vst [vmem:[#allocation2 + $0x74] sm:$0x1] %v691_v52  ;;  %4813 = vmatmul.mubr.bf16.gmra.mxu0 %v6735_v47  ;;  %4950 = vmatmul.mubr.bf16.gmra.mxu1 %v6750_v55  ;;  %s6935_s29 = scalar_lea.vmem %s6934_s28, 8192 }
  0xc4   : > { %v1321_v56 = vld [vmem:[#allocation2 + $0x40] sm:$0xf]  ;;  %v1067_v58 = vrot.slane %v1066_v49, 4  ;;  %v1322_v59 = vld [vmem:[#allocation2 + $0x44] sm:$0x1]  ;;  %p6937_p2 = scmp.lt.s32.totalorder %s6935_s29, %s6929_s26 }
  0xc5   : > { %v1441_v60 = vrot.slane %v1321_v56, 5  ;;  %v1062_v62 = vsel %vm7142_vm6, %v1057_v54, %v1061_v37  ;;  %v1444_v63 = vrot.slane %v1322_v59, 5  ;;  %v1591_v0 = vld [vmem:[#allocation2 + $0x4c] sm:$0xf]  ;;  %1622 = vst [vmem:[#allocation3 + $0x174] sm:$0xf] %v1590_v61 }
  0xc6   : > { %v287_v2 = vld [vmem:[%s7124_s8 + $0x48] sm:$0xf]  ;;  %v1072_v3 = vsel %vm7142_vm6, %v1067_v58, %v1071_v45  ;;  %1289 = vst [vmem:[#allocation3 + $0x244] sm:$0xf] %v1062_v62  ;;  %1623 = vst [vmem:[#allocation3 + $0x198] sm:$0xf] %v1591_v0  ;;  %p6938_p3 = por %p6937_p2, %p6936_p1 }
  0xc7   : > { %v1442_v4 = vsel %vm7354_vm13, %v5786_v53, %v1441_v60  ;;  %v1443_v5 = vrot.slane %v1441_v60, 4  ;;  %v288_v6 = vld [vmem:[%s7124_s8 + $0x4c] sm:$0xf]  ;;  %v458_v7 = vshrl.u32 %v287_v2, 16  ;;  %1290 = vst [vmem:[#allocation3 + $0x268] sm:$0xf] %v1072_v3 }
  0xc8   : > { %v760_v8 = vld [vmem:[#allocation2 + $0x6c] sm:$0xf]  ;;  %1558 = vst [vmem:[#allocation3 + $0x170] sm:$0xf] %v1442_v4  ;;  %v461_v10 = vshll.u32 %v287_v2, 16  ;;  %v466_v11 = vshrl.u32 %v288_v6, 16  ;;  %p6939_p5 = pnand %p6938_p3, %p6932_p0 }
  0xc9   : > { %v833_v9 = vld [vmem:[#allocation2 + $0x6c] sm:$0xf]  ;;  %792 = vst [vmem:[#allocation3 + $0x288] sm:$0xf] %v760_v8  ;;  %v1445_v14 = vsel %vm7354_vm13, %v1443_v5, %v1444_v63  ;;  %v460_v15 = vrot.slane %v458_v7, 7  ;;  %v469_v18 = vshll.u32 %v288_v6, 16 }
  0xca   : > { %v1074_v12 = vshrl.u32 %v833_v9, 16  ;;  %v1077_v13 = vshll.u32 %v833_v9, 16  ;;  %v693_v16 = vld [vmem:[#allocation2 + $0x78] sm:$0xf]  ;;  %1559 = vst [vmem:[#allocation3 + $0x194] sm:$0xf] %v1445_v14 }
  0xcb   : > { %v468_v17 = vrot.slane %v466_v11, 7  ;;  %v697_v19 = vld [vmem:[#allocation2 + $0x80] sm:$0x1]  ;;  %v761_v20 = vld [vmem:[#allocation2 + $0x70] sm:$0xf]  ;;  %v463_v23 = vor.u32 %v461_v10, %v460_v15  ;;  %v464_v29 = vrot.slane %v460_v15, 4 }
  0xcc   : > { %v834_v21 = vld [vmem:[#allocation2 + $0x70] sm:$0xf]  ;;  %v835_v22 = vld [vmem:[#allocation2 + $0x74] sm:$0x1]  ;;  %793 = vst [vmem:[#allocation3 + $0x2ac] sm:$0xf] %v761_v20 }
  0xcd   : > { %v1076_v24 = vrot.slane %v1074_v12, 4  ;;  %v1079_v25 = vrot.slane %v1077_v13, 5  ;;  %v1083_v26 = vshll.u32 %v834_v21, 16  ;;  %v1087_v27 = vshrl.u32 %v834_v21, 16  ;;  %v1323_v37 = vld [vmem:[#allocation2 + $0x48] sm:$0xe] }
  0xce   : > { %v1093_v28 = vshll.u32 %v835_v22, 16  ;;  %v471_v30 = vor.u32 %v469_v18, %v468_v17  ;;  %v473_v31 = vrot.slane %v468_v17, 4  ;;  %v694_v36 = vsel %vm7153_vm9, %v463_v23, %v693_v16  ;;  %v6740_v38 = vld [vmem:[#allocation3 + $0x244] ss:$36 sps:$4 sm:$0xff]   ;;  %v1324_v47 = vld [vmem:[#allocation2 + $0x4c] sm:$0xf] }
  0xcf   : > { %v1080_v32 = vor.u32 %v1079_v25, %v1076_v24  ;;  %v1085_v34 = vrot.slane %v1083_v26, 5  ;;  %v1089_v35 = vrot.slane %v1087_v27, 4  ;;  %v6743_v39 = vld [vmem:[#allocation3 + $0x240] ss:$36 sps:$4 sm:$0xff]   ;;  %695 = vst [vmem:[#allocation2 + $0x78] sm:$0xf] %v694_v36  ;;  %4820 = vmatprep.mubr.bf16.mxu0 %v6740_v38 }
  0xd0   : > { %v1095_v40 = vrot.slane %v1093_v28, 5  ;;  %v472_v41 = vsel %vm7159_vm10, %v464_v29, %v471_v30  ;;  %v698_v43 = vsel %vm7148_vm8, %v473_v31, %v697_v19  ;;  %v1325_v49 = vld [vmem:[#allocation2 + $0x50] sm:$0x1]  ;;  %v5787_v52 = vrot.slane %v1323_v37, 9  ;;  %4821 = vmatmul.mubr.bf16.gmra.mxu0 %v6743_v39  ;;  %v1592_v57 = vld [vmem:[#allocation2 + $0x54] sm:$0xf] }
  0xd1   : > { %v1081_v44 = vrot.slane %v1080_v32, 4  ;;  %v1090_v45 = vor.u32 %v1089_v35, %v1085_v34  ;;  %696 = vst [vmem:[#allocation2 + $0x7c] sm:$0xf] %v472_v41  ;;  %699 = vst [vmem:[#allocation2 + $0x80] sm:$0x1] %v698_v43  ;;  %v1448_v55 = vrot.slane %v1324_v47, 5 }
  0xd2   : > { %v6754_v50 = vld [vmem:[#allocation3 + $0x174] ss:$36 sps:$4 sm:$0xff]   ;;  %v1451_v56 = vrot.slane %v1325_v49, 5  ;;  %v1593_v58 = vld [vmem:[#allocation2 + $0x58] sm:$0xf] }
  0xd3   : > { %v6758_v51 = vld [vmem:[#allocation3 + $0x170] ss:$36 sps:$4 sm:$0xff]   ;;  %v1086_v53 = vsel %vm7142_vm6, %v1081_v44, %v1085_v34  ;;  %v1091_v54 = vrot.slane %v1090_v45, 4  ;;  %4957 = vmatprep.mubr.bf16.mxu1 %v6754_v50  ;;  %1624 = vst [vmem:[#allocation3 + $0x1bc] sm:$0xf] %v1592_v57  ;;  %v1449_v60 = vsel %vm7354_vm13, %v5787_v52, %v1448_v55  ;;  %v1450_v61 = vrot.slane %v1448_v55, 4 }
  0xd4   : > { %1291 = vst [vmem:[#allocation3 + $0x28c] sm:$0xf] %v1086_v53  ;;  %4958 = vmatmul.mubr.bf16.gmra.mxu1 %v6758_v51  ;;  %1625 = vst [vmem:[#allocation3 + $0x1e0] sm:$0xf] %v1593_v58  ;;  %v289_v62 = vld [vmem:[%s7124_s8 + $0x50] sm:$0xf] }
  0xd5   : > { %v1096_v59 = vsel %vm7142_vm6, %v1091_v54, %v1095_v40  ;;  %v290_v63 = vld [vmem:[%s7124_s8 + $0x54] sm:$0xf]  ;;  %1560 = vst [vmem:[#allocation3 + $0x1b8] sm:$0xf] %v1449_v60  ;;  %v475_v0 = vshrl.u32 %v289_v62, 16  ;;  %v1452_v5 = vsel %vm7354_vm13, %v1450_v61, %v1451_v56  ;;  %v478_v6 = vshll.u32 %v289_v62, 16 }
  0xd6   : > { %1292 = vst [vmem:[#allocation3 + $0x2b0] sm:$0xf] %v1096_v59  ;;  %v483_v2 = vshrl.u32 %v290_v63, 16  ;;  %v762_v3 = vld [vmem:[#allocation2 + $0x78] sm:$0xf]  ;;  %v486_v7 = vshll.u32 %v290_v63, 16 }
  0xd7   : > { %v836_v4 = vld [vmem:[#allocation2 + $0x78] sm:$0xf]  ;;  %794 = vst [vmem:[#allocation3 + $0x2d0] sm:$0xf] %v762_v3  ;;  %1561 = vst [vmem:[#allocation3 + $0x1dc] sm:$0xf] %v1452_v5 }
  0xd8   : > { %v763_v8 = vld [vmem:[#allocation2 + $0x7c] sm:$0xf]  ;;  %v838_v10 = vld [vmem:[#allocation2 + $0x80] sm:$0x1]  ;;  %v1098_v11 = vshrl.u32 %v836_v4, 16  ;;  %v1101_v12 = vshll.u32 %v836_v4, 16 }
  0xd9   : > { %v837_v9 = vld [vmem:[#allocation2 + $0x7c] sm:$0xf]  ;;  %795 = vst [vmem:[#allocation3 + $0x2f4] sm:$0xf] %v763_v8  ;;  %v700_v15 = vld [vmem:[#allocation2 + $0x84] sm:$0xf] }
  0xda   : > { %v1107_v13 = vshll.u32 %v837_v9, 16  ;;  %v1111_v14 = vshrl.u32 %v837_v9, 16  ;;  %v1117_v16 = vshll.u32 %v838_v10, 16  ;;  %v477_v17 = vrot.slane %v475_v0, 7  ;;  %v704_v19 = vld [vmem:[#allocation2 + $0x8c] sm:$0x1] }
  0xdb   : > { %v485_v18 = vrot.slane %v483_v2, 7  ;;  %v1100_v20 = vrot.slane %v1098_v11, 4  ;;  %v1103_v21 = vrot.slane %v1101_v12, 5  ;;  %v6753_v29 = vld [vmem:[#allocation3 + $0x288] ss:$36 sps:$4 sm:$0xff]  }
  0xdc   : > { %v1109_v22 = vrot.slane %v1107_v13, 5  ;;  %v1113_v23 = vrot.slane %v1111_v14, 4  ;;  %v1119_v24 = vrot.slane %v1117_v16, 5  ;;  %v480_v25 = vor.u32 %v478_v6, %v477_v17  ;;  %v6762_v38 = vld [vmem:[#allocation3 + $0x1bc] ss:$36 sps:$4 sm:$0xff]  }
  0xdd   : > { %v481_v26 = vrot.slane %v477_v17, 4  ;;  %v488_v27 = vor.u32 %v486_v7, %v485_v18  ;;  %v6748_v28 = vld [vmem:[#allocation3 + $0x28c] ss:$36 sps:$4 sm:$0xff]   ;;  %v1104_v30 = vor.u32 %v1103_v21, %v1100_v20  ;;  %v490_v32 = vrot.slane %v485_v18, 4  ;;  %v1326_v41 = vld [vmem:[#allocation2 + $0x54] sm:$0xe]  ;;  %4965 = vmatprep.mubr.bf16.mxu1 %v6762_v38 }
  0xde   : > { %v1114_v31 = vor.u32 %v1113_v23, %v1109_v22  ;;  %v701_v35 = vsel %vm7153_vm9, %v480_v25, %v700_v15  ;;  %4828 = vmatprep.mubr.bf16.mxu0 %v6748_v28  ;;  %v6767_v40 = vld [vmem:[#allocation3 + $0x1b8] ss:$36 sps:$4 sm:$0xff]   ;;  %v1327_v43 = vld [vmem:[#allocation2 + $0x58] sm:$0xf]  ;;  %v1328_v47 = vld [vmem:[#allocation2 + $0x5c] sm:$0x1] }
  0xdf   : > { %v489_v34 = vsel %vm7159_vm10, %v481_v26, %v488_v27  ;;  %v1105_v36 = vrot.slane %v1104_v30, 4  ;;  %702 = vst [vmem:[#allocation2 + $0x84] sm:$0xf] %v701_v35  ;;  %v705_v39 = vsel %vm7148_vm8, %v490_v32, %v704_v19  ;;  %4829 = vmatmul.mubr.bf16.gmra.mxu0 %v6753_v29  ;;  %v5788_v49 = vrot.slane %v1326_v41, 9  ;;  %v1594_v51 = vld [vmem:[#allocation2 + $0x60] sm:$0xf]  ;;  %4966 = vmatmul.mubr.bf16.gmra.mxu1 %v6767_v40 }
  0xe0   : > { %v1115_v37 = vrot.slane %v1114_v31, 4  ;;  %703 = vst [vmem:[#allocation2 + $0x88] sm:$0xf] %v489_v34  ;;  %706 = vst [vmem:[#allocation2 + $0x8c] sm:$0x1] %v705_v39  ;;  %v1455_v50 = vrot.slane %v1327_v43, 5 }
  0xe1   : > { %v1110_v44 = vsel %vm7142_vm6, %v1105_v36, %v1109_v22  ;;  %v1458_v52 = vrot.slane %v1328_v47, 5  ;;  %v1595_v53 = vld [vmem:[#allocation2 + $0x64] sm:$0xf]  ;;  %1626 = vst [vmem:[#allocation3 + $0x204] sm:$0xf] %v1594_v51 }
  0xe2   : > { %v1120_v45 = vsel %vm7142_vm6, %v1115_v37, %v1119_v24  ;;  %1293 = vst [vmem:[#allocation3 + $0x2d4] sm:$0xf] %v1110_v44  ;;  %v1644_v54 = vld [vmem:[#allocation2 + $0xc] sm:$0xf]  ;;  %v1456_v55 = vsel %vm7354_vm13, %v5788_v49, %v1455_v50  ;;  %v1457_v56 = vrot.slane %v1455_v50, 4 }
  0xe3   : > { %1294 = vst [vmem:[#allocation3 + $0x2f8] sm:$0xf] %v1120_v45  ;;  %1627 = vst [vmem:[#allocation3 + $0x228] sm:$0xf] %v1595_v53  ;;  %v1645_v57 = vld [vmem:[#allocation2 + $0x10] sm:$0xf] }
  0xe4   : > { %v1646_v58 = vld [vmem:[#allocation2 + $0x14] sm:$0x1]  ;;  %v1693_v59 = vshrl.u32 %v1644_v54, 16  ;;  %1562 = vst [vmem:[#allocation3 + $0x200] sm:$0xf] %v1456_v55  ;;  %v1696_v60 = vshll.u32 %v1644_v54, 16  ;;  %v1459_v0 = vsel %vm7354_vm13, %v1457_v56, %v1458_v52 }
  0xe5   : > { %v1702_v61 = vshll.u32 %v1645_v57, 16  ;;  %v1706_v62 = vshrl.u32 %v1645_v57, 16  ;;  %v2140_v63 = vld [vmem:[#allocation2 + $0xc] sm:$0xe]  ;;  %v1712_v3 = vshll.u32 %v1646_v58, 16 }
  0xe6   : > { %v1695_v2 = vrot.slane %v1693_v59, 4  ;;  %v5797_v4 = vrot.slane %v2140_v63, 9  ;;  %v764_v5 = vld [vmem:[#allocation2 + $0x84] sm:$0xf]  ;;  %1563 = vst [vmem:[#allocation3 + $0x224] sm:$0xf] %v1459_v0 }
  0xe7   : > { %v765_v6 = vld [vmem:[#allocation2 + $0x88] sm:$0xf]  ;;  %v839_v7 = vld [vmem:[#allocation2 + $0x84] sm:$0xf]  ;;  %796 = vst [vmem:[#allocation3 + $0x318] sm:$0xf] %v764_v5 }
  0xe8   : > { %797 = vst [vmem:[#allocation3 + $0x33c] sm:$0xf] %v765_v6  ;;  %v840_v8 = vld [vmem:[#allocation2 + $0x88] sm:$0xf]  ;;  %v841_v9 = vld [vmem:[#allocation2 + $0x8c] sm:$0x1] }
  0xe9   : > { %v1122_v10 = vshrl.u32 %v839_v7, 16  ;;  %v1125_v11 = vshll.u32 %v839_v7, 16  ;;  %v2141_v12 = vld [vmem:[#allocation2 + $0x10] sm:$0xf]  ;;  %v1131_v13 = vshll.u32 %v840_v8, 16  ;;  %v1135_v14 = vshrl.u32 %v840_v8, 16 }
  0xea   : > { %v1141_v15 = vshll.u32 %v841_v9, 16  ;;  %v1698_v16 = vrot.slane %v1696_v60, 5  ;;  %v2142_v17 = vld [vmem:[#allocation2 + $0x14] sm:$0x1]  ;;  %v6756_v18 = vld [vmem:[#allocation3 + $0x2d4] ss:$36 sps:$4 sm:$0xff]  }
  0xeb   : > { %v1124_v19 = vrot.slane %v1122_v10, 4  ;;  %v1127_v20 = vrot.slane %v1125_v11, 5  ;;  %v6759_v21 = vld [vmem:[#allocation3 + $0x2d0] ss:$36 sps:$4 sm:$0xff]   ;;  %v1133_v22 = vrot.slane %v1131_v13, 5  ;;  %v1137_v23 = vrot.slane %v1135_v14, 4  ;;  %4836 = vmatprep.mubr.bf16.mxu0 %v6756_v18 }
  0xec   : > { %v1143_v24 = vrot.slane %v1141_v15, 5  ;;  %v1699_v25 = vor.u32 %v1698_v16, %v1695_v2  ;;  %v1329_v26 = vld [vmem:[#allocation2 + $0x60] sm:$0xe]  ;;  %v1704_v28 = vrot.slane %v1702_v61, 5  ;;  %v1708_v29 = vrot.slane %v1706_v62, 4  ;;  %4837 = vmatmul.mubr.bf16.gmra.mxu0 %v6759_v21 }
  0xed   : > { %v1128_v27 = vor.u32 %v1127_v20, %v1124_v19  ;;  %v1714_v30 = vrot.slane %v1712_v3, 5  ;;  %v1330_v31 = vld [vmem:[#allocation2 + $0x64] sm:$0xf]  ;;  %v1138_v32 = vor.u32 %v1137_v23, %v1133_v22  ;;  %v2238_v35 = vrot.slane %v2141_v12, 5  ;;  %v1331_v37 = vld [vmem:[#allocation2 + $0x68] sm:$0x1] }
  0xee   : > { %v1700_v34 = vrot.slane %v1699_v25, 4  ;;  %v2241_v36 = vrot.slane %v2142_v17, 5  ;;  %v6772_v39 = vld [vmem:[#allocation3 + $0x204] ss:$36 sps:$4 sm:$0xff]   ;;  %v1709_v41 = vor.u32 %v1708_v29, %v1704_v28  ;;  %v1596_v49 = vld [vmem:[#allocation2 + $0x6c] sm:$0xf] }
  0xef   : > { %v1129_v38 = vrot.slane %v1128_v27, 4  ;;  %v6774_v40 = vld [vmem:[#allocation3 + $0x200] ss:$36 sps:$4 sm:$0xff]   ;;  %v1139_v43 = vrot.slane %v1138_v32, 4  ;;  %v2239_v45 = vsel %vm7354_vm13, %v5797_v4, %v2238_v35  ;;  %v2240_v47 = vrot.slane %v2238_v35, 4  ;;  %4973 = vmatprep.mubr.bf16.mxu1 %v6772_v39 }
  0xf0   : > { %v1705_v44 = vsel %vm7142_vm6, %v1700_v34, %v1704_v28  ;;  %v1597_v50 = vld [vmem:[#allocation2 + $0x70] sm:$0xf]  ;;  %v1710_v52 = vrot.slane %v1709_v41, 4  ;;  %2380 = vst [vmem:[#allocation3 + $0x14] sm:$0xf] %v2239_v45  ;;  %v5789_v53 = vrot.slane %v1329_v26, 9  ;;  %4974 = vmatmul.mubr.bf16.gmra.mxu1 %v6774_v40 }
  0xf1   : > { %v1134_v51 = vsel %vm7142_vm6, %v1129_v38, %v1133_v22  ;;  %2108 = vst [vmem:[#allocation3 + $0x10] sm:$0xf] %v1705_v44  ;;  %v1462_v54 = vrot.slane %v1330_v31, 5  ;;  %1628 = vst [vmem:[#allocation3 + $0x24c] sm:$0xf] %v1596_v49  ;;  %v1144_v55 = vsel %vm7142_vm6, %v1139_v43, %v1143_v24  ;;  %v2242_v56 = vsel %vm7354_vm13, %v2240_v47, %v2241_v36 }
  0xf2   : > { %1629 = vst [vmem:[#allocation3 + $0x270] sm:$0xf] %v1597_v50  ;;  %1295 = vst [vmem:[#allocation3 + $0x31c] sm:$0xf] %v1134_v51  ;;  %v1465_v57 = vrot.slane %v1331_v37, 5  ;;  %v1715_v59 = vsel %vm7142_vm6, %v1710_v52, %v1714_v30 }
  0xf3   : > { %v1647_v58 = vld [vmem:[#allocation2 + $0x18] sm:$0xf]  ;;  %1296 = vst [vmem:[#allocation3 + $0x340] sm:$0xf] %v1144_v55  ;;  %2381 = vst [vmem:[#allocation3 + $0x38] sm:$0xf] %v2242_v56  ;;  %v1463_v60 = vsel %vm7354_vm13, %v5789_v53, %v1462_v54 }
  0xf4   : > { %v1464_v61 = vrot.slane %v1462_v54, 4  ;;  %v1648_v62 = vld [vmem:[#allocation2 + $0x1c] sm:$0xf]  ;;  %v1649_v63 = vld [vmem:[#allocation2 + $0x20] sm:$0x1]  ;;  %v1717_v0 = vshrl.u32 %v1647_v58, 16 }
  0xf5   : > { %2109 = vst [vmem:[#allocation3 + $0x34] sm:$0xf] %v1715_v59  ;;  %1564 = vst [vmem:[#allocation3 + $0x248] sm:$0xf] %v1463_v60  ;;  %v1720_v2 = vshll.u32 %v1647_v58, 16  ;;  %v1726_v3 = vshll.u32 %v1648_v62, 16 }
  0xf6   : > { %v1730_v4 = vshrl.u32 %v1648_v62, 16  ;;  %v1736_v5 = vshll.u32 %v1649_v63, 16  ;;  %v2143_v6 = vld [vmem:[#allocation2 + $0x18] sm:$0xe]  ;;  %v1466_v7 = vsel %vm7354_vm13, %v1464_v61, %v1465_v57  ;;  %v1719_v8 = vrot.slane %v1717_v0, 4  ;;  %v6801_v61 = vld [vmem:[%s8589_s1 + $0x230] sm:$0xff]  }
  0xf7   : > { %v2144_v9 = vld [vmem:[#allocation2 + $0x1c] sm:$0xf]  ;;  %v2145_v10 = vld [vmem:[#allocation2 + $0x20] sm:$0x1]  ;;  %v5798_v11 = vrot.slane %v2143_v6, 9  ;;  %v1722_v12 = vrot.slane %v1720_v2, 5 }
  0xf8   : > { %1565 = vst [vmem:[#allocation3 + $0x26c] sm:$0xf] %v1466_v7  ;;  %v1728_v13 = vrot.slane %v1726_v3, 5  ;;  %v1732_v14 = vrot.slane %v1730_v4, 4  ;;  %v2245_v15 = vrot.slane %v2144_v9, 5  ;;  %v2248_v16 = vrot.slane %v2145_v10, 5 }
  0xf9   : > { %v1723_v17 = vor.u32 %v1722_v12, %v1719_v8  ;;  %v1738_v19 = vrot.slane %v1736_v5, 5  ;;  %v1332_v20 = vld [vmem:[#allocation2 + $0x6c] sm:$0xe]  ;;  %v1333_v23 = vld [vmem:[#allocation2 + $0x70] sm:$0xf] }
  0xfa   : > { %v1733_v18 = vor.u32 %v1732_v14, %v1728_v13  ;;  %v2246_v21 = vsel %vm7354_vm13, %v5798_v11, %v2245_v15  ;;  %v2247_v22 = vrot.slane %v2245_v15, 4  ;;  %v1334_v24 = vld [vmem:[#allocation2 + $0x74] sm:$0x1]  ;;  %v6777_v28 = vld [vmem:[#allocation3 + $0x14] ss:$36 sps:$4 sm:$0xff]   ;;  %v5790_v32 = vrot.slane %v1332_v20, 9 }
  0xfb   : > { %v6765_v25 = vld [vmem:[#allocation3 + $0x31c] ss:$36 sps:$4 sm:$0xff]   ;;  %v1724_v27 = vrot.slane %v1723_v17, 4  ;;  %2382 = vst [vmem:[#allocation3 + $0x5c] sm:$0xf] %v2246_v21  ;;  %v1469_v34 = vrot.slane %v1333_v23, 5 }
  0xfc   : > { %v6769_v26 = vld [vmem:[#allocation3 + $0x318] ss:$36 sps:$4 sm:$0xff]   ;;  %v1734_v29 = vrot.slane %v1733_v18, 4  ;;  %v2249_v30 = vsel %vm7354_vm13, %v2247_v22, %v2248_v16  ;;  %4844 = vmatprep.mubr.bf16.mxu0 %v6765_v25  ;;  %v1472_v35 = vrot.slane %v1334_v24, 5  ;;  %v1598_v36 = vld [vmem:[#allocation2 + $0x78] sm:$0xf] }
  0xfd   : > { %v1729_v31 = vsel %vm7142_vm6, %v1724_v27, %v1728_v13  ;;  %2383 = vst [vmem:[#allocation3 + $0x80] sm:$0xf] %v2249_v30  ;;  %4845 = vmatmul.mubr.bf16.gmra.mxu0 %v6769_v26  ;;  %v6778_v37 = vld [vmem:[#allocation3 + $0x24c] ss:$36 sps:$4 sm:$0xff]   ;;  %1630 = vst [vmem:[#allocation3 + $0x294] sm:$0xf] %v1598_v36  ;;  %v1470_v40 = vsel %vm7354_vm13, %v5790_v32, %v1469_v34 }
  0xfe   : > { %v1739_v39 = vsel %vm7142_vm6, %v1734_v29, %v1738_v19  ;;  %2110 = vst [vmem:[#allocation3 + $0x58] sm:$0xf] %v1729_v31  ;;  %5078 = vmatprep.mubr.bf16.mxu0 %v6777_v28  ;;  %v1471_v41 = vrot.slane %v1469_v34, 4  ;;  %v1599_v43 = vld [vmem:[#allocation2 + $0x7c] sm:$0xf]  ;;  %4981 = vmatprep.mubr.bf16.mxu1 %v6778_v37  ;;  %v6816_v17 = vld [vmem:[%s8589_s1 + $0x228] sm:$0xff]  }
  0xff   : > { %v6781_v38 = vld [vmem:[#allocation3 + $0x248] ss:$36 sps:$4 sm:$0xff]   ;;  %2111 = vst [vmem:[#allocation3 + $0x7c] sm:$0xf] %v1739_v39  ;;  %v6775_v45 = vld [vmem:[#allocation3 + $0x10] ss:$36 sps:$4 sm:$0xff]  }
 0x100   : > { %v1650_v44 = vld [vmem:[#allocation2 + $0x24] sm:$0xf]  ;;  %1566 = vst [vmem:[#allocation3 + $0x290] sm:$0xf] %v1470_v40  ;;  %1631 = vst [vmem:[#allocation3 + $0x2b8] sm:$0xf] %v1599_v43  ;;  %4982 = vmatmul.mubr.bf16.gmra.mxu1 %v6781_v38  ;;  %v1473_v52 = vsel %vm7354_vm13, %v1471_v41, %v1472_v35 }
 0x101   : > { %v1651_v47 = vld [vmem:[#allocation2 + $0x28] sm:$0xf]  ;;  %v1652_v49 = vld [vmem:[#allocation2 + $0x2c] sm:$0x1]  ;;  %v1741_v50 = vshrl.u32 %v1650_v44, 16  ;;  %v1744_v51 = vshll.u32 %v1650_v44, 16 }
 0x102   : > { %v1750_v53 = vshll.u32 %v1651_v47, 16  ;;  %v1754_v54 = vshrl.u32 %v1651_v47, 16  ;;  %v1760_v55 = vshll.u32 %v1652_v49, 16  ;;  %v2146_v56 = vld [vmem:[#allocation2 + $0x24] sm:$0xe]  ;;  %v6927_v18 = vld [vmem:[%s8589_s1 + $0x238] sm:$0xff]  }
 0x103   : > { %1567 = vst [vmem:[#allocation3 + $0x2b4] sm:$0xf] %v1473_v52  ;;  %v1743_v57 = vrot.slane %v1741_v50, 4  ;;  %v1746_v58 = vrot.slane %v1744_v51, 5  ;;  %v2147_v59 = vld [vmem:[#allocation2 + $0x28] sm:$0xf]  ;;  %v6069_v50 = vpop.f32.mrf.mxu0 }
 0x104   : > { %v2148_v60 = vld [vmem:[#allocation2 + $0x2c] sm:$0x1]  ;;  %v1752_v62 = vrot.slane %v1750_v53, 5  ;;  %v1756_v63 = vrot.slane %v1754_v54, 4  ;;  %v1762_v0 = vrot.slane %v1760_v55, 5  ;;  %v5799_v2 = vrot.slane %v2146_v56, 9 }
 0x105   : > { %v1335_v3 = vld [vmem:[#allocation2 + $0x78] sm:$0xe]  ;;  %v1747_v4 = vor.u32 %v1746_v58, %v1743_v57  ;;  %v2252_v5 = vrot.slane %v2147_v59, 5  ;;  %v2255_v6 = vrot.slane %v2148_v60, 5  ;;  %v1336_v7 = vld [vmem:[#allocation2 + $0x7c] sm:$0xf]  ;;  %5079 = vmatmul.mubr.bf16.vlgmr.msra.gmra.mxu0 %v6775_v45  ;;  %v6070_v58 = vpop.f32.mrf.mxu0 }
 0x106   : > { %v1337_v8 = vld [vmem:[#allocation2 + $0x80] sm:$0x1]  ;;  %v1757_v9 = vor.u32 %v1756_v63, %v1752_v62  ;;  %v5791_v10 = vrot.slane %v1335_v3, 9  ;;  %v1476_v11 = vrot.slane %v1336_v7, 5  ;;  %v1600_v13 = vld [vmem:[#allocation2 + $0x84] sm:$0xf]  ;;  %6526 = vmatpush3.bf16.msra.mxu0 %v6927_v18  ;;  %v7586_v63 = vadd.f32 %v6070_v58, %v6069_v50 }
 0x107   : > { %v1479_v12 = vrot.slane %v1337_v8, 5  ;;  %v6782_v14 = vld [vmem:[#allocation3 + $0x5c] ss:$36 sps:$4 sm:$0xff]   ;;  %v1748_v15 = vrot.slane %v1747_v4, 4  ;;  %v2253_v16 = vsel %vm7354_vm13, %v5799_v2, %v2252_v5  ;;  %1632 = vst [vmem:[#allocation3 + $0x2dc] sm:$0xf] %v1600_v13  ;;  %6527 = vmatprep.subr.bf16.mxu0 %v6801_v61 }
 0x108   : > { %v1758_v19 = vrot.slane %v1757_v9, 4  ;;  %v2254_v20 = vrot.slane %v2252_v5, 4  ;;  %2384 = vst [vmem:[#allocation3 + $0xa4] sm:$0xf] %v2253_v16  ;;  %v1477_v21 = vsel %vm7354_vm13, %v5791_v10, %v1476_v11  ;;  %v1478_v22 = vrot.slane %v1476_v11, 4  ;;  %5086 = vmatprep.mubr.bf16.mxu0 %v6782_v14  ;;  %v6831_v37 = vld [vmem:[%s8589_s1 + $0x220] sm:$0xff]  }
 0x109   : > { %v1601_v23 = vld [vmem:[#allocation2 + $0x88] sm:$0xf]  ;;  %v6785_v24 = vld [vmem:[#allocation3 + $0x58] ss:$36 sps:$4 sm:$0xff]   ;;  %v1753_v25 = vsel %vm7142_vm6, %v1748_v15, %v1752_v62  ;;  %1568 = vst [vmem:[#allocation3 + $0x2d8] sm:$0xf] %v1477_v21 }
 0x10a   : > { %1633 = vst [vmem:[#allocation3 + $0x300] sm:$0xf] %v1601_v23  ;;  %v1653_v26 = vld [vmem:[#allocation2 + $0x30] sm:$0xf]  ;;  %v6789_v28 = vld [vmem:[#allocation3 + $0x290] ss:$36 sps:$4 sm:$0xff]   ;;  %v1763_v29 = vsel %vm7142_vm6, %v1758_v19, %v1762_v0  ;;  %v2256_v30 = vsel %vm7354_vm13, %v2254_v20, %v2255_v6  ;;  %v1480_v31 = vsel %vm7354_vm13, %v1478_v22, %v1479_v12  ;;  %6528 = vmatpush3.bf16.msra.mxu0 %v6801_v61 }
 0x10b   : > { %v6787_v27 = vld [vmem:[#allocation3 + $0x294] ss:$36 sps:$4 sm:$0xff]   ;;  %2112 = vst [vmem:[#allocation3 + $0xa0] sm:$0xf] %v1753_v25  ;;  %v1765_v32 = vshrl.u32 %v1653_v26, 16  ;;  %v1768_v36 = vshll.u32 %v1653_v26, 16  ;;  %6529 = vmatprep.subr.bf16.mxu0 %v6816_v17 }
 0x10c   : > { %2113 = vst [vmem:[#allocation3 + $0xc4] sm:$0xf] %v1763_v29  ;;  %2385 = vst [vmem:[#allocation3 + $0xc8] sm:$0xf] %v2256_v30  ;;  %v1654_v34 = vld [vmem:[#allocation2 + $0x34] sm:$0xf]  ;;  %4989 = vmatprep.mubr.bf16.mxu1 %v6787_v27 }
 0x10d   : > { %1569 = vst [vmem:[#allocation3 + $0x2fc] sm:$0xf] %v1480_v31  ;;  %v1655_v35 = vld [vmem:[#allocation2 + $0x38] sm:$0x1]  ;;  %v1767_v38 = vrot.slane %v1765_v32, 4  ;;  %v1774_v39 = vshll.u32 %v1654_v34, 16  ;;  %4990 = vmatmul.mubr.bf16.gmra.mxu1 %v6789_v28  ;;  %5087 = vmatmul.mubr.bf16.gmra.mxu0 %v6785_v24 }
 0x10e   : > { %v1778_v40 = vshrl.u32 %v1654_v34, 16  ;;  %v1784_v41 = vshll.u32 %v1655_v35, 16  ;;  %v2149_v43 = vld [vmem:[#allocation2 + $0x30] sm:$0xe]  ;;  %v1770_v44 = vrot.slane %v1768_v36, 5  ;;  %v6844_v57 = vld [vmem:[%s8589_s1 + $0x218] sm:$0xff]   ;;  %6530 = vmatpush3.bf16.msra.mxu0 %v6816_v17 }
 0x10f   : > { %v2150_v45 = vld [vmem:[#allocation2 + $0x34] sm:$0xf]  ;;  %v2151_v47 = vld [vmem:[#allocation2 + $0x38] sm:$0x1]  ;;  %v5800_v49 = vrot.slane %v2149_v43, 9  ;;  %v1776_v51 = vrot.slane %v1774_v39, 5  ;;  %6531 = vmatprep.subr.bf16.mxu0 %v6831_v37 }
 0x110   : > { %v1780_v52 = vrot.slane %v1778_v40, 4  ;;  %v2259_v53 = vrot.slane %v2150_v45, 5  ;;  %v1771_v54 = vor.u32 %v1770_v44, %v1767_v38  ;;  %v1786_v55 = vrot.slane %v1784_v41, 5  ;;  %v1338_v62 = vld [vmem:[#allocation2 + $0x84] sm:$0xe]  ;;  %v6857_v12 = vld [vmem:[%s8589_s1 + $0x210] sm:$0xff]  }
 0x111   : > { %v2262_v56 = vrot.slane %v2151_v47, 5  ;;  %v1339_v2 = vld [vmem:[#allocation2 + $0x88] sm:$0xf]  ;;  %v1340_v3 = vld [vmem:[#allocation2 + $0x8c] sm:$0x1]  ;;  %v5792_v11 = vrot.slane %v1338_v62, 9 }
 0x112   : > { %v1781_v59 = vor.u32 %v1780_v52, %v1776_v51  ;;  %v2260_v60 = vsel %vm7354_vm13, %v5800_v49, %v2259_v53  ;;  %v2261_v61 = vrot.slane %v2259_v53, 4  ;;  %v1772_v0 = vrot.slane %v1771_v54, 4  ;;  %v6793_v8 = vld [vmem:[#allocation3 + $0x2dc] ss:$36 sps:$4 sm:$0xff]   ;;  %v1602_v16 = vld [vmem:[#allocation2 + $0x90] sm:$0xf]  ;;  %6532 = vmatpush3.bf16.msra.mxu0 %v6831_v37 }
 0x113   : > { %2386 = vst [vmem:[#allocation3 + $0xec] sm:$0xf] %v2260_v60  ;;  %v6790_v4 = vld [vmem:[#allocation3 + $0xa4] ss:$36 sps:$4 sm:$0xff]   ;;  %v1483_v14 = vrot.slane %v1339_v2, 5  ;;  %v1486_v15 = vrot.slane %v1340_v3, 5  ;;  %4997 = vmatprep.mubr.bf16.mxu1 %v6793_v8  ;;  %6533 = vmatprep.subr.bf16.mxu0 %v6844_v57  ;;  %v7610_v2 = vpop.f32.mrf.mxu0 }
 0x114   : > { %v6792_v5 = vld [vmem:[#allocation3 + $0xa0] ss:$36 sps:$4 sm:$0xff]   ;;  %v1782_v6 = vrot.slane %v1781_v59, 4  ;;  %v2263_v7 = vsel %vm7354_vm13, %v2261_v61, %v2262_v56  ;;  %v6796_v9 = vld [vmem:[#allocation3 + $0x2d8] ss:$36 sps:$4 sm:$0xff]   ;;  %v1777_v10 = vsel %vm7142_vm6, %v1772_v0, %v1776_v51  ;;  %5094 = vmatprep.mubr.bf16.mxu0 %v6790_v4  ;;  %v6870_v41 = vld [vmem:[%s8589_s1 + $0x208] sm:$0xff]  }
 0x115   : > { %2387 = vst [vmem:[#allocation3 + $0x110] sm:$0xf] %v2263_v7  ;;  %2114 = vst [vmem:[#allocation3 + $0xe8] sm:$0xf] %v1777_v10  ;;  %v1603_v17 = vld [vmem:[#allocation2 + $0x94] sm:$0xf]  ;;  %4998 = vmatmul.mubr.bf16.gmra.mxu1 %v6796_v9  ;;  %v1484_v21 = vsel %vm7354_vm13, %v5792_v11, %v1483_v14  ;;  %5095 = vmatmul.mubr.bf16.gmra.mxu0 %v6792_v5 }
 0x116   : > { %v1787_v13 = vsel %vm7142_vm6, %v1782_v6, %v1786_v55  ;;  %1634 = vst [vmem:[#allocation3 + $0x324] sm:$0xf] %v1602_v16  ;;  %1635 = vst [vmem:[#allocation3 + $0x348] sm:$0xf] %v1603_v17  ;;  %v1656_v18 = vld [vmem:[#allocation2 + $0x3c] sm:$0xf]  ;;  %6534 = vmatpush3.bf16.msra.mxu0 %v6844_v57 }
 0x117   : > { %2115 = vst [vmem:[#allocation3 + $0x10c] sm:$0xf] %v1787_v13  ;;  %v1657_v19 = vld [vmem:[#allocation2 + $0x40] sm:$0xf]  ;;  %v1658_v20 = vld [vmem:[#allocation2 + $0x44] sm:$0x1]  ;;  %6535 = vmatprep.subr.bf16.mxu0 %v6857_v12 }
 0x118   : > { %v1485_v22 = vrot.slane %v1483_v14, 4  ;;  %v1789_v23 = vshrl.u32 %v1656_v18, 16  ;;  %v1792_v24 = vshll.u32 %v1656_v18, 16  ;;  %v2152_v25 = vld [vmem:[#allocation2 + $0x3c] sm:$0xe]  ;;  %v1798_v26 = vshll.u32 %v1657_v19, 16  ;;  %v6141_v14 = vpop.f32.mrf.mxu1 }
 0x119   : > { %1570 = vst [vmem:[#allocation3 + $0x320] sm:$0xf] %v1484_v21  ;;  %v1802_v27 = vshrl.u32 %v1657_v19, 16  ;;  %v1808_v28 = vshll.u32 %v1658_v20, 16  ;;  %v2153_v29 = vld [vmem:[#allocation2 + $0x40] sm:$0xf]  ;;  %v7618_v20 = vpop.f32.mrf.mxu0 }
 0x11a   : > { %v5801_v30 = vrot.slane %v2152_v25, 9  ;;  %v1487_v31 = vsel %vm7354_vm13, %v1485_v22, %v1486_v15  ;;  %v1791_v32 = vrot.slane %v1789_v23, 4  ;;  %v1794_v34 = vrot.slane %v1792_v24, 5  ;;  %v2154_v35 = vld [vmem:[#allocation2 + $0x44] sm:$0x1]  ;;  %6536 = vmatpush3.bf16.msra.mxu0 %v6857_v12  ;;  %v6142_v25 = vpop.f32.mrf.mxu1 }
 0x11b   : > { %v2266_v36 = vrot.slane %v2153_v29, 5  ;;  %1571 = vst [vmem:[#allocation3 + $0x344] sm:$0xf] %v1487_v31  ;;  %v1800_v37 = vrot.slane %v1798_v26, 5  ;;  %v1804_v38 = vrot.slane %v1802_v27, 4  ;;  %v2269_v39 = vrot.slane %v2154_v35, 5  ;;  %6537 = vmatprep.subr.bf16.mxu0 %v6870_v41 }
 0x11c   : > { %v1341_v40 = vld [vmem:[#allocation2 + $0x90] sm:$0xe]  ;;  %v1795_v43 = vor.u32 %v1794_v34, %v1791_v32  ;;  %v1342_v47 = vld [vmem:[#allocation2 + $0x94] sm:$0xf]  ;;  %v1343_v49 = vld [vmem:[#allocation2 + $0x98] sm:$0x1]  ;;  %v7620_v31 = vadd.f32 %v6142_v25, %v6141_v14 }
 0x11d   : > { %v2267_v44 = vsel %vm7354_vm13, %v5801_v30, %v2266_v36  ;;  %v2268_v45 = vrot.slane %v2266_v36, 4  ;;  %v5793_v50 = vrot.slane %v1341_v40, 9  ;;  %v1805_v51 = vor.u32 %v1804_v38, %v1800_v37  ;;  %v1604_v55 = vld [vmem:[#allocation2 + $0x9c] sm:$0xf]  ;;  %v6797_v56 = vld [vmem:[#allocation3 + $0xec] ss:$36 sps:$4 sm:$0xff]  }
 0x11e   : > { %v1810_v52 = vrot.slane %v1808_v28, 5  ;;  %2388 = vst [vmem:[#allocation3 + $0x134] sm:$0xf] %v2267_v44  ;;  %v1490_v53 = vrot.slane %v1342_v47, 5  ;;  %v1493_v54 = vrot.slane %v1343_v49, 5  ;;  %v1796_v58 = vrot.slane %v1795_v43, 4  ;;  %5102 = vmatprep.mubr.bf16.mxu0 %v6797_v56  ;;  %6538 = vmatpush3.bf16.msra.mxu0 %v6870_v41  ;;  %v7628_v49 = vpop.f32.mrf.mxu1 }
 0x11f   : > { %v6800_v57 = vld [vmem:[#allocation3 + $0xe8] ss:$36 sps:$4 sm:$0xff]   ;;  %v2270_v59 = vsel %vm7354_vm13, %v2268_v45, %v2269_v39  ;;  %1636 = vst [vmem:[#allocation3 + $0x36c] sm:$0xf] %v1604_v55  ;;  %v1806_v60 = vrot.slane %v1805_v51, 4  ;;  %8604 = vst [vmem:[#allocation7_spill] sm:$0xff] %v7620_v31 }
 0x120   : > { %2389 = vst [vmem:[#allocation3 + $0x158] sm:$0xf] %v2270_v59  ;;  %v1491_v61 = vsel %vm7354_vm13, %v5793_v50, %v1490_v53  ;;  %v1492_v62 = vrot.slane %v1490_v53, 4  ;;  %v1605_v0 = vld [vmem:[#allocation2 + $0xa0] sm:$0xf]  ;;  %v1801_v3 = vsel %vm7142_vm6, %v1796_v58, %v1800_v37  ;;  %5103 = vmatmul.mubr.bf16.gmra.mxu0 %v6800_v57  ;;  %v6075_v37 = vpop.f32.mrf.mxu0  ;;  %8605 = vst [vmem:[#allocation8_spill] sm:$0xff] %v7628_v49 }
 0x121   : > { %1572 = vst [vmem:[#allocation3 + $0x368] sm:$0xf] %v1491_v61  ;;  %1637 = vst [vmem:[#allocation3 + $0x390] sm:$0xf] %v1605_v0  ;;  %v1659_v4 = vld [vmem:[#allocation2 + $0x48] sm:$0xf]  ;;  %v1811_v5 = vsel %vm7142_vm6, %v1806_v60, %v1810_v52 }
 0x122   : > { %2116 = vst [vmem:[#allocation3 + $0x130] sm:$0xf] %v1801_v3  ;;  %v1494_v6 = vsel %vm7354_vm13, %v1492_v62, %v1493_v54  ;;  %v1660_v7 = vld [vmem:[#allocation2 + $0x4c] sm:$0xf]  ;;  %v1661_v8 = vld [vmem:[#allocation2 + $0x50] sm:$0x1]  ;;  %v6076_v47 = vpop.f32.mrf.mxu0 }
 0x123   : > { %v1813_v9 = vshrl.u32 %v1659_v4, 16  ;;  %v1816_v10 = vshll.u32 %v1659_v4, 16  ;;  %v6802_v11 = vld [vmem:[#allocation3 + $0x324] ss:$36 sps:$4 sm:$0xff]   ;;  %2117 = vst [vmem:[#allocation3 + $0x154] sm:$0xf] %v1811_v5  ;;  %v7630_v53 = vadd.f32 %v6076_v47, %v6075_v37 }
 0x124   : > { %v6804_v12 = vld [vmem:[#allocation3 + $0x320] ss:$36 sps:$4 sm:$0xff]   ;;  %1573 = vst [vmem:[#allocation3 + $0x38c] sm:$0xf] %v1494_v6  ;;  %v1822_v13 = vshll.u32 %v1660_v7, 16  ;;  %v1826_v17 = vshrl.u32 %v1660_v7, 16  ;;  %5005 = vmatprep.mubr.bf16.mxu1 %v6802_v11  ;;  %v7639_v6 = vpop.f32.mrf.mxu1 }
 0x125   : > { %v1815_v15 = vrot.slane %v1813_v9, 4  ;;  %v1818_v16 = vrot.slane %v1816_v10, 5  ;;  %v1832_v18 = vshll.u32 %v1661_v8, 16  ;;  %v2155_v19 = vld [vmem:[#allocation2 + $0x48] sm:$0xe]  ;;  %5006 = vmatmul.mubr.bf16.gmra.mxu1 %v6804_v12  ;;  %v6883_v58 = vld [vmem:[%s8589_s1 + $0x200] sm:$0xff]  }
 0x126   : > { %v1824_v21 = vrot.slane %v1822_v13, 5  ;;  %v2156_v22 = vld [vmem:[#allocation2 + $0x4c] sm:$0xf]  ;;  %v2157_v23 = vld [vmem:[#allocation2 + $0x50] sm:$0x1]  ;;  %v5802_v24 = vrot.slane %v2155_v19, 9  ;;  %6539 = vmatprep.subr.bf16.mxu0 %v6883_v58 }
 0x127   : > { %v1819_v26 = vor.u32 %v1818_v16, %v1815_v15  ;;  %v1828_v27 = vrot.slane %v1826_v17, 4  ;;  %v2273_v28 = vrot.slane %v2156_v22, 5  ;;  %v1834_v29 = vrot.slane %v1832_v18, 5  ;;  %v1344_v38 = vld [vmem:[#allocation2 + $0x9c] sm:$0xe]  ;;  %8606 = vst [vmem:[#allocation9_spill] sm:$0xff] %v7639_v6  ;;  %6540 = vmatpush3.bf16.msra.mxu0 %v6883_v58 }
 0x128   : > { %v2276_v30 = vrot.slane %v2157_v23, 5  ;;  %v1345_v39 = vld [vmem:[#allocation2 + $0xa0] sm:$0xf]  ;;  %v6805_v40 = vld [vmem:[#allocation3 + $0x134] ss:$36 sps:$4 sm:$0xff]   ;;  %v5794_v52 = vrot.slane %v1344_v38, 9 }
 0x129   : > { %v1820_v32 = vrot.slane %v1819_v26, 4  ;;  %v1829_v34 = vor.u32 %v1828_v27, %v1824_v21  ;;  %v2274_v35 = vsel %vm7354_vm13, %v5802_v24, %v2273_v28  ;;  %v2275_v36 = vrot.slane %v2273_v28, 4  ;;  %v6808_v50 = vld [vmem:[#allocation3 + $0x36c] ss:$36 sps:$4 sm:$0xff]   ;;  %5110 = vmatprep.mubr.bf16.mxu0 %v6805_v40  ;;  %v1607_v60 = vld [vmem:[#allocation2 + $0xac] sm:$0xf]  ;;  %v6147_v26 = vpop.f32.mrf.mxu1 }
 0x12a   : > { %2390 = vst [vmem:[#allocation3 + $0x17c] sm:$0xf] %v2274_v35  ;;  %v6807_v41 = vld [vmem:[#allocation3 + $0x130] ss:$36 sps:$4 sm:$0xff]   ;;  %v1346_v55 = vld [vmem:[#allocation2 + $0xa4] sm:$0x1]  ;;  %5013 = vmatprep.mubr.bf16.mxu1 %v6808_v50  ;;  %v7643_v35 = vpop.f32.mrf.mxu0 }
 0x12b   : > { %v1825_v43 = vsel %vm7142_vm6, %v1820_v32, %v1824_v21  ;;  %v1830_v44 = vrot.slane %v1829_v34, 4  ;;  %v2277_v45 = vsel %vm7354_vm13, %v2275_v36, %v2276_v30  ;;  %v6811_v51 = vld [vmem:[#allocation3 + $0x368] ss:$36 sps:$4 sm:$0xff]   ;;  %v1497_v56 = vrot.slane %v1345_v39, 5  ;;  %v1606_v57 = vld [vmem:[#allocation2 + $0xa8] sm:$0xf]  ;;  %5111 = vmatmul.mubr.bf16.gmra.mxu0 %v6807_v41  ;;  %v6148_v40 = vpop.f32.mrf.mxu1 }
 0x12c   : > { %2118 = vst [vmem:[#allocation3 + $0x178] sm:$0xf] %v1825_v43  ;;  %2391 = vst [vmem:[#allocation3 + $0x1a0] sm:$0xf] %v2277_v45  ;;  %v1500_v59 = vrot.slane %v1346_v55, 5 }
 0x12d   : > { %v1835_v54 = vsel %vm7142_vm6, %v1830_v44, %v1834_v29  ;;  %1638 = vst [vmem:[#allocation3 + $0x3b4] sm:$0xf] %v1606_v57  ;;  %v1662_v61 = vld [vmem:[#allocation2 + $0x54] sm:$0xf]  ;;  %5014 = vmatmul.mubr.bf16.gmra.mxu1 %v6811_v51  ;;  %v1498_v62 = vsel %vm7354_vm13, %v5794_v52, %v1497_v56  ;;  %v1499_v0 = vrot.slane %v1497_v56, 4  ;;  %v7651_v52 = vadd.f32 %v6148_v40, %v6147_v26 }
 0x12e   : > { %2119 = vst [vmem:[#allocation3 + $0x19c] sm:$0xf] %v1835_v54  ;;  %1639 = vst [vmem:[#allocation3 + $0x3d8] sm:$0xf] %v1607_v60  ;;  %v1663_v3 = vld [vmem:[#allocation2 + $0x58] sm:$0xf] }
 0x12f   : > { %v1664_v4 = vld [vmem:[#allocation2 + $0x5c] sm:$0x1]  ;;  %v1837_v5 = vshrl.u32 %v1662_v61, 16  ;;  %1574 = vst [vmem:[#allocation3 + $0x3b0] sm:$0xf] %v1498_v62  ;;  %v1840_v7 = vshll.u32 %v1662_v61, 16  ;;  %v1501_v12 = vsel %vm7354_vm13, %v1499_v0, %v1500_v59  ;;  %v7657_v59 = vpop.f32.mrf.mxu0 }
 0x130   : > { %v1846_v8 = vshll.u32 %v1663_v3, 16  ;;  %v1850_v9 = vshrl.u32 %v1663_v3, 16  ;;  %v1856_v10 = vshll.u32 %v1664_v4, 16  ;;  %v2158_v11 = vld [vmem:[#allocation2 + $0x54] sm:$0xe]  ;;  %8607 = vst [vmem:[#allocation10_spill] sm:$0xff] %v7651_v52 }
 0x131   : > { %v1839_v13 = vrot.slane %v1837_v5, 4  ;;  %v2159_v14 = vld [vmem:[#allocation2 + $0x58] sm:$0xf]  ;;  %v2160_v15 = vld [vmem:[#allocation2 + $0x5c] sm:$0x1]  ;;  %v5803_v16 = vrot.slane %v2158_v11, 9 }
 0x132   : > { %1575 = vst [vmem:[#allocation3 + $0x3d4] sm:$0xf] %v1501_v12  ;;  %v1842_v17 = vrot.slane %v1840_v7, 5  ;;  %v1848_v18 = vrot.slane %v1846_v8, 5  ;;  %v1852_v19 = vrot.slane %v1850_v9, 4  ;;  %v2280_v22 = vrot.slane %v2159_v14, 5 }
 0x133   : > { %v1347_v21 = vld [vmem:[#allocation2 + $0xa8] sm:$0xe]  ;;  %v2283_v23 = vrot.slane %v2160_v15, 5  ;;  %v1348_v24 = vld [vmem:[#allocation2 + $0xac] sm:$0xf]  ;;  %v1858_v29 = vrot.slane %v1856_v10, 5 }
 0x134   : > { %v5795_v25 = vrot.slane %v1347_v21, 9  ;;  %v1843_v27 = vor.u32 %v1842_v17, %v1839_v13  ;;  %v1853_v28 = vor.u32 %v1852_v19, %v1848_v18  ;;  %v1349_v30 = vld [vmem:[#allocation2 + $0xb0] sm:$0x1]  ;;  %v1504_v32 = vrot.slane %v1348_v24, 5  ;;  %v1608_v34 = vld [vmem:[#allocation2 + $0xb4] sm:$0xf]  ;;  %v7661_v17 = vpop.f32.mrf.mxu1 }
 0x135   : > { %v6812_v36 = vld [vmem:[#allocation3 + $0x17c] ss:$36 sps:$4 sm:$0xff]   ;;  %v2281_v38 = vsel %vm7354_vm13, %v5803_v16, %v2280_v22  ;;  %v2282_v39 = vrot.slane %v2280_v22, 4  ;;  %1640 = vst [vmem:[#allocation3 + $0x3fc] sm:$0xf] %v1608_v34  ;;  %v1507_v51 = vrot.slane %v1349_v30, 5  ;;  %v6081_v16 = vpop.f32.mrf.mxu0 }
 0x136   : > { %v6815_v37 = vld [vmem:[#allocation3 + $0x178] ss:$36 sps:$4 sm:$0xff]   ;;  %v1844_v41 = vrot.slane %v1843_v27, 4  ;;  %v1854_v43 = vrot.slane %v1853_v28, 4  ;;  %2392 = vst [vmem:[#allocation3 + $0x1c4] sm:$0xf] %v2281_v38  ;;  %v1505_v44 = vsel %vm7354_vm13, %v5795_v25, %v1504_v32  ;;  %5118 = vmatprep.mubr.bf16.mxu0 %v6812_v36  ;;  %v7669_v38 = vpop.f32.mrf.mxu1 }
 0x137   : > { %v1506_v45 = vrot.slane %v1504_v32, 4  ;;  %v1609_v47 = vld [vmem:[#allocation2 + $0xb8] sm:$0xf]  ;;  %v2284_v50 = vsel %vm7354_vm13, %v2282_v39, %v2283_v23  ;;  %1576 = vst [vmem:[#allocation3 + $0x3f8] sm:$0xf] %v1505_v44  ;;  %5119 = vmatmul.mubr.bf16.gmra.mxu0 %v6815_v37  ;;  %8608 = vst [vmem:[#allocation11_spill] sm:$0xff] %v7661_v17  ;;  %v6082_v30 = vpop.f32.mrf.mxu0 }
 0x138   : > { %1641 = vst [vmem:[#allocation3 + $0x420] sm:$0xf] %v1609_v47  ;;  %v1849_v54 = vsel %vm7142_vm6, %v1844_v41, %v1848_v18  ;;  %v1859_v55 = vsel %vm7142_vm6, %v1854_v43, %v1858_v29  ;;  %2393 = vst [vmem:[#allocation3 + $0x1e8] sm:$0xf] %v2284_v50  ;;  %v1665_v56 = vld [vmem:[#allocation2 + $0x60] sm:$0xf]  ;;  %v7667_v37 = vadd.f32 %v6082_v30, %v6081_v16 }
 0x139   : > { %v1666_v57 = vld [vmem:[#allocation2 + $0x64] sm:$0xf]  ;;  %v1667_v58 = vld [vmem:[#allocation2 + $0x68] sm:$0x1]  ;;  %v6817_v60 = vld [vmem:[#allocation3 + $0x3b4] ss:$36 sps:$4 sm:$0xff]   ;;  %v1508_v62 = vsel %vm7354_vm13, %v1506_v45, %v1507_v51  ;;  %v7684_v46 = vpop.f32.mrf.mxu0 }
 0x13a   : > { %v6819_v61 = vld [vmem:[#allocation3 + $0x3b0] ss:$36 sps:$4 sm:$0xff]   ;;  %2120 = vst [vmem:[#allocation3 + $0x1c0] sm:$0xf] %v1849_v54  ;;  %2121 = vst [vmem:[#allocation3 + $0x1e4] sm:$0xf] %v1859_v55  ;;  %5021 = vmatprep.mubr.bf16.mxu1 %v6817_v60 }
 0x13b   : > { %v1861_v0 = vshrl.u32 %v1665_v56, 16  ;;  %1577 = vst [vmem:[#allocation3 + $0x41c] sm:$0xf] %v1508_v62  ;;  %v1864_v3 = vshll.u32 %v1665_v56, 16  ;;  %v1870_v4 = vshll.u32 %v1666_v57, 16  ;;  %v1874_v5 = vshrl.u32 %v1666_v57, 16  ;;  %5022 = vmatmul.mubr.bf16.gmra.mxu1 %v6819_v61 }
 0x13c   : > { %v1880_v7 = vshll.u32 %v1667_v58, 16  ;;  %v2161_v8 = vld [vmem:[#allocation2 + $0x60] sm:$0xe]  ;;  %v2162_v10 = vld [vmem:[#allocation2 + $0x64] sm:$0xf]  ;;  %8609 = vst [vmem:[#allocation12_spill] sm:$0xff] %v7669_v38 }
 0x13d   : > { %v1863_v9 = vrot.slane %v1861_v0, 4  ;;  %v2163_v11 = vld [vmem:[#allocation2 + $0x68] sm:$0x1]  ;;  %v5804_v12 = vrot.slane %v2161_v8, 9  ;;  %v1866_v13 = vrot.slane %v1864_v3, 5  ;;  %v1872_v14 = vrot.slane %v1870_v4, 5  ;;  %v6153_v3 = vpop.f32.mrf.mxu1 }
 0x13e   : > { %v1876_v15 = vrot.slane %v1874_v5, 4  ;;  %v2287_v18 = vrot.slane %v2162_v10, 5  ;;  %v2290_v19 = vrot.slane %v2163_v11, 5  ;;  %v1882_v23 = vrot.slane %v1880_v7, 5  ;;  %v299_v24 = vld [vmem:[%s7124_s8 + $0x78] sm:$0xf] }
 0x13f   : > { %v1867_v21 = vor.u32 %v1866_v13, %v1863_v9  ;;  %v300_v27 = vld [vmem:[%s7124_s8 + $0x7c] sm:$0xf]  ;;  %v560_v28 = vshrl.u32 %v299_v24, 16  ;;  %v563_v29 = vshll.u32 %v299_v24, 16  ;;  %v6823_v40 = vld [vmem:[#allocation3 + $0x3fc] ss:$36 sps:$4 sm:$0xff]  }
 0x140   : > { %v1877_v22 = vor.u32 %v1876_v15, %v1872_v14  ;;  %v2288_v25 = vsel %vm7354_vm13, %v5804_v12, %v2287_v18  ;;  %v2289_v26 = vrot.slane %v2287_v18, 4  ;;  %v6820_v32 = vld [vmem:[#allocation3 + $0x1c4] ss:$36 sps:$4 sm:$0xff]   ;;  %v568_v50 = vshrl.u32 %v300_v27, 16  ;;  %5029 = vmatprep.mubr.bf16.mxu1 %v6823_v40  ;;  %v1350_v56 = vld [vmem:[#allocation2 + $0xb4] sm:$0xe] }
 0x141   : > { %v1868_v34 = vrot.slane %v1867_v21, 4  ;;  %2394 = vst [vmem:[#allocation3 + $0x20c] sm:$0xf] %v2288_v25  ;;  %v6822_v39 = vld [vmem:[#allocation3 + $0x1c0] ss:$36 sps:$4 sm:$0xff]   ;;  %v562_v43 = vrot.slane %v560_v28, 7  ;;  %5126 = vmatprep.mubr.bf16.mxu0 %v6820_v32  ;;  %v6154_v21 = vpop.f32.mrf.mxu1 }
 0x142   : > { %v1878_v36 = vrot.slane %v1877_v22, 4  ;;  %v2291_v41 = vsel %vm7354_vm13, %v2289_v26, %v2290_v19  ;;  %v6826_v44 = vld [vmem:[#allocation3 + $0x3f8] ss:$36 sps:$4 sm:$0xff]   ;;  %v571_v51 = vshll.u32 %v300_v27, 16  ;;  %v735_v54 = vld [vmem:[#allocation2 + $0xc0] sm:$0xf]  ;;  %5127 = vmatmul.mubr.bf16.gmra.mxu0 %v6822_v39  ;;  %v7690_v48 = vadd.f32 %v6154_v21, %v6153_v3 }
 0x143   : > { %v1873_v45 = vsel %vm7142_vm6, %v1868_v34, %v1872_v14  ;;  %2395 = vst [vmem:[#allocation3 + $0x230] sm:$0xf] %v2291_v41  ;;  %v565_v55 = vor.u32 %v563_v29, %v562_v43  ;;  %v1351_v57 = vld [vmem:[#allocation2 + $0xb8] sm:$0xf]  ;;  %5030 = vmatmul.mubr.bf16.gmra.mxu1 %v6826_v44  ;;  %v566_v58 = vrot.slane %v562_v43, 4  ;;  %v7677_v60 = vrot.slane %v568_v50, 7  ;;  %v7692_v50 = vpop.f32.mrf.mxu0 }
 0x144   : > { %v1883_v47 = vsel %vm7142_vm6, %v1878_v36, %v1882_v23  ;;  %2122 = vst [vmem:[#allocation3 + $0x208] sm:$0xf] %v1873_v45  ;;  %v1352_v61 = vld [vmem:[#allocation2 + $0xbc] sm:$0x1]  ;;  %v5796_v62 = vrot.slane %v1350_v56, 9  ;;  %v1511_v0 = vrot.slane %v1351_v57, 5 }
 0x145   : > { %2123 = vst [vmem:[#allocation3 + $0x22c] sm:$0xf] %v1883_v47  ;;  %v736_v4 = vsel %vm7153_vm9, %v565_v55, %v735_v54  ;;  %v1514_v5 = vrot.slane %v1352_v61, 5  ;;  %v1668_v7 = vld [vmem:[#allocation2 + $0x6c] sm:$0xf]  ;;  %v573_v9 = vor.u32 %v571_v51, %v7677_v60  ;;  %8610 = vst [vmem:[#allocation13_spill] sm:$0xff] %v7690_v48 }
 0x146   : > { %v1669_v8 = vld [vmem:[#allocation2 + $0x70] sm:$0xf]  ;;  %737 = vst [vmem:[#allocation2 + $0xc0] sm:$0xf] %v736_v4  ;;  %v1512_v10 = vsel %vm7354_vm13, %v5796_v62, %v1511_v0  ;;  %v1513_v11 = vrot.slane %v1511_v0, 4  ;;  %v1885_v14 = vshrl.u32 %v1668_v7, 16 }
 0x147   : > { %v1670_v12 = vld [vmem:[#allocation2 + $0x74] sm:$0x1]  ;;  %v2164_v13 = vld [vmem:[#allocation2 + $0x6c] sm:$0xe]  ;;  %1578 = vst [vmem:[#allocation3 + $0x440] sm:$0xf] %v1512_v10  ;;  %v574_v22 = vsel %vm7159_vm10, %v566_v58, %v573_v9 }
 0x148   : > { %v1888_v15 = vshll.u32 %v1668_v7, 16  ;;  %v1894_v16 = vshll.u32 %v1669_v8, 16  ;;  %v1898_v18 = vshrl.u32 %v1669_v8, 16  ;;  %v2165_v19 = vld [vmem:[#allocation2 + $0x70] sm:$0xf]  ;;  %v1515_v23 = vsel %vm7354_vm13, %v1513_v11, %v1514_v5 }
 0x149   : > { %v1904_v24 = vshll.u32 %v1670_v12, 16  ;;  %v2166_v25 = vld [vmem:[#allocation2 + $0x74] sm:$0x1]  ;;  %v5805_v26 = vrot.slane %v2164_v13, 9  ;;  %v2413_v27 = vld [vmem:[#allocation2 + $0x18] sm:$0xf] }
 0x14a   : > { %738 = vst [vmem:[#allocation2 + $0xc4] sm:$0xf] %v574_v22  ;;  %1579 = vst [vmem:[#allocation3 + $0x464] sm:$0xf] %v1515_v23  ;;  %v1887_v28 = vrot.slane %v1885_v14, 4  ;;  %v1890_v29 = vrot.slane %v1888_v15, 5 }
 0x14b   : > { %v1896_v30 = vrot.slane %v1894_v16, 5  ;;  %v1900_v32 = vrot.slane %v1898_v18, 4  ;;  %v2414_v34 = vld [vmem:[#allocation2 + $0x1c] sm:$0xf]  ;;  %2445 = vst [vmem:[#allocation3 + $0x18] sm:$0xf] %v2413_v27  ;;  %v6087_v16 = vpop.f32.mrf.mxu0 }
 0x14c   : > { %v6827_v36 = vld [vmem:[#allocation3 + $0x20c] ss:$36 sps:$4 sm:$0xff]   ;;  %v2294_v39 = vrot.slane %v2165_v19, 5  ;;  %2446 = vst [vmem:[#allocation3 + $0x3c] sm:$0xf] %v2414_v34  ;;  %v1891_v41 = vor.u32 %v1890_v29, %v1887_v28  ;;  %v1906_v44 = vrot.slane %v1904_v24, 5 }
 0x14d   : > { %v6830_v40 = vld [vmem:[#allocation3 + $0x208] ss:$36 sps:$4 sm:$0xff]   ;;  %v1901_v43 = vor.u32 %v1900_v32, %v1896_v30  ;;  %v2297_v45 = vrot.slane %v2166_v25, 5  ;;  %v2477_v47 = vld [vmem:[#allocation2 + $0x18] sm:$0xf]  ;;  %5134 = vmatprep.mubr.bf16.mxu0 %v6827_v36  ;;  %v6088_v29 = vpop.f32.mrf.mxu0 }
 0x14e   : > { %v2295_v51 = vsel %vm7354_vm13, %v5805_v26, %v2294_v39  ;;  %v2296_v54 = vrot.slane %v2294_v39, 4  ;;  %v2478_v55 = vld [vmem:[#allocation2 + $0x1c] sm:$0xf]  ;;  %v2479_v56 = vld [vmem:[#allocation2 + $0x20] sm:$0x1]  ;;  %v2526_v57 = vshrl.u32 %v2477_v47, 16  ;;  %5135 = vmatmul.mubr.bf16.gmra.mxu0 %v6830_v40  ;;  %v7702_v40 = vadd.f32 %v6088_v29, %v6087_v16 }
 0x14f   : > { %v1610_v58 = vld [vmem:[#allocation2 + $0xc0] sm:$0xf]  ;;  %v1892_v61 = vrot.slane %v1891_v41, 4  ;;  %v1902_v62 = vrot.slane %v1901_v43, 4  ;;  %2396 = vst [vmem:[#allocation3 + $0x254] sm:$0xf] %v2295_v51 }
 0x150   : > { %v2529_v0 = vshll.u32 %v2477_v47, 16  ;;  %v2535_v3 = vshll.u32 %v2478_v55, 16  ;;  %1642 = vst [vmem:[#allocation3 + $0x444] sm:$0xf] %v1610_v58  ;;  %v2298_v4 = vsel %vm7354_vm13, %v2296_v54, %v2297_v45  ;;  %v2528_v5 = vrot.slane %v2526_v57, 4  ;;  %v7704_v47 = vpop.f32.mrf.mxu1 }
 0x151   : > { %v2539_v7 = vshrl.u32 %v2478_v55, 16  ;;  %v2545_v8 = vshll.u32 %v2479_v56, 16  ;;  %v1671_v9 = vld [vmem:[#allocation2 + $0x78] sm:$0xf]  ;;  %v1897_v10 = vsel %vm7142_vm6, %v1892_v61, %v1896_v30  ;;  %v1907_v11 = vsel %vm7142_vm6, %v1902_v62, %v1906_v44  ;;  %2397 = vst [vmem:[#allocation3 + $0x278] sm:$0xf] %v2298_v4 }
 0x152   : > { %v2531_v12 = vrot.slane %v2529_v0, 5  ;;  %v2537_v13 = vrot.slane %v2535_v3, 5  ;;  %v1672_v14 = vld [vmem:[#allocation2 + $0x7c] sm:$0xf]  ;;  %v1673_v15 = vld [vmem:[#allocation2 + $0x80] sm:$0x1] }
 0x153   : > { %v1611_v18 = vld [vmem:[#allocation2 + $0xc4] sm:$0xf]  ;;  %2124 = vst [vmem:[#allocation3 + $0x250] sm:$0xf] %v1897_v10  ;;  %2125 = vst [vmem:[#allocation3 + $0x274] sm:$0xf] %v1907_v11 }
 0x154   : > { %v2541_v19 = vrot.slane %v2539_v7, 4  ;;  %v2547_v21 = vrot.slane %v2545_v8, 5  ;;  %v1909_v22 = vshrl.u32 %v1671_v9, 16  ;;  %v1912_v23 = vshll.u32 %v1671_v9, 16  ;;  %1643 = vst [vmem:[#allocation3 + $0x468] sm:$0xf] %v1611_v18 }
 0x155   : > { %v2532_v24 = vor.u32 %v2531_v12, %v2528_v5  ;;  %v1918_v25 = vshll.u32 %v1672_v14, 16  ;;  %v1922_v26 = vshrl.u32 %v1672_v14, 16  ;;  %v1928_v27 = vshll.u32 %v1673_v15, 16  ;;  %v2167_v28 = vld [vmem:[#allocation2 + $0x78] sm:$0xe]  ;;  %8611 = vst [vmem:[#allocation14_spill] sm:$0xff] %v7704_v47 }
 0x156   : > { %v2542_v30 = vor.u32 %v2541_v19, %v2537_v13  ;;  %v1911_v32 = vrot.slane %v1909_v22, 4  ;;  %v1914_v34 = vrot.slane %v1912_v23, 5  ;;  %v2168_v36 = vld [vmem:[#allocation2 + $0x7c] sm:$0xf]  ;;  %v2169_v39 = vld [vmem:[#allocation2 + $0x80] sm:$0x1] }
 0x157   : > { %v2533_v41 = vrot.slane %v2532_v24, 4  ;;  %v1920_v43 = vrot.slane %v1918_v25, 5  ;;  %v1924_v44 = vrot.slane %v1922_v26, 4  ;;  %v1930_v45 = vrot.slane %v1928_v27, 5  ;;  %v2415_v62 = vld [vmem:[#allocation2 + $0x24] sm:$0xf] }
 0x158   : > { %v2543_v51 = vrot.slane %v2542_v30, 4  ;;  %v1915_v54 = vor.u32 %v1914_v34, %v1911_v32  ;;  %v5806_v55 = vrot.slane %v2167_v28, 9  ;;  %v2301_v56 = vrot.slane %v2168_v36, 5  ;;  %v2416_v0 = vld [vmem:[#allocation2 + $0x28] sm:$0xf] }
 0x159   : > { %v2538_v57 = vsel %vm7142_vm6, %v2533_v41, %v2537_v13  ;;  %v1925_v58 = vor.u32 %v1924_v44, %v1920_v43  ;;  %v2304_v61 = vrot.slane %v2169_v39, 5  ;;  %2447 = vst [vmem:[#allocation3 + $0x60] sm:$0xf] %v2415_v62  ;;  %2448 = vst [vmem:[#allocation3 + $0x84] sm:$0xf] %v2416_v0  ;;  %v7712_v13 = vpop.f32.mrf.mxu1 }
 0x15a   : > { %v2548_v3 = vsel %vm7142_vm6, %v2543_v51, %v2547_v21  ;;  %2941 = vst [vmem:[#allocation3 + $0x1c] sm:$0xf] %v2538_v57  ;;  %v1916_v4 = vrot.slane %v1915_v54, 4  ;;  %v2302_v5 = vsel %vm7354_vm13, %v5806_v55, %v2301_v56  ;;  %v2303_v7 = vrot.slane %v2301_v56, 4  ;;  %v2480_v8 = vld [vmem:[#allocation2 + $0x24] sm:$0xf] }
 0x15b   : > { %v2481_v9 = vld [vmem:[#allocation2 + $0x28] sm:$0xf]  ;;  %v6835_v10 = vld [vmem:[#allocation3 + $0x254] ss:$36 sps:$4 sm:$0xff]   ;;  %2942 = vst [vmem:[#allocation3 + $0x40] sm:$0xf] %v2548_v3  ;;  %v6159_v39 = vpop.f32.mrf.mxu1 }
 0x15c   : > { %v1926_v11 = vrot.slane %v1925_v58, 4  ;;  %2398 = vst [vmem:[#allocation3 + $0x29c] sm:$0xf] %v2302_v5  ;;  %v2550_v12 = vshrl.u32 %v2480_v8, 16  ;;  %8612 = vst [vmem:[#allocation15_spill] sm:$0xff] %v7712_v13  ;;  %v1921_v16 = vsel %vm7142_vm6, %v1916_v4, %v1920_v43  ;;  %v2305_v18 = vsel %vm7354_vm13, %v2303_v7, %v2304_v61  ;;  %5142 = vmatprep.mubr.bf16.mxu0 %v6835_v10  ;;  %v7720_v58 = vpop.f32.mrf.mxu0 }
 0x15d   : > { %v6832_v14 = vld [vmem:[#allocation3 + $0x444] ss:$36 sps:$4 sm:$0xff]   ;;  %v2553_v19 = vshll.u32 %v2480_v8, 16  ;;  %v6837_v21 = vld [vmem:[#allocation3 + $0x250] ss:$36 sps:$4 sm:$0xff]   ;;  %v2559_v25 = vshll.u32 %v2481_v9, 16  ;;  %v6160_v61 = vpop.f32.mrf.mxu1 }
 0x15e   : > { %v6834_v15 = vld [vmem:[#allocation3 + $0x440] ss:$36 sps:$4 sm:$0xff]   ;;  %v1931_v22 = vsel %vm7142_vm6, %v1926_v11, %v1930_v45  ;;  %2126 = vst [vmem:[#allocation3 + $0x298] sm:$0xf] %v1921_v16  ;;  %2399 = vst [vmem:[#allocation3 + $0x2c0] sm:$0xf] %v2305_v18  ;;  %5037 = vmatprep.mubr.bf16.mxu1 %v6832_v14  ;;  %5143 = vmatmul.mubr.bf16.gmra.mxu0 %v6837_v21  ;;  %v7722_v5 = vadd.f32 %v6160_v61, %v6159_v39 }
 0x15f   : > { %v2482_v23 = vld [vmem:[#allocation2 + $0x2c] sm:$0x1]  ;;  %v2552_v24 = vrot.slane %v2550_v12, 4  ;;  %2127 = vst [vmem:[#allocation3 + $0x2bc] sm:$0xf] %v1931_v22  ;;  %v2555_v26 = vrot.slane %v2553_v19, 5  ;;  %5038 = vmatmul.mubr.bf16.gmra.mxu1 %v6834_v15  ;;  %v7724_v12 = vpop.f32.mrf.mxu1 }
 0x160   : > { %v2563_v27 = vshrl.u32 %v2481_v9, 16  ;;  %v2569_v28 = vshll.u32 %v2482_v23, 16  ;;  %v1674_v29 = vld [vmem:[#allocation2 + $0x84] sm:$0xf]  ;;  %v2561_v30 = vrot.slane %v2559_v25, 5  ;;  %8613 = vst [vmem:[#allocation16_spill] sm:$0xff] %v7722_v5 }
 0x161   : > { %v1675_v32 = vld [vmem:[#allocation2 + $0x88] sm:$0xf]  ;;  %v1676_v34 = vld [vmem:[#allocation2 + $0x8c] sm:$0x1]  ;;  %v1933_v36 = vshrl.u32 %v1674_v29, 16  ;;  %v2556_v41 = vor.u32 %v2555_v26, %v2552_v24  ;;  %v1936_v45 = vshll.u32 %v1674_v29, 16  ;;  %v7728_v26 = vpop.f32.mrf.mxu0 }
 0x162   : > { %v2565_v43 = vrot.slane %v2563_v27, 4  ;;  %v2571_v44 = vrot.slane %v2569_v28, 5  ;;  %v2170_v51 = vld [vmem:[#allocation2 + $0x84] sm:$0xe]  ;;  %v1942_v55 = vshll.u32 %v1675_v32, 16  ;;  %v1946_v56 = vshrl.u32 %v1675_v32, 16  ;;  %v7730_v27 = vpop.f32.mrf.mxu1 }
 0x163   : > { %v1935_v54 = vrot.slane %v1933_v36, 4  ;;  %v1952_v57 = vshll.u32 %v1676_v34, 16  ;;  %v6838_v62 = vld [vmem:[#allocation3 + $0x18] ss:$36 sps:$4 sm:$0xff]   ;;  %v2557_v3 = vrot.slane %v2556_v41, 4  ;;  %v1938_v7 = vrot.slane %v1936_v45, 5 }
 0x164   : > { %v6840_v0 = vld [vmem:[#allocation3 + $0x1c] ss:$36 sps:$4 sm:$0xff]   ;;  %v2566_v4 = vor.u32 %v2565_v43, %v2561_v30  ;;  %v1944_v8 = vrot.slane %v1942_v55, 5  ;;  %v1948_v9 = vrot.slane %v1946_v56, 4  ;;  %v2171_v11 = vld [vmem:[#allocation2 + $0x88] sm:$0xf]  ;;  %v6181_v45 = vpop.f32.mrf.mxu1 }
 0x165   : > { %v1954_v10 = vrot.slane %v1952_v57, 5  ;;  %8614 = vst [vmem:[#allocation17_spill] sm:$0xff] %v7724_v12  ;;  %5239 = vmatprep.mubr.bf16.mxu1 %v6840_v0  ;;  %v2562_v14 = vsel %vm7142_vm6, %v2557_v3, %v2561_v30  ;;  %v2172_v16 = vld [vmem:[#allocation2 + $0x8c] sm:$0x1]  ;;  %v5807_v18 = vrot.slane %v2170_v51, 9  ;;  %v2308_v19 = vrot.slane %v2171_v11, 5 }
 0x166   : > { %v2567_v15 = vrot.slane %v2566_v4, 4  ;;  %v6841_v21 = vld [vmem:[#allocation3 + $0x29c] ss:$36 sps:$4 sm:$0xff]   ;;  %2943 = vst [vmem:[#allocation3 + $0x64] sm:$0xf] %v2562_v14  ;;  %v1939_v23 = vor.u32 %v1938_v7, %v1935_v54  ;;  %v1949_v24 = vor.u32 %v1948_v9, %v1944_v8  ;;  %v2311_v25 = vrot.slane %v2172_v16, 5  ;;  %v6093_v7 = vpop.f32.mrf.mxu0  ;;  %v6182_v9 = vpop.f32.mrf.mxu1 }
 0x167   : > { %v6843_v22 = vld [vmem:[#allocation3 + $0x298] ss:$36 sps:$4 sm:$0xff]   ;;  %8615 = vst [vmem:[#allocation18_spill] sm:$0xff] %v7730_v27  ;;  %v2309_v29 = vsel %vm7354_vm13, %v5807_v18, %v2308_v19  ;;  %v2310_v30 = vrot.slane %v2308_v19, 4  ;;  %5150 = vmatprep.mubr.bf16.mxu0 %v6841_v21  ;;  %5240 = vmatmul.mubr.bf16.vlgmr.msra.gmra.mxu1 %v6838_v62  ;;  %v2485_v51 = vld [vmem:[#allocation2 + $0x38] sm:$0x1] }
 0x168   : > { %v2572_v28 = vsel %vm7142_vm6, %v2567_v15, %v2571_v44  ;;  %v2417_v32 = vld [vmem:[#allocation2 + $0x30] sm:$0xf]  ;;  %v2418_v34 = vld [vmem:[#allocation2 + $0x34] sm:$0xf]  ;;  %v1940_v36 = vrot.slane %v1939_v23, 4  ;;  %v1950_v39 = vrot.slane %v1949_v24, 4  ;;  %5151 = vmatmul.mubr.bf16.gmra.mxu0 %v6843_v22 }
 0x169   : > { %2944 = vst [vmem:[#allocation3 + $0x88] sm:$0xf] %v2572_v28  ;;  %2400 = vst [vmem:[#allocation3 + $0x2e4] sm:$0xf] %v2309_v29  ;;  %v2483_v41 = vld [vmem:[#allocation2 + $0x30] sm:$0xf]  ;;  %v2312_v44 = vsel %vm7354_vm13, %v2310_v30, %v2311_v25 }
 0x16a   : > { %2449 = vst [vmem:[#allocation3 + $0xa8] sm:$0xf] %v2417_v32  ;;  %2450 = vst [vmem:[#allocation3 + $0xcc] sm:$0xf] %v2418_v34  ;;  %v2484_v43 = vld [vmem:[#allocation2 + $0x34] sm:$0xf]  ;;  %v1945_v57 = vsel %vm7142_vm6, %v1940_v36, %v1944_v8  ;;  %v1955_v61 = vsel %vm7142_vm6, %v1950_v39, %v1954_v10  ;;  %v7742_v10 = vpop.f32.mrf.mxu1 }
 0x16b   : > { %v2574_v54 = vshrl.u32 %v2483_v41, 16  ;;  %v2577_v55 = vshll.u32 %v2483_v41, 16  ;;  %v2583_v56 = vshll.u32 %v2484_v43, 16  ;;  %2401 = vst [vmem:[#allocation3 + $0x308] sm:$0xf] %v2312_v44  ;;  %v2587_v62 = vshrl.u32 %v2484_v43, 16  ;;  %v6094_v43 = vpop.f32.mrf.mxu0 }
 0x16c   : > { %v2593_v0 = vshll.u32 %v2485_v51, 16  ;;  %v1677_v3 = vld [vmem:[#allocation2 + $0x90] sm:$0xf]  ;;  %v1678_v4 = vld [vmem:[#allocation2 + $0x94] sm:$0xf]  ;;  %v7744_v44 = vpop.f32.mrf.mxu1 }
 0x16d   : > { %2128 = vst [vmem:[#allocation3 + $0x2e0] sm:$0xf] %v1945_v57  ;;  %2129 = vst [vmem:[#allocation3 + $0x304] sm:$0xf] %v1955_v61  ;;  %v2576_v11 = vrot.slane %v2574_v54, 4  ;;  %v2579_v14 = vrot.slane %v2577_v55, 5  ;;  %v7748_v57 = vadd.f32 %v6182_v9, %v6181_v45 }
 0x16e   : > { %v2585_v15 = vrot.slane %v2583_v56, 5  ;;  %v1679_v16 = vld [vmem:[#allocation2 + $0x98] sm:$0x1]  ;;  %v1957_v18 = vshrl.u32 %v1677_v3, 16  ;;  %v2589_v19 = vrot.slane %v2587_v62, 4  ;;  %v2595_v21 = vrot.slane %v2593_v0, 5 }
 0x16f   : > { %v1960_v8 = vshll.u32 %v1677_v3, 16  ;;  %v1966_v22 = vshll.u32 %v1678_v4, 16  ;;  %v2173_v23 = vld [vmem:[#allocation2 + $0x90] sm:$0xe]  ;;  %v2580_v24 = vor.u32 %v2579_v14, %v2576_v11  ;;  %v1970_v28 = vshrl.u32 %v1678_v4, 16  ;;  %v6187_v3 = vpop.f32.mrf.mxu1 }
 0x170   : > { %v1959_v25 = vrot.slane %v1957_v18, 4  ;;  %v1976_v29 = vshll.u32 %v1679_v16, 16  ;;  %v2174_v30 = vld [vmem:[#allocation2 + $0x94] sm:$0xf]  ;;  %v2590_v32 = vor.u32 %v2589_v19, %v2585_v15  ;;  %v2175_v39 = vld [vmem:[#allocation2 + $0x98] sm:$0x1]  ;;  %v7746_v56 = vadd.f32 %v6094_v43, %v6093_v7 }
 0x171   : > { %v1962_v34 = vrot.slane %v1960_v8, 5  ;;  %v1968_v36 = vrot.slane %v1966_v22, 5  ;;  %v5808_v41 = vrot.slane %v2173_v23, 9  ;;  %v6845_v51 = vld [vmem:[#allocation3 + $0x64] ss:$36 sps:$4 sm:$0xff]   ;;  %v2581_v55 = vrot.slane %v2580_v24, 4  ;;  %v6188_v8 = vpop.f32.mrf.mxu1 }
 0x172   : > { %v6849_v54 = vld [vmem:[#allocation3 + $0x60] ss:$36 sps:$4 sm:$0xff]   ;;  %v2591_v61 = vrot.slane %v2590_v32, 4  ;;  %v1972_v0 = vrot.slane %v1970_v28, 4  ;;  %5247 = vmatprep.mubr.bf16.mxu1 %v6845_v51  ;;  %v2315_v11 = vrot.slane %v2174_v30, 5  ;;  %v2318_v14 = vrot.slane %v2175_v39, 5 }
 0x173   : > { %v1963_v62 = vor.u32 %v1962_v34, %v1959_v25  ;;  %v2586_v4 = vsel %vm7142_vm6, %v2581_v55, %v2585_v15  ;;  %v2419_v16 = vld [vmem:[#allocation2 + $0x3c] sm:$0xf]  ;;  %5248 = vmatmul.mubr.bf16.gmra.mxu1 %v6849_v54  ;;  %v1978_v9 = vrot.slane %v1976_v29, 5  ;;  %v2420_v24 = vld [vmem:[#allocation2 + $0x40] sm:$0xf]  ;;  %v7756_v25 = vpop.f32.mrf.mxu0  ;;  %v7758_v28 = vadd.f32 %v6188_v8, %v6187_v3  ;;  %v7762_v34 = vpop.f32.mrf.mxu1 }
 0x174   : > { %v6847_v18 = vld [vmem:[#allocation3 + $0x2e4] ss:$36 sps:$4 sm:$0xff]   ;;  %v2596_v19 = vsel %vm7142_vm6, %v2591_v61, %v2595_v21  ;;  %2945 = vst [vmem:[#allocation3 + $0xac] sm:$0xf] %v2586_v4  ;;  %v1973_v45 = vor.u32 %v1972_v0, %v1968_v36  ;;  %2451 = vst [vmem:[#allocation3 + $0xf0] sm:$0xf] %v2419_v16  ;;  %v2316_v23 = vsel %vm7354_vm13, %v5808_v41, %v2315_v11 }
 0x175   : > { %v1964_v7 = vrot.slane %v1963_v62, 4  ;;  %v6850_v22 = vld [vmem:[#allocation3 + $0x2e0] ss:$36 sps:$4 sm:$0xff]   ;;  %2946 = vst [vmem:[#allocation3 + $0xd0] sm:$0xf] %v2596_v19  ;;  %v2317_v15 = vrot.slane %v2315_v11, 4  ;;  %5158 = vmatprep.mubr.bf16.mxu0 %v6847_v18  ;;  %v7768_v3 = vpop.f32.mrf.mxu1  ;;  %v7770_v19 = vpop.f32.mrf.mxu0 }
 0x176   : > { %v1974_v30 = vrot.slane %v1973_v45, 4  ;;  %2402 = vst [vmem:[#allocation3 + $0x32c] sm:$0xf] %v2316_v23  ;;  %2452 = vst [vmem:[#allocation3 + $0x114] sm:$0xf] %v2420_v24  ;;  %5159 = vmatmul.mubr.bf16.gmra.mxu0 %v6850_v22 }
 0x177   : > { %v1969_v21 = vsel %vm7142_vm6, %v1964_v7, %v1968_v36  ;;  %v2486_v29 = vld [vmem:[#allocation2 + $0x3c] sm:$0xf]  ;;  %v2487_v32 = vld [vmem:[#allocation2 + $0x40] sm:$0xf]  ;;  %v2319_v39 = vsel %vm7354_vm13, %v2317_v15, %v2318_v14  ;;  %v2488_v41 = vld [vmem:[#allocation2 + $0x44] sm:$0x1]  ;;  %v7772_v23 = vpop.f32.mrf.mxu1 }
 0x178   : > { %2130 = vst [vmem:[#allocation3 + $0x328] sm:$0xf] %v1969_v21  ;;  %v2598_v43 = vshrl.u32 %v2486_v29, 16  ;;  %v2601_v51 = vshll.u32 %v2486_v29, 16  ;;  %v2607_v54 = vshll.u32 %v2487_v32, 16  ;;  %v1979_v55 = vsel %vm7142_vm6, %v1974_v30, %v1978_v9 }
 0x179   : > { %2403 = vst [vmem:[#allocation3 + $0x350] sm:$0xf] %v2319_v39  ;;  %v2611_v36 = vshrl.u32 %v2487_v32, 16  ;;  %v2617_v61 = vshll.u32 %v2488_v41, 16  ;;  %v1680_v62 = vld [vmem:[#allocation2 + $0x9c] sm:$0xf] }
 0x17a   : > { %v1681_v0 = vld [vmem:[#allocation2 + $0xa0] sm:$0xf]  ;;  %2131 = vst [vmem:[#allocation3 + $0x34c] sm:$0xf] %v1979_v55  ;;  %v2600_v4 = vrot.slane %v2598_v43, 4  ;;  %v2603_v11 = vrot.slane %v2601_v51, 5  ;;  %v7774_v51 = vpop.f32.mrf.mxu1 }
 0x17b   : > { %v2609_v16 = vrot.slane %v2607_v54, 5  ;;  %v1682_v18 = vld [vmem:[#allocation2 + $0xa4] sm:$0x1]  ;;  %v1981_v14 = vshrl.u32 %v1680_v62, 16  ;;  %v2613_v7 = vrot.slane %v2611_v36, 4  ;;  %v2619_v45 = vrot.slane %v2617_v61, 5 }
 0x17c   : > { %v1984_v8 = vshll.u32 %v1680_v62, 16  ;;  %v1990_v22 = vshll.u32 %v1681_v0, 16  ;;  %v2176_v9 = vld [vmem:[#allocation2 + $0x9c] sm:$0xe]  ;;  %v2604_v15 = vor.u32 %v2603_v11, %v2600_v4  ;;  %v1994_v21 = vshrl.u32 %v1681_v0, 16  ;;  %v7776_v62 = vpop.f32.mrf.mxu0 }
 0x17d   : > { %v1983_v24 = vrot.slane %v1981_v14, 4  ;;  %v2000_v30 = vshll.u32 %v1682_v18, 16  ;;  %v2177_v29 = vld [vmem:[#allocation2 + $0xa0] sm:$0xf]  ;;  %v6851_v32 = vld [vmem:[#allocation3 + $0xac] ss:$36 sps:$4 sm:$0xff]   ;;  %v2614_v41 = vor.u32 %v2613_v7, %v2609_v16 }
 0x17e   : > { %v6855_v39 = vld [vmem:[#allocation3 + $0xa8] ss:$36 sps:$4 sm:$0xff]   ;;  %v1986_v43 = vrot.slane %v1984_v8, 5  ;;  %v2605_v54 = vrot.slane %v2604_v15, 4  ;;  %v1992_v55 = vrot.slane %v1990_v22, 5  ;;  %v1996_v36 = vrot.slane %v1994_v21, 4  ;;  %5255 = vmatprep.mubr.bf16.mxu1 %v6851_v32  ;;  %v7780_v15 = vpop.f32.mrf.mxu0 }
 0x17f   : > { %v2178_v61 = vld [vmem:[#allocation2 + $0xa4] sm:$0x1]  ;;  %v2615_v27 = vrot.slane %v2614_v41, 4  ;;  %v5809_v4 = vrot.slane %v2176_v9, 9  ;;  %v2322_v11 = vrot.slane %v2177_v29, 5  ;;  %5256 = vmatmul.mubr.bf16.gmra.mxu1 %v6855_v39  ;;  %v2002_v14 = vrot.slane %v2000_v30, 5 }
 0x180   : > { %v1987_v12 = vor.u32 %v1986_v43, %v1983_v24  ;;  %v2610_v0 = vsel %vm7142_vm6, %v2605_v54, %v2609_v16  ;;  %v1997_v18 = vor.u32 %v1996_v36, %v1992_v55  ;;  %v2325_v7 = vrot.slane %v2178_v61, 5  ;;  %v2421_v8 = vld [vmem:[#allocation2 + $0x48] sm:$0xf]  ;;  %v2422_v5 = vld [vmem:[#allocation2 + $0x4c] sm:$0xf]  ;;  %v7786_v16 = vpop.f32.mrf.mxu1  ;;  %v7788_v43 = vpop.f32.mrf.mxu0 }
 0x181   : > { %v6853_v22 = vld [vmem:[#allocation3 + $0x32c] ss:$36 sps:$4 sm:$0xff]   ;;  %v2620_v32 = vsel %vm7142_vm6, %v2615_v27, %v2619_v45  ;;  %2947 = vst [vmem:[#allocation3 + $0xf4] sm:$0xf] %v2610_v0  ;;  %v2323_v9 = vsel %vm7354_vm13, %v5809_v4, %v2322_v11  ;;  %2453 = vst [vmem:[#allocation3 + $0x138] sm:$0xf] %v2421_v8 }
 0x182   : > { %v6856_v21 = vld [vmem:[#allocation3 + $0x328] ss:$36 sps:$4 sm:$0xff]   ;;  %v1988_v24 = vrot.slane %v1987_v12, 4  ;;  %2454 = vst [vmem:[#allocation3 + $0x15c] sm:$0xf] %v2422_v5  ;;  %v1998_v30 = vrot.slane %v1997_v18, 4  ;;  %5166 = vmatprep.mubr.bf16.mxu0 %v6853_v22  ;;  %v7796_v8 = vpop.f32.mrf.mxu0 }
 0x183   : > { %2948 = vst [vmem:[#allocation3 + $0x118] sm:$0xf] %v2620_v32  ;;  %v2324_v29 = vrot.slane %v2322_v11, 4  ;;  %2404 = vst [vmem:[#allocation3 + $0x374] sm:$0xf] %v2323_v9  ;;  %5167 = vmatmul.mubr.bf16.gmra.mxu0 %v6856_v21  ;;  %v7798_v9 = vpop.f32.mrf.mxu1 }
 0x184   : > { %v2489_v39 = vld [vmem:[#allocation2 + $0x48] sm:$0xf]  ;;  %v2490_v41 = vld [vmem:[#allocation2 + $0x4c] sm:$0xf]  ;;  %v1993_v27 = vsel %vm7142_vm6, %v1988_v24, %v1992_v55  ;;  %v2491_v12 = vld [vmem:[#allocation2 + $0x50] sm:$0x1]  ;;  %v2003_v5 = vsel %vm7142_vm6, %v1998_v30, %v2002_v14  ;;  %v7800_v48 = vpop.f32.mrf.mxu0 }
 0x185   : > { %v2622_v45 = vshrl.u32 %v2489_v39, 16  ;;  %v2625_v54 = vshll.u32 %v2489_v39, 16  ;;  %v2631_v36 = vshll.u32 %v2490_v41, 16  ;;  %2132 = vst [vmem:[#allocation3 + $0x370] sm:$0xf] %v1993_v27  ;;  %v2326_v61 = vsel %vm7354_vm13, %v2324_v29, %v2325_v7 }
 0x186   : > { %v2635_v4 = vshrl.u32 %v2490_v41, 16  ;;  %v2641_v11 = vshll.u32 %v2491_v12, 16  ;;  %v1683_v0 = vld [vmem:[#allocation2 + $0xa8] sm:$0xf]  ;;  %v1684_v18 = vld [vmem:[#allocation2 + $0xac] sm:$0xf] }
 0x187   : > { %2133 = vst [vmem:[#allocation3 + $0x394] sm:$0xf] %v2003_v5  ;;  %2405 = vst [vmem:[#allocation3 + $0x398] sm:$0xf] %v2326_v61  ;;  %v2624_v55 = vrot.slane %v2622_v45, 4  ;;  %v2627_v22 = vrot.slane %v2625_v54, 5 }
 0x188   : > { %v2633_v32 = vrot.slane %v2631_v36, 5  ;;  %v1685_v24 = vld [vmem:[#allocation2 + $0xb0] sm:$0x1]  ;;  %v2005_v21 = vshrl.u32 %v1683_v0, 16  ;;  %v2637_v14 = vrot.slane %v2635_v4, 4  ;;  %v2643_v30 = vrot.slane %v2641_v11, 5  ;;  %v7802_v4 = vpop.f32.mrf.mxu1 }
 0x189   : > { %v2008_v39 = vshll.u32 %v1683_v0, 16  ;;  %v2014_v27 = vshll.u32 %v1684_v18, 16  ;;  %v2179_v7 = vld [vmem:[#allocation2 + $0xa8] sm:$0xe]  ;;  %v2628_v29 = vor.u32 %v2627_v22, %v2624_v55  ;;  %v2018_v12 = vshrl.u32 %v1684_v18, 16  ;;  %v7808_v22 = vpop.f32.mrf.mxu0 }
 0x18a   : > { %v2007_v41 = vrot.slane %v2005_v21, 4  ;;  %v2024_v13 = vshll.u32 %v1685_v24, 16  ;;  %v2180_v47 = vld [vmem:[#allocation2 + $0xac] sm:$0xf]  ;;  %v2638_v5 = vor.u32 %v2637_v14, %v2633_v32  ;;  %v2181_v36 = vld [vmem:[#allocation2 + $0xb0] sm:$0x1]  ;;  %v7806_v11 = vadd.f32 %v7618_v20, %v7610_v2 }
 0x18b   : > { %v2010_v45 = vrot.slane %v2008_v39, 5  ;;  %v2016_v54 = vrot.slane %v2014_v27, 5  ;;  %v5810_v61 = vrot.slane %v2179_v7, 9  ;;  %v6858_v38 = vld [vmem:[#allocation3 + $0xf4] ss:$36 sps:$4 sm:$0xff]   ;;  %v2629_v52 = vrot.slane %v2628_v29, 4  ;;  %v7812_v27 = vpop.f32.mrf.mxu1 }
 0x18c   : > { %v6862_v17 = vld [vmem:[#allocation3 + $0xf0] ss:$36 sps:$4 sm:$0xff]   ;;  %v2639_v0 = vrot.slane %v2638_v5, 4  ;;  %v2020_v55 = vrot.slane %v2018_v12, 4  ;;  %5263 = vmatprep.mubr.bf16.mxu1 %v6858_v38  ;;  %v2026_v21 = vrot.slane %v2024_v13, 5  ;;  %v2329_v14 = vrot.slane %v2180_v47, 5 }
 0x18d   : > { %v2011_v18 = vor.u32 %v2010_v45, %v2007_v41  ;;  %v2634_v24 = vsel %vm7142_vm6, %v2629_v52, %v2633_v32  ;;  %v2332_v39 = vrot.slane %v2181_v36, 5  ;;  %5264 = vmatmul.mubr.bf16.gmra.mxu1 %v6862_v17  ;;  %v7818_v38 = vadd.f32 %v7657_v59, %v7643_v35  ;;  %v2423_v32 = vld [vmem:[#allocation2 + $0x54] sm:$0xf]  ;;  %v2424_v17 = vld [vmem:[#allocation2 + $0x58] sm:$0xf] }
 0x18e   : > { %v6860_v7 = vld [vmem:[#allocation3 + $0x374] ss:$36 sps:$4 sm:$0xff]   ;;  %v2644_v2 = vsel %vm7142_vm6, %v2639_v0, %v2643_v30  ;;  %2949 = vst [vmem:[#allocation3 + $0x13c] sm:$0xf] %v2634_v24  ;;  %v2021_v41 = vor.u32 %v2020_v55, %v2016_v54  ;;  %v2330_v47 = vsel %vm7354_vm13, %v5810_v61, %v2329_v14  ;;  %v2331_v13 = vrot.slane %v2329_v14, 4  ;;  %v7841_v55 = vpop.f32.mrf.mxu1 }
 0x18f   : > { %v6863_v29 = vld [vmem:[#allocation3 + $0x370] ss:$36 sps:$4 sm:$0xff]   ;;  %v2012_v20 = vrot.slane %v2011_v18, 4  ;;  %2950 = vst [vmem:[#allocation3 + $0x160] sm:$0xf] %v2644_v2  ;;  %v7825_v12 = vadd.f32 %v7692_v50, %v7684_v46  ;;  %5174 = vmatprep.mubr.bf16.mxu0 %v6860_v7  ;;  %v7831_v45 = vadd.f32 %v7728_v26, %v7720_v58  ;;  %v7835_v36 = vadd.f32 %v7744_v44, %v7742_v10  ;;  %v7837_v46 = vpop.f32.mrf.mxu0 }
 0x190   : > { %v2022_v5 = vrot.slane %v2021_v41, 4  ;;  %2406 = vst [vmem:[#allocation3 + $0x3bc] sm:$0xf] %v2330_v47  ;;  %2455 = vst [vmem:[#allocation3 + $0x180] sm:$0xf] %v2423_v32  ;;  %5175 = vmatmul.mubr.bf16.gmra.mxu0 %v6863_v29  ;;  %v2333_v50 = vsel %vm7354_vm13, %v2331_v13, %v2332_v39  ;;  %v7847_v14 = vadd.f32 %v7770_v19, %v7756_v25 }
 0x191   : > { %v2017_v30 = vsel %vm7142_vm6, %v2012_v20, %v2016_v54  ;;  %2456 = vst [vmem:[#allocation3 + $0x1a4] sm:$0xf] %v2424_v17  ;;  %v2492_v35 = vld [vmem:[#allocation2 + $0x54] sm:$0xf]  ;;  %v2493_v59 = vld [vmem:[#allocation2 + $0x58] sm:$0xf] }
 0x192   : > { %2134 = vst [vmem:[#allocation3 + $0x3b8] sm:$0xf] %v2017_v30  ;;  %v2494_v54 = vld [vmem:[#allocation2 + $0x5c] sm:$0x1]  ;;  %v2646_v61 = vshrl.u32 %v2492_v35, 16  ;;  %v2649_v0 = vshll.u32 %v2492_v35, 16  ;;  %v2027_v58 = vsel %vm7142_vm6, %v2022_v5, %v2026_v21  ;;  %v7854_v30 = vpop.f32.mrf.mxu0 }
 0x193   : > { %v2655_v18 = vshll.u32 %v2493_v59, 16  ;;  %2407 = vst [vmem:[#allocation3 + $0x3e0] sm:$0xf] %v2333_v50  ;;  %v2659_v26 = vshrl.u32 %v2493_v59, 16  ;;  %v2665_v10 = vshll.u32 %v2494_v54, 16  ;;  %v7856_v50 = vpop.f32.mrf.mxu1 }
 0x194   : > { %v1686_v44 = vld [vmem:[#allocation2 + $0xb4] sm:$0xf]  ;;  %v1687_v24 = vld [vmem:[#allocation2 + $0xb8] sm:$0xf]  ;;  %v7852_v39 = vld [vmem:[%s8590_s2] ss:$0 sm:$0xff] }
 0x195   : > { %2135 = vst [vmem:[#allocation3 + $0x3dc] sm:$0xf] %v2027_v58  ;;  %v2648_v7 = vrot.slane %v2646_v61, 4  ;;  %v2651_v29 = vrot.slane %v2649_v0, 5  ;;  %v2657_v2 = vrot.slane %v2655_v18, 5  ;;  %v2029_v21 = vshrl.u32 %v1686_v44, 16 }
 0x196   : > { %v1688_v20 = vld [vmem:[#allocation2 + $0xbc] sm:$0x1]  ;;  %v2661_v41 = vrot.slane %v2659_v26, 4  ;;  %v2667_v47 = vrot.slane %v2665_v10, 5  ;;  %v2032_v13 = vshll.u32 %v1686_v44, 16  ;;  %v2038_v32 = vshll.u32 %v1687_v24, 16 }
 0x197   : > { %v2182_v17 = vld [vmem:[#allocation2 + $0xb4] sm:$0xe]  ;;  %v2652_v25 = vor.u32 %v2651_v29, %v2648_v7  ;;  %v2031_v19 = vrot.slane %v2029_v21, 4  ;;  %v2042_v5 = vshrl.u32 %v1687_v24, 16  ;;  %v2048_v35 = vshll.u32 %v1688_v20, 16 }
 0x198   : > { %v2183_v59 = vld [vmem:[#allocation2 + $0xb8] sm:$0xf]  ;;  %v4759_v54 = vadd.f32 %v7586_v63, %v7852_v39  ;;  %v6868_v0 = vld [vmem:[#allocation3 + $0x138] ss:$36 sps:$4 sm:$0xff]   ;;  %v2662_v18 = vor.u32 %v2661_v41, %v2657_v2  ;;  %v2034_v58 = vrot.slane %v2032_v13, 5  ;;  %v7862_v26 = vadd.f32 %v7768_v3, %v7762_v34  ;;  %v7868_v41 = vpop.f32.mrf.mxu0 }
 0x199   : > { %v6864_v61 = vld [vmem:[#allocation3 + $0x13c] ss:$36 sps:$4 sm:$0xff]   ;;  %v7866_v10 = vadd.f32 %v7806_v11, %v7852_v39  ;;  %v2653_v44 = vrot.slane %v2652_v25, 4  ;;  %v2040_v24 = vrot.slane %v2038_v32, 5  ;;  %v2044_v7 = vrot.slane %v2042_v5, 4  ;;  %v7872_v25 = vpop.f32.mrf.mxu1 }
 0x19a   : > { %v2184_v29 = vld [vmem:[#allocation2 + $0xbc] sm:$0x1]  ;;  %5271 = vmatprep.mubr.bf16.mxu1 %v6864_v61  ;;  %v2663_v20 = vrot.slane %v2662_v18, 4  ;;  %v2035_v21 = vor.u32 %v2034_v58, %v2031_v19  ;;  %v5811_v63 = vrot.slane %v2182_v17, 9  ;;  %v2336_v52 = vrot.slane %v2183_v59, 5 }
 0x19b   : > { %v2425_v31 = vld [vmem:[#allocation2 + $0x60] sm:$0xf]  ;;  %5272 = vmatmul.mubr.bf16.gmra.mxu1 %v6868_v0  ;;  %v2658_v34 = vsel %vm7142_vm6, %v2653_v44, %v2657_v2  ;;  %v2045_v3 = vor.u32 %v2044_v7, %v2040_v24  ;;  %v2050_v13 = vrot.slane %v2048_v35, 5  ;;  %v2339_v11 = vrot.slane %v2184_v29, 5  ;;  %v2426_v6 = vld [vmem:[#allocation2 + $0x64] sm:$0xf]  ;;  %v7882_v35 = vpop.f32.mrf.mxu0  ;;  %v7891_v44 = vpop.f32.mrf.mxu1 }
 0x19c   : > { %2457 = vst [vmem:[#allocation3 + $0x1c8] sm:$0xf] %v2425_v31  ;;  %v2495_v32 = vld [vmem:[#allocation2 + $0x60] sm:$0xf]  ;;  %v6866_v5 = vld [vmem:[#allocation3 + $0x3bc] ss:$36 sps:$4 sm:$0xff]   ;;  %v7876_v17 = vadd.f32 %v7630_v53, %v7852_v39  ;;  %v2668_v19 = vsel %vm7142_vm6, %v2663_v20, %v2667_v47  ;;  %v2337_v2 = vsel %vm7354_vm13, %v5811_v63, %v2336_v52  ;;  %v7885_v53 = vadd.f32 %v7748_v57, %v4759_v54 }
 0x19d   : > { %v6869_v61 = vld [vmem:[#allocation3 + $0x3b8] ss:$36 sps:$4 sm:$0xff]   ;;  %2951 = vst [vmem:[#allocation3 + $0x184] sm:$0xf] %v2658_v34  ;;  %v2036_v59 = vrot.slane %v2035_v21, 4  ;;  %v2046_v31 = vrot.slane %v2045_v3, 4  ;;  %v7889_v47 = vadd.f32 %v7780_v15, %v7776_v62  ;;  %5182 = vmatprep.mubr.bf16.mxu0 %v6866_v5  ;;  %v7899_v34 = vpop.f32.mrf.mxu0  ;;  %v4770_v42 = vadd.f32 %v7818_v38, %v7852_v39 }
 0x19e   : > { %2458 = vst [vmem:[#allocation3 + $0x1ec] sm:$0xf] %v2426_v6  ;;  %2952 = vst [vmem:[#allocation3 + $0x1a8] sm:$0xf] %v2668_v19  ;;  %v2338_v0 = vrot.slane %v2336_v52, 4  ;;  %v2670_v7 = vshrl.u32 %v2495_v32, 16  ;;  %5183 = vmatmul.mubr.bf16.gmra.mxu0 %v6869_v61  ;;  %v7923_v38 = vadd.f32 %v7825_v12, %v7852_v39 }
 0x19f   : > { %2408 = vst [vmem:[#allocation3 + $0x404] sm:$0xf] %v2337_v2  ;;  %v2496_v18 = vld [vmem:[#allocation2 + $0x64] sm:$0xf]  ;;  %v2497_v58 = vld [vmem:[#allocation2 + $0x68] sm:$0x1]  ;;  %v2041_v6 = vsel %vm7142_vm6, %v2036_v59, %v2040_v24  ;;  %v2051_v21 = vsel %vm7142_vm6, %v2046_v31, %v2050_v13 }
 0x1a0   : > { %v2673_v29 = vshll.u32 %v2495_v32, 16  ;;  %v2679_v20 = vshll.u32 %v2496_v18, 16  ;;  %v739_v52 = vld [vmem:[#allocation2 + $0xc8] sm:$0x1]  ;;  %2136 = vst [vmem:[#allocation3 + $0x400] sm:$0xf] %v2041_v6  ;;  %v2340_v57 = vsel %vm7354_vm13, %v2338_v0, %v2339_v11  ;;  %v7905_v0 = vpop.f32.mrf.mxu1 }
 0x1a1   : > { %v2683_v62 = vshrl.u32 %v2496_v18, 16  ;;  %v2689_v15 = vshll.u32 %v2497_v58, 16  ;;  %v1689_v54 = vld [vmem:[#allocation2 + $0xc0] sm:$0xf]  ;;  %v1690_v63 = vld [vmem:[#allocation2 + $0xc4] sm:$0xf] }
 0x1a2   : > { %2137 = vst [vmem:[#allocation3 + $0x424] sm:$0xf] %v2051_v21  ;;  %2409 = vst [vmem:[#allocation3 + $0x428] sm:$0xf] %v2340_v57  ;;  %v2672_v24 = vrot.slane %v2670_v7, 4  ;;  %v2675_v3 = vrot.slane %v2673_v29, 5  ;;  %v7907_v57 = vpop.f32.mrf.mxu0 }
 0x1a3   : > { %v2681_v32 = vrot.slane %v2679_v20, 5  ;;  %v8616_v5 = vrot.slane %v7677_v60, 4  ;;  %v2185_v61 = vld [vmem:[#allocation2 + $0xc0] sm:$0xe]  ;;  %v2685_v19 = vrot.slane %v2683_v62, 4  ;;  %v2691_v59 = vrot.slane %v2689_v15, 5 }
 0x1a4   : > { %v2053_v11 = vshrl.u32 %v1689_v54, 16  ;;  %v2056_v2 = vshll.u32 %v1689_v54, 16  ;;  %v2186_v31 = vld [vmem:[#allocation2 + $0xc4] sm:$0xf]  ;;  %v2676_v18 = vor.u32 %v2675_v3, %v2672_v24  ;;  %v2062_v58 = vshll.u32 %v1690_v63, 16 }
 0x1a5   : > { %v740_v13 = vsel %vm7148_vm8, %v8616_v5, %v739_v52  ;;  %v2066_v6 = vshrl.u32 %v1690_v63, 16  ;;  %v5812_v7 = vrot.slane %v2185_v61, 9  ;;  %v2686_v29 = vor.u32 %v2685_v19, %v2681_v32  ;;  %v6871_v52 = vld [vmem:[#allocation3 + $0x184] ss:$36 sps:$4 sm:$0xff]   ;;  %v2427_v61 = vld [vmem:[#allocation2 + $0x6c] sm:$0xf]  ;;  %v7919_v19 = vpop.f32.mrf.mxu1 }
 0x1a6   : > { %741 = vst [vmem:[#allocation2 + $0xc8] sm:$0x1] %v740_v13  ;;  %v2055_v20 = vrot.slane %v2053_v11, 4  ;;  %v2058_v21 = vrot.slane %v2056_v2, 5  ;;  %v2343_v60 = vrot.slane %v2186_v31, 5  ;;  %v7913_v15 = vadd.f32 %v7667_v37, %v7852_v39  ;;  %5279 = vmatprep.mubr.bf16.mxu1 %v6871_v52 }
 0x1a7   : > { %v6875_v62 = vld [vmem:[#allocation3 + $0x180] ss:$36 sps:$4 sm:$0xff]   ;;  %v2677_v54 = vrot.slane %v2676_v18, 4  ;;  %v7917_v63 = vadd.f32 %v7835_v36, %v7866_v10  ;;  %v2687_v24 = vrot.slane %v2686_v29, 4  ;;  %v2064_v5 = vrot.slane %v2062_v58, 5 }
 0x1a8   : > { %v2059_v3 = vor.u32 %v2058_v21, %v2055_v20  ;;  %v2068_v13 = vrot.slane %v2066_v6, 4  ;;  %v2344_v11 = vsel %vm7354_vm13, %v5812_v7, %v2343_v60  ;;  %v2345_v36 = vrot.slane %v2343_v60, 4  ;;  %v2428_v10 = vld [vmem:[#allocation2 + $0x70] sm:$0xf]  ;;  %2459 = vst [vmem:[#allocation3 + $0x210] sm:$0xf] %v2427_v61  ;;  %5280 = vmatmul.mubr.bf16.gmra.mxu1 %v6875_v62  ;;  %v7935_v7 = vpop.f32.mrf.mxu0 }
 0x1a9   : > { %v2682_v37 = vsel %vm7142_vm6, %v2677_v54, %v2681_v32  ;;  %v2498_v2 = vld [vmem:[#allocation2 + $0x6c] sm:$0xf]  ;;  %v6873_v31 = vld [vmem:[#allocation3 + $0x404] ss:$36 sps:$4 sm:$0xff]   ;;  %v2692_v58 = vsel %vm7142_vm6, %v2687_v24, %v2691_v59  ;;  %2410 = vst [vmem:[#allocation3 + $0x44c] sm:$0xf] %v2344_v11  ;;  %v7933_v32 = vadd.f32 %v7758_v28, %v7876_v17  ;;  %v7939_v21 = vadd.f32 %v7702_v40, %v7852_v39 }
 0x1aa   : > { %v6876_v18 = vld [vmem:[#allocation3 + $0x400] ss:$36 sps:$4 sm:$0xff]   ;;  %2953 = vst [vmem:[#allocation3 + $0x1cc] sm:$0xf] %v2682_v37  ;;  %v2060_v6 = vrot.slane %v2059_v3, 4  ;;  %v2069_v12 = vor.u32 %v2068_v13, %v2064_v5  ;;  %v7943_v59 = vadd.f32 %v7808_v22, %v7800_v48  ;;  %v7946_v52 = vadd.f32 %v7862_v26, %v4770_v42  ;;  %5190 = vmatprep.mubr.bf16.mxu0 %v6873_v31  ;;  %v7952_v3 = vpop.f32.mrf.mxu0  ;;  %v7954_v13 = vpop.f32.mrf.mxu1 }
 0x1ab   : > { %2460 = vst [vmem:[#allocation3 + $0x234] sm:$0xf] %v2428_v10  ;;  %2954 = vst [vmem:[#allocation3 + $0x1f0] sm:$0xf] %v2692_v58  ;;  %v2499_v60 = vld [vmem:[#allocation2 + $0x70] sm:$0xf]  ;;  %v6195_v28 = vadd.f32 %v7774_v51, %v7772_v23  ;;  %5191 = vmatmul.mubr.bf16.gmra.mxu0 %v6876_v18 }
 0x1ac   : > { %8617 = vst [vmem:[#allocation19_spill] sm:$0xff] %v7946_v52  ;;  %v2065_v17 = vsel %vm7142_vm6, %v2060_v6, %v2064_v5  ;;  %v2070_v62 = vrot.slane %v2069_v12, 4  ;;  %v2500_v40 = vld [vmem:[#allocation2 + $0x74] sm:$0x1]  ;;  %v2694_v48 = vshrl.u32 %v2498_v2, 16  ;;  %v2697_v22 = vshll.u32 %v2498_v2, 16  ;;  %v7962_v31 = vpop.f32.mrf.mxu1 }
 0x1ad   : > { %v1691_v29 = vld [vmem:[#allocation2 + $0xc8] sm:$0x1]  ;;  %2138 = vst [vmem:[#allocation3 + $0x448] sm:$0xf] %v2065_v17  ;;  %v2703_v26 = vshll.u32 %v2499_v60, 16  ;;  %v2707_v42 = vshrl.u32 %v2499_v60, 16  ;;  %v7960_v5 = vadd.f32 %v7831_v45, %v7852_v39 }
 0x1ae   : > { %v2187_v20 = vld [vmem:[#allocation2 + $0xc8] sm:$0x1]  ;;  %v2072_v54 = vshll.u32 %v1691_v29, 16  ;;  %v2973_v61 = vld [vmem:[#allocation2 + $0x18] sm:$0xe]  ;;  %v2713_v37 = vshll.u32 %v2500_v40, 16  ;;  %v7964_v29 = vpop.f32.mrf.mxu0 }
 0x1af   : > { %v2346_v24 = vrot.slane %v2187_v20, 5  ;;  %v2974_v11 = vld [vmem:[#allocation2 + $0x1c] sm:$0xf]  ;;  %v2975_v10 = vld [vmem:[#allocation2 + $0x20] sm:$0x1]  ;;  %v2696_v18 = vrot.slane %v2694_v48, 4  ;;  %v7968_v48 = vpop.f32.mrf.mxu1 }
 0x1b0   : > { %v2074_v23 = vrot.slane %v2072_v54, 5  ;;  %v2699_v58 = vrot.slane %v2697_v22, 5  ;;  %v2705_v2 = vrot.slane %v2703_v26, 5  ;;  %v2709_v6 = vrot.slane %v2707_v42, 4  ;;  %v2976_v12 = vld [vmem:[#allocation2 + $0x24] sm:$0xe] }
 0x1b1   : > { %v2347_v51 = vsel %vm7354_vm13, %v2345_v36, %v2346_v24  ;;  %v2715_v20 = vrot.slane %v2713_v37, 5  ;;  %v5813_v60 = vrot.slane %v2973_v61, 9  ;;  %v3071_v45 = vrot.slane %v2974_v11, 5  ;;  %v2977_v17 = vld [vmem:[#allocation2 + $0x28] sm:$0xf] }
 0x1b2   : > { %2411 = vst [vmem:[#allocation3 + $0x470] sm:$0xf] %v2347_v51  ;;  %v2075_v36 = vsel %vm7142_vm6, %v2070_v62, %v2074_v23  ;;  %v2700_v54 = vor.u32 %v2699_v58, %v2696_v18  ;;  %v2710_v24 = vor.u32 %v2709_v6, %v2705_v2  ;;  %v3074_v40 = vrot.slane %v2975_v10, 5  ;;  %v2978_v49 = vld [vmem:[#allocation2 + $0x2c] sm:$0x1]  ;;  %v7979_v58 = vpop.f32.mrf.mxu0 }
 0x1b3   : > { %2139 = vst [vmem:[#allocation3 + $0x46c] sm:$0xf] %v2075_v36  ;;  %v5814_v51 = vrot.slane %v2976_v12, 9  ;;  %v6877_v22 = vld [vmem:[#allocation3 + $0x1cc] ss:$36 sps:$4 sm:$0xff]   ;;  %v3072_v42 = vsel %vm7354_vm13, %v5813_v60, %v3071_v45  ;;  %v3073_v52 = vrot.slane %v3071_v45, 4  ;;  %v7974_v62 = vadd.f32 %v7746_v56, %v7852_v39 }
 0x1b4   : > { %v6881_v26 = vld [vmem:[#allocation3 + $0x1c8] ss:$36 sps:$4 sm:$0xff]   ;;  %v7977_v61 = vadd.f32 %v6195_v28, %v7913_v15  ;;  %v2701_v23 = vrot.slane %v2700_v54, 4  ;;  %v2711_v37 = vrot.slane %v2710_v24, 4  ;;  %3213 = vst [vmem:[#allocation3 + $0x20] sm:$0xf] %v3072_v42  ;;  %5287 = vmatprep.mubr.bf16.mxu1 %v6877_v22  ;;  %v7985_v12 = vadd.f32 %v7847_v14, %v7852_v39  ;;  %v6123_v42 = vpop.f32.mrf.mxu0 }
 0x1b5   : > { %v3078_v11 = vrot.slane %v2977_v17, 5  ;;  %v3081_v10 = vrot.slane %v2978_v49, 5  ;;  %v2429_v18 = vld [vmem:[#allocation2 + $0x78] sm:$0xf]  ;;  %v3075_v6 = vsel %vm7354_vm13, %v3073_v52, %v3074_v40  ;;  %v2430_v56 = vld [vmem:[#allocation2 + $0x7c] sm:$0xf]  ;;  %v7989_v28 = vadd.f32 %v7882_v35, %v7868_v41  ;;  %5288 = vmatmul.mubr.bf16.gmra.mxu1 %v6881_v26  ;;  %v7999_v41 = vpop.f32.mrf.mxu1 }
 0x1b6   : > { %2461 = vst [vmem:[#allocation3 + $0x258] sm:$0xf] %v2429_v18  ;;  %v2501_v15 = vld [vmem:[#allocation2 + $0x78] sm:$0xf]  ;;  %v6198_v49 = vadd.f32 %v7798_v9, %v7786_v16  ;;  %v2706_v36 = vsel %vm7142_vm6, %v2701_v23, %v2705_v2  ;;  %v2716_v52 = vsel %vm7142_vm6, %v2711_v37, %v2715_v20  ;;  %3214 = vst [vmem:[#allocation3 + $0x44] sm:$0xf] %v3075_v6 }
 0x1b7   : > { %v3079_v14 = vsel %vm7354_vm13, %v5814_v51, %v3078_v11  ;;  %v3080_v60 = vrot.slane %v3078_v11, 4  ;;  %2462 = vst [vmem:[#allocation3 + $0x27c] sm:$0xf] %v2430_v56  ;;  %v2502_v45 = vld [vmem:[#allocation2 + $0x7c] sm:$0xf]  ;;  %v2718_v16 = vshrl.u32 %v2501_v15, 16  ;;  %v8005_v26 = vadd.f32 %v7889_v47, %v7852_v39 }
 0x1b8   : > { %v2503_v17 = vld [vmem:[#allocation2 + $0x80] sm:$0x1]  ;;  %2955 = vst [vmem:[#allocation3 + $0x214] sm:$0xf] %v2706_v36  ;;  %2956 = vst [vmem:[#allocation3 + $0x238] sm:$0xf] %v2716_v52  ;;  %v6104_v18 = vadd.f32 %v7796_v8, %v7788_v43  ;;  %v8010_v6 = vadd.f32 %v6198_v49, %v7923_v38  ;;  %v8021_v8 = vadd.f32 %v7952_v3, %v7935_v7 }
 0x1b9   : > { %3215 = vst [vmem:[#allocation3 + $0x68] sm:$0xf] %v3079_v14  ;;  %v2721_v9 = vshll.u32 %v2501_v15, 16  ;;  %v2727_v35 = vshll.u32 %v2502_v45, 16  ;;  %v2731_v2 = vshrl.u32 %v2502_v45, 16  ;;  %v3082_v20 = vsel %vm7354_vm13, %v3080_v60, %v3081_v10  ;;  %v6124_v14 = vpop.f32.mrf.mxu0  ;;  %v8014_v60 = vpop.f32.mrf.mxu1 }
 0x1ba   : > { %v2979_v54 = vld [vmem:[#allocation2 + $0x30] sm:$0xe]  ;;  %v2737_v24 = vshll.u32 %v2503_v17, 16  ;;  %v2980_v40 = vld [vmem:[#allocation2 + $0x34] sm:$0xf]  ;;  %v2720_v11 = vrot.slane %v2718_v16, 4  ;;  %v6201_v10 = vadd.f32 %v7812_v27, %v7802_v4  ;;  %v8030_v7 = vadd.f32 %v6104_v18, %v7852_v39 }
 0x1bb   : > { %v2981_v51 = vld [vmem:[#allocation2 + $0x38] sm:$0x1]  ;;  %v5815_v22 = vrot.slane %v2979_v54, 9  ;;  %v6879_v23 = vld [vmem:[#allocation3 + $0x44c] ss:$36 sps:$4 sm:$0xff]   ;;  %v2723_v56 = vrot.slane %v2721_v9, 5  ;;  %v8025_v54 = vpop.f32.mrf.mxu1  ;;  %v8040_v18 = vadd.f32 %v7979_v58, %v7964_v29 }
 0x1bc   : > { %v6882_v37 = vld [vmem:[#allocation3 + $0x448] ss:$36 sps:$4 sm:$0xff]   ;;  %3216 = vst [vmem:[#allocation3 + $0x8c] sm:$0xf] %v3082_v20  ;;  %v2729_v15 = vrot.slane %v2727_v35, 5  ;;  %v2733_v36 = vrot.slane %v2731_v2, 4  ;;  %5198 = vmatprep.mubr.bf16.mxu0 %v6879_v23  ;;  %v8017_v43 = vadd.f32 %v6201_v10, %v7939_v21  ;;  %v8023_v2 = vpop.f32.mrf.mxu0 }
 0x1bd   : > { %v2739_v52 = vrot.slane %v2737_v24, 5  ;;  %v2982_v47 = vld [vmem:[#allocation2 + $0x3c] sm:$0xe]  ;;  %v3085_v45 = vrot.slane %v2980_v40, 5  ;;  %v3088_v17 = vrot.slane %v2981_v51, 5  ;;  %5199 = vmatmul.mubr.bf16.gmra.mxu0 %v6882_v37  ;;  %v2724_v4 = vor.u32 %v2723_v56, %v2720_v11  ;;  %v8053_v58 = vpop.f32.mrf.mxu1 }
 0x1be   : > { %v2983_v16 = vld [vmem:[#allocation2 + $0x40] sm:$0xf]  ;;  %v2734_v27 = vor.u32 %v2733_v36, %v2729_v15  ;;  %v2984_v38 = vld [vmem:[#allocation2 + $0x44] sm:$0x1]  ;;  %v5816_v49 = vrot.slane %v2982_v47, 9  ;;  %v6204_v11 = vadd.f32 %v7856_v50, %v7841_v55  ;;  %v6207_v36 = vadd.f32 %v7891_v44, %v7872_v25  ;;  %v6127_v29 = vpop.f32.mrf.mxu0 }
 0x1bf   : > { %v3092_v9 = vrot.slane %v2983_v16, 5  ;;  %v2431_v35 = vld [vmem:[#allocation2 + $0x84] sm:$0xf]  ;;  %v6887_v20 = vld [vmem:[#allocation3 + $0x20] ss:$36 sps:$4 sm:$0xff]   ;;  %v3086_v21 = vsel %vm7354_vm13, %v5815_v22, %v3085_v45  ;;  %v3087_v24 = vrot.slane %v3085_v45, 4  ;;  %v8051_v16 = vadd.f32 %v6124_v14, %v6123_v42 }
 0x1c0   : > { %v3095_v40 = vrot.slane %v2984_v38, 5  ;;  %2463 = vst [vmem:[#allocation3 + $0x2a0] sm:$0xf] %v2431_v35  ;;  %v6884_v3 = vld [vmem:[#allocation3 + $0x214] ss:$36 sps:$4 sm:$0xff]   ;;  %v2725_v51 = vrot.slane %v2724_v4, 4  ;;  %6541 = vmatprep.mubr.bf16.mxu0 %v6887_v20  ;;  %v6110_v4 = vadd.f32 %v7854_v30, %v7837_v46  ;;  %v6210_v42 = vadd.f32 %v7919_v19, %v7905_v0 }
 0x1c1   : > { %v2735_v23 = vrot.slane %v2734_v27, 4  ;;  %3217 = vst [vmem:[#allocation3 + $0xb0] sm:$0xf] %v3086_v21  ;;  %v3093_v37 = vsel %vm7354_vm13, %v5816_v49, %v3092_v9  ;;  %v6886_v10 = vld [vmem:[#allocation3 + $0x210] ss:$36 sps:$4 sm:$0xff]   ;;  %v3089_v22 = vsel %vm7354_vm13, %v3087_v24, %v3088_v17  ;;  %v3094_v56 = vrot.slane %v3092_v9, 4  ;;  %5295 = vmatprep.mubr.bf16.mxu1 %v6884_v3 }
 0x1c2   : > { %3219 = vst [vmem:[#allocation3 + $0xf8] sm:$0xf] %v3093_v37  ;;  %v2730_v45 = vsel %vm7142_vm6, %v2725_v51, %v2729_v15  ;;  %3218 = vst [vmem:[#allocation3 + $0xd4] sm:$0xf] %v3089_v22  ;;  %v2432_v50 = vld [vmem:[#allocation2 + $0x88] sm:$0xf]  ;;  %v8049_v17 = vadd.f32 %v6204_v11, %v7960_v5  ;;  %5296 = vmatmul.mubr.bf16.gmra.mxu1 %v6886_v10  ;;  %v8060_v5 = vadd.f32 %v6207_v36, %v7974_v62  ;;  %v6129_v51 = vpop.f32.mrf.mxu0 }
 0x1c3   : > { %v6888_v47 = vld [vmem:[#allocation3 + $0x68] ss:$36 sps:$4 sm:$0xff]   ;;  %v2740_v55 = vsel %vm7142_vm6, %v2735_v23, %v2739_v52  ;;  %2957 = vst [vmem:[#allocation3 + $0x25c] sm:$0xf] %v2730_v45  ;;  %v3096_v25 = vsel %vm7354_vm13, %v3094_v56, %v3095_v40  ;;  %2464 = vst [vmem:[#allocation3 + $0x2c4] sm:$0xf] %v2432_v50  ;;  %v8066_v40 = vadd.f32 %v7943_v59, %v7852_v39  ;;  %v6221_v23 = vpop.f32.mrf.mxu1 }
 0x1c4   : > { %2958 = vst [vmem:[#allocation3 + $0x280] sm:$0xf] %v2740_v55  ;;  %v2504_v44 = vld [vmem:[#allocation2 + $0x84] sm:$0xf]  ;;  %v2505_v15 = vld [vmem:[#allocation2 + $0x88] sm:$0xf]  ;;  %v8069_v46 = vadd.f32 %v6210_v42, %v7985_v12  ;;  %v8072_v55 = vadd.f32 %v6127_v29, %v8023_v2  ;;  %v6213_v12 = vadd.f32 %v7962_v31, %v7954_v13 }
 0x1c5   : > { %v2506_v52 = vld [vmem:[#allocation2 + $0x8c] sm:$0x1]  ;;  %3220 = vst [vmem:[#allocation3 + $0x11c] sm:$0xf] %v3096_v25  ;;  %v2742_v14 = vshrl.u32 %v2504_v44, 16  ;;  %v2745_v27 = vshll.u32 %v2504_v44, 16  ;;  %6542 = vmatmul.mubr.bf16.vlgmr.msra.gmra.mxu0 %v6888_v47  ;;  %v6130_v47 = vpop.f32.mrf.mxu0  ;;  %v6223_v13 = vpop.f32.mrf.mxu1 }
 0x1c6   : > { %v2751_v38 = vshll.u32 %v2505_v15, 16  ;;  %v2755_v49 = vshrl.u32 %v2505_v15, 16  ;;  %v2985_v9 = vld [vmem:[#allocation2 + $0x48] sm:$0xe]  ;;  %v2761_v35 = vshll.u32 %v2506_v52, 16  ;;  %v8078_v52 = vadd.f32 %v6130_v47, %v6129_v51 }
 0x1c7   : > { %v2986_v20 = vld [vmem:[#allocation2 + $0x4c] sm:$0xf]  ;;  %v2987_v21 = vld [vmem:[#allocation2 + $0x50] sm:$0x1]  ;;  %v5817_v24 = vrot.slane %v2985_v9, 9  ;;  %v2744_v30 = vrot.slane %v2742_v14, 4  ;;  %v8082_v2 = vadd.f32 %v6213_v12, %v8005_v26  ;;  %v6132_v29 = vpop.f32.mrf.mxu0  ;;  %v6224_v51 = vpop.f32.mrf.mxu1 }
 0x1c8   : > { %v2747_v0 = vrot.slane %v2745_v27, 5  ;;  %v2753_v19 = vrot.slane %v2751_v38, 5  ;;  %v2757_v62 = vrot.slane %v2755_v49, 4  ;;  %v2988_v3 = vld [vmem:[#allocation2 + $0x54] sm:$0xe]  ;;  %v2763_v37 = vrot.slane %v2761_v35, 5 }
 0x1c9   : > { %v3099_v11 = vrot.slane %v2986_v20, 5  ;;  %v3102_v10 = vrot.slane %v2987_v21, 5  ;;  %v5818_v22 = vrot.slane %v2988_v3, 9  ;;  %v2989_v45 = vld [vmem:[#allocation2 + $0x58] sm:$0xf]  ;;  %v4810_v38 = vadd.f32 %v6110_v4, %v7852_v39  ;;  %v6133_v3 = vpop.f32.mrf.mxu0 }
 0x1ca   : > { %v2748_v56 = vor.u32 %v2747_v0, %v2744_v30  ;;  %v2758_v36 = vor.u32 %v2757_v62, %v2753_v19  ;;  %v2990_v59 = vld [vmem:[#allocation2 + $0x5c] sm:$0x1]  ;;  %v6892_v50 = vld [vmem:[#allocation3 + $0xb0] ss:$36 sps:$4 sm:$0xff]   ;;  %v3106_v15 = vrot.slane %v2989_v45, 5  ;;  %v6116_v20 = vadd.f32 %v7907_v57, %v7899_v34 }
 0x1cb   : > { %v3100_v25 = vsel %vm7354_vm13, %v5817_v24, %v3099_v11  ;;  %v3101_v44 = vrot.slane %v3099_v11, 4  ;;  %v6889_v42 = vld [vmem:[#allocation3 + $0x258] ss:$36 sps:$4 sm:$0xff]   ;;  %6545 = vmatprep.mubr.bf16.mxu0 %v6892_v50  ;;  %v6216_v4 = vadd.f32 %v7999_v41, %v7968_v48  ;;  %v3109_v30 = vrot.slane %v2990_v59, 5  ;;  %v2509_v48 = vld [vmem:[#allocation2 + $0x98] sm:$0x1]  ;;  %v6226_v59 = vpop.f32.mrf.mxu1 }
 0x1cc   : > { %v2749_v14 = vrot.slane %v2748_v56, 4  ;;  %v2759_v27 = vrot.slane %v2758_v36, 4  ;;  %3221 = vst [vmem:[#allocation3 + $0x140] sm:$0xf] %v3100_v25  ;;  %v6891_v31 = vld [vmem:[#allocation3 + $0x25c] ss:$36 sps:$4 sm:$0xff]   ;;  %v3107_v35 = vsel %vm7354_vm13, %v5818_v22, %v3106_v15  ;;  %v6222_v11 = vadd.f32 %v6221_v23, %v8053_v58 }
 0x1cd   : > { %v6893_v49 = vld [vmem:[#allocation3 + $0xf8] ss:$36 sps:$4 sm:$0xff]   ;;  %v3103_v9 = vsel %vm7354_vm13, %v3101_v44, %v3102_v10  ;;  %v3108_v24 = vrot.slane %v3106_v15, 4  ;;  %3223 = vst [vmem:[#allocation3 + $0x188] sm:$0xf] %v3107_v35  ;;  %5303 = vmatprep.mubr.bf16.mxu1 %v6891_v31  ;;  %v8097_v41 = vadd.f32 %v6216_v4, %v8030_v7  ;;  %v2785_v12 = vshll.u32 %v2509_v48, 16 }
 0x1ce   : > { %v2754_v26 = vsel %vm7142_vm6, %v2749_v14, %v2753_v19  ;;  %v2764_v21 = vsel %vm7142_vm6, %v2759_v27, %v2763_v37  ;;  %3222 = vst [vmem:[#allocation3 + $0x164] sm:$0xf] %v3103_v9  ;;  %v2433_v0 = vld [vmem:[#allocation2 + $0x90] sm:$0xf]  ;;  %v2434_v62 = vld [vmem:[#allocation2 + $0x94] sm:$0xf]  ;;  %v8099_v19 = vadd.f32 %v6133_v3, %v6132_v29  ;;  %v6219_v37 = vadd.f32 %v8025_v54, %v8014_v60 }
 0x1cf   : > { %2959 = vst [vmem:[#allocation3 + $0x2a4] sm:$0xf] %v2754_v26  ;;  %2960 = vst [vmem:[#allocation3 + $0x2c8] sm:$0xf] %v2764_v21  ;;  %v2507_v34 = vld [vmem:[#allocation2 + $0x90] sm:$0xf]  ;;  %5304 = vmatmul.mubr.bf16.gmra.mxu1 %v6889_v42  ;;  %6546 = vmatmul.mubr.bf16.gmra.mxu0 %v6893_v49  ;;  %v3110_v10 = vsel %vm7354_vm13, %v3108_v24, %v3109_v30  ;;  %v4815_v60 = vadd.f32 %v7989_v28, %v7852_v39  ;;  %v6227_v42 = vpop.f32.mrf.mxu1 }
 0x1d0   : > { %2465 = vst [vmem:[#allocation3 + $0x2e8] sm:$0xf] %v2433_v0  ;;  %2466 = vst [vmem:[#allocation3 + $0x30c] sm:$0xf] %v2434_v62  ;;  %v2508_v57 = vld [vmem:[#allocation2 + $0x94] sm:$0xf]  ;;  %v8109_v54 = vadd.f32 %v6219_v37, %v8066_v40  ;;  %v8111_v26 = vadd.f32 %v6222_v11, %v4810_v38  ;;  %v6225_v28 = vadd.f32 %v6224_v51, %v6223_v13  ;;  %v6135_v13 = vpop.f32.mrf.mxu0 }
 0x1d1   : > { %v2766_v22 = vshrl.u32 %v2507_v34, 16  ;;  %v2769_v56 = vshll.u32 %v2507_v34, 16  ;;  %v2775_v36 = vshll.u32 %v2508_v57, 16  ;;  %v2991_v45 = vld [vmem:[#allocation2 + $0x60] sm:$0xe]  ;;  %v2779_v7 = vshrl.u32 %v2508_v57, 16 }
 0x1d2   : > { %3224 = vst [vmem:[#allocation3 + $0x1ac] sm:$0xf] %v3110_v10  ;;  %v2992_v47 = vld [vmem:[#allocation2 + $0x64] sm:$0xf]  ;;  %v2993_v50 = vld [vmem:[#allocation2 + $0x68] sm:$0x1]  ;;  %v4818_v30 = vadd.f32 %v6116_v20, %v7852_v39  ;;  %v6228_v0 = vadd.f32 %v6227_v42, %v6226_v59  ;;  %v8116_v57 = vadd.f32 %v6225_v28, %v4815_v60  ;;  %v4823_v28 = vadd.f32 %v8021_v8, %v7852_v39 }
 0x1d3   : > { %v2768_v58 = vrot.slane %v2766_v22, 4  ;;  %v2771_v23 = vrot.slane %v2769_v56, 5  ;;  %v2777_v25 = vrot.slane %v2775_v36, 5  ;;  %v5819_v44 = vrot.slane %v2991_v45, 9  ;;  %v2994_v15 = vld [vmem:[#allocation2 + $0x6c] sm:$0xe] }
 0x1d4   : > { %v2781_v14 = vrot.slane %v2779_v7, 4  ;;  %v2787_v27 = vrot.slane %v2785_v12, 5  ;;  %v3113_v29 = vrot.slane %v2992_v47, 5  ;;  %v3116_v31 = vrot.slane %v2993_v50, 5  ;;  %v2995_v9 = vld [vmem:[#allocation2 + $0x70] sm:$0xf]  ;;  %v6136_v47 = vpop.f32.mrf.mxu0 }
 0x1d5   : > { %v2772_v49 = vor.u32 %v2771_v23, %v2768_v58  ;;  %v2996_v35 = vld [vmem:[#allocation2 + $0x74] sm:$0x1]  ;;  %v5820_v4 = vrot.slane %v2994_v15, 9  ;;  %v6897_v21 = vld [vmem:[#allocation3 + $0x140] ss:$36 sps:$4 sm:$0xff]   ;;  %v3120_v38 = vrot.slane %v2995_v9, 5  ;;  %v8118_v51 = vadd.f32 %v6228_v0, %v4818_v30 }
 0x1d6   : > { %v2782_v40 = vor.u32 %v2781_v14, %v2777_v25  ;;  %v3114_v24 = vsel %vm7354_vm13, %v5819_v44, %v3113_v29  ;;  %v6894_v62 = vld [vmem:[#allocation3 + $0x2a0] ss:$36 sps:$4 sm:$0xff]   ;;  %v3115_v34 = vrot.slane %v3113_v29, 4  ;;  %6549 = vmatprep.mubr.bf16.mxu0 %v6897_v21  ;;  %v3123_v11 = vrot.slane %v2996_v35, 5  ;;  %v2436_v7 = vld [vmem:[#allocation2 + $0xa0] sm:$0xf]  ;;  %v6229_v44 = vpop.f32.mrf.mxu1 }
 0x1d7   : > { %v2773_v3 = vrot.slane %v2772_v49, 4  ;;  %3225 = vst [vmem:[#allocation3 + $0x1d0] sm:$0xf] %v3114_v24  ;;  %v6896_v48 = vld [vmem:[#allocation3 + $0x2a4] ss:$36 sps:$4 sm:$0xff]   ;;  %v3121_v45 = vsel %vm7354_vm13, %v5820_v4, %v3120_v38  ;;  %v3122_v59 = vrot.slane %v3120_v38, 4 }
 0x1d8   : > { %v2783_v37 = vrot.slane %v2782_v40, 4  ;;  %v3117_v20 = vsel %vm7354_vm13, %v3115_v34, %v3116_v31  ;;  %v2435_v56 = vld [vmem:[#allocation2 + $0x9c] sm:$0xf]  ;;  %5311 = vmatprep.mubr.bf16.mxu1 %v6896_v48  ;;  %3227 = vst [vmem:[#allocation3 + $0x218] sm:$0xf] %v3121_v45  ;;  %v6138_v31 = vpop.f32.mrf.mxu0  ;;  %v6230_v21 = vpop.f32.mrf.mxu1 }
 0x1d9   : > { %v6898_v10 = vld [vmem:[#allocation3 + $0x188] ss:$36 sps:$4 sm:$0xff]   ;;  %v2778_v22 = vsel %vm7142_vm6, %v2773_v3, %v2777_v25  ;;  %3226 = vst [vmem:[#allocation3 + $0x1f4] sm:$0xf] %v3117_v20  ;;  %2467 = vst [vmem:[#allocation3 + $0x330] sm:$0xf] %v2435_v56  ;;  %5312 = vmatmul.mubr.bf16.gmra.mxu1 %v6894_v62  ;;  %v8128_v25 = vadd.f32 %v6136_v47, %v6135_v13  ;;  %v3124_v15 = vsel %vm7354_vm13, %v3122_v59, %v3123_v11 }
 0x1da   : > { %v2788_v36 = vsel %vm7142_vm6, %v2783_v37, %v2787_v27  ;;  %2961 = vst [vmem:[#allocation3 + $0x2ec] sm:$0xf] %v2778_v22  ;;  %v2510_v12 = vld [vmem:[#allocation2 + $0x9c] sm:$0xf]  ;;  %6550 = vmatmul.mubr.bf16.gmra.mxu0 %v6898_v10  ;;  %2468 = vst [vmem:[#allocation3 + $0x354] sm:$0xf] %v2436_v7  ;;  %v6139_v62 = vpop.f32.mrf.mxu0  ;;  %v6232_v13 = vpop.f32.mrf.mxu1  ;;  %v6231_v8 = vadd.f32 %v6230_v21, %v6229_v44 }
 0x1db   : > { %2962 = vst [vmem:[#allocation3 + $0x310] sm:$0xf] %v2788_v36  ;;  %v2511_v50 = vld [vmem:[#allocation2 + $0xa0] sm:$0xf]  ;;  %v2512_v60 = vld [vmem:[#allocation2 + $0xa4] sm:$0x1]  ;;  %v8134_v11 = vadd.f32 %v6139_v62, %v6138_v31 }
 0x1dc   : > { %v2790_v58 = vshrl.u32 %v2510_v12, 16  ;;  %v2793_v23 = vshll.u32 %v2510_v12, 16  ;;  %v2799_v42 = vshll.u32 %v2511_v50, 16  ;;  %v2803_v14 = vshrl.u32 %v2511_v50, 16  ;;  %v2997_v29 = vld [vmem:[#allocation2 + $0x78] sm:$0xe]  ;;  %v6293_v39 = vpop.f32.mrf.mxu0  ;;  %v6233_v50 = vpop.f32.mrf.mxu1 }
 0x1dd   : > { %v2809_v27 = vshll.u32 %v2512_v60, 16  ;;  %3228 = vst [vmem:[#allocation3 + $0x23c] sm:$0xf] %v3124_v15  ;;  %v2998_v35 = vld [vmem:[#allocation2 + $0x7c] sm:$0xf]  ;;  %v5821_v0 = vrot.slane %v2997_v29, 9 }
 0x1de   : > { %v2792_v49 = vrot.slane %v2790_v58, 4  ;;  %v2795_v9 = vrot.slane %v2793_v23, 5  ;;  %v2999_v4 = vld [vmem:[#allocation2 + $0x80] sm:$0x1]  ;;  %v2801_v40 = vrot.slane %v2799_v42, 5  ;;  %v2805_v24 = vrot.slane %v2803_v14, 4  ;;  %v6294_v15 = vpop.f32.mrf.mxu0 }
 0x1df   : > { %v2811_v30 = vrot.slane %v2809_v27, 5  ;;  %v3127_v34 = vrot.slane %v2998_v35, 5  ;;  %v3130_v48 = vrot.slane %v2999_v4, 5  ;;  %v3000_v37 = vld [vmem:[#allocation2 + $0x84] sm:$0xe]  ;;  %v8147_v42 = vadd.f32 %v6231_v8, %v4823_v28 }
 0x1e0   : > { %v2796_v3 = vor.u32 %v2795_v9, %v2792_v49  ;;  %v3001_v38 = vld [vmem:[#allocation2 + $0x88] sm:$0xf]  ;;  %v2806_v10 = vor.u32 %v2805_v24, %v2801_v40  ;;  %v3002_v22 = vld [vmem:[#allocation2 + $0x8c] sm:$0x1]  ;;  %v5822_v20 = vrot.slane %v3000_v37, 9  ;;  %v6234_v14 = vadd.f32 %v6233_v50, %v6232_v13  ;;  %v6296_v21 = vpop.f32.mrf.mxu0 }
 0x1e1   : > { %v3134_v56 = vrot.slane %v3001_v38, 5  ;;  %v2437_v36 = vld [vmem:[#allocation2 + $0xa8] sm:$0xf]  ;;  %v3128_v7 = vsel %vm7354_vm13, %v5821_v0, %v3127_v34  ;;  %v8141_v12 = vld [vmem:[%s8590_s2] ss:$0 sm:$0xff]  ;;  %v3129_v29 = vrot.slane %v3127_v34, 4  ;;  %v6295_v4 = vadd.f32 %v6294_v15, %v6293_v39 }
 0x1e2   : > { %v6902_v45 = vld [vmem:[#allocation3 + $0x1d0] ss:$36 sps:$4 sm:$0xff]   ;;  %v2797_v59 = vrot.slane %v2796_v3, 4  ;;  %v4826_v47 = vadd.f32 %v8141_v12, %v8040_v18  ;;  %2469 = vst [vmem:[#allocation3 + $0x378] sm:$0xf] %v2437_v36  ;;  %v2807_v23 = vrot.slane %v2806_v10, 4 }
 0x1e3   : > { %v6899_v60 = vld [vmem:[#allocation3 + $0x2e8] ss:$36 sps:$4 sm:$0xff]   ;;  %3229 = vst [vmem:[#allocation3 + $0x260] sm:$0xf] %v3128_v7  ;;  %v3135_v44 = vsel %vm7354_vm13, %v5822_v20, %v3134_v56  ;;  %6553 = vmatprep.mubr.bf16.mxu0 %v6902_v45  ;;  %v3136_v31 = vrot.slane %v3134_v56, 4  ;;  %v3137_v18 = vrot.slane %v3002_v22, 5  ;;  %v6297_v22 = vpop.f32.mrf.mxu0  ;;  %v8162_v8 = vadd.f32 %v6295_v4, %v7885_v53 }
 0x1e4   : > { %v6901_v58 = vld [vmem:[#allocation3 + $0x2ec] ss:$36 sps:$4 sm:$0xff]   ;;  %v2802_v27 = vsel %vm7142_vm6, %v2797_v59, %v2801_v40  ;;  %3231 = vst [vmem:[#allocation3 + $0x2a8] sm:$0xf] %v3135_v44  ;;  %v6903_v49 = vld [vmem:[#allocation3 + $0x218] ss:$36 sps:$4 sm:$0xff]   ;;  %v2812_v9 = vsel %vm7142_vm6, %v2807_v23, %v2811_v30  ;;  %v8153_v28 = vadd.f32 %v6234_v14, %v4826_v47  ;;  %v3131_v40 = vsel %vm7354_vm13, %v3129_v29, %v3130_v48  ;;  %v6235_v48 = vpop.f32.mrf.mxu1 }
 0x1e5   : > { %5319 = vmatprep.mubr.bf16.mxu1 %v6901_v58  ;;  %2963 = vst [vmem:[#allocation3 + $0x334] sm:$0xf] %v2802_v27  ;;  %v2438_v35 = vld [vmem:[#allocation2 + $0xac] sm:$0xf]  ;;  %2964 = vst [vmem:[#allocation3 + $0x358] sm:$0xf] %v2812_v9  ;;  %v3138_v24 = vsel %vm7354_vm13, %v3136_v31, %v3137_v18  ;;  %v4831_v30 = vadd.f32 %v8141_v12, %v8051_v16  ;;  %6554 = vmatmul.mubr.bf16.gmra.mxu0 %v6903_v49 }
 0x1e6   : > { %5320 = vmatmul.mubr.bf16.gmra.mxu1 %v6899_v60  ;;  %2470 = vst [vmem:[#allocation3 + $0x39c] sm:$0xf] %v2438_v35  ;;  %v2513_v0 = vld [vmem:[#allocation2 + $0xa8] sm:$0xf]  ;;  %v2514_v62 = vld [vmem:[#allocation2 + $0xac] sm:$0xf]  ;;  %v6298_v45 = vadd.f32 %v6297_v22, %v6296_v21  ;;  %v6299_v60 = vpop.f32.mrf.mxu0  ;;  %v6236_v58 = vpop.f32.mrf.mxu1 }
 0x1e7   : > { %v2515_v3 = vld [vmem:[#allocation2 + $0xb0] sm:$0x1]  ;;  %3230 = vst [vmem:[#allocation3 + $0x284] sm:$0xf] %v3131_v40  ;;  %3232 = vst [vmem:[#allocation3 + $0x2cc] sm:$0xf] %v3138_v24  ;;  %v6237_v9 = vadd.f32 %v6236_v58, %v6235_v48 }
 0x1e8   : > { %v2814_v34 = vshrl.u32 %v2513_v0, 16  ;;  %v2817_v37 = vshll.u32 %v2513_v0, 16  ;;  %v2823_v38 = vshll.u32 %v2514_v62, 16  ;;  %v2827_v13 = vshrl.u32 %v2514_v62, 16  ;;  %v3003_v10 = vld [vmem:[#allocation2 + $0x90] sm:$0xe]  ;;  %v6300_v53 = vpop.f32.mrf.mxu0  ;;  %v6238_v35 = vpop.f32.mrf.mxu1 }
 0x1e9   : > { %v2833_v20 = vshll.u32 %v2515_v3, 16  ;;  %v3004_v56 = vld [vmem:[#allocation2 + $0x94] sm:$0xf]  ;;  %v3005_v36 = vld [vmem:[#allocation2 + $0x98] sm:$0x1]  ;;  %v5823_v39 = vrot.slane %v3003_v10, 9  ;;  %v8165_v49 = vadd.f32 %v6298_v45, %v7917_v63 }
 0x1ea   : > { %v2816_v59 = vrot.slane %v2814_v34, 4  ;;  %v2819_v16 = vrot.slane %v2817_v37, 5  ;;  %v2825_v7 = vrot.slane %v2823_v38, 5  ;;  %v2829_v47 = vrot.slane %v2827_v13, 4  ;;  %v3006_v50 = vld [vmem:[#allocation2 + $0x9c] sm:$0xe]  ;;  %v6302_v38 = vpop.f32.mrf.mxu0  ;;  %v6239_v63 = vpop.f32.mrf.mxu1 }
 0x1eb   : > { %v2835_v23 = vrot.slane %v2833_v20, 5  ;;  %v3141_v44 = vrot.slane %v3004_v56, 5  ;;  %v3144_v15 = vrot.slane %v3005_v36, 5  ;;  %v5824_v14 = vrot.slane %v3006_v50, 9  ;;  %v3007_v31 = vld [vmem:[#allocation2 + $0xa0] sm:$0xf] }
 0x1ec   : > { %v2820_v27 = vor.u32 %v2819_v16, %v2816_v59  ;;  %v2830_v29 = vor.u32 %v2829_v47, %v2825_v7  ;;  %v3008_v18 = vld [vmem:[#allocation2 + $0xa4] sm:$0x1]  ;;  %v3148_v40 = vrot.slane %v3007_v31, 5  ;;  %v2439_v0 = vld [vmem:[#allocation2 + $0xb4] sm:$0xf]  ;;  %v6301_v37 = vadd.f32 %v6300_v53, %v6299_v60  ;;  %v6303_v47 = vpop.f32.mrf.mxu0 }
 0x1ed   : > { %v3142_v4 = vsel %vm7354_vm13, %v5823_v39, %v3141_v44  ;;  %v3143_v21 = vrot.slane %v3141_v44, 4  ;;  %v3151_v24 = vrot.slane %v3008_v18, 5  ;;  %v6904_v62 = vld [vmem:[#allocation3 + $0x330] ss:$36 sps:$4 sm:$0xff]   ;;  %2471 = vst [vmem:[#allocation3 + $0x3c0] sm:$0xf] %v2439_v0  ;;  %v8169_v13 = vadd.f32 %v6237_v9, %v4831_v30 }
 0x1ee   : > { %v6906_v3 = vld [vmem:[#allocation3 + $0x334] ss:$36 sps:$4 sm:$0xff]   ;;  %v2821_v34 = vrot.slane %v2820_v27, 4  ;;  %3233 = vst [vmem:[#allocation3 + $0x2f0] sm:$0xf] %v3142_v4  ;;  %v3149_v48 = vsel %vm7354_vm13, %v5824_v14, %v3148_v40  ;;  %v4834_v20 = vadd.f32 %v8141_v12, %v8072_v55  ;;  %v6240_v56 = vadd.f32 %v6239_v63, %v6238_v35  ;;  %v6305_v18 = vpop.f32.mrf.mxu0 }
 0x1ef   : > { %v6907_v10 = vld [vmem:[#allocation3 + $0x260] ss:$36 sps:$4 sm:$0xff]   ;;  %v3145_v22 = vsel %vm7354_vm13, %v3143_v21, %v3144_v15  ;;  %5327 = vmatprep.mubr.bf16.mxu1 %v6906_v3  ;;  %v6908_v36 = vld [vmem:[#allocation3 + $0x2a8] ss:$36 sps:$4 sm:$0xff]   ;;  %v2831_v45 = vrot.slane %v2830_v29, 4  ;;  %v3150_v30 = vrot.slane %v3148_v40, 4  ;;  %v8180_v16 = vadd.f32 %v6301_v37, %v7933_v32 }
 0x1f0   : > { %v2826_v39 = vsel %vm7142_vm6, %v2821_v34, %v2825_v7  ;;  %3234 = vst [vmem:[#allocation3 + $0x314] sm:$0xf] %v3145_v22  ;;  %3235 = vst [vmem:[#allocation3 + $0x338] sm:$0xf] %v3149_v48  ;;  %v2440_v59 = vld [vmem:[#allocation2 + $0xb8] sm:$0xf]  ;;  %5328 = vmatmul.mubr.bf16.gmra.mxu1 %v6904_v62  ;;  %6557 = vmatprep.mubr.bf16.mxu0 %v6907_v10  ;;  %v6304_v58 = vadd.f32 %v6303_v47, %v6302_v38  ;;  %v6241_v7 = vpop.f32.mrf.mxu1  ;;  %v6306_v37 = vpop.f32.mrf.mxu0 }
 0x1f1   : > { %2965 = vst [vmem:[#allocation3 + $0x37c] sm:$0xf] %v2826_v39  ;;  %2472 = vst [vmem:[#allocation3 + $0x3e4] sm:$0xf] %v2440_v59  ;;  %v2516_v55 = vld [vmem:[#allocation2 + $0xb4] sm:$0xf]  ;;  %v8182_v44 = vadd.f32 %v6240_v56, %v4834_v20  ;;  %6558 = vmatmul.mubr.bf16.gmra.mxu0 %v6908_v36  ;;  %v2836_v15 = vsel %vm7142_vm6, %v2831_v45, %v2835_v23  ;;  %v3152_v32 = vsel %vm7354_vm13, %v3150_v30, %v3151_v24 }
 0x1f2   : > { %v2517_v50 = vld [vmem:[#allocation2 + $0xb8] sm:$0xf]  ;;  %v2518_v60 = vld [vmem:[#allocation2 + $0xbc] sm:$0x1]  ;;  %v2838_v14 = vshrl.u32 %v2516_v55, 16  ;;  %v2841_v27 = vshll.u32 %v2516_v55, 16  ;;  %v6242_v40 = vpop.f32.mrf.mxu1  ;;  %v6308_v59 = vpop.f32.mrf.mxu0 }
 0x1f3   : > { %v3009_v29 = vld [vmem:[#allocation2 + $0xa8] sm:$0xe]  ;;  %v3010_v31 = vld [vmem:[#allocation2 + $0xac] sm:$0xf]  ;;  %2966 = vst [vmem:[#allocation3 + $0x3a0] sm:$0xf] %v2836_v15  ;;  %v6243_v15 = vadd.f32 %v6242_v40, %v6241_v7 }
 0x1f4   : > { %3236 = vst [vmem:[#allocation3 + $0x35c] sm:$0xf] %v3152_v32  ;;  %v2847_v53 = vshll.u32 %v2517_v50, 16  ;;  %v2851_v9 = vshrl.u32 %v2517_v50, 16  ;;  %v2857_v35 = vshll.u32 %v2518_v60, 16  ;;  %v5825_v21 = vrot.slane %v3009_v29, 9  ;;  %v6244_v22 = vpop.f32.mrf.mxu1 }
 0x1f5   : > { %v3011_v4 = vld [vmem:[#allocation2 + $0xb0] sm:$0x1]  ;;  %v2840_v0 = vrot.slane %v2838_v14, 4  ;;  %v2843_v62 = vrot.slane %v2841_v27, 5  ;;  %v3155_v3 = vrot.slane %v3010_v31, 5  ;;  %v8618_v45 = vld [vmem:[#allocation19_spill] sm:$0xff]  ;;  %v4839_v50 = vadd.f32 %v8141_v12, %v8078_v52 }
 0x1f6   : > { %v3158_v23 = vrot.slane %v3011_v4, 5  ;;  %v3012_v34 = vld [vmem:[#allocation2 + $0xb4] sm:$0xe]  ;;  %v2849_v24 = vrot.slane %v2847_v53, 5  ;;  %v2853_v38 = vrot.slane %v2851_v9, 4  ;;  %v2859_v63 = vrot.slane %v2857_v35, 5  ;;  %v6245_v32 = vpop.f32.mrf.mxu1  ;;  %v6309_v9 = vpop.f32.mrf.mxu0 }
 0x1f7   : > { %v5826_v10 = vrot.slane %v3012_v34, 9  ;;  %v2844_v48 = vor.u32 %v2843_v62, %v2840_v0  ;;  %v3156_v20 = vsel %vm7354_vm13, %v5825_v21, %v3155_v3  ;;  %v3157_v56 = vrot.slane %v3155_v3, 4  ;;  %v3013_v36 = vld [vmem:[#allocation2 + $0xb8] sm:$0xf]  ;;  %v3014_v39 = vld [vmem:[#allocation2 + $0xbc] sm:$0x1] }
 0x1f8   : > { %v8191_v30 = vadd.f32 %v6304_v58, %v8618_v45  ;;  %v6912_v47 = vld [vmem:[#allocation3 + $0x2f0] ss:$36 sps:$4 sm:$0xff]   ;;  %v2854_v55 = vor.u32 %v2853_v38, %v2849_v24  ;;  %3237 = vst [vmem:[#allocation3 + $0x380] sm:$0xf] %v3156_v20  ;;  %v6307_v60 = vadd.f32 %v6306_v37, %v6305_v18  ;;  %v3162_v29 = vrot.slane %v3013_v36, 5 }
 0x1f9   : > { %v2845_v14 = vrot.slane %v2844_v48, 4  ;;  %v3159_v27 = vsel %vm7354_vm13, %v3157_v56, %v3158_v23  ;;  %v3165_v31 = vrot.slane %v3014_v39, 5  ;;  %v2441_v53 = vld [vmem:[#allocation2 + $0xc0] sm:$0xf]  ;;  %6561 = vmatprep.mubr.bf16.mxu0 %v6912_v47  ;;  %v2442_v35 = vld [vmem:[#allocation2 + $0xc4] sm:$0xf]  ;;  %v6310_v52 = vadd.f32 %v6309_v9, %v6308_v59  ;;  %v6311_v23 = vpop.f32.mrf.mxu0 }
 0x1fa   : > { %v2855_v58 = vrot.slane %v2854_v55, 4  ;;  %3238 = vst [vmem:[#allocation3 + $0x3a4] sm:$0xf] %v3159_v27  ;;  %2473 = vst [vmem:[#allocation3 + $0x408] sm:$0xf] %v2441_v53  ;;  %v8198_v21 = vadd.f32 %v6307_v60, %v7977_v61  ;;  %v8200_v7 = vadd.f32 %v6243_v15, %v4839_v50  ;;  %v3163_v62 = vsel %vm7354_vm13, %v5826_v10, %v3162_v29 }
 0x1fb   : > { %v2519_v4 = vld [vmem:[#allocation2 + $0xc0] sm:$0xf]  ;;  %v6909_v18 = vld [vmem:[#allocation3 + $0x378] ss:$36 sps:$4 sm:$0xff]   ;;  %v2850_v0 = vsel %vm7142_vm6, %v2845_v14, %v2849_v24  ;;  %v3164_v3 = vrot.slane %v3162_v29, 4  ;;  %v6246_v34 = vadd.f32 %v6245_v32, %v6244_v22  ;;  %v4842_v38 = vadd.f32 %v8141_v12, %v8099_v19  ;;  %v6312_v39 = vpop.f32.mrf.mxu0  ;;  %v6247_v14 = vpop.f32.mrf.mxu1 }
 0x1fc   : > { %v6911_v40 = vld [vmem:[#allocation3 + $0x37c] ss:$36 sps:$4 sm:$0xff]   ;;  %2474 = vst [vmem:[#allocation3 + $0x42c] sm:$0xf] %v2442_v35  ;;  %v2860_v61 = vsel %vm7142_vm6, %v2855_v58, %v2859_v63  ;;  %2967 = vst [vmem:[#allocation3 + $0x3c4] sm:$0xf] %v2850_v0  ;;  %v8211_v20 = vadd.f32 %v6310_v52, %v8010_v6  ;;  %v6313_v47 = vadd.f32 %v6312_v39, %v6311_v23 }
 0x1fd   : > { %v6913_v37 = vld [vmem:[#allocation3 + $0x338] ss:$36 sps:$4 sm:$0xff]   ;;  %3239 = vst [vmem:[#allocation3 + $0x3c8] sm:$0xf] %v3163_v62  ;;  %v2520_v48 = vld [vmem:[#allocation2 + $0xc4] sm:$0xf]  ;;  %5335 = vmatprep.mubr.bf16.mxu1 %v6911_v40  ;;  %v3166_v24 = vsel %vm7354_vm13, %v3164_v3, %v3165_v31  ;;  %v8215_v6 = vadd.f32 %v6246_v34, %v4842_v38  ;;  %v6314_v32 = vpop.f32.mrf.mxu0 }
 0x1fe   : > { %2968 = vst [vmem:[#allocation3 + $0x3e8] sm:$0xf] %v2860_v61  ;;  %v2521_v10 = vld [vmem:[#allocation2 + $0xc8] sm:$0x1]  ;;  %v2862_v22 = vshrl.u32 %v2519_v4, 16  ;;  %v2865_v56 = vshll.u32 %v2519_v4, 16  ;;  %5336 = vmatmul.mubr.bf16.gmra.mxu1 %v6909_v18  ;;  %6562 = vmatmul.mubr.bf16.gmra.mxu0 %v6913_v37  ;;  %v8218_v53 = vadd.f32 %v6313_v47, %v8017_v43  ;;  %v6248_v18 = vpop.f32.mrf.mxu1  ;;  %v4847_v43 = vadd.f32 %v8141_v12, %v8128_v25 }
 0x1ff   : > { %v2871_v36 = vshll.u32 %v2520_v48, 16  ;;  %3240 = vst [vmem:[#allocation3 + $0x3ec] sm:$0xf] %v3166_v24  ;;  %v2875_v63 = vshrl.u32 %v2520_v48, 16  ;;  %v2881_v45 = vshll.u32 %v2521_v10, 16  ;;  %v6315_v52 = vpop.f32.mrf.mxu0  ;;  %v6249_v38 = vadd.f32 %v6248_v18, %v6247_v14  ;;  %v8619_v14 = vld [vmem:[#allocation8_spill] sm:$0xff] }
 0x200   : > { %v3015_v19 = vld [vmem:[#allocation2 + $0xc0] sm:$0xe]  ;;  %v3016_v59 = vld [vmem:[#allocation2 + $0xc4] sm:$0xf]  ;;  %v2864_v55 = vrot.slane %v2862_v22, 4  ;;  %v2867_v50 = vrot.slane %v2865_v56, 5  ;;  %v6316_v34 = vadd.f32 %v6315_v52, %v6314_v32  ;;  %v6250_v48 = vpop.f32.mrf.mxu1 }
 0x201   : > { %v2873_v60 = vrot.slane %v2871_v36, 5  ;;  %v5827_v15 = vrot.slane %v3015_v19, 9  ;;  %v2877_v27 = vrot.slane %v2875_v63, 4  ;;  %v3017_v29 = vld [vmem:[#allocation2 + $0xc8] sm:$0x1]  ;;  %v3169_v31 = vrot.slane %v3016_v59, 5 }
 0x202   : > { %v6917_v9 = vld [vmem:[#allocation3 + $0x380] ss:$36 sps:$4 sm:$0xff]   ;;  %v2868_v58 = vor.u32 %v2867_v50, %v2864_v55  ;;  %v2883_v35 = vrot.slane %v2881_v45, 5  ;;  %v3172_v4 = vrot.slane %v3017_v29, 5  ;;  %v3018_v3 = vld [vmem:[#allocation2 + $0xcc] sm:$0xe]  ;;  %v8227_v36 = vadd.f32 %v6316_v34, %v8049_v17  ;;  %v6251_v59 = vpop.f32.mrf.mxu1  ;;  %v6317_v17 = vpop.f32.mrf.mxu0 }
 0x203   : > { %v2878_v40 = vor.u32 %v2877_v27, %v2873_v60  ;;  %v3170_v0 = vsel %vm7354_vm13, %v5827_v15, %v3169_v31  ;;  %v3171_v62 = vrot.slane %v3169_v31, 4  ;;  %v3019_v23 = vld [vmem:[#allocation2 + $0xd0] sm:$0xf]  ;;  %6565 = vmatprep.mubr.bf16.mxu0 %v6917_v9  ;;  %v3020_v61 = vld [vmem:[#allocation2 + $0xd4] sm:$0x1]  ;;  %v5828_v45 = vrot.slane %v3018_v3, 9 }
 0x204   : > { %v2869_v37 = vrot.slane %v2868_v58, 4  ;;  %3241 = vst [vmem:[#allocation3 + $0x410] sm:$0xf] %v3170_v0  ;;  %v6914_v24 = vld [vmem:[#allocation3 + $0x3c0] ss:$36 sps:$4 sm:$0xff]   ;;  %v3176_v25 = vrot.slane %v3019_v23, 5  ;;  %v8231_v19 = vadd.f32 %v6249_v38, %v4847_v43  ;;  %v6252_v32 = vadd.f32 %v6251_v59, %v6250_v48  ;;  %v6318_v3 = vpop.f32.mrf.mxu0 }
 0x205   : > { %v6916_v10 = vld [vmem:[#allocation3 + $0x3c4] ss:$36 sps:$4 sm:$0xff]   ;;  %v2879_v22 = vrot.slane %v2878_v40, 4  ;;  %v3173_v56 = vsel %vm7354_vm13, %v3171_v62, %v3172_v4  ;;  %v3179_v55 = vrot.slane %v3020_v61, 5  ;;  %v2443_v50 = vld [vmem:[#allocation2 + $0xcc] sm:$0xf]  ;;  %v4850_v9 = vadd.f32 %v8141_v12, %v8134_v11  ;;  %v6253_v4 = vpop.f32.mrf.mxu1 }
 0x206   : > { %v6918_v39 = vld [vmem:[#allocation3 + $0x3c8] ss:$36 sps:$4 sm:$0xff]   ;;  %v2874_v63 = vsel %vm7142_vm6, %v2869_v37, %v2873_v60  ;;  %3242 = vst [vmem:[#allocation3 + $0x434] sm:$0xf] %v3173_v56  ;;  %5343 = vmatprep.mubr.bf16.mxu1 %v6916_v10  ;;  %v2444_v15 = vld [vmem:[#allocation2 + $0xd0] sm:$0xf]  ;;  %v3177_v60 = vsel %vm7354_vm13, %v5828_v45, %v3176_v25  ;;  %v6319_v37 = vadd.f32 %v6318_v3, %v6317_v17  ;;  %v6320_v10 = vpop.f32.mrf.mxu0 }
 0x207   : > { %v2884_v47 = vsel %vm7142_vm6, %v2879_v22, %v2883_v35  ;;  %2969 = vst [vmem:[#allocation3 + $0x40c] sm:$0xf] %v2874_v63  ;;  %v8620_v27 = vld [vmem:[#allocation9_spill] sm:$0xff]  ;;  %5344 = vmatmul.mubr.bf16.gmra.mxu1 %v6914_v24  ;;  %6566 = vmatmul.mubr.bf16.gmra.mxu0 %v6918_v39  ;;  %v3178_v31 = vrot.slane %v3176_v25, 4  ;;  %2475 = vst [vmem:[#allocation3 + $0x450] sm:$0xf] %v2443_v50  ;;  %v8243_v43 = vadd.f32 %v6252_v32, %v4850_v9  ;;  %v6254_v11 = vpop.f32.mrf.mxu1 }
 0x208   : > { %v6146_v29 = vadd.f32 %v8620_v27, %v8619_v14  ;;  %2970 = vst [vmem:[#allocation3 + $0x430] sm:$0xf] %v2884_v47  ;;  %2476 = vst [vmem:[#allocation3 + $0x474] sm:$0xf] %v2444_v15  ;;  %v2522_v58 = vld [vmem:[#allocation2 + $0xcc] sm:$0xf]  ;;  %v8248_v39 = vadd.f32 %v6319_v37, %v8060_v5  ;;  %v6255_v63 = vadd.f32 %v6254_v11, %v6253_v4  ;;  %v6321_v47 = vpop.f32.mrf.mxu0 }
 0x209   : > { %v2523_v35 = vld [vmem:[#allocation2 + $0xd0] sm:$0xf]  ;;  %3243 = vst [vmem:[#allocation3 + $0x458] sm:$0xf] %v3177_v60  ;;  %v2524_v52 = vld [vmem:[#allocation2 + $0xd4] sm:$0x1]  ;;  %v3180_v23 = vsel %vm7354_vm13, %v3178_v31, %v3179_v55  ;;  %v6256_v1 = vpop.f32.mrf.mxu1  ;;  %v6322_v50 = vadd.f32 %v6321_v47, %v6320_v10 }
 0x20a   : > { %v2886_v18 = vshrl.u32 %v2522_v58, 16  ;;  %v2889_v40 = vshll.u32 %v2522_v58, 16  ;;  %v2895_v0 = vshll.u32 %v2523_v35, 16  ;;  %v2899_v62 = vshrl.u32 %v2523_v35, 16  ;;  %3244 = vst [vmem:[#allocation3 + $0x47c] sm:$0xf] %v3180_v23  ;;  %v6323_v35 = vpop.f32.mrf.mxu0 }
 0x20b   : > { %v2905_v34 = vshll.u32 %v2524_v52, 16  ;;  %v8621_v22 = vld [vmem:[#allocation7_spill] sm:$0xff]  ;;  %v6257_v17 = vpop.f32.mrf.mxu1  ;;  %v4858_v32 = vadd.f32 %v8141_v12, %v6146_v29  ;;  %v6919_v14 = vld [vmem:[#allocation3 + $0x408] ss:$36 sps:$4 sm:$0xff]   ;;  %v8254_v9 = vadd.f32 %v6322_v50, %v8069_v46 }
 0x20c   : > { %v2888_v61 = vrot.slane %v2886_v18, 4  ;;  %v2891_v38 = vrot.slane %v2889_v40, 5  ;;  %v2897_v48 = vrot.slane %v2895_v0, 5  ;;  %v2901_v24 = vrot.slane %v2899_v62, 4  ;;  %v6324_v18 = vpop.f32.mrf.mxu0  ;;  %v8623_v11 = vld [vmem:[#allocation11_spill] sm:$0xff] }
 0x20d   : > { %v4855_v56 = vadd.f32 %v8141_v12, %v8621_v22  ;;  %v6922_v45 = vld [vmem:[#allocation3 + $0x410] ss:$36 sps:$4 sm:$0xff]   ;;  %v2907_v55 = vrot.slane %v2905_v34, 5  ;;  %v6258_v31 = vadd.f32 %v6257_v17, %v6256_v1  ;;  %v6325_v40 = vadd.f32 %v6324_v18, %v6323_v35  ;;  %v6259_v46 = vpop.f32.mrf.mxu1  ;;  %v8622_v34 = vld [vmem:[#allocation10_spill] sm:$0xff] }
 0x20e   : > { %v2892_v25 = vor.u32 %v2891_v38, %v2888_v61  ;;  %v2902_v59 = vor.u32 %v2901_v24, %v2897_v48  ;;  %6569 = vmatprep.mubr.bf16.mxu0 %v6922_v45  ;;  %v6326_v0 = vpop.f32.mrf.mxu0  ;;  %v4863_v37 = vadd.f32 %v8141_v12, %v8622_v34  ;;  %v8624_v61 = vld [vmem:[#allocation12_spill] sm:$0xff] }
 0x20f   : > { %v8250_v15 = vadd.f32 %v6255_v63, %v4855_v56  ;;  %v6921_v27 = vld [vmem:[#allocation3 + $0x40c] ss:$36 sps:$4 sm:$0xff]   ;;  %v8258_v4 = vadd.f32 %v6258_v31, %v4858_v32  ;;  %v8263_v62 = vadd.f32 %v6325_v40, %v8082_v2  ;;  %v6260_v23 = vpop.f32.mrf.mxu1  ;;  %v6152_v38 = vadd.f32 %v8624_v61, %v8623_v11 }
 0x210   : > { %v2893_v60 = vrot.slane %v2892_v25, 4  ;;  %v2903_v5 = vrot.slane %v2902_v59, 4  ;;  %5351 = vmatprep.mubr.bf16.mxu1 %v6921_v27  ;;  %v6327_v3 = vpop.f32.mrf.mxu0  ;;  %v6924_v10 = vld [vmem:[#allocation3 + $0x450] ss:$36 sps:$4 sm:$0xff]   ;;  %v8627_v27 = vld [vmem:[#allocation15_spill] sm:$0xff] }
 0x211   : > { %5352 = vmatmul.mubr.bf16.gmra.mxu1 %v6919_v14  ;;  %v6923_v52 = vld [vmem:[#allocation3 + $0x458] ss:$36 sps:$4 sm:$0xff]   ;;  %v6328_v33 = vadd.f32 %v6327_v3, %v6326_v0  ;;  %v6262_v24 = vpop.f32.mrf.mxu1  ;;  %v4866_v1 = vadd.f32 %v8141_v12, %v6152_v38  ;;  %v8625_v32 = vld [vmem:[#allocation13_spill] sm:$0xff] }
 0x212   : > { %v2898_v58 = vsel %vm7142_vm6, %v2893_v60, %v2897_v48  ;;  %v2908_v29 = vsel %vm7142_vm6, %v2903_v5, %v2907_v55  ;;  %6570 = vmatmul.mubr.bf16.gmra.mxu0 %v6923_v52  ;;  %v6261_v48 = vadd.f32 %v6260_v23, %v6259_v46  ;;  %v6329_v45 = vpop.f32.mrf.mxu0  ;;  %v4871_v14 = vadd.f32 %v8141_v12, %v8625_v32 }
 0x213   : > { %2971 = vst [vmem:[#allocation3 + $0x454] sm:$0xf] %v2898_v58  ;;  %2972 = vst [vmem:[#allocation3 + $0x478] sm:$0xf] %v2908_v29  ;;  %v8270_v56 = vadd.f32 %v6328_v33, %v8097_v41  ;;  %v6263_v2 = vpop.f32.mrf.mxu1  ;;  %v8626_v41 = vld [vmem:[#allocation14_spill] sm:$0xff] }
 0x214   : > { %v8272_v63 = vadd.f32 %v6261_v48, %v4863_v37  ;;  %v6264_v25 = vadd.f32 %v6263_v2, %v6262_v24  ;;  %v6330_v47 = vpop.f32.mrf.mxu0  ;;  %v6158_v60 = vadd.f32 %v8627_v27, %v8626_v41 }
 0x215   : > { %v6265_v59 = vpop.f32.mrf.mxu1  ;;  %v6331_v50 = vadd.f32 %v6330_v47, %v6329_v45  ;;  %v8629_v45 = vld [vmem:[#allocation17_spill] sm:$0xff] }
 0x216   : > { %v8275_v55 = vadd.f32 %v6264_v25, %v4866_v1  ;;  %v6332_v31 = vpop.f32.mrf.mxu0  ;;  %v4874_v0 = vadd.f32 %v8141_v12, %v6158_v60  ;;  %v8630_v25 = vld [vmem:[#allocation18_spill] sm:$0xff] }
 0x217   : > { %v6266_v17 = vpop.f32.mrf.mxu1  ;;  %v8282_v58 = vadd.f32 %v6331_v50, %v8109_v54 }
 0x218   : > { %v6267_v5 = vadd.f32 %v6266_v17, %v6265_v59  ;;  %v6333_v52 = vpop.f32.mrf.mxu0  ;;  %v6164_v59 = vadd.f32 %v8630_v25, %v8629_v45 }
 0x219   : > { %v6268_v35 = vpop.f32.mrf.mxu1  ;;  %v6334_v18 = vadd.f32 %v6333_v52, %v6332_v31 }
 0x21a   : > { %v6926_v22 = vld [vmem:[#allocation3 + $0x454] ss:$36 sps:$4 sm:$0xff]   ;;  %v8284_v29 = vadd.f32 %v6267_v5, %v4871_v14  ;;  %v6335_v23 = vpop.f32.mrf.mxu0  ;;  %v4882_v27 = vadd.f32 %v8141_v12, %v6164_v59 }
 0x21b   : > { %5359 = vmatprep.mubr.bf16.mxu1 %v6926_v22  ;;  %v6269_v40 = vpop.f32.mrf.mxu1  ;;  %v8288_v3 = vadd.f32 %v6334_v18, %v8111_v26  ;;  %v8628_v26 = vld [vmem:[#allocation16_spill] sm:$0xff] }
 0x21c   : > { %5360 = vmatmul.mubr.bf16.gmra.mxu1 %v6924_v10  ;;  %v6270_v46 = vadd.f32 %v6269_v40, %v6268_v35  ;;  %v6336_v37 = vpop.f32.mrf.mxu0  ;;  %v4879_v1 = vadd.f32 %v8141_v12, %v8628_v26 }
 0x21d   : > { %v6337_v11 = vadd.f32 %v6336_v37, %v6335_v23 }
 0x21e   : > { %v8290_v34 = vadd.f32 %v6270_v46, %v4874_v0  ;;  %v6338_v61 = vpop.f32.mrf.mxu0 }
 0x21f   : > { %v8293_v54 = vadd.f32 %v6337_v11, %v8116_v57  ;;  %v6271_v24 = vpop.f32.mrf.mxu1 }
 0x220   : > { %v6339_v38 = vpop.f32.mrf.mxu0 }
 0x221   : > { %v6340_v33 = vadd.f32 %v6339_v38, %v6338_v61  ;;  %v6272_v22 = vpop.f32.mrf.mxu1 }
 0x222   : > { %v6341_v10 = vpop.f32.mrf.mxu0  ;;  %v6273_v47 = vadd.f32 %v6272_v22, %v6271_v24 }
 0x223   : > { %v8296_v48 = vadd.f32 %v6340_v33, %v8118_v51  ;;  %v6274_v17 = vpop.f32.mrf.mxu1 }
 0x224   : > { %v6342_v2 = vpop.f32.mrf.mxu0  ;;  %v8302_v32 = vadd.f32 %v6273_v47, %v4879_v1 }
 0x225   : > { %v6343_v50 = vadd.f32 %v6342_v2, %v6341_v10  ;;  %v6275_v51 = vpop.f32.mrf.mxu1 }
 0x226   : > { %v6344_v57 = vpop.f32.mrf.mxu0  ;;  %v6276_v60 = vadd.f32 %v6275_v51, %v6274_v17 }
 0x227   : > { %v8305_v14 = vadd.f32 %v6343_v50, %v8147_v42  ;;  %v8308_v5 = vpop.f32.mrf.mxu1 }
 0x228   : > { %v6345_v41 = vpop.f32.mrf.mxu0  ;;  %v8310_v35 = vadd.f32 %v6276_v60, %v4882_v27 }
 0x229   : > { %v6346_v31 = vadd.f32 %v6345_v41, %v6344_v57  ;;  %v8315_v40 = vpop.f32.mrf.mxu1 }
 0x22a   : > { %v6347_v18 = vpop.f32.mrf.mxu0 }
 0x22b   : > { %v8313_v52 = vadd.f32 %v6346_v31, %v8153_v28  ;;  %v8317_v42 = vpop.f32.mrf.mxu1 }
 0x22c   : > { %v6348_v0 = vpop.f32.mrf.mxu0 }
 0x22d   : > { %v6349_v46 = vadd.f32 %v6348_v0, %v6347_v18  ;;  %v8322_v12 = vpop.f32.mrf.mxu1 }
 0x22e   : > { %v6350_v23 = vpop.f32.mrf.mxu0 }
 0x22f   : > { %v8320_v37 = vadd.f32 %v6349_v46, %v8169_v13 }
 0x230   : > { %v6351_v11 = vpop.f32.mrf.mxu0 }
 0x231   : > { %v6352_v61 = vadd.f32 %v6351_v11, %v6350_v23 }
 0x233   : > { %v8325_v38 = vadd.f32 %v6352_v61, %v8182_v44  ;;  %v8327_v28 = vpop.f32.mrf.mxu1 }
 0x235   : > { %v8329_v33 = vpop.f32.mrf.mxu1 }
 0x236   : > { %v6353_v24 = vpop.f32.mrf.mxu0 }
 0x237   : > { %v8331_v10 = vpop.f32.mrf.mxu1 }
 0x238   : > { %v6354_v22 = vpop.f32.mrf.mxu0 }
 0x239   : > { %v6355_v2 = vadd.f32 %v6354_v22, %v6353_v24  ;;  %v8333_v1 = vpop.f32.mrf.mxu1 }
 0x23a   : > { %v6356_v26 = vpop.f32.mrf.mxu0 }
 0x23b   : > { %v8336_v13 = vadd.f32 %v6355_v2, %v8200_v7 }
 0x23c   : > { %v6357_v45 = vpop.f32.mrf.mxu0 }
 0x23d   : > { %8631 = vst [vmem:[#allocation19_spill] sm:$0xff] %v8336_v13  ;;  %v6358_v25 = vadd.f32 %v6357_v45, %v6356_v26 }
 0x23f   : > { %v8338_v59 = vpop.f32.mrf.mxu1  ;;  %v8341_v44 = vadd.f32 %v6358_v25, %v8215_v6 }
 0x241   : > { %8632 = vst [vmem:[#allocation8_spill] sm:$0xff] %v8341_v44  ;;  %v8343_v47 = vpop.f32.mrf.mxu1 }
 0x243   : > { %v6359_v50 = vpop.f32.mrf.mxu0  ;;  %v8345_v17 = vpop.f32.mrf.mxu1 }
 0x245   : > { %v6360_v57 = vpop.f32.mrf.mxu0  ;;  %v8347_v27 = vpop.f32.mrf.mxu1 }
 0x246   : > { %v6361_v51 = vadd.f32 %v6360_v57, %v6359_v50 }
 0x247   : > { %v6362_v41 = vpop.f32.mrf.mxu0 }
 0x248   : > { %v8350_v7 = vadd.f32 %v6361_v51, %v8231_v19 }
 0x249   : > { %v6363_v60 = vpop.f32.mrf.mxu0 }
 0x24a   : > { %v6364_v31 = vadd.f32 %v6363_v60, %v6362_v41 }
 0x24c   : > { %v8353_v0 = vadd.f32 %v6364_v31, %v8243_v43 }
 0x24d   : > { %v6423_v18 = vpop.f32.mrf.mxu1 }
 0x24e   : > { %8633 = vst [vmem:[#allocation9_spill] sm:$0xff] %v8353_v0 }
 0x24f   : > { %v6424_v6 = vpop.f32.mrf.mxu1 }
 0x250   : > { %v6365_v46 = vpop.f32.mrf.mxu0 }
 0x251   : > { %v8355_v23 = vpop.f32.mrf.mxu1 }
 0x252   : > { %v6366_v11 = vpop.f32.mrf.mxu0 }
 0x253   : > { %v6367_v61 = vadd.f32 %v6366_v11, %v6365_v46  ;;  %v8357_v22 = vpop.f32.mrf.mxu1 }
 0x254   : > { %v6368_v24 = vpop.f32.mrf.mxu0 }
 0x255   : > { %v8360_v2 = vadd.f32 %v6367_v61, %v8250_v15 }
 0x256   : > { %v6369_v19 = vpop.f32.mrf.mxu0 }
 0x257   : > { %8634 = vst [vmem:[#allocation7_spill] sm:$0xff] %v8360_v2  ;;  %v6370_v26 = vadd.f32 %v6369_v19, %v6368_v24 }
 0x259   : > { %v8365_v25 = vadd.f32 %v6370_v26, %v8258_v4 }
 0x25b   : > { %v8362_v45 = vpop.f32.mrf.mxu1  ;;  %8635 = vst [vmem:[#allocation10_spill] sm:$0xff] %v8365_v25 }
 0x25d   : > { %v8367_v43 = vpop.f32.mrf.mxu1 }
 0x25e   : > { %v6371_v50 = vpop.f32.mrf.mxu0 }
 0x25f   : > { %v8369_v57 = vpop.f32.mrf.mxu1 }
 0x260   : > { %v6372_v51 = vpop.f32.mrf.mxu0 }
 0x261   : > { %v6373_v41 = vadd.f32 %v6372_v51, %v6371_v50  ;;  %v8371_v31 = vpop.f32.mrf.mxu1 }
 0x262   : > { %v6374_v60 = vpop.f32.mrf.mxu0 }
 0x263   : > { %v8374_v15 = vadd.f32 %v6373_v41, %v8272_v63 }
 0x264   : > { %v6375_v46 = vpop.f32.mrf.mxu0 }
 0x265   : > { %8636 = vst [vmem:[#allocation11_spill] sm:$0xff] %v8374_v15  ;;  %v6376_v11 = vadd.f32 %v6375_v46, %v6374_v60 }
 0x267   : > { %v8379_v4 = vadd.f32 %v6376_v11, %v8275_v55 }
 0x268   : > { %v8376_v61 = vpop.f32.mrf.mxu1 }
 0x269   : > { %8637 = vst [vmem:[#allocation12_spill] sm:$0xff] %v8379_v4 }
 0x26a   : > { %v8381_v24 = vpop.f32.mrf.mxu1 }
 0x26b   : > { %v6377_v19 = vpop.f32.mrf.mxu0 }
 0x26c   : > { %v8383_v26 = vpop.f32.mrf.mxu1 }
 0x26d   : > { %v6378_v25 = vpop.f32.mrf.mxu0 }
 0x26e   : > { %v6379_v50 = vadd.f32 %v6378_v25, %v6377_v19  ;;  %v8385_v2 = vpop.f32.mrf.mxu1 }
 0x26f   : > { %v6380_v51 = vpop.f32.mrf.mxu0 }
 0x270   : > { %v8388_v63 = vadd.f32 %v6379_v50, %v8284_v29  ;;  %v6413_v29 = vadd.f32 %v8329_v33, %v8327_v28  ;;  %v6410_v28 = vadd.f32 %v8322_v12, %v8317_v42 }
 0x271   : > { %v6381_v41 = vpop.f32.mrf.mxu0 }
 0x272   : > { %8638 = vst [vmem:[#allocation13_spill] sm:$0xff] %v8388_v63  ;;  %v6382_v60 = vadd.f32 %v6381_v41, %v6380_v51  ;;  %v6407_v51 = vadd.f32 %v8315_v40, %v8308_v5  ;;  %v5250_v0 = vadd.f32 %v6413_v29, %v8180_v16  ;;  %v5245_v12 = vadd.f32 %v6410_v28, %v8165_v49 }
 0x274   : > { %v8393_v55 = vadd.f32 %v6382_v60, %v8290_v34  ;;  %v5242_v33 = vadd.f32 %v6407_v51, %v8162_v8  ;;  %v6419_v8 = vadd.f32 %v8343_v47, %v8338_v59  ;;  %v6422_v51 = vadd.f32 %v8347_v27, %v8345_v17 }
 0x275   : > { %v8390_v46 = vpop.f32.mrf.mxu1  ;;  %v6437_v27 = vadd.f32 %v8381_v24, %v8376_v61  ;;  %v6431_v61 = vadd.f32 %v8367_v43, %v8362_v45  ;;  %v6434_v43 = vadd.f32 %v8371_v31, %v8369_v57 }
 0x276   : > { %8639 = vst [vmem:[#allocation14_spill] sm:$0xff] %v8393_v55  ;;  %v6416_v55 = vadd.f32 %v8333_v1, %v8331_v10  ;;  %v6425_v10 = vadd.f32 %v6424_v6, %v6423_v18  ;;  %v6428_v18 = vadd.f32 %v8357_v22, %v8355_v23 }
 0x277   : > { %v8395_v11 = vpop.f32.mrf.mxu1  ;;  %v5274_v45 = vadd.f32 %v6431_v61, %v8248_v39  ;;  %v5277_v31 = vadd.f32 %v6434_v43, %v8254_v9 }
 0x278   : > { %v5269_v17 = vadd.f32 %v6428_v18, %v8227_v36 }
 0x279   : > { %v8397_v4 = vpop.f32.mrf.mxu1 }
 0x27b   : > { %v8399_v25 = vpop.f32.mrf.mxu1 }
 0x27d   : > { %v6383_v15 = vpop.f32.mrf.mxu0 }
 0x27f   : > { %v6384_v19 = vpop.f32.mrf.mxu0 }
 0x280   : > { %v6385_v50 = vadd.f32 %v6384_v19, %v6383_v15  ;;  %v5253_v19 = vadd.f32 %v6416_v55, %v8191_v30 }
 0x281   : > { %v6386_v63 = vpop.f32.mrf.mxu0 }
 0x282   : > { %v8406_v34 = vadd.f32 %v6385_v50, %v8302_v32  ;;  %v8408_v41 = vpop.f32.mrf.mxu1 }
 0x283   : > { %v6387_v60 = vpop.f32.mrf.mxu0 }
 0x284   : > { %v6388_v44 = vadd.f32 %v6387_v60, %v6386_v63  ;;  %v8414_v13 = vpop.f32.mrf.mxu1 }
 0x285   : > { %v6543_v5 = vpop.f32.mrf.mxu0 }
 0x286   : > { %v8421_v32 = vadd.f32 %v6388_v44, %v8310_v35  ;;  %v5411_v40 = vadd.f32 %v6543_v5, %v5250_v0  ;;  %v8424_v15 = vpop.f32.mrf.mxu1  ;;  %v5266_v0 = vadd.f32 %v6425_v10, %v8218_v53  ;;  %v5258_v53 = vadd.f32 %v6419_v8, %v8198_v21 }
 0x287   : > { %v5402_v1 = vpop.f32.mrf.mxu0 }
 0x288   : > { %vm5531_vm14 = vcmp.ge.f32.partialorder %v5411_v40, 0.0  ;;  %v5563_v16 = vmul.f32 0.01, %v5411_v40  ;;  %v5403_v63 = vadd.f32 %v5402_v1, %v5242_v33  ;;  %v8427_v42 = vpop.f32.mrf.mxu1 }
 0x289   : > { %v6544_v29 = vpop.f32.mrf.mxu0 }
 0x28a   : > { %v5595_v50 = vsel %vm5531_vm14, %v5411_v40, %v5563_v16  ;;  %vm5529_vm15 = vcmp.ge.f32.partialorder %v5403_v63, 0.0  ;;  %v5561_v35 = vmul.f32 0.01, %v5403_v63  ;;  %v5414_v44 = vadd.f32 %v6544_v29, %v5253_v19 }
 0x28b   : > { %5627 = vst [vmem:[%s8434_s10 + $0x10] sm:$0xff] %v5595_v50  ;;  %v5405_v30 = vpop.f32.mrf.mxu0  ;;  %v5261_v29 = vadd.f32 %v6422_v51, %v8211_v20  ;;  %v6440_v20 = vadd.f32 %v8385_v2, %v8383_v26 }
 0x28c   : > { %v5593_v49 = vsel %vm5529_vm15, %v5403_v63, %v5561_v35  ;;  %vm5532_vm0 = vcmp.ge.f32.partialorder %v5414_v44, 0.0  ;;  %v5564_v6 = vmul.f32 0.01, %v5414_v44  ;;  %v5406_v55 = vadd.f32 %v5405_v30, %v5245_v12 }
 0x28d   : > { %5625 = vst [vmem:[%s8434_s10] sm:$0xff] %v5593_v49  ;;  %v5285_v51 = vadd.f32 %v6440_v20, %v8270_v56  ;;  %v6443_v56 = vadd.f32 %v8395_v11, %v8390_v46 }
 0x28e   : > { %v5596_v23 = vsel %vm5532_vm0, %v5414_v44, %v5564_v6  ;;  %vm5530_vm1 = vcmp.ge.f32.partialorder %v5406_v55, 0.0  ;;  %v5562_v22 = vmul.f32 0.01, %v5406_v55  ;;  %v5282_v44 = vadd.f32 %v6437_v27, %v8263_v62 }
 0x28f   : > { %v8441_v59 = vpop.f32.mrf.mxu1  ;;  %v6547_v47 = vpop.f32.mrf.mxu0  ;;  %5628 = vst [vmem:[%s8434_s10 + $0x18] sm:$0xff] %v5596_v23 }
 0x290   : > { %v5427_v60 = vadd.f32 %v6547_v47, %v5266_v0  ;;  %v5594_v40 = vsel %vm5530_vm1, %v5406_v55, %v5562_v22 }
 0x291   : > { %v8444_v28 = vpop.f32.mrf.mxu1  ;;  %v5418_v5 = vpop.f32.mrf.mxu0  ;;  %5626 = vst [vmem:[%s8434_s10 + $0x8] sm:$0xff] %v5594_v40 }
 0x292   : > { %vm5535_vm2 = vcmp.ge.f32.partialorder %v5427_v60, 0.0  ;;  %v5567_v33 = vmul.f32 0.01, %v5427_v60  ;;  %v5419_v10 = vadd.f32 %v5418_v5, %v5258_v53  ;;  %v6449_v53 = vadd.f32 %v8414_v13, %v8408_v41 }
 0x293   : > { %v8451_v1 = vpop.f32.mrf.mxu1  ;;  %v6548_v16 = vpop.f32.mrf.mxu0 }
 0x294   : > { %v5599_v63 = vsel %vm5535_vm2, %v5427_v60, %v5567_v33  ;;  %v5430_v19 = vadd.f32 %v6548_v16, %v5269_v17  ;;  %vm5533_vm3 = vcmp.ge.f32.partialorder %v5419_v10, 0.0  ;;  %v5565_v21 = vmul.f32 0.01, %v5419_v10 }
 0x295   : > { %5631 = vst [vmem:[%s8434_s10 + $0x30] sm:$0xff] %v5599_v63  ;;  %v8455_v12 = vpop.f32.mrf.mxu1  ;;  %v5421_v36 = vpop.f32.mrf.mxu0  ;;  %v5298_v9 = vadd.f32 %v6449_v53, %v8293_v54  ;;  %v6446_v16 = vadd.f32 %v8399_v25, %v8397_v4 }
 0x296   : > { %vm5536_vm4 = vcmp.ge.f32.partialorder %v5430_v19, 0.0  ;;  %v5568_v24 = vmul.f32 0.01, %v5430_v19  ;;  %v5422_v50 = vadd.f32 %v5421_v36, %v5261_v29  ;;  %v5597_v35 = vsel %vm5533_vm3, %v5419_v10, %v5565_v21 }
 0x297   : > { %5629 = vst [vmem:[%s8434_s10 + $0x20] sm:$0xff] %v5597_v35  ;;  %v6452_v10 = vadd.f32 %v8427_v42, %v8424_v15  ;;  %v5290_v29 = vadd.f32 %v6443_v56, %v8282_v58  ;;  %v5293_v4 = vadd.f32 %v6446_v16, %v8288_v3 }
 0x298   : > { %v5600_v8 = vsel %vm5536_vm4, %v5430_v19, %v5568_v24  ;;  %vm5534_vm5 = vcmp.ge.f32.partialorder %v5422_v50, 0.0  ;;  %v5566_v18 = vmul.f32 0.01, %v5422_v50 }
 0x299   : > { %5632 = vst [vmem:[%s8434_s10 + $0x38] sm:$0xff] %v5600_v8  ;;  %v6459_v30 = vpop.f32.mrf.mxu1  ;;  %v5301_v61 = vadd.f32 %v6452_v10, %v8296_v48 }
 0x29a   : > { %v6551_v0 = vpop.f32.mrf.mxu0  ;;  %v5598_v49 = vsel %vm5534_vm5, %v5422_v50, %v5566_v18 }
 0x29b   : > { %v5443_v6 = vadd.f32 %v6551_v0, %v5282_v44  ;;  %5630 = vst [vmem:[%s8434_s10 + $0x28] sm:$0xff] %v5598_v49  ;;  %v6460_v62 = vpop.f32.mrf.mxu1  ;;  %v6455_v44 = vadd.f32 %v8444_v28, %v8441_v59 }
 0x29c   : > { %v5434_v55 = vpop.f32.mrf.mxu0  ;;  %v6461_v54 = vadd.f32 %v6460_v62, %v6459_v30 }
 0x29d   : > { %vm5539_vm6 = vcmp.ge.f32.partialorder %v5443_v6, 0.0  ;;  %v5571_v2 = vmul.f32 0.01, %v5443_v6  ;;  %v5435_v26 = vadd.f32 %v5434_v55, %v5274_v45  ;;  %v6462_v47 = vpop.f32.mrf.mxu1  ;;  %v6458_v45 = vadd.f32 %v8455_v12, %v8451_v1 }
 0x29e   : > { %v6552_v23 = vpop.f32.mrf.mxu0  ;;  %v5314_v30 = vadd.f32 %v6461_v54, %v8320_v37  ;;  %v5306_v55 = vadd.f32 %v6455_v44, %v8305_v14 }
 0x29f   : > { %v5603_v22 = vsel %vm5539_vm6, %v5443_v6, %v5571_v2  ;;  %vm5537_vm7 = vcmp.ge.f32.partialorder %v5435_v26, 0.0  ;;  %v5569_v60 = vmul.f32 0.01, %v5435_v26  ;;  %v5446_v39 = vadd.f32 %v6552_v23, %v5285_v51  ;;  %v6463_v57 = vpop.f32.mrf.mxu1 }
 0x2a0   : > { %5635 = vst [vmem:[%s8434_s10 + $0x50] sm:$0xff] %v5603_v22  ;;  %v5437_v5 = vpop.f32.mrf.mxu0  ;;  %v6464_v3 = vadd.f32 %v6463_v57, %v6462_v47  ;;  %v5309_v1 = vadd.f32 %v6458_v45, %v8313_v52 }
 0x2a1   : > { %v5601_v40 = vsel %vm5537_vm7, %v5435_v26, %v5569_v60  ;;  %vm5540_vm8 = vcmp.ge.f32.partialorder %v5446_v39, 0.0  ;;  %v5572_v33 = vmul.f32 0.01, %v5446_v39  ;;  %v5438_v17 = vadd.f32 %v5437_v5, %v5277_v31 }
 0x2a2   : > { %5633 = vst [vmem:[%s8434_s10 + $0x40] sm:$0xff] %v5601_v40  ;;  %v5317_v47 = vadd.f32 %v6464_v3, %v8325_v38  ;;  %v8643_v3 = vld [vmem:[#allocation7_spill] sm:$0xff] }
 0x2a3   : > { %v5604_v27 = vsel %vm5540_vm8, %v5446_v39, %v5572_v33  ;;  %vm5538_vm9 = vcmp.ge.f32.partialorder %v5438_v17, 0.0  ;;  %v5570_v13 = vmul.f32 0.01, %v5438_v17 }
 0x2a4   : > { %5636 = vst [vmem:[%s8434_s10 + $0x58] sm:$0xff] %v5604_v27 }
 0x2a5   : > { %v6555_v63 = vpop.f32.mrf.mxu0  ;;  %v5602_v19 = vsel %vm5538_vm9, %v5438_v17, %v5570_v13 }
 0x2a6   : > { %v8479_v41 = vpop.f32.mrf.mxu1  ;;  %v5459_v46 = vadd.f32 %v6555_v63, %v5298_v9  ;;  %5634 = vst [vmem:[%s8434_s10 + $0x48] sm:$0xff] %v5602_v19  ;;  %v8640_v9 = vld [vmem:[#allocation19_spill] sm:$0xff] }
 0x2a7   : > { %v5450_v21 = vpop.f32.mrf.mxu0 }
 0x2a8   : > { %v6466_v11 = vpop.f32.mrf.mxu1  ;;  %vm5543_vm10 = vcmp.ge.f32.partialorder %v5459_v46, 0.0  ;;  %v5575_v15 = vmul.f32 0.01, %v5459_v46  ;;  %v5451_v42 = vadd.f32 %v5450_v21, %v5290_v29  ;;  %v8641_v29 = vld [vmem:[#allocation9_spill] sm:$0xff] }
 0x2a9   : > { %v6556_v24 = vpop.f32.mrf.mxu0  ;;  %v6467_v38 = vadd.f32 %v6466_v11, %v8479_v41 }
 0x2aa   : > { %v8486_v36 = vpop.f32.mrf.mxu1  ;;  %v5607_v25 = vsel %vm5543_vm10, %v5459_v46, %v5575_v15  ;;  %vm5541_vm11 = vcmp.ge.f32.partialorder %v5451_v42, 0.0  ;;  %v5573_v50 = vmul.f32 0.01, %v5451_v42  ;;  %v5462_v35 = vadd.f32 %v6556_v24, %v5301_v61 }
 0x2ab   : > { %5639 = vst [vmem:[%s8434_s10 + $0x70] sm:$0xff] %v5607_v25  ;;  %v5453_v20 = vpop.f32.mrf.mxu0  ;;  %v5322_v16 = vadd.f32 %v6467_v38, %v8640_v9  ;;  %v8642_v25 = vld [vmem:[#allocation8_spill] sm:$0xff]  ;;  %v8647_v9 = vld [vmem:[#allocation13_spill] sm:$0xff] }
 0x2ac   : > { %v6469_v58 = vpop.f32.mrf.mxu1  ;;  %v5605_v8 = vsel %vm5541_vm11, %v5451_v42, %v5573_v50  ;;  %vm5544_vm12 = vcmp.ge.f32.partialorder %v5462_v35, 0.0  ;;  %v5576_v18 = vmul.f32 0.01, %v5462_v35  ;;  %v5454_v48 = vadd.f32 %v5453_v20, %v5293_v4 }
 0x2ad   : > { %5637 = vst [vmem:[%s8434_s10 + $0x60] sm:$0xff] %v5605_v8  ;;  %v6470_v63 = vadd.f32 %v6469_v58, %v8486_v36 }
 0x2ae   : > { %v5608_v0 = vsel %vm5544_vm12, %v5462_v35, %v5576_v18  ;;  %vm5542_vm13 = vcmp.ge.f32.partialorder %v5454_v48, 0.0  ;;  %v5574_v49 = vmul.f32 0.01, %v5454_v48 }
 0x2af   : > { %5640 = vst [vmem:[%s8434_s10 + $0x78] sm:$0xff] %v5608_v0  ;;  %v5325_v36 = vadd.f32 %v6470_v63, %v8642_v25 }
 0x2b0   : > { %v6471_v6 = vpop.f32.mrf.mxu1  ;;  %v5606_v28 = vsel %vm5542_vm13, %v5454_v48, %v5574_v49 }
 0x2b1   : > { %v6559_v59 = vpop.f32.mrf.mxu0  ;;  %5638 = vst [vmem:[%s8434_s10 + $0x68] sm:$0xff] %v5606_v28 }
 0x2b2   : > { %v5475_v43 = vadd.f32 %v6559_v59, %v5314_v30  ;;  %v6472_v62 = vpop.f32.mrf.mxu1 }
 0x2b3   : > { %v5466_v2 = vpop.f32.mrf.mxu0  ;;  %v6473_v39 = vadd.f32 %v6472_v62, %v6471_v6 }
 0x2b4   : > { %vm5547_vm14 = vcmp.ge.f32.partialorder %v5475_v43, 0.0  ;;  %v5579_v37 = vmul.f32 0.01, %v5475_v43  ;;  %v5467_v26 = vadd.f32 %v5466_v2, %v5306_v55  ;;  %v6474_v51 = vpop.f32.mrf.mxu1  ;;  %v8644_v55 = vld [vmem:[#allocation11_spill] sm:$0xff] }
 0x2b5   : > { %v6560_v23 = vpop.f32.mrf.mxu0  ;;  %v5330_v56 = vadd.f32 %v6473_v39, %v8350_v7 }
 0x2b6   : > { %v5611_v12 = vsel %vm5547_vm14, %v5475_v43, %v5579_v37  ;;  %vm5545_vm15 = vcmp.ge.f32.partialorder %v5467_v26, 0.0  ;;  %v5577_v22 = vmul.f32 0.01, %v5467_v26  ;;  %v5478_v60 = vadd.f32 %v6560_v23, %v5317_v47  ;;  %v6475_v31 = vpop.f32.mrf.mxu1 }
 0x2b7   : > { %5643 = vst [vmem:[%s8434_s10 + $0x90] sm:$0xff] %v5611_v12  ;;  %v5469_v14 = vpop.f32.mrf.mxu0  ;;  %v6476_v33 = vadd.f32 %v6475_v31, %v6474_v51 }
 0x2b8   : > { %v5609_v53 = vsel %vm5545_vm15, %v5467_v26, %v5577_v22  ;;  %vm5548_vm0 = vcmp.ge.f32.partialorder %v5478_v60, 0.0  ;;  %v5580_v57 = vmul.f32 0.01, %v5478_v60  ;;  %v5470_v5 = vadd.f32 %v5469_v14, %v5309_v1  ;;  %v8645_v26 = vld [vmem:[#allocation10_spill] sm:$0xff]  ;;  %v8646_v14 = vld [vmem:[#allocation12_spill] sm:$0xff] }
 0x2b9   : > { %5641 = vst [vmem:[%s8434_s10 + $0x80] sm:$0xff] %v5609_v53  ;;  %v5333_v21 = vadd.f32 %v6476_v33, %v8641_v29 }
 0x2ba   : > { %v5612_v40 = vsel %vm5548_vm0, %v5478_v60, %v5580_v57  ;;  %vm5546_vm1 = vcmp.ge.f32.partialorder %v5470_v5, 0.0  ;;  %v5578_v52 = vmul.f32 0.01, %v5470_v5 }
 0x2bb   : > { %5644 = vst [vmem:[%s8434_s10 + $0x98] sm:$0xff] %v5612_v40 }
 0x2bc   : > { %v5610_v17 = vsel %vm5546_vm1, %v5470_v5, %v5578_v52 }
 0x2bd   : > { %5642 = vst [vmem:[%s8434_s10 + $0x88] sm:$0xff] %v5610_v17 }
 0x2be   : > { %v6477_v27 = vpop.f32.mrf.mxu1  ;;  %v6563_v10 = vpop.f32.mrf.mxu0 }
 0x2bf   : > { %v5491_v13 = vadd.f32 %v6563_v10, %v5330_v56 }
 0x2c0   : > { %v6478_v19 = vpop.f32.mrf.mxu1  ;;  %v5482_v41 = vpop.f32.mrf.mxu0 }
 0x2c1   : > { %vm5551_vm2 = vcmp.ge.f32.partialorder %v5491_v13, 0.0  ;;  %v5583_v46 = vmul.f32 0.01, %v5491_v13  ;;  %v5483_v11 = vadd.f32 %v5482_v41, %v5322_v16  ;;  %v6479_v24 = vadd.f32 %v6478_v19, %v6477_v27 }
 0x2c2   : > { %v6480_v15 = vpop.f32.mrf.mxu1  ;;  %v6564_v7 = vpop.f32.mrf.mxu0 }
 0x2c3   : > { %v5615_v42 = vsel %vm5551_vm2, %v5491_v13, %v5583_v46  ;;  %vm5549_vm3 = vcmp.ge.f32.partialorder %v5483_v11, 0.0  ;;  %v5581_v61 = vmul.f32 0.01, %v5483_v11  ;;  %v5494_v54 = vadd.f32 %v6564_v7, %v5333_v21  ;;  %v8648_v21 = vld [vmem:[#allocation14_spill] sm:$0xff] }
 0x2c4   : > { %5647 = vst [vmem:[%s8434_s10 + $0xb0] sm:$0xff] %v5615_v42  ;;  %v6481_v4 = vpop.f32.mrf.mxu1  ;;  %v5485_v50 = vpop.f32.mrf.mxu0  ;;  %v5338_v0 = vadd.f32 %v6479_v24, %v8643_v3 }
 0x2c5   : > { %v5613_v35 = vsel %vm5549_vm3, %v5483_v11, %v5581_v61  ;;  %vm5552_vm4 = vcmp.ge.f32.partialorder %v5494_v54, 0.0  ;;  %v5584_v58 = vmul.f32 0.01, %v5494_v54  ;;  %v5486_v44 = vadd.f32 %v5485_v50, %v5325_v36 }
 0x2c6   : > { %5645 = vst [vmem:[%s8434_s10 + $0xa0] sm:$0xff] %v5613_v35  ;;  %v6482_v48 = vadd.f32 %v6481_v4, %v6480_v15 }
 0x2c7   : > { %v5616_v20 = vsel %vm5552_vm4, %v5494_v54, %v5584_v58  ;;  %v6483_v8 = vpop.f32.mrf.mxu1  ;;  %v6567_v18 = vpop.f32.mrf.mxu0  ;;  %vm5550_vm5 = vcmp.ge.f32.partialorder %v5486_v44, 0.0  ;;  %v5582_v30 = vmul.f32 0.01, %v5486_v44 }
 0x2c8   : > { %5648 = vst [vmem:[%s8434_s10 + $0xb8] sm:$0xff] %v5616_v20  ;;  %v5341_v51 = vadd.f32 %v6482_v48, %v8645_v26 }
 0x2c9   : > { %v6484_v49 = vpop.f32.mrf.mxu1  ;;  %v5498_v6 = vpop.f32.mrf.mxu0  ;;  %v5614_v45 = vsel %vm5550_vm5, %v5486_v44, %v5582_v30 }
 0x2ca   : > { %v6485_v59 = vadd.f32 %v6484_v49, %v6483_v8  ;;  %v5499_v28 = vadd.f32 %v5498_v6, %v5338_v0  ;;  %5646 = vst [vmem:[%s8434_s10 + $0xa8] sm:$0xff] %v5614_v45 }
 0x2cb   : > { %v6486_v43 = vpop.f32.mrf.mxu1  ;;  %v6568_v62 = vpop.f32.mrf.mxu0 }
 0x2cc   : > { %v5346_v2 = vadd.f32 %v6485_v59, %v8644_v55  ;;  %vm5553_vm6 = vcmp.ge.f32.partialorder %v5499_v28, 0.0  ;;  %v5585_v37 = vmul.f32 0.01, %v5499_v28 }
 0x2cd   : > { %v6487_v47 = vpop.f32.mrf.mxu1  ;;  %v5501_v23 = vpop.f32.mrf.mxu0 }
 0x2ce   : > { %v5507_v1 = vadd.f32 %v6567_v18, %v5346_v2  ;;  %v5617_v12 = vsel %vm5553_vm6, %v5499_v28, %v5585_v37  ;;  %v6488_v22 = vadd.f32 %v6487_v47, %v6486_v43  ;;  %v5502_v60 = vadd.f32 %v5501_v23, %v5341_v51 }
 0x2cf   : > { %5649 = vst [vmem:[%s8434_s10 + $0xc0] sm:$0xff] %v5617_v12 }
 0x2d0   : > { %vm5555_vm7 = vcmp.ge.f32.partialorder %v5507_v1, 0.0  ;;  %v5587_v39 = vmul.f32 0.01, %v5507_v1  ;;  %v5349_v53 = vadd.f32 %v6488_v22, %v8646_v14  ;;  %vm5554_vm8 = vcmp.ge.f32.partialorder %v5502_v60, 0.0 }
 0x2d1   : > { %v5586_v57 = vmul.f32 0.01, %v5502_v60  ;;  %v6489_v31 = vpop.f32.mrf.mxu1 }
 0x2d2   : > { %v5619_v5 = vsel %vm5555_vm7, %v5507_v1, %v5587_v39  ;;  %v5510_v38 = vadd.f32 %v6568_v62, %v5349_v53  ;;  %v6571_v33 = vpop.f32.mrf.mxu0 }
 0x2d3   : > { %5651 = vst [vmem:[%s8434_s10 + $0xd0] sm:$0xff] %v5619_v5  ;;  %v5618_v40 = vsel %vm5554_vm8, %v5502_v60, %v5586_v57  ;;  %v6490_v52 = vpop.f32.mrf.mxu1 }
 0x2d4   : > { %vm5556_vm9 = vcmp.ge.f32.partialorder %v5510_v38, 0.0  ;;  %v5588_v56 = vmul.f32 0.01, %v5510_v38  ;;  %5650 = vst [vmem:[%s8434_s10 + $0xc8] sm:$0xff] %v5618_v40  ;;  %v6491_v17 = vadd.f32 %v6490_v52, %v6489_v31  ;;  %v5514_v10 = vpop.f32.mrf.mxu0 }
 0x2d5   : > { %v6492_v27 = vpop.f32.mrf.mxu1 }
 0x2d6   : > { %v5620_v13 = vsel %vm5556_vm9, %v5510_v38, %v5588_v56  ;;  %v5354_v16 = vadd.f32 %v6491_v17, %v8647_v9  ;;  %v6572_v19 = vpop.f32.mrf.mxu0 }
 0x2d7   : > { %5652 = vst [vmem:[%s8434_s10 + $0xd8] sm:$0xff] %v5620_v13  ;;  %v6493_v63 = vpop.f32.mrf.mxu1 }
 0x2d8   : > { %v6494_v41 = vadd.f32 %v6493_v63, %v6492_v27  ;;  %v5515_v46 = vadd.f32 %v5514_v10, %v5354_v16  ;;  %v5517_v11 = vpop.f32.mrf.mxu0 }
 0x2da   : > { %vm5557_vm10 = vcmp.ge.f32.partialorder %v5515_v46, 0.0  ;;  %v5589_v29 = vmul.f32 0.01, %v5515_v46  ;;  %v5357_v15 = vadd.f32 %v6494_v41, %v8648_v21 }
 0x2dc   : > { %v5621_v7 = vsel %vm5557_vm10, %v5515_v46, %v5589_v29  ;;  %v6495_v42 = vpop.f32.mrf.mxu1  ;;  %v5518_v61 = vadd.f32 %v5517_v11, %v5357_v15 }
 0x2dd   : > { %5653 = vst [vmem:[%s8434_s10 + $0xe0] sm:$0xff] %v5621_v7 }
 0x2de   : > { %v6496_v54 = vpop.f32.mrf.mxu1  ;;  %vm5558_vm11 = vcmp.ge.f32.partialorder %v5518_v61, 0.0  ;;  %v5590_v24 = vmul.f32 0.01, %v5518_v61 }
 0x2df   : > { %v6497_v4 = vadd.f32 %v6496_v54, %v6495_v42 }
 0x2e0   : > { %v5622_v25 = vsel %vm5558_vm11, %v5518_v61, %v5590_v24  ;;  %v6498_v36 = vpop.f32.mrf.mxu1 }
 0x2e1   : > { %v5362_v50 = vadd.f32 %v6497_v4, %v8406_v34  ;;  %5654 = vst [vmem:[%s8434_s10 + $0xe8] sm:$0xff] %v5622_v25 }
 0x2e2   : > { %v6499_v35 = vpop.f32.mrf.mxu1 }
 0x2e3   : > { %v5523_v58 = vadd.f32 %v6571_v33, %v5362_v50  ;;  %v6500_v44 = vadd.f32 %v6499_v35, %v6498_v36 }
 0x2e5   : > { %vm5559_vm12 = vcmp.ge.f32.partialorder %v5523_v58, 0.0  ;;  %v5591_v20 = vmul.f32 0.01, %v5523_v58  ;;  %v5365_v8 = vadd.f32 %v6500_v44, %v8421_v32 }
 0x2e7   : > { %v5623_v18 = vsel %vm5559_vm12, %v5523_v58, %v5591_v20  ;;  %v5526_v48 = vadd.f32 %v6572_v19, %v5365_v8 }
 0x2e8   : > { %5655 = vst [vmem:[%s8434_s10 + $0xf0] sm:$0xff] %v5623_v18 }
 0x2e9   : > { %vm5560_vm13 = vcmp.ge.f32.partialorder %v5526_v48, 0.0  ;;  %v5592_v30 = vmul.f32 0.01, %v5526_v48 }
 0x2eb   : > { %v5624_v34 = vsel %vm5560_vm13, %v5526_v48, %v5592_v30 }
 0x2ec   : > { %5656 = vst [vmem:[%s8434_s10 + $0xf8] sm:$0xff] %v5624_v34 }
 0x2ed   : > { %6942 = shalt.err (!%p6939_p5)
}
 0x2ee   : > { %s6943_s30 = scalar_lea.hbm %s8536_s23, 4096  ;;  %s6947_s5 = scalar_lea.hbm %s8591_s3, 8192 }
 0x2ef   : > { %p6944_p6 = scmp.ne.s32.totalorder %s8536_s23, %s6943_s30  ;;  %p6948_p10 = scmp.lt.s32.totalorder %s8536_s23, %s8591_s3 }
 0x2f0   : > { %p6949_p11 = scmp.lt.s32.totalorder %s6947_s5, %s6943_s30 }
 0x2f1   : > { %p6945_p7 = pnand %p6944_p6, %p7071_p4 }
 0x2f2   : > { %p6950_p12 = por %p6949_p11, %p6948_p10 }
 0x2f3   : > { %p6946_p9 = pneg %p6945_p7 }
 0x2f5   : > { %p6951_p13 = pnand %p6950_p12, %p6946_p9 }
 0x2f7   : > { %6954 = shalt.err (!%p6951_p13)
}
 0x2f8   : > { %s7009_s9 = smov 128   ;;  %s7010_s10 = smov 8  }
 0x2f9   : > { %6589 = dma.vmem_to_hbm [thread:$0]  (%p7071_p4), %s8538_s18, 4096, %s8536_s23, %s8543_s15, %s7009_s9, %s7009_s9, %s7010_s10  }
 0x2fa PF: > { %p6595_p0 = scmp.ge.s32.totalorder %s7005_s17, 2  ;;  %s5687_s11 = sand.u32 1, %s6985_s12  }
 0x2fb   : > { %s5688_s19 = scalar_lea.sflag [#allocation5], %s5687_s11 }
 0x2fc   : > { %p6592_p1 = pnand %p6595_p0, %p7078_p8 }
 0x2fe   : > { %p6593_p2 = pneg %p6592_p1 }
 0x300   : > { %6980 = dma.done.wait (%p6593_p2), %s5688_s19, 4096  }
 0x301   : > { %6982 = vsyncadd (%p6593_p2), %s5688_s19, 4294963200  ;;  %s16_s17 = sadd.s32 1, %s7005_s17   ;;  %s8649_s12 = smov %s6989_s13 }
 0x302   : > { %p13_p3 = scmp.ge.s32.totalorder %s16_s17, 4   ;;  %s8650_s13 = smov %s6993_s14 }
 0x303   : > { %s8651_s14 = smov %s7084_s25  ;;  %s8652_s15 = smov %s7001_s16 }
 0x304   : > { %s8653_s16 = smov %s8655_s20  ;;  %15 = sbr.rel (!%p13_p3) target bundleno = 4 (0x4), region = 75 }
 0x309   :  { %5693 = vsyncpa [#allocation5], 1 }
 0x30a   :  { %5695 = vsyncpa [#allocation5 + $0x1], 1 }

// kernel: upsampling_forward.4
= control target key start
LH: loop header
LB: loop body
LE: loop exit
PB: predicated region body
PF: predicated region fallthrough
CT: control target
= control target key end

     0   :  { %s10187_s15 = smov 0   ;;  %s10189_s16 = smov 0   ;;  %s13111_s0 = inlined_call_operand.vmem [shape: bf16[2,16,16,128], index: 0, kind: input, shape index: {}]   ;;  %s13112_s1 = inlined_call_operand.vmem [shape: bf16[2,16,16,128], index: 1, kind: input, shape index: {}]   ;;  %s13113_s2 = inlined_call_operand.vmem [shape: bf16[2304,128], index: 2, kind: input, shape index: {}]   ;;  %s13114_s3 = inlined_call_operand.vmem [shape: f32[1,128], index: 3, kind: input, shape index: {}]   ;;  %s13115_s4 = inlined_call_operand.vmem [shape: bf16[2,16,16,128], index: 4, kind: output, shape index: {}]  }
   0x1   :  { %s10191_s17 = smov 0  }
   0x2 LB: > { %s23_s18 = sadd.s32 1, %s10155_s16  ;;  %p8215_p0 = scmp.ge.s32.totalorder %s10159_s17, 1  ;;  %s10159_s17 = sphi %s10191_s17, %s14_s17   ;;  %s10155_s16 = sphi %s10189_s16, %s13233_s16   ;;  %s10151_s15 = sphi %s10187_s15, %s13232_s15  }
   0x3   : > { %p24_p1 = scmp.ge.s32.totalorder %s23_s18, 2  ;;  %p203_p2 = scmp.lt.s32.totalorder %s10159_s17, 3 }
   0x5   : > { %s13235_s18 = smov (%p24_p1, %s23_s18), 0  ;;  %p204_p3 = pnand %p8215_p0, %p203_p2 }
   0x7   : > { %207 = sbr.rel (%p204_p3) target bundleno = 826 (0x33a), region = 36 }
   0xc   : > { %v9948_v0 = vld [vmem:[%s13113_s2 + $0x78] sm:$0xff]   ;;  %v10161_v2 = vmov 0   ;;  %v9950_v4 = vld [vmem:[%s13113_s2 + $0x70] sm:$0xff]   ;;  %p244_p4 = scmp.lt.s32.totalorder %s10151_s15, 1  ;;  %v9952_v6 = vld [vmem:[%s13113_s2 + $0x68] sm:$0xff]   ;;  %vm872_vm0 = vcmask 1043456  }
   0xd   : > { %v9949_v1 = vld [vmem:[%s13113_s2 + $0x38] sm:$0xff]   ;;  %270 = vst [vmem:[#allocation2 + $0xb0] sm:$0xff] %v10161_v2  ;;  %v8304_v3 = vcombine.high %v10161_v2, %v10161_v2  ;;  %272 = vst [vmem:[#allocation2 + $0x10] sm:$0x11] %v10161_v2  ;;  %8899 = vmatprep.subr.bf16.mxu0 %v9948_v0  ;;  %9907 = vmatprep.subr.bf16.mxu1 %v9948_v0  ;;  %v9951_v5 = vld [vmem:[%s13113_s2 + $0x30] sm:$0xff]   ;;  %v1115_v13 = vrot.slane %v10161_v2, 4  ;;  %v8303_v58 = vcombine.low %v10161_v2, %v10161_v2 }
   0xe   : > { %275 = vst [vmem:[#allocation2 + $0x128] sm:$0x11] %v10161_v2  ;;  %278 = vst [vmem:[#allocation2 + $0x108] sm:$0x11] %v10161_v2  ;;  %8900 = vmatpush3.bf16.msra.mxu0 %v9949_v1  ;;  %9915 = vmatpush3.bf16.msra.mxu1 %v9949_v1  ;;  %s13237_s15 = smov (!%p244_p4, %s10151_s15), 1  ;;  %v9953_v7 = vld [vmem:[%s13113_s2 + $0x28] sm:$0xff]  }
   0xf   : > { %281 = vst [vmem:[#allocation2 + $0x118] sm:$0x11] %v10161_v2  ;;  %284 = vst [vmem:[#allocation2 + $0x58] sm:$0x11] %v10161_v2  ;;  %8901 = vmatprep.subr.bf16.mxu0 %v9950_v4  ;;  %9908 = vmatprep.subr.bf16.mxu1 %v9950_v4  ;;  %v9954_v8 = vld [vmem:[%s13113_s2 + $0x60] sm:$0xff]   ;;  %s10255_s9 = sshll.u32 %s13237_s15, 7 }
  0x10   : > { %287 = vst [vmem:[#allocation2 + $0x130] sm:$0x11] %v10161_v2  ;;  %290 = vst [vmem:[#allocation2 + $0x1a0] sm:$0x11] %v10161_v2  ;;  %6419 = vmatprep.mubr.bf16.mxu0 %v8304_v3  ;;  %v9955_v9 = vld [vmem:[%s13113_s2 + $0x20] sm:$0xff]   ;;  %v9956_v10 = vld [vmem:[%s13113_s2 + $0x58] sm:$0xff]   ;;  %s10267_s20 = scalar_lea.vmem %s13111_s0, %s10255_s9  ;;  %s10273_s22 = scalar_lea.vmem %s13112_s1, %s10255_s9 }
  0x11   : > { %293 = vst [vmem:[#allocation2 + $0xe8] sm:$0x11] %v10161_v2  ;;  %296 = vst [vmem:[#allocation2 + $0x28] sm:$0x11] %v10161_v2  ;;  %v9957_v11 = vld [vmem:[%s13113_s2 + $0x18] sm:$0xff]   ;;  %v9958_v12 = vld [vmem:[%s13113_s2 + $0x50] sm:$0xff]  }
  0x12   : > { %299 = vst [vmem:[#allocation2 + $0xb8] sm:$0x11] %v10161_v2  ;;  %302 = vst [vmem:[#allocation2 + $0x50] sm:$0x11] %v10161_v2  ;;  %8902 = vmatpush3.bf16.msra.mxu0 %v9951_v5  ;;  %9916 = vmatpush3.bf16.msra.mxu1 %v9951_v5  ;;  %v10280_v14 = vrot.slane %v10161_v2, 5  ;;  %v9959_v18 = vld [vmem:[%s13113_s2 + $0x10] sm:$0xff]  }
  0x13   : > { %305 = vst [vmem:[#allocation2 + $0x198] sm:$0x11] %v10161_v2  ;;  %308 = vst [vmem:[#allocation2 + $0xc8] sm:$0x11] %v10161_v2  ;;  %8903 = vmatprep.subr.bf16.mxu0 %v9952_v6  ;;  %9909 = vmatprep.subr.bf16.mxu1 %v9952_v6  ;;  %v338_v15 = vld [vmem:[%s10267_s20 + $0x38] sm:$0xf] }
  0x14   : > { %311 = vst [vmem:[#allocation2 + $0x30] sm:$0x11] %v10161_v2  ;;  %314 = vst [vmem:[#allocation2 + $0x8] sm:$0x11] %v10161_v2  ;;  %v339_v16 = vld [vmem:[%s10267_s20 + $0x3c] sm:$0xf]  ;;  %v1119_v25 = vor.u32 %v10280_v14, %v1115_v13 }
  0x15   : > { %317 = vst [vmem:[#allocation2 + $0x68] sm:$0x11] %v10161_v2  ;;  %320 = vst [vmem:[#allocation2 + $0x88] sm:$0x11] %v10161_v2  ;;  %v370_v17 = vld [vmem:[%s10273_s22 + $0x38] sm:$0xf] }
  0x16   : > { %321 = vst [vmem:[#allocation2 + $0xe0] sm:$0xff] %v10161_v2  ;;  %323 = vst [vmem:[#allocation2 + $0x188] sm:$0x11] %v10161_v2  ;;  %8904 = vmatpush3.bf16.msra.mxu0 %v9953_v7  ;;  %9917 = vmatpush3.bf16.msra.mxu1 %v9953_v7  ;;  %v371_v19 = vld [vmem:[%s10273_s22 + $0x3c] sm:$0xf]  ;;  %v8236_v20 = vcombine.low %v338_v15, %v370_v17  ;;  %vm875_vm1 = vcmask 1047556  }
  0x17   : > { %8905 = vmatprep.subr.bf16.mxu0 %v9954_v8  ;;  %9910 = vmatprep.subr.bf16.mxu1 %v9954_v8  ;;  %v9960_v21 = vld [vmem:[%s13113_s2 + $0x48] sm:$0xff]   ;;  %v8237_v22 = vcombine.low %v339_v16, %v371_v19  ;;  %vm548_vm2 = vsmask.f32 256  ;;  %vm873_vm3 = vsmask.f32 7938  ;;  %v9962_v35 = vld [vmem:[%s13113_s2 + $0x40] sm:$0xff]  }
  0x18   : > { %vm876_vm4 = vsmask.f32 7954  ;;  %v671_v23 = vshrl.u32 %v8236_v20, 16  ;;  %v674_v24 = vshll.u32 %v8236_v20, 16  ;;  %vm874_vm5 = vmand %vm872_vm0, %vm873_vm3  ;;  %vm549_vm6 = vsmask.f32 4368 }
  0x19   : > { %v679_v26 = vshrl.u32 %v8237_v22, 16  ;;  %v682_v27 = vshll.u32 %v8237_v22, 16  ;;  %vm877_vm7 = vmand %vm875_vm1, %vm876_vm4  ;;  %v9961_v31 = vld [vmem:[%s13113_s2 + $0x8] sm:$0xff]   ;;  %v10313_v37 = vrot.slane %v1119_v25, 4  ;;  %v9963_v38 = vld [vmem:[%s13113_s2] sm:$0xff]   ;;  %v1663_v6 = vrot.slane %v10280_v14, 4 }
  0x1a   : > { %8906 = vmatpush3.bf16.msra.mxu0 %v9955_v9  ;;  %9918 = vmatpush3.bf16.msra.mxu1 %v9955_v9  ;;  %v673_v28 = vrot.slane %v671_v23, 7  ;;  %vm10297_vm8 = vmor %vm877_vm7, %vm874_vm5  ;;  %v324_v40 = vld [vmem:[%s10267_s20] sm:$0xf]  ;;  %v325_v41 = vld [vmem:[%s10267_s20 + $0x4] sm:$0xf]  ;;  %vm1656_vm12 = vcmask 1042432  }
  0x1b   : > { %8907 = vmatprep.subr.bf16.mxu0 %v9956_v10  ;;  %9911 = vmatprep.subr.bf16.mxu1 %v9956_v10  ;;  %v10295_v29 = vrot.slane %v679_v26, 7  ;;  %vm10305_vm9 = vmor %vm548_vm2, %vm549_vm6  ;;  %v356_v42 = vld [vmem:[%s10273_s22] sm:$0xf]  ;;  %v357_v44 = vld [vmem:[%s10273_s22 + $0x4] sm:$0xf]  ;;  %vm1657_vm13 = vcmask 1046532  }
  0x1c   : > { %v676_v33 = vor.u32 %v674_v24, %v673_v28  ;;  %v677_v34 = vrot.slane %v673_v28, 4  ;;  %v8222_v45 = vcombine.low %v324_v40, %v356_v42  ;;  %v340_v46 = vld [vmem:[%s10267_s20 + $0x40] sm:$0xf]  ;;  %v341_v47 = vld [vmem:[%s10267_s20 + $0x44] sm:$0xf]  ;;  %v8223_v49 = vcombine.low %v325_v41, %v357_v44  ;;  %v9964_v52 = vld [vmem:[%s13113_s2 + $0xf8] sm:$0xff]  }
  0x1d   : > { %v684_v36 = vor.u32 %v682_v27, %v10295_v29  ;;  %v372_v50 = vld [vmem:[%s10273_s22 + $0x40] sm:$0xf]  ;;  %v373_v51 = vld [vmem:[%s10273_s22 + $0x44] sm:$0xf]  ;;  %v9966_v53 = vld [vmem:[%s13113_s2 + $0x178] sm:$0xff]   ;;  %vm883_vm14 = vcmask 1040384  }
  0x1e   : > { %8908 = vmatpush3.bf16.msra.mxu0 %v9957_v11  ;;  %9919 = vmatpush3.bf16.msra.mxu1 %v9957_v11  ;;  %v935_v39 = vsel %vm10297_vm8, %v676_v33, 0  ;;  %v552_v54 = vshrl.u32 %v8222_v45, 16  ;;  %v555_v55 = vshll.u32 %v8222_v45, 16  ;;  %v8238_v56 = vcombine.low %v340_v46, %v372_v50  ;;  %v9965_v60 = vld [vmem:[%s13113_s2 + $0xb8] sm:$0xff]   ;;  %v9968_v11 = vld [vmem:[%s13113_s2 + $0xf0] sm:$0xff]   ;;  %v9972_v33 = vld [vmem:[%s13113_s2 + $0xe8] sm:$0xff]  }
  0x1f   : > { %8909 = vmatprep.subr.bf16.mxu0 %v9958_v12  ;;  %9912 = vmatprep.subr.bf16.mxu1 %v9958_v12  ;;  %v685_v43 = vsel %vm10305_vm9, %v677_v34, %v684_v36  ;;  %936 = vst [vmem:[#allocation2 + $0x80] sm:$0xff] %v935_v39  ;;  %v8239_v57 = vcombine.low %v341_v47, %v373_v51  ;;  %v560_v61 = vshrl.u32 %v8223_v49, 16  ;;  %v563_v62 = vshll.u32 %v8223_v49, 16  ;;  %v9967_v4 = vld [vmem:[%s13113_s2 + $0x138] sm:$0xff]   ;;  %v9969_v15 = vld [vmem:[%s13113_s2 + $0xb0] sm:$0xff]   ;;  %v9973_v45 = vld [vmem:[%s13113_s2 + $0xa8] sm:$0xff]  }
  0x20   : > { %937 = vst [vmem:[#allocation2 + $0xa8] sm:$0xff] %v685_v43  ;;  %v8448_v48 = vcombine.high %v935_v39, %v685_v43  ;;  %v8447_v59 = vcombine.low %v935_v39, %v685_v43  ;;  %v554_v63 = vrot.slane %v552_v54, 7  ;;  %v688_v0 = vshrl.u32 %v8238_v56, 16  ;;  %v9970_v16 = vld [vmem:[%s13113_s2 + $0x170] sm:$0xff]   ;;  %v326_v17 = vld [vmem:[%s10267_s20 + $0x8] sm:$0xf]  ;;  %vm10652_vm3 = vmor %vm1656_vm12, %vm1657_vm13 }
  0x21   : > { %v691_v1 = vshll.u32 %v8238_v56, 16  ;;  %v696_v3 = vshrl.u32 %v8239_v57, 16  ;;  %v10344_v2 = vrot.slane %v560_v61, 7  ;;  %v699_v5 = vshll.u32 %v8239_v57, 16  ;;  %v9971_v22 = vld [vmem:[%s13113_s2 + $0x130] sm:$0xff]   ;;  %v9974_v46 = vld [vmem:[%s13113_s2 + $0x168] sm:$0xff]   ;;  %vm10658_vm4 = vmand %vm883_vm14, %vm548_vm2 }
  0x22   : > { %8910 = vmatpush3.bf16.msra.mxu0 %v9959_v18  ;;  %9920 = vmatpush3.bf16.msra.mxu1 %v9959_v18  ;;  %v557_v7 = vor.u32 %v555_v55, %v554_v63  ;;  %v558_v8 = vrot.slane %v554_v63, 4  ;;  %v690_v9 = vrot.slane %v688_v0, 7  ;;  %v686_v12 = vrot.slane %v10295_v29, 4  ;;  %v327_v23 = vld [vmem:[%s10267_s20 + $0xc] sm:$0xf]  ;;  %v9978_v56 = vld [vmem:[%s13113_s2 + $0x160] sm:$0xff]  }
  0x23   : > { %8911 = vmatprep.subr.bf16.mxu0 %v9960_v21  ;;  %9913 = vmatprep.subr.bf16.mxu1 %v9960_v21  ;;  %v10347_v10 = vrot.slane %v696_v3, 7  ;;  %v565_v13 = vor.u32 %v563_v62, %v10344_v2  ;;  %v358_v24 = vld [vmem:[%s10273_s22 + $0x8] sm:$0xf]  ;;  %v567_v26 = vrot.slane %v10344_v2, 4  ;;  %v359_v27 = vld [vmem:[%s10273_s22 + $0xc] sm:$0xf] }
  0x24   : > { %6483 = vmatprep.mubr.bf16.mxu1 %v8448_v48  ;;  %v880_v18 = vsel %vm10297_vm8, %v557_v7, 0  ;;  %v693_v19 = vor.u32 %v691_v1, %v690_v9  ;;  %v694_v20 = vrot.slane %v690_v9, 4  ;;  %v8224_v28 = vcombine.low %v326_v17, %v358_v24  ;;  %v374_v39 = vld [vmem:[%s10273_s22 + $0x48] sm:$0xf]  ;;  %v375_v40 = vld [vmem:[%s10273_s22 + $0x4c] sm:$0xf] }
  0x25   : > { %v701_v21 = vor.u32 %v699_v5, %v10347_v10  ;;  %v566_v25 = vsel %vm10305_vm9, %v558_v8, %v565_v13  ;;  %881 = vst [vmem:[#allocation2 + $0x48] sm:$0xff] %v880_v18  ;;  %v8225_v43 = vcombine.low %v327_v23, %v359_v27  ;;  %v9975_v51 = vld [vmem:[%s13113_s2 + $0x128] sm:$0xff]   ;;  %v328_v3 = vld [vmem:[%s10267_s20 + $0x10] sm:$0xf]  ;;  %v9977_v13 = vld [vmem:[%s13113_s2 + $0xa0] sm:$0xff]   ;;  %vm885_vm15 = vcmask 1044484  }
  0x26   : > { %8912 = vmatpush3.bf16.msra.mxu0 %v9961_v31  ;;  %9921 = vmatpush3.bf16.msra.mxu1 %v9961_v31  ;;  %v342_v31 = vld [vmem:[%s10267_s20 + $0x48] sm:$0xf]  ;;  %882 = vst [vmem:[#allocation2 + $0x160] sm:$0xff] %v566_v25  ;;  %v8322_v34 = vcombine.high %v880_v18, %v566_v25  ;;  %v942_v36 = vsel %vm10297_vm8, %v693_v19, 0  ;;  %v8321_v42 = vcombine.low %v880_v18, %v566_v25  ;;  %v569_v44 = vshrl.u32 %v8224_v28, 16 }
  0x27   : > { %8913 = vmatprep.subr.bf16.mxu0 %v9962_v35  ;;  %9914 = vmatprep.subr.bf16.mxu1 %v9962_v35  ;;  %v702_v35 = vsel %vm10305_vm9, %v694_v20, %v701_v21  ;;  %943 = vst [vmem:[#allocation2] sm:$0xff] %v942_v36  ;;  %v572_v48 = vshll.u32 %v8224_v28, 16  ;;  %v8240_v49 = vcombine.low %v342_v31, %v374_v39  ;;  %v577_v54 = vshrl.u32 %v8225_v43, 16  ;;  %v360_v9 = vld [vmem:[%s10273_s22 + $0x10] sm:$0xf]  ;;  %v9979_v20 = vld [vmem:[%s13113_s2 + $0x120] sm:$0xff]  }
  0x28   : > { %944 = vst [vmem:[#allocation2 + $0x168] sm:$0xff] %v702_v35  ;;  %v8466_v41 = vcombine.high %v942_v36, %v702_v35  ;;  %v8465_v47 = vcombine.low %v942_v36, %v702_v35  ;;  %v580_v55 = vshll.u32 %v8225_v43, 16  ;;  %v344_v18 = vld [vmem:[%s10267_s20 + $0x50] sm:$0xf]  ;;  %v345_v19 = vld [vmem:[%s10267_s20 + $0x54] sm:$0xf] }
  0x29   : > { %v705_v57 = vshrl.u32 %v8240_v49, 16  ;;  %v10399_v63 = vrot.slane %v577_v54, 7  ;;  %v376_v24 = vld [vmem:[%s10273_s22 + $0x50] sm:$0xf]  ;;  %v377_v25 = vld [vmem:[%s10273_s22 + $0x54] sm:$0xf] }
  0x2a   : > { %8914 = vmatpush3.bf16.msra.mxu0 %v9963_v38  ;;  %9922 = vmatpush3.bf16.msra.mxu1 %v9963_v38  ;;  %v343_v38 = vld [vmem:[%s10267_s20 + $0x4c] sm:$0xf]  ;;  %vm1109_vm10 = vsmask.f32 3328  ;;  %vm1110_vm11 = vsmask.f32 7440 }
  0x2b   : > { %9011 = vmatprep.subr.bf16.mxu1 %v9964_v52  ;;  %9123 = vmatprep.subr.bf16.mxu0 %v9966_v53  ;;  %v8241_v50 = vcombine.low %v343_v38, %v375_v40  ;;  %v9976_v52 = vld [vmem:[%s13113_s2 + $0xe0] sm:$0xff]   ;;  %v571_v53 = vrot.slane %v569_v44, 7  ;;  %v707_v0 = vrot.slane %v705_v57, 7  ;;  %v582_v7 = vor.u32 %v580_v55, %v10399_v63  ;;  %v330_v44 = vld [vmem:[%s10267_s20 + $0x18] sm:$0xf]  ;;  %vm10646_vm1 = vmor %vm1109_vm10, %vm1110_vm11 }
  0x2c   : > { %v363_v55 = vld [vmem:[%s10273_s22 + $0x1c] sm:$0xf]  ;;  %v584_v57 = vrot.slane %v10399_v63, 4  ;;  %vm886_vm0 = vsmask.f32 4352 }
  0x2d   : > { %6420 = vmatmul.mubr.bf16.vlgmr.msra.gmra.mxu0 %v8303_v58  ;;  %6484 = vmatmul.mubr.bf16.vlgmr.msra.gmra.mxu1 %v8447_v59  ;;  %v708_v58 = vshll.u32 %v8240_v49, 16  ;;  %v713_v59 = vshrl.u32 %v8241_v50, 16  ;;  %v574_v61 = vor.u32 %v572_v48, %v571_v53  ;;  %v575_v62 = vrot.slane %v571_v53, 4  ;;  %vm10666_vm5 = vmand %vm885_vm15, %vm886_vm0 }
  0x2e   : > { %9012 = vmatpush3.bf16.msra.mxu1 %v9965_v60  ;;  %9124 = vmatpush3.bf16.msra.mxu0 %v9967_v4  ;;  %v716_v60 = vshll.u32 %v8241_v50, 16  ;;  %v329_v4 = vld [vmem:[%s10267_s20 + $0x14] sm:$0xf]  ;;  %vm10701_vm2 = vmor %vm10666_vm5, %vm10658_vm4 }
  0x2f   : > { %9013 = vmatprep.subr.bf16.mxu1 %v9968_v11  ;;  %9125 = vmatprep.subr.bf16.mxu0 %v9970_v16  ;;  %v10401_v1 = vrot.slane %v713_v59, 7  ;;  %v10409_v8 = vsel %vm10297_vm8, %v574_v61, 0  ;;  %v361_v11 = vld [vmem:[%s10273_s22 + $0x14] sm:$0xf]  ;;  %v711_v16 = vrot.slane %v707_v0, 4  ;;  %v10425_v21 = vsel %vm10305_vm9, %v575_v62, %v582_v7  ;;  %v9981_v61 = vld [vmem:[%s13113_s2 + $0x98] sm:$0xff]  }
  0x30   : > { %6427 = vmatprep.mubr.bf16.mxu0 %v8322_v34  ;;  %6491 = vmatprep.mubr.bf16.mxu1 %v8466_v41  ;;  %894 = vst [vmem:[#allocation2 + $0x40] sm:$0xff] %v10409_v8  ;;  %v8227_v23 = vcombine.low %v329_v4, %v361_v11  ;;  %895 = vst [vmem:[#allocation2 + $0x178] sm:$0xff] %v10425_v21  ;;  %v8340_v27 = vcombine.high %v10409_v8, %v10425_v21  ;;  %v346_v7 = vld [vmem:[%s10267_s20 + $0x58] sm:$0xf] }
  0x31   : > { %v718_v17 = vor.u32 %v716_v60, %v10401_v1  ;;  %v8242_v41 = vcombine.low %v344_v18, %v376_v24  ;;  %v378_v11 = vld [vmem:[%s10273_s22 + $0x58] sm:$0xf] }
  0x32   : > { %9014 = vmatpush3.bf16.msra.mxu1 %v9969_v15  ;;  %9126 = vmatpush3.bf16.msra.mxu0 %v9971_v22  ;;  %v710_v15 = vor.u32 %v708_v58, %v707_v0  ;;  %v8226_v22 = vcombine.low %v328_v3, %v360_v9  ;;  %v594_v39 = vshrl.u32 %v8227_v23, 16  ;;  %v597_v40 = vshll.u32 %v8227_v23, 16  ;;  %v347_v9 = vld [vmem:[%s10267_s20 + $0x5c] sm:$0xf] }
  0x33   : > { %9015 = vmatprep.subr.bf16.mxu1 %v9972_v33  ;;  %9127 = vmatprep.subr.bf16.mxu0 %v9974_v46  ;;  %v719_v28 = vsel %vm10305_vm9, %v711_v16, %v718_v17  ;;  %v8339_v33 = vcombine.low %v10409_v8, %v10425_v21  ;;  %v9980_v46 = vld [vmem:[%s13113_s2 + $0xd8] sm:$0xff]   ;;  %v722_v48 = vshrl.u32 %v8242_v41, 16  ;;  %v725_v49 = vshll.u32 %v8242_v41, 16 }
  0x34   : > { %v949_v31 = vsel %vm10297_vm8, %v710_v15, 0  ;;  %951 = vst [vmem:[#allocation2 + $0x140] sm:$0xff] %v719_v28  ;;  %v586_v36 = vshrl.u32 %v8226_v22, 16  ;;  %v589_v38 = vshll.u32 %v8226_v22, 16 }
  0x35   : > { %6428 = vmatmul.mubr.bf16.gmra.mxu0 %v8321_v42  ;;  %6492 = vmatmul.mubr.bf16.gmra.mxu1 %v8465_v47  ;;  %950 = vst [vmem:[#allocation2 + $0x1a8] sm:$0xff] %v949_v31  ;;  %v8484_v34 = vcombine.high %v949_v31, %v719_v28  ;;  %v8483_v35 = vcombine.low %v949_v31, %v719_v28  ;;  %v10443_v47 = vrot.slane %v594_v39, 7  ;;  %v724_v59 = vrot.slane %v722_v48, 7  ;;  %v365_v48 = vld [vmem:[%s10273_s22 + $0x24] sm:$0xf] }
  0x36   : > { %9016 = vmatpush3.bf16.msra.mxu1 %v9973_v45  ;;  %9128 = vmatpush3.bf16.msra.mxu0 %v9975_v51  ;;  %v8243_v42 = vcombine.low %v345_v19, %v377_v25  ;;  %v588_v43 = vrot.slane %v586_v36, 7  ;;  %v331_v45 = vld [vmem:[%s10267_s20 + $0x1c] sm:$0xf]  ;;  %v362_v51 = vld [vmem:[%s10273_s22 + $0x18] sm:$0xf] }
  0x37   : > { %9017 = vmatprep.subr.bf16.mxu1 %v9976_v52  ;;  %9129 = vmatprep.subr.bf16.mxu0 %v9978_v56  ;;  %v8228_v56 = vcombine.low %v330_v44, %v362_v51  ;;  %v599_v58 = vor.u32 %v597_v40, %v10443_v47  ;;  %v8229_v0 = vcombine.low %v331_v45, %v363_v55  ;;  %v728_v17 = vrot.slane %v724_v59, 4  ;;  %v9982_v19 = vld [vmem:[%s13113_s2 + $0x158] sm:$0xff]   ;;  %v9984_v44 = vld [vmem:[%s13113_s2 + $0xd0] sm:$0xff]  }
  0x38   : > { %6435 = vmatprep.mubr.bf16.mxu0 %v8340_v27  ;;  %6499 = vmatprep.mubr.bf16.mxu1 %v8484_v34  ;;  %v730_v50 = vshrl.u32 %v8243_v42, 16  ;;  %v591_v52 = vor.u32 %v589_v38, %v588_v43  ;;  %v592_v53 = vrot.slane %v588_v43, 4  ;;  %v733_v54 = vshll.u32 %v8243_v42, 16  ;;  %v9983_v38 = vld [vmem:[%s13113_s2 + $0x118] sm:$0xff]   ;;  %v332_v42 = vld [vmem:[%s10267_s20 + $0x20] sm:$0xf] }
  0x39   : > { %v603_v3 = vshrl.u32 %v8228_v56, 16  ;;  %v606_v4 = vshll.u32 %v8228_v56, 16  ;;  %v727_v16 = vor.u32 %v725_v49, %v724_v59  ;;  %v611_v28 = vshrl.u32 %v8229_v0, 16  ;;  %v333_v43 = vld [vmem:[%s10267_s20 + $0x24] sm:$0xf]  ;;  %v9985_v55 = vld [vmem:[%s13113_s2 + $0x90] sm:$0xff]  }
  0x3a   : > { %9018 = vmatpush3.bf16.msra.mxu1 %v9977_v13  ;;  %9130 = vmatpush3.bf16.msra.mxu0 %v9979_v20  ;;  %v10449_v60 = vrot.slane %v730_v50, 7  ;;  %v10456_v62 = vsel %vm10297_vm8, %v591_v52, 0  ;;  %v379_v13 = vld [vmem:[%s10273_s22 + $0x5c] sm:$0xf]  ;;  %v10464_v15 = vsel %vm10305_vm9, %v592_v53, %v599_v58  ;;  %v614_v31 = vshll.u32 %v8229_v0, 16  ;;  %v10695_v20 = vld [vmem:[#allocation2 + $0x160] sm:$0xff] }
  0x3b   : > { %9019 = vmatprep.subr.bf16.mxu1 %v9980_v46  ;;  %901 = vst [vmem:[#allocation2 + $0x110] sm:$0xff] %v10456_v62  ;;  %902 = vst [vmem:[#allocation2 + $0x90] sm:$0xff] %v10464_v15  ;;  %v8358_v22 = vcombine.high %v10456_v62, %v10464_v15  ;;  %v8357_v23 = vcombine.low %v10456_v62, %v10464_v15  ;;  %v605_v24 = vrot.slane %v603_v3, 7  ;;  %v956_v27 = vsel %vm10297_vm8, %v727_v16, 0  ;;  %v364_v46 = vld [vmem:[%s10273_s22 + $0x20] sm:$0xf] }
  0x3c   : > { %v735_v18 = vor.u32 %v733_v54, %v10449_v60  ;;  %9131 = vmatprep.subr.bf16.mxu0 %v9982_v19  ;;  %957 = vst [vmem:[#allocation2 + $0xa0] sm:$0xff] %v956_v27  ;;  %v10484_v39 = vrot.slane %v611_v28, 7  ;;  %v8244_v40 = vcombine.low %v346_v7, %v378_v11  ;;  %v8245_v41 = vcombine.low %v347_v9, %v379_v13  ;;  %v348_v49 = vld [vmem:[%s10267_s20 + $0x60] sm:$0xf]  ;;  %v349_v54 = vld [vmem:[%s10267_s20 + $0x64] sm:$0xf] }
  0x3d   : > { %6436 = vmatmul.mubr.bf16.gmra.mxu0 %v8339_v33  ;;  %6500 = vmatmul.mubr.bf16.gmra.mxu1 %v8483_v35  ;;  %v608_v35 = vor.u32 %v606_v4, %v605_v24  ;;  %v609_v36 = vrot.slane %v605_v24, 4  ;;  %v601_v50 = vrot.slane %v10443_v47, 4  ;;  %v8230_v59 = vcombine.low %v332_v42, %v364_v46  ;;  %v380_v0 = vld [vmem:[%s10273_s22 + $0x60] sm:$0xf]  ;;  %v381_v3 = vld [vmem:[%s10273_s22 + $0x64] sm:$0xf] }
  0x3e   : > { %9020 = vmatpush3.bf16.msra.mxu1 %v9981_v61  ;;  %v736_v25 = vsel %vm10305_vm9, %v728_v17, %v735_v18  ;;  %6443 = vmatprep.mubr.bf16.mxu0 %v8358_v22  ;;  %v616_v51 = vor.u32 %v614_v31, %v10484_v39  ;;  %v739_v52 = vshrl.u32 %v8244_v40, 16  ;;  %v742_v53 = vshll.u32 %v8244_v40, 16  ;;  %v9986_v13 = vld [vmem:[%s13113_s2 + $0x150] sm:$0xff]   ;;  %v9989_v42 = vld [vmem:[%s13113_s2 + $0x88] sm:$0xff]  }
  0x3f   : > { %958 = vst [vmem:[#allocation2 + $0x170] sm:$0xff] %v736_v25  ;;  %v8502_v33 = vcombine.high %v956_v27, %v736_v25  ;;  %v8501_v34 = vcombine.low %v956_v27, %v736_v25  ;;  %v10493_v45 = vsel %vm10297_vm8, %v608_v35, 0  ;;  %9132 = vmatpush3.bf16.msra.mxu0 %v9983_v38  ;;  %9021 = vmatprep.subr.bf16.mxu1 %v9984_v44  ;;  %v747_v56 = vshrl.u32 %v8245_v41, 16  ;;  %v9987_v27 = vld [vmem:[%s13113_s2 + $0x110] sm:$0xff]   ;;  %v9988_v35 = vld [vmem:[%s13113_s2 + $0xc8] sm:$0xff]  }
  0x40   : > { %908 = vst [vmem:[#allocation2 + $0x148] sm:$0xff] %v10493_v45  ;;  %v750_v58 = vshll.u32 %v8245_v41, 16  ;;  %v8231_v61 = vcombine.low %v333_v43, %v365_v48  ;;  %v10509_v4 = vsel %vm10305_vm9, %v609_v36, %v616_v51  ;;  %v741_v7 = vrot.slane %v739_v52, 7  ;;  %9133 = vmatprep.subr.bf16.mxu0 %v9986_v13 }
  0x41   : > { %6507 = vmatprep.mubr.bf16.mxu1 %v8502_v33  ;;  %v10511_v9 = vcombine.low %v348_v49, %v380_v0  ;;  %v10513_v11 = vcombine.low %v349_v54, %v381_v3  ;;  %909 = vst [vmem:[#allocation2 + $0x100] sm:$0xff] %v10509_v4  ;;  %v8376_v16 = vcombine.high %v10493_v45, %v10509_v4  ;;  %v10521_v17 = vrot.slane %v747_v56, 7  ;;  %v334_v49 = vld [vmem:[%s10267_s20 + $0x28] sm:$0xf] }
  0x42   : > { %9022 = vmatpush3.bf16.msra.mxu1 %v9985_v55  ;;  %v8375_v18 = vcombine.low %v10493_v45, %v10509_v4  ;;  %v620_v19 = vshrl.u32 %v8230_v59, 16  ;;  %v744_v22 = vor.u32 %v742_v53, %v741_v7  ;;  %v623_v24 = vshll.u32 %v8230_v59, 16  ;;  %v335_v55 = vld [vmem:[%s10267_s20 + $0x2c] sm:$0xf]  ;;  %v366_v56 = vld [vmem:[%s10273_s22 + $0x28] sm:$0xf] }
  0x43   : > { %v628_v25 = vshrl.u32 %v8231_v61, 16  ;;  %v752_v31 = vor.u32 %v750_v58, %v10521_v17  ;;  %v756_v40 = vshrl.u32 %v10511_v9, 16  ;;  %v759_v41 = vshll.u32 %v10511_v9, 16  ;;  %9134 = vmatpush3.bf16.msra.mxu0 %v9987_v27  ;;  %9023 = vmatprep.subr.bf16.mxu1 %v9988_v35  ;;  %v9990_v58 = vld [vmem:[%s13113_s2 + $0x148] sm:$0xff]  }
  0x44   : > { %v622_v33 = vrot.slane %v620_v19, 7  ;;  %v963_v36 = vsel %vm10297_vm8, %v744_v22, 0  ;;  %v764_v48 = vshrl.u32 %v10513_v11, 16  ;;  %v618_v51 = vrot.slane %v10484_v39, 4  ;;  %v9991_v9 = vld [vmem:[%s13113_s2 + $0x108] sm:$0xff]   ;;  %9135 = vmatprep.subr.bf16.mxu0 %v9990_v58  ;;  %v9995_v58 = vld [vmem:[%s13113_s2 + $0x100] sm:$0xff]  }
  0x45   : > { %6444 = vmatmul.mubr.bf16.gmra.mxu0 %v8357_v23  ;;  %6508 = vmatmul.mubr.bf16.gmra.mxu1 %v8501_v34  ;;  %v745_v23 = vrot.slane %v741_v7, 4  ;;  %v631_v34 = vshll.u32 %v8231_v61, 16  ;;  %v10535_v38 = vrot.slane %v628_v25, 7  ;;  %964 = vst [vmem:[#allocation2 + $0xc0] sm:$0xff] %v963_v36  ;;  %v758_v61 = vrot.slane %v756_v40, 7 }
  0x46   : > { %6451 = vmatprep.mubr.bf16.mxu0 %v8376_v16  ;;  %v625_v44 = vor.u32 %v623_v24, %v622_v33  ;;  %v626_v46 = vrot.slane %v622_v33, 4  ;;  %9024 = vmatpush3.bf16.msra.mxu1 %v9989_v42  ;;  %v10557_v0 = vrot.slane %v764_v48, 7  ;;  %v767_v3 = vshll.u32 %v10513_v11, 16  ;;  %v367_v7 = vld [vmem:[%s10273_s22 + $0x2c] sm:$0xf]  ;;  %v9992_v33 = vld [vmem:[%s13113_s2 + $0xc0] sm:$0xff]  }
  0x47   : > { %v753_v43 = vsel %vm10305_vm9, %v745_v23, %v752_v31  ;;  %v633_v54 = vor.u32 %v631_v34, %v10535_v38  ;;  %v8232_v16 = vcombine.low %v334_v49, %v366_v56  ;;  %v350_v19 = vld [vmem:[%s10267_s20 + $0x68] sm:$0xf]  ;;  %v351_v22 = vld [vmem:[%s10267_s20 + $0x6c] sm:$0xf]  ;;  %v761_v24 = vor.u32 %v759_v41, %v758_v61  ;;  %9136 = vmatpush3.bf16.msra.mxu0 %v9991_v9  ;;  %v9993_v41 = vld [vmem:[%s13113_s2 + $0x80] sm:$0xff]  }
  0x48   : > { %965 = vst [vmem:[#allocation2 + $0x190] sm:$0xff] %v753_v43  ;;  %v8520_v52 = vcombine.high %v963_v36, %v753_v43  ;;  %v8519_v53 = vcombine.low %v963_v36, %v753_v43  ;;  %v10555_v59 = vsel %vm10297_vm8, %v625_v44, 0  ;;  %v382_v23 = vld [vmem:[%s10273_s22 + $0x68] sm:$0xf]  ;;  %v762_v25 = vrot.slane %v758_v61, 4  ;;  %9025 = vmatprep.subr.bf16.mxu1 %v9992_v33 }
  0x49   : > { %v10566_v13 = vsel %vm10305_vm9, %v626_v46, %v633_v54  ;;  %915 = vst [vmem:[#allocation2 + $0xd8] sm:$0xff] %v10555_v59  ;;  %v769_v27 = vor.u32 %v767_v3, %v10557_v0  ;;  %v383_v31 = vld [vmem:[%s10273_s22 + $0x6c] sm:$0xf]  ;;  %v637_v36 = vshrl.u32 %v8232_v16, 16  ;;  %v640_v40 = vshll.u32 %v8232_v16, 16 }
  0x4a   : > { %6515 = vmatprep.mubr.bf16.mxu1 %v8520_v52  ;;  %916 = vst [vmem:[#allocation2 + $0x180] sm:$0xff] %v10566_v13  ;;  %v8394_v11 = vcombine.high %v10555_v59, %v10566_v13  ;;  %v8393_v35 = vcombine.low %v10555_v59, %v10566_v13  ;;  %v970_v43 = vsel %vm10297_vm8, %v761_v24, 0  ;;  %v8248_v52 = vcombine.low %v350_v19, %v382_v23  ;;  %v336_v16 = vld [vmem:[%s10267_s20 + $0x30] sm:$0xf]  ;;  %v337_v24 = vld [vmem:[%s10267_s20 + $0x34] sm:$0xf] }
  0x4b   : > { %v770_v42 = vsel %vm10305_vm9, %v762_v25, %v769_v27  ;;  %971 = vst [vmem:[#allocation2 + $0xf0] sm:$0xff] %v970_v43  ;;  %v639_v49 = vrot.slane %v637_v36, 7  ;;  %9026 = vmatpush3.bf16.msra.mxu1 %v9993_v41  ;;  %v8249_v56 = vcombine.low %v351_v22, %v383_v31  ;;  %v635_v19 = vrot.slane %v10535_v38, 4  ;;  %v10605_v25 = vld [vmem:[#allocation2 + $0xb0] sm:$0xff]  ;;  %v9998_v36 = vld [vmem:[%s13113_s2 + $0x278] sm:$0xff]  }
  0x4c   : > { %972 = vst [vmem:[#allocation2 + $0x150] sm:$0xff] %v770_v42  ;;  %v8538_v48 = vcombine.high %v970_v43, %v770_v42  ;;  %v8537_v54 = vcombine.low %v970_v43, %v770_v42  ;;  %v776_v9 = vshll.u32 %v8248_v52, 16  ;;  %v368_v33 = vld [vmem:[%s10273_s22 + $0x30] sm:$0xf] }
  0x4d   : > { %6452 = vmatmul.mubr.bf16.gmra.mxu0 %v8375_v18  ;;  %v8233_v18 = vcombine.low %v335_v55, %v367_v7  ;;  %6516 = vmatmul.mubr.bf16.gmra.mxu1 %v8519_v53  ;;  %v9994_v53 = vld [vmem:[%s13113_s2 + $0x140] sm:$0xff]   ;;  %v642_v61 = vor.u32 %v640_v40, %v639_v49  ;;  %v643_v3 = vrot.slane %v639_v49, 4  ;;  %v773_v7 = vshrl.u32 %v8248_v52, 16 }
  0x4e   : > { %6459 = vmatprep.mubr.bf16.mxu0 %v8394_v11  ;;  %6523 = vmatprep.mubr.bf16.mxu1 %v8538_v48  ;;  %v781_v23 = vshrl.u32 %v8249_v56, 16  ;;  %v784_v11 = vshll.u32 %v8249_v56, 16  ;;  %v8234_v42 = vcombine.low %v336_v16, %v368_v33  ;;  %v385_v56 = vld [vmem:[%s10273_s22 + $0x74] sm:$0xf]  ;;  %v10640_v33 = vld [vmem:[#allocation2 + $0x48] sm:$0xff] }
  0x4f   : > { %v645_v44 = vshrl.u32 %v8233_v18, 16  ;;  %v648_v46 = vshll.u32 %v8233_v18, 16  ;;  %9137 = vmatprep.subr.bf16.mxu0 %v9994_v53  ;;  %v9996_v18 = vld [vmem:[%s13113_s2 + $0x1f8] sm:$0xff]   ;;  %v10610_v27 = vsel %vm10297_vm8, %v642_v61, %v10605_v25  ;;  %v775_v31 = vrot.slane %v773_v7, 7 }
  0x50   : > { %9138 = vmatpush3.bf16.msra.mxu0 %v9995_v58  ;;  %9235 = vmatprep.subr.bf16.mxu1 %v9996_v18  ;;  %922 = vst [vmem:[#allocation2 + $0x138] sm:$0xff] %v10610_v27  ;;  %v10622_v41 = vrot.slane %v781_v23, 7  ;;  %v657_v7 = vshll.u32 %v8234_v42, 16 }
  0x51   : > { %v10593_v55 = vrot.slane %v645_v44, 7  ;;  %v352_v44 = vld [vmem:[%s10267_s20 + $0x70] sm:$0xf]  ;;  %v778_v49 = vor.u32 %v776_v9, %v775_v31  ;;  %v779_v52 = vrot.slane %v775_v31, 4  ;;  %9347 = vmatprep.subr.bf16.mxu0 %v9998_v36 }
  0x52   : > { %v786_v61 = vor.u32 %v784_v11, %v10622_v41 }
  0x53   : > { %v650_v22 = vor.u32 %v648_v46, %v10593_v55  ;;  %v353_v46 = vld [vmem:[%s10267_s20 + $0x74] sm:$0xf]  ;;  %v652_v58 = vrot.slane %v10593_v55, 4  ;;  %v977_v16 = vsel %vm10297_vm8, %v778_v49, %v10605_v25 }
  0x54   : > { %v787_v23 = vsel %vm10305_vm9, %v779_v52, %v786_v61  ;;  %978 = vst [vmem:[#allocation2 + $0xf8] sm:$0xff] %v977_v16  ;;  %v8251_v31 = vcombine.low %v353_v46, %v385_v56 }
  0x55   : > { %6460 = vmatmul.mubr.bf16.gmra.mxu0 %v8393_v35  ;;  %v369_v35 = vld [vmem:[%s10273_s22 + $0x34] sm:$0xf]  ;;  %6524 = vmatmul.mubr.bf16.gmra.mxu1 %v8537_v54  ;;  %v10619_v40 = vsel %vm10305_vm9, %v643_v3, %v650_v22  ;;  %v384_v54 = vld [vmem:[%s10273_s22 + $0x70] sm:$0xf]  ;;  %v654_v3 = vshrl.u32 %v8234_v42, 16  ;;  %979 = vst [vmem:[#allocation2 + $0x18] sm:$0xff] %v787_v23  ;;  %v8556_v11 = vcombine.high %v977_v16, %v787_v23 }
  0x56   : > { %v8235_v43 = vcombine.low %v337_v24, %v369_v35  ;;  %923 = vst [vmem:[#allocation2 + $0x78] sm:$0xff] %v10619_v40  ;;  %v8412_v48 = vcombine.high %v10610_v27, %v10619_v40  ;;  %v8411_v53 = vcombine.low %v10610_v27, %v10619_v40  ;;  %v8250_v22 = vcombine.low %v352_v44, %v384_v54 }
  0x57   : > { %v656_v24 = vrot.slane %v654_v3, 7  ;;  %v8555_v35 = vcombine.low %v977_v16, %v787_v23  ;;  %v798_v52 = vshrl.u32 %v8251_v31, 16  ;;  %6531 = vmatprep.mubr.bf16.mxu1 %v8556_v11  ;;  %v801_v61 = vshll.u32 %v8251_v31, 16  ;;  %v1063_v3 = vld [vmem:[#allocation2 + $0x10] sm:$0x11] }
  0x58   : > { %6467 = vmatprep.mubr.bf16.mxu0 %v8412_v48  ;;  %v662_v18 = vshrl.u32 %v8235_v43, 16  ;;  %v665_v9 = vshll.u32 %v8235_v43, 16  ;;  %v790_v42 = vshrl.u32 %v8250_v22, 16  ;;  %v793_v49 = vshll.u32 %v8250_v22, 16  ;;  %v1562_v31 = vld [vmem:[#allocation2 + $0x10] sm:$0x11] }
  0x59   : > { %v659_v44 = vor.u32 %v657_v7, %v656_v24  ;;  %v660_v48 = vrot.slane %v656_v24, 4  ;;  %v1137_v7 = vshrl.u32 %v10640_v33, 16  ;;  %v10675_v22 = vrot.slane %v798_v52, 7  ;;  %v1560_v24 = vld [vmem:[#allocation2 + $0xb0] sm:$0xee] }
  0x5a   : > { %v10642_v36 = vrot.slane %v662_v18, 7  ;;  %v792_v56 = vrot.slane %v790_v42, 7  ;;  %v1132_v23 = vshll.u32 %v1063_v3, 16  ;;  %v889_v16 = vld [vmem:[#allocation2 + $0x128] sm:$0x11] }
  0x5b   : > { %v10673_v18 = vsel %vm10297_vm8, %v659_v44, %v10605_v25  ;;  %v8254_v44 = vrot.slane %v1560_v24, 9  ;;  %v803_v3 = vor.u32 %v801_v61, %v10675_v22  ;;  %v1664_v61 = vrot.slane %v1562_v31, 5  ;;  %v896_v31 = vld [vmem:[#allocation2 + $0x108] sm:$0x11] }
  0x5c   : > { %v667_v54 = vor.u32 %v665_v9, %v10642_v36  ;;  %v10681_v9 = vsel %vm10646_vm1, %v10313_v37, %v10280_v14  ;;  %929 = vst [vmem:[#allocation2 + $0x158] sm:$0xff] %v10673_v18  ;;  %v796_v42 = vrot.slane %v792_v56, 4  ;;  %v669_v52 = vrot.slane %v10642_v36, 4 }
  0x5d   : > { %6468 = vmatmul.mubr.bf16.gmra.mxu0 %v8411_v53  ;;  %6532 = vmatmul.mubr.bf16.gmra.mxu1 %v8555_v35  ;;  %v795_v35 = vor.u32 %v793_v49, %v792_v56  ;;  %v1662_v56 = vsel %vm10652_vm3, %v8254_v44, %v10280_v14  ;;  %v1146_v14 = vshll.u32 %v10695_v20, 16  ;;  %v897_v2 = vsel %vm10701_vm2, %v584_v57, %v896_v31 }
  0x5e   : > { %v10685_v11 = vsel %vm10305_vm9, %v660_v48, %v667_v54  ;;  %v1134_v54 = vrot.slane %v1132_v23, 5  ;;  %v804_v53 = vsel %vm10305_vm9, %v796_v42, %v803_v3  ;;  %v1665_v23 = vsel %vm10652_vm3, %v1663_v6, %v1664_v61  ;;  %898 = vst [vmem:[#allocation2 + $0x108] sm:$0x11] %v897_v2 }
  0x5f   : > { %930 = vst [vmem:[#allocation2 + $0x98] sm:$0xff] %v10685_v11  ;;  %v8430_v34 = vcombine.high %v10673_v18, %v10685_v11  ;;  %v8429_v28 = vcombine.low %v10673_v18, %v10685_v11  ;;  %v984_v49 = vsel %vm10297_vm8, %v795_v35, %v10605_v25  ;;  %986 = vst [vmem:[#allocation2 + $0x70] sm:$0xff] %v804_v53  ;;  %v1140_v3 = vshll.u32 %v10640_v33, 16 }
  0x60   : > { %985 = vst [vmem:[#allocation2 + $0x60] sm:$0xff] %v984_v49  ;;  %v8574_v24 = vcombine.high %v984_v49, %v804_v53  ;;  %v8573_v5 = vcombine.low %v984_v49, %v804_v53  ;;  %v10716_v25 = vsel %vm10646_vm1, %v10313_v37, %v1134_v54  ;;  %v8307_v42 = vcombine.low %v1662_v56, %v1665_v23  ;;  %v1566_v49 = vld [vmem:[#allocation2 + $0x40] sm:$0xee] }
  0x61   : > { %6475 = vmatprep.mubr.bf16.mxu0 %v8430_v34  ;;  %v1563_v34 = vld [vmem:[#allocation2 + $0x48] sm:$0xee]  ;;  %v8306_v35 = vcombine.high %v10681_v9, %v10716_v25  ;;  %v8308_v44 = vcombine.high %v1662_v56, %v1665_v23  ;;  %v1139_v37 = vrot.slane %v1137_v7, 4  ;;  %v1150_v6 = vshrl.u32 %v10695_v20, 16 }
  0x62   : > { %6539 = vmatprep.mubr.bf16.mxu1 %v8574_v24  ;;  %v8255_v54 = vrot.slane %v1563_v34, 9  ;;  %v1668_v56 = vrot.slane %v10695_v20, 5  ;;  %v1142_v7 = vrot.slane %v1140_v3, 5  ;;  %v1148_v33 = vrot.slane %v1146_v14, 5  ;;  %v9999_v20 = vld [vmem:[%s13113_s2 + $0x238] sm:$0xff]  }
  0x63   : > { %v1161_v61 = vshrl.u32 %v10409_v8, 16  ;;  %v8305_v53 = vcombine.low %v10681_v9, %v10716_v25  ;;  %v1152_v63 = vrot.slane %v1150_v6, 4  ;;  %v1174_v31 = vshrl.u32 %v10425_v21, 16  ;;  %v9997_v3 = vld [vmem:[%s13113_s2 + $0x1b8] sm:$0xff]  }
  0x64   : > { %v10745_v57 = vsel %vm10652_vm3, %v8255_v54, %v1668_v56  ;;  %v1143_v24 = vor.u32 %v1142_v7, %v1139_v37  ;;  %v10003_v7 = vld [vmem:[%s13113_s2 + $0x230] sm:$0xff]  }
  0x65   : > { %6476 = vmatmul.mubr.bf16.gmra.mxu0 %v8429_v28  ;;  %v890_v28 = vsel %vm10701_vm2, %v567_v26, %v889_v16  ;;  %6540 = vmatmul.mubr.bf16.gmra.mxu1 %v8573_v5  ;;  %v1567_v26 = vld [vmem:[#allocation2 + $0x178] sm:$0xff]  ;;  %v1164_v5 = vshll.u32 %v10409_v8, 16  ;;  %v1170_v16 = vshll.u32 %v10425_v21, 16  ;;  %v1163_v23 = vrot.slane %v1161_v61, 4  ;;  %v10002_v8 = vld [vmem:[%s13113_s2 + $0x270] sm:$0xff]  }
  0x66   : > { %6741 = vmatprep.mubr.bf16.mxu0 %v8308_v44  ;;  %891 = vst [vmem:[#allocation2 + $0x128] sm:$0x11] %v890_v28  ;;  %6580 = vmatprep.mubr.bf16.mxu1 %v8306_v35  ;;  %v1153_v9 = vor.u32 %v1152_v63, %v1148_v33  ;;  %v8256_v35 = vrot.slane %v1566_v49, 9  ;;  %v1675_v44 = vrot.slane %v1567_v26, 5  ;;  %v903_v28 = vld [vmem:[#allocation2 + $0x118] sm:$0x11] }
  0x67   : > { %v1166_v34 = vrot.slane %v1164_v5, 5  ;;  %v1172_v25 = vrot.slane %v1170_v16, 5  ;;  %v1144_v14 = vrot.slane %v1143_v24, 4  ;;  %v1176_v6 = vrot.slane %v1174_v31, 4  ;;  %v10000_v21 = vld [vmem:[%s13113_s2 + $0x1f0] sm:$0xff]   ;;  %v10006_v5 = vld [vmem:[%s13113_s2 + $0x268] sm:$0xff]  }
  0x68   : > { %v904_v54 = vsel %vm10701_vm2, %v601_v50, %v903_v28  ;;  %v910_v49 = vld [vmem:[#allocation2 + $0x58] sm:$0x11]  ;;  %v1154_v2 = vrot.slane %v1153_v9, 4  ;;  %v1677_v26 = vrot.slane %v1675_v44, 4  ;;  %v1185_v61 = vshrl.u32 %v10456_v62, 16 }
  0x69   : > { %v1167_v37 = vor.u32 %v1166_v34, %v1163_v23  ;;  %905 = vst [vmem:[#allocation2 + $0x118] sm:$0x11] %v904_v54  ;;  %v1177_v50 = vor.u32 %v1176_v6, %v1172_v25  ;;  %v1149_v24 = vsel %vm10646_vm1, %v1144_v14, %v1148_v33  ;;  %v1069_v31 = vld [vmem:[#allocation2 + $0x108] sm:$0x11]  ;;  %v911_v28 = vsel %vm10701_vm2, %v618_v51, %v910_v49  ;;  %v10001_v33 = vld [vmem:[%s13113_s2 + $0x1b0] sm:$0xff]  }
  0x6a   : > { %v1568_v9 = vld [vmem:[#allocation2 + $0x108] sm:$0x11]  ;;  %912 = vst [vmem:[#allocation2 + $0x58] sm:$0x11] %v911_v28  ;;  %v1187_v51 = vrot.slane %v1185_v61, 4 }
  0x6b   : > { %v1168_v16 = vrot.slane %v1167_v37, 4  ;;  %v1569_v14 = vld [vmem:[#allocation2 + $0x110] sm:$0xee] }
  0x6d   : > { %6742 = vmatmul.mubr.bf16.vlgmr.msra.gmra.mxu0 %v8307_v42  ;;  %v1670_v42 = vrot.slane %v1668_v56, 4  ;;  %v1066_v47 = vld [vmem:[#allocation2 + $0x128] sm:$0x11]  ;;  %v1188_v56 = vshll.u32 %v10456_v62, 16  ;;  %6581 = vmatmul.mubr.bf16.vlgmr.msra.gmra.mxu1 %v8305_v53  ;;  %v1180_v62 = vshll.u32 %v1069_v31, 16  ;;  %v1678_v53 = vrot.slane %v1568_v9, 5 }
  0x6e   : > { %9348 = vmatpush3.bf16.msra.mxu0 %v9999_v20  ;;  %v1565_v63 = vld [vmem:[#allocation2 + $0x128] sm:$0x11]  ;;  %v10771_v20 = vsel %vm10652_vm3, %v8256_v35, %v1675_v44  ;;  %v1156_v23 = vshll.u32 %v1066_v47, 16  ;;  %9236 = vmatpush3.bf16.msra.mxu1 %v9997_v3  ;;  %v10782_v35 = vsel %vm10646_vm1, %v1168_v16, %v1172_v25  ;;  %v10008_v31 = vld [vmem:[%s13113_s2 + $0x1e0] sm:$0xff]  }
  0x6f   : > { %9349 = vmatprep.subr.bf16.mxu0 %v10002_v8  ;;  %v1671_v34 = vrot.slane %v1565_v63, 5  ;;  %v1178_v8 = vrot.slane %v1177_v50, 4  ;;  %9237 = vmatprep.subr.bf16.mxu1 %v10000_v21  ;;  %v1190_v3 = vrot.slane %v1188_v56, 5  ;;  %v10004_v25 = vld [vmem:[%s13113_s2 + $0x1e8] sm:$0xff]   ;;  %v1182_v54 = vrot.slane %v1180_v62, 5  ;;  %v10010_v9 = vld [vmem:[%s13113_s2 + $0x260] sm:$0xff]  }
  0x70   : > { %v1158_v44 = vrot.slane %v1156_v23, 5  ;;  %v10796_v49 = vsel %vm10652_vm3, %v1677_v26, %v1678_v53  ;;  %v10007_v21 = vld [vmem:[%s13113_s2 + $0x228] sm:$0xff]   ;;  %v1072_v26 = vld [vmem:[#allocation2 + $0x118] sm:$0x11]  ;;  %v1198_v23 = vshrl.u32 %v10464_v15, 16  ;;  %v8257_v62 = vrot.slane %v1569_v14, 9 }
  0x71   : > { %v1672_v39 = vsel %vm10652_vm3, %v1670_v42, %v1671_v34  ;;  %v1191_v61 = vor.u32 %v1190_v3, %v1187_v51  ;;  %v10807_v63 = vsel %vm10646_vm1, %v1178_v8, %v1182_v54  ;;  %v1571_v16 = vld [vmem:[#allocation2 + $0x118] sm:$0x11]  ;;  %v8343_v56 = vcombine.low %v10771_v20, %v10796_v49  ;;  %v1572_v34 = vld [vmem:[#allocation2 + $0x148] sm:$0xee]  ;;  %v10011_v53 = vld [vmem:[%s13113_s2 + $0x220] sm:$0xff]  }
  0x72   : > { %9350 = vmatpush3.bf16.msra.mxu0 %v10003_v7  ;;  %v8326_v37 = vcombine.high %v10745_v57, %v1672_v39  ;;  %v8325_v6 = vcombine.low %v10745_v57, %v1672_v39  ;;  %v1159_v42 = vsel %vm10646_vm1, %v1154_v2, %v1158_v44  ;;  %v8344_v7 = vcombine.high %v10771_v20, %v10796_v49  ;;  %v10005_v2 = vld [vmem:[%s13113_s2 + $0x1a8] sm:$0xff]   ;;  %v1075_v39 = vld [vmem:[#allocation2 + $0x58] sm:$0x11]  ;;  %v10009_v54 = vld [vmem:[%s13113_s2 + $0x1a0] sm:$0xff]  }
  0x73   : > { %9351 = vmatprep.subr.bf16.mxu0 %v10006_v5  ;;  %v8324_v47 = vcombine.high %v1149_v24, %v1159_v42  ;;  %v8323_v57 = vcombine.low %v1149_v24, %v1159_v42  ;;  %9238 = vmatpush3.bf16.msra.mxu1 %v10001_v33  ;;  %v1194_v5 = vshll.u32 %v10464_v15, 16  ;;  %v8342_v50 = vcombine.high %v10782_v35, %v10807_v63 }
  0x74   : > { %6749 = vmatprep.mubr.bf16.mxu0 %v8326_v37  ;;  %v1192_v24 = vrot.slane %v1191_v61, 4  ;;  %9239 = vmatprep.subr.bf16.mxu1 %v10004_v25  ;;  %v1204_v8 = vshll.u32 %v1072_v26, 16  ;;  %v1682_v20 = vrot.slane %v10464_v15, 5  ;;  %v1200_v33 = vrot.slane %v1198_v23, 4 }
  0x75   : > { %6750 = vmatmul.mubr.bf16.gmra.mxu0 %v8325_v6  ;;  %6588 = vmatprep.mubr.bf16.mxu1 %v8324_v47  ;;  %v1196_v28 = vrot.slane %v1194_v5, 5  ;;  %v1685_v44 = vrot.slane %v1571_v16, 5  ;;  %v1209_v51 = vshrl.u32 %v10493_v45, 16  ;;  %v1212_v3 = vshll.u32 %v10493_v45, 16  ;;  %v917_v6 = vld [vmem:[#allocation2 + $0x130] sm:$0x11] }
  0x76   : > { %6757 = vmatprep.mubr.bf16.mxu0 %v8344_v7  ;;  %6589 = vmatmul.mubr.bf16.gmra.mxu1 %v8323_v57  ;;  %v8341_v25 = vcombine.low %v10782_v35, %v10807_v63  ;;  %v1206_v14 = vrot.slane %v1204_v8, 5  ;;  %v10834_v15 = vsel %vm10652_vm3, %v8257_v62, %v1682_v20  ;;  %v1684_v37 = vrot.slane %v1682_v20, 4  ;;  %v1574_v7 = vld [vmem:[#allocation2 + $0x58] sm:$0x11] }
  0x77   : > { %9352 = vmatpush3.bf16.msra.mxu0 %v10007_v21  ;;  %6596 = vmatprep.mubr.bf16.mxu1 %v8342_v50  ;;  %v1201_v49 = vor.u32 %v1200_v33, %v1196_v28  ;;  %v1211_v42 = vrot.slane %v1209_v51, 4  ;;  %v1214_v45 = vrot.slane %v1212_v3, 5  ;;  %v1218_v21 = vshll.u32 %v10509_v4, 16  ;;  %v10012_v50 = vld [vmem:[%s13113_s2 + $0x1d8] sm:$0xff]  }
  0x78   : > { %9240 = vmatpush3.bf16.msra.mxu1 %v10005_v2  ;;  %9353 = vmatprep.subr.bf16.mxu0 %v10010_v9  ;;  %v1686_v35 = vsel %vm10652_vm3, %v1684_v37, %v1685_v44  ;;  %v1222_v61 = vshrl.u32 %v10509_v4, 16  ;;  %v1228_v47 = vshll.u32 %v1075_v39, 16  ;;  %v8258_v57 = vrot.slane %v1572_v34, 9  ;;  %v1575_v2 = vld [vmem:[#allocation2 + $0xd8] sm:$0xee] }
  0x79   : > { %9241 = vmatprep.subr.bf16.mxu1 %v10008_v31  ;;  %v10845_v63 = vsel %vm10646_vm1, %v1192_v24, %v1196_v28  ;;  %v1202_v26 = vrot.slane %v1201_v49, 4  ;;  %v8362_v5 = vcombine.high %v10834_v15, %v1686_v35  ;;  %v1215_v16 = vor.u32 %v1214_v45, %v1211_v42  ;;  %v10013_v39 = vld [vmem:[%s13113_s2 + $0x198] sm:$0xff]   ;;  %v931_v49 = vld [vmem:[#allocation2 + $0xe8] sm:$0x11] }
  0x7a   : > { %v8361_v23 = vcombine.low %v10834_v15, %v1686_v35  ;;  %v1220_v31 = vrot.slane %v1218_v21, 5  ;;  %v1224_v9 = vrot.slane %v1222_v61, 4  ;;  %v1689_v34 = vrot.slane %v10509_v4, 5  ;;  %v924_v15 = vld [vmem:[#allocation2 + $0x1a0] sm:$0x11]  ;;  %v10014_v42 = vld [vmem:[%s13113_s2 + $0x258] sm:$0xff]  }
  0x7b   : > { %9354 = vmatpush3.bf16.msra.mxu0 %v10011_v53  ;;  %v1207_v24 = vsel %vm10646_vm1, %v1202_v26, %v1206_v14  ;;  %v1216_v28 = vrot.slane %v1215_v16, 4  ;;  %v1692_v8 = vrot.slane %v1574_v7, 5  ;;  %v918_v62 = vsel %vm10701_vm2, %v635_v19, %v917_v6  ;;  %v10015_v35 = vld [vmem:[%s13113_s2 + $0x218] sm:$0xff]  }
  0x7c   : > { %9242 = vmatpush3.bf16.msra.mxu1 %v10009_v54  ;;  %v8360_v20 = vcombine.high %v10845_v63, %v1207_v24  ;;  %v1225_v53 = vor.u32 %v1224_v9, %v1220_v31  ;;  %v1230_v33 = vrot.slane %v1228_v47, 5  ;;  %v10862_v4 = vsel %vm10652_vm3, %v8258_v57, %v1689_v34  ;;  %919 = vst [vmem:[#allocation2 + $0x130] sm:$0x11] %v918_v62 }
  0x7d   : > { %6758 = vmatmul.mubr.bf16.gmra.mxu0 %v8343_v56  ;;  %9243 = vmatprep.subr.bf16.mxu1 %v10012_v50  ;;  %v10866_v56 = vsel %vm10646_vm1, %v1216_v28, %v1220_v31  ;;  %v1691_v38 = vrot.slane %v1689_v34, 4  ;;  %v1233_v44 = vshrl.u32 %v10555_v59, 16  ;;  %v1236_v19 = vshll.u32 %v10555_v59, 16  ;;  %v1578_v50 = vld [vmem:[#allocation2 + $0x138] sm:$0xee] }
  0x7e   : > { %6765 = vmatprep.mubr.bf16.mxu0 %v8362_v5  ;;  %6597 = vmatmul.mubr.bf16.gmra.mxu1 %v8341_v25  ;;  %v1226_v51 = vrot.slane %v1225_v53, 4  ;;  %v1242_v3 = vshll.u32 %v10566_v13, 16  ;;  %v1246_v14 = vshrl.u32 %v10566_v13, 16  ;;  %v8259_v25 = vrot.slane %v1575_v2, 9 }
  0x7f   : > { %6604 = vmatprep.mubr.bf16.mxu1 %v8360_v20  ;;  %v10877_v37 = vsel %vm10652_vm3, %v1691_v38, %v1692_v8  ;;  %v1235_v6 = vrot.slane %v1233_v44, 4  ;;  %v1238_v54 = vrot.slane %v1236_v19, 5  ;;  %v1696_v59 = vrot.slane %v10566_v13, 5  ;;  %9355 = vmatprep.subr.bf16.mxu0 %v10014_v42 }
  0x80   : > { %9244 = vmatpush3.bf16.msra.mxu1 %v10013_v39  ;;  %v10885_v45 = vsel %vm10646_vm1, %v1226_v51, %v1230_v33  ;;  %v8380_v21 = vcombine.high %v10862_v4, %v10877_v37  ;;  %v1244_v7 = vrot.slane %v1242_v3, 5  ;;  %v8359_v13 = vcombine.low %v10845_v63, %v1207_v24  ;;  %9356 = vmatpush3.bf16.msra.mxu0 %v10015_v35  ;;  %v938_v51 = vld [vmem:[#allocation2 + $0x28] sm:$0x11]  ;;  %v10940_v35 = vld [vmem:[#allocation2 + $0x158] sm:$0xee] }
  0x81   : > { %v8378_v61 = vcombine.high %v10866_v56, %v10885_v45  ;;  %v1239_v47 = vor.u32 %v1238_v54, %v1235_v6  ;;  %v1248_v57 = vrot.slane %v1246_v14, 4  ;;  %v10897_v26 = vsel %vm10652_vm3, %v8259_v25, %v1696_v59 }
  0x82   : > { %v1698_v5 = vrot.slane %v1696_v59, 4  ;;  %v925_v16 = vsel %vm10701_vm2, %v652_v58, %v924_v15  ;;  %v1257_v2 = vshrl.u32 %v10610_v27, 16  ;;  %v1260_v24 = vshll.u32 %v10610_v27, 16 }
  0x83   : > { %v1078_v63 = vld [vmem:[#allocation2 + $0x130] sm:$0x11]  ;;  %v1240_v31 = vrot.slane %v1239_v47, 4  ;;  %v1249_v9 = vor.u32 %v1248_v57, %v1244_v7  ;;  %926 = vst [vmem:[#allocation2 + $0x1a0] sm:$0x11] %v925_v16  ;;  %v932_v55 = vsel %vm10701_vm2, %v669_v52, %v931_v49  ;;  %v1266_v62 = vshll.u32 %v10619_v40, 16 }
  0x84   : > { %v1577_v34 = vld [vmem:[#allocation2 + $0x130] sm:$0x11]  ;;  %v1252_v28 = vshll.u32 %v1078_v63, 16  ;;  %v1259_v8 = vrot.slane %v1257_v2, 4  ;;  %933 = vst [vmem:[#allocation2 + $0xe8] sm:$0x11] %v932_v55  ;;  %v8377_v6 = vcombine.low %v10866_v56, %v10885_v45  ;;  %v939_v56 = vsel %vm10701_vm2, %v686_v12, %v938_v51 }
  0x85   : > { %6766 = vmatmul.mubr.bf16.gmra.mxu0 %v8361_v23  ;;  %v1699_v58 = vrot.slane %v1577_v34, 5  ;;  %v8379_v23 = vcombine.low %v10862_v4, %v10877_v37  ;;  %v1250_v20 = vrot.slane %v1249_v9, 4  ;;  %v1262_v53 = vrot.slane %v1260_v24, 5  ;;  %v10016_v37 = vld [vmem:[%s13113_s2 + $0x1d0] sm:$0xff]   ;;  %940 = vst [vmem:[#allocation2 + $0x28] sm:$0x11] %v939_v56 }
  0x86   : > { %6773 = vmatprep.mubr.bf16.mxu0 %v8380_v21  ;;  %6605 = vmatmul.mubr.bf16.gmra.mxu1 %v8359_v13  ;;  %v1270_v27 = vshrl.u32 %v10619_v40, 16  ;;  %v10915_v36 = vsel %vm10646_vm1, %v1240_v31, %v1244_v7  ;;  %v1254_v52 = vrot.slane %v1252_v28, 5  ;;  %v1268_v38 = vrot.slane %v1266_v62, 5  ;;  %v10017_v49 = vld [vmem:[%s13113_s2 + $0x190] sm:$0xff]   ;;  %v1085_v24 = vld [vmem:[#allocation2 + $0x80] sm:$0xff] }
  0x87   : > { %6612 = vmatprep.mubr.bf16.mxu1 %v8378_v61  ;;  %v10919_v33 = vsel %vm10652_vm3, %v1698_v5, %v1699_v58  ;;  %v1263_v19 = vor.u32 %v1262_v53, %v1259_v8  ;;  %v8260_v39 = vrot.slane %v1578_v50, 9  ;;  %v1703_v14 = vrot.slane %v10619_v40, 5  ;;  %9245 = vmatprep.subr.bf16.mxu1 %v10016_v37  ;;  %v10018_v5 = vld [vmem:[%s13113_s2 + $0x250] sm:$0xff]   ;;  %v945_v55 = vld [vmem:[#allocation2 + $0xb8] sm:$0x11] }
  0x88   : > { %v8398_v44 = vcombine.high %v10897_v26, %v10919_v33  ;;  %v1272_v4 = vrot.slane %v1270_v27, 4  ;;  %v10925_v3 = vsel %vm10646_vm1, %v1250_v20, %v1254_v52  ;;  %v1281_v25 = vshrl.u32 %v10673_v18, 16  ;;  %9246 = vmatpush3.bf16.msra.mxu1 %v10017_v49  ;;  %9357 = vmatprep.subr.bf16.mxu0 %v10018_v5  ;;  %v10019_v28 = vld [vmem:[%s13113_s2 + $0x210] sm:$0xff]   ;;  %v1584_v49 = vld [vmem:[#allocation2 + $0x80] sm:$0xee] }
  0x89   : > { %v1284_v15 = vshll.u32 %v10673_v18, 16  ;;  %v1264_v54 = vrot.slane %v1263_v19, 4  ;;  %v8396_v40 = vcombine.high %v10915_v36, %v10925_v3  ;;  %v1705_v7 = vrot.slane %v1703_v14, 4  ;;  %9358 = vmatpush3.bf16.msra.mxu0 %v10019_v28 }
  0x8a   : > { %v1273_v59 = vor.u32 %v1272_v4, %v1268_v38  ;;  %v1081_v42 = vld [vmem:[#allocation2 + $0x1a0] sm:$0x11]  ;;  %v1283_v18 = vrot.slane %v1281_v25, 4  ;;  %v10948_v61 = vsel %vm10652_vm3, %v8260_v39, %v1703_v14  ;;  %v1290_v12 = vshll.u32 %v10685_v11, 16 }
  0x8b   : > { %v1580_v21 = vld [vmem:[#allocation2 + $0x1a0] sm:$0x11]  ;;  %v1276_v13 = vshll.u32 %v1081_v42, 16  ;;  %v1084_v57 = vld [vmem:[#allocation2 + $0xe8] sm:$0x11]  ;;  %v1286_v29 = vrot.slane %v1284_v15, 5  ;;  %v10957_v63 = vsel %vm10646_vm1, %v1264_v54, %v1268_v38  ;;  %v8397_v58 = vcombine.low %v10897_v26, %v10919_v33 }
  0x8c   : > { %v1274_v45 = vrot.slane %v1273_v59, 4  ;;  %v1706_v47 = vrot.slane %v1580_v21, 5  ;;  %v1294_v16 = vshrl.u32 %v10685_v11, 16  ;;  %v1300_v2 = vshll.u32 %v1084_v57, 16  ;;  %v1583_v50 = vld [vmem:[#allocation2 + $0xe8] sm:$0x11] }
  0x8d   : > { %6774 = vmatmul.mubr.bf16.gmra.mxu0 %v8379_v23  ;;  %v1278_v31 = vrot.slane %v1276_v13, 5  ;;  %v1710_v34 = vrot.slane %v10685_v11, 5  ;;  %v1287_v8 = vor.u32 %v1286_v29, %v1283_v18  ;;  %v1292_v62 = vrot.slane %v1290_v12, 5  ;;  %v10969_v23 = vld [vmem:[#allocation2 + $0xa8] sm:$0xff] }
  0x8e   : > { %6781 = vmatprep.mubr.bf16.mxu0 %v8398_v44  ;;  %6613 = vmatmul.mubr.bf16.gmra.mxu1 %v8377_v6  ;;  %v10961_v9 = vsel %vm10652_vm3, %v1705_v7, %v1706_v47  ;;  %v8395_v20 = vcombine.low %v10915_v36, %v10925_v3  ;;  %v1296_v53 = vrot.slane %v1294_v16, 4  ;;  %v8261_v27 = vrot.slane %v10940_v35, 9  ;;  %v1087_v51 = vld [vmem:[#allocation2 + $0x28] sm:$0x11]  ;;  %v1088_v7 = vld [vmem:[#allocation2] sm:$0xff] }
  0x8f   : > { %6620 = vmatprep.mubr.bf16.mxu1 %v8396_v40  ;;  %v10975_v11 = vsel %vm10646_vm1, %v1274_v45, %v1278_v31  ;;  %v8416_v26 = vcombine.high %v10948_v61, %v10961_v9  ;;  %v1302_v33 = vrot.slane %v1300_v2, 5  ;;  %v1712_v38 = vrot.slane %v1710_v34, 4  ;;  %v1586_v21 = vld [vmem:[#allocation2 + $0x28] sm:$0x11] }
  0x90   : > { %v8414_v52 = vcombine.high %v10957_v63, %v10975_v11  ;;  %v1297_v44 = vor.u32 %v1296_v53, %v1292_v62  ;;  %v1713_v19 = vrot.slane %v1583_v50, 5  ;;  %v1305_v4 = vshrl.u32 %v1085_v24, 16  ;;  %v11000_v13 = vld [vmem:[#allocation2 + $0x168] sm:$0xff] }
  0x91   : > { %v1308_v36 = vshll.u32 %v1085_v24, 16  ;;  %v1288_v39 = vrot.slane %v1287_v8, 4  ;;  %v1314_v3 = vshll.u32 %v10969_v23, 16  ;;  %v1318_v14 = vshrl.u32 %v10969_v23, 16  ;;  %v10021_v12 = vld [vmem:[%s13113_s2 + $0x188] sm:$0xff]  }
  0x92   : > { %v13130_v25 = vrot.slane %v10347_v10, 4  ;;  %v771_v37 = vrot.slane %v10557_v0, 4  ;;  %v1298_v6 = vrot.slane %v1297_v44, 4  ;;  %v1307_v54 = vrot.slane %v1305_v4, 4  ;;  %v10020_v10 = vld [vmem:[%s13113_s2 + $0x1c8] sm:$0xff]  }
  0x93   : > { %v1310_v59 = vrot.slane %v1308_v36, 5  ;;  %v1316_v40 = vrot.slane %v1314_v3, 5  ;;  %v1320_v42 = vrot.slane %v1318_v14, 4  ;;  %v10994_v18 = vsel %vm10652_vm3, %v8261_v27, %v1710_v34  ;;  %9247 = vmatprep.subr.bf16.mxu1 %v10020_v10  ;;  %v11042_v14 = vld [vmem:[#allocation2 + $0x140] sm:$0xff] }
  0x94   : > { %v946_v15 = vsel %vm10701_vm2, %v13130_v25, %v945_v55  ;;  %v10998_v35 = vsel %vm10652_vm3, %v1712_v38, %v1713_v19  ;;  %v1324_v45 = vshll.u32 %v1087_v51, 16  ;;  %v8415_v47 = vcombine.low %v10948_v61, %v10961_v9  ;;  %9248 = vmatpush3.bf16.msra.mxu1 %v10021_v12  ;;  %v10022_v55 = vld [vmem:[%s13113_s2 + $0x248] sm:$0xff]   ;;  %v1094_v12 = vld [vmem:[#allocation2 + $0xa0] sm:$0xff] }
  0x95   : > { %6782 = vmatmul.mubr.bf16.gmra.mxu0 %v8397_v58  ;;  %947 = vst [vmem:[#allocation2 + $0xb8] sm:$0x11] %v946_v15  ;;  %v1311_v56 = vor.u32 %v1310_v59, %v1307_v54  ;;  %v11006_v57 = vsel %vm10646_vm1, %v1288_v39, %v1292_v62  ;;  %v11010_v5 = vsel %vm10646_vm1, %v1298_v6, %v1302_v33  ;;  %v1717_v29 = vrot.slane %v10969_v23, 5  ;;  %v11025_v23 = vld [vmem:[#allocation2] sm:$0xee] }
  0x96   : > { %6789 = vmatprep.mubr.bf16.mxu0 %v8416_v26  ;;  %6621 = vmatmul.mubr.bf16.gmra.mxu1 %v8395_v20  ;;  %v1321_v2 = vor.u32 %v1320_v42, %v1316_v40  ;;  %v8262_v50 = vrot.slane %v1584_v49, 9  ;;  %v1329_v31 = vshrl.u32 %v1088_v7, 16  ;;  %v8434_v61 = vcombine.high %v10994_v18, %v10998_v35  ;;  %v10023_v20 = vld [vmem:[%s13113_s2 + $0x208] sm:$0xff]  }
  0x97   : > { %6628 = vmatprep.mubr.bf16.mxu1 %v8414_v52  ;;  %v1312_v16 = vrot.slane %v1311_v56, 4  ;;  %v1719_v9 = vrot.slane %v1717_v29, 4  ;;  %v1720_v34 = vrot.slane %v1586_v21, 5  ;;  %v1332_v24 = vshll.u32 %v1088_v7, 16  ;;  %9359 = vmatprep.subr.bf16.mxu0 %v10022_v55  ;;  %v10024_v56 = vld [vmem:[%s13113_s2 + $0x1c0] sm:$0xff]  }
  0x98   : > { %v8413_v28 = vcombine.low %v10957_v63, %v10975_v11  ;;  %v1331_v58 = vrot.slane %v1329_v31, 4  ;;  %v1338_v8 = vshll.u32 %v11000_v13, 16  ;;  %v1342_v62 = vshrl.u32 %v11000_v13, 16  ;;  %v952_v63 = vld [vmem:[#allocation2 + $0x50] sm:$0x11]  ;;  %v1091_v11 = vld [vmem:[#allocation2 + $0x1a8] sm:$0xff]  ;;  %9360 = vmatpush3.bf16.msra.mxu0 %v10023_v20  ;;  %9249 = vmatprep.subr.bf16.mxu1 %v10024_v56 }
  0x99   : > { %v8432_v53 = vcombine.high %v11006_v57, %v11010_v5  ;;  %v8433_v27 = vcombine.low %v10994_v18, %v10998_v35  ;;  %v1334_v26 = vrot.slane %v1332_v24, 5  ;;  %v11036_v33 = vsel %vm10646_vm1, %v1312_v16, %v1316_v40  ;;  %v966_v16 = vld [vmem:[#allocation2 + $0xc8] sm:$0x11] }
  0x9a   : > { %v1322_v38 = vrot.slane %v1321_v2, 4  ;;  %v1326_v44 = vrot.slane %v1324_v45, 5  ;;  %v11040_v19 = vsel %vm10652_vm3, %v8262_v50, %v1717_v29  ;;  %v1340_v39 = vrot.slane %v1338_v8, 5  ;;  %v10025_v2 = vld [vmem:[%s13113_s2 + $0x180] sm:$0xff]  }
  0x9b   : > { %v1335_v36 = vor.u32 %v1334_v26, %v1331_v58  ;;  %v1344_v51 = vrot.slane %v1342_v62, 4  ;;  %v11046_v25 = vsel %vm10652_vm3, %v1719_v9, %v1720_v34  ;;  %v1724_v15 = vrot.slane %v11000_v13, 5  ;;  %v10026_v34 = vld [vmem:[%s13113_s2 + $0x240] sm:$0xff]   ;;  %9250 = vmatpush3.bf16.msra.mxu1 %v10025_v2 }
  0x9c   : > { %v1090_v52 = vld [vmem:[#allocation2 + $0xb8] sm:$0x11]  ;;  %v13131_v6 = vrot.slane %v10401_v1, 4  ;;  %v1353_v59 = vshrl.u32 %v1091_v11, 16  ;;  %v8263_v40 = vrot.slane %v11025_v23, 9  ;;  %v1356_v21 = vshll.u32 %v1091_v11, 16  ;;  %9361 = vmatprep.subr.bf16.mxu0 %v10026_v34 }
  0x9d   : > { %6790 = vmatmul.mubr.bf16.gmra.mxu0 %v8415_v47  ;;  %v1589_v4 = vld [vmem:[#allocation2 + $0xb8] sm:$0x11]  ;;  %v1348_v3 = vshll.u32 %v1090_v52, 16  ;;  %v1345_v49 = vor.u32 %v1344_v51, %v1340_v39  ;;  %v11056_v7 = vsel %vm10646_vm1, %v1322_v38, %v1326_v44  ;;  %v1336_v10 = vrot.slane %v1335_v36, 4  ;;  %v11086_v23 = vld [vmem:[#allocation2 + $0x170] sm:$0xff] }
  0x9e   : > { %6797 = vmatprep.mubr.bf16.mxu0 %v8434_v61  ;;  %6629 = vmatmul.mubr.bf16.gmra.mxu1 %v8413_v28  ;;  %v953_v54 = vsel %vm10701_vm2, %v13131_v6, %v952_v63  ;;  %v1727_v42 = vrot.slane %v1589_v4, 5  ;;  %v1362_v35 = vshll.u32 %v11042_v14, 16  ;;  %v959_v1 = vld [vmem:[#allocation2 + $0x198] sm:$0x11]  ;;  %v8452_v45 = vcombine.high %v11040_v19, %v11046_v25  ;;  %v1097_v6 = vld [vmem:[#allocation2 + $0xc0] sm:$0xff] }
  0x9f   : > { %6636 = vmatprep.mubr.bf16.mxu1 %v8432_v53  ;;  %954 = vst [vmem:[#allocation2 + $0x50] sm:$0x11] %v953_v54  ;;  %v1350_v18 = vrot.slane %v1348_v3, 5  ;;  %v1355_v13 = vrot.slane %v1353_v59, 4  ;;  %v1358_v47 = vrot.slane %v1356_v21, 5  ;;  %v1366_v29 = vshrl.u32 %v11042_v14, 16 }
  0xa0   : > { %v8431_v50 = vcombine.low %v11006_v57, %v11010_v5  ;;  %v1346_v31 = vrot.slane %v1345_v49, 4  ;;  %v1726_v61 = vrot.slane %v1724_v15, 4  ;;  %v11070_v9 = vrot.slane %v1362_v35, 5  ;;  %v10027_v57 = vld [vmem:[%s13113_s2 + $0x200] sm:$0xff]   ;;  %v980_v54 = vld [vmem:[#allocation2 + $0x8] sm:$0x11] }
  0xa1   : > { %v8450_v24 = vcombine.high %v11036_v33, %v11056_v7  ;;  %v1368_v55 = vrot.slane %v1366_v29, 4  ;;  %v788_v5 = vrot.slane %v10622_v41, 4  ;;  %v1359_v28 = vor.u32 %v1358_v47, %v1355_v13  ;;  %9362 = vmatpush3.bf16.msra.mxu0 %v10027_v57  ;;  %v10030_v59 = vld [vmem:[%s13113_s2 + $0x2f8] sm:$0xff]   ;;  %v11120_v21 = vld [vmem:[#allocation2 + $0x190] sm:$0xff]  ;;  %v1593_v2 = vld [vmem:[#allocation2 + $0xa0] sm:$0xee] }
  0xa2   : > { %v1731_v58 = vrot.slane %v11042_v14, 5  ;;  %v13132_v8 = vrot.slane %v10449_v60, 4  ;;  %v11090_v20 = vsel %vm10652_vm3, %v8263_v40, %v1724_v15  ;;  %v11094_v53 = vsel %vm10652_vm3, %v1726_v61, %v1727_v42  ;;  %v973_v14 = vld [vmem:[#allocation2 + $0x30] sm:$0x11]  ;;  %9459 = vmatprep.subr.bf16.mxu1 %v10030_v59  ;;  %v10032_v13 = vld [vmem:[%s13113_s2 + $0x378] sm:$0xff]  }
  0xa3   : > { %v1377_v52 = vshrl.u32 %v1094_v12, 16  ;;  %v13133_v60 = vrot.slane %v10521_v17, 4  ;;  %v8451_v63 = vcombine.low %v11040_v19, %v11046_v25  ;;  %v11104_v11 = vsel %vm10646_vm1, %v1336_v10, %v1340_v39  ;;  %9571 = vmatprep.subr.bf16.mxu0 %v10032_v13 }
  0xa4   : > { %v960_v62 = vsel %vm10701_vm2, %v13132_v8, %v959_v1  ;;  %v1369_v38 = vor.u32 %v1368_v55, %v11070_v9  ;;  %v1380_v4 = vshll.u32 %v1094_v12, 16  ;;  %v11109_v17 = vsel %vm10646_vm1, %v1346_v31, %v1350_v18 }
  0xa5   : > { %6798 = vmatmul.mubr.bf16.gmra.mxu0 %v8433_v27  ;;  %v1590_v27 = vld [vmem:[#allocation2 + $0x1a8] sm:$0xee]  ;;  %961 = vst [vmem:[#allocation2 + $0x198] sm:$0x11] %v960_v62  ;;  %v967_v26 = vsel %vm10701_vm2, %v13133_v60, %v966_v16  ;;  %v1386_v51 = vshll.u32 %v11086_v23, 16  ;;  %v1390_v3 = vshrl.u32 %v11086_v23, 16  ;;  %v8470_v19 = vcombine.high %v11090_v20, %v11094_v53 }
  0xa6   : > { %6805 = vmatprep.mubr.bf16.mxu0 %v8452_v45  ;;  %6637 = vmatmul.mubr.bf16.gmra.mxu1 %v8431_v50  ;;  %v1093_v41 = vld [vmem:[#allocation2 + $0x50] sm:$0x11]  ;;  %968 = vst [vmem:[#allocation2 + $0xc8] sm:$0x11] %v967_v26  ;;  %v1360_v39 = vrot.slane %v1359_v28, 4  ;;  %v8264_v25 = vrot.slane %v1590_v27, 9  ;;  %v8449_v49 = vcombine.low %v11036_v33, %v11056_v7  ;;  %v8468_v10 = vcombine.high %v11104_v11, %v11109_v17 }
  0xa7   : > { %6644 = vmatprep.mubr.bf16.mxu1 %v8450_v24  ;;  %v1592_v44 = vld [vmem:[#allocation2 + $0x50] sm:$0x11]  ;;  %v1372_v36 = vshll.u32 %v1093_v41, 16  ;;  %v1733_v15 = vrot.slane %v1731_v58, 4  ;;  %v1379_v42 = vrot.slane %v1377_v52, 4  ;;  %v1370_v18 = vrot.slane %v1369_v38, 4 }
  0xa8   : > { %v1734_v40 = vrot.slane %v1592_v44, 5  ;;  %v1382_v35 = vrot.slane %v1380_v4, 5  ;;  %v11124_v56 = vrot.slane %v1386_v51, 5  ;;  %v1392_v45 = vrot.slane %v1390_v3, 4  ;;  %v1100_v4 = vld [vmem:[#allocation2 + $0xf0] sm:$0xff] }
  0xa9   : > { %v1374_v1 = vrot.slane %v1372_v36, 5  ;;  %v805_v33 = vrot.slane %v10675_v22, 4  ;;  %v1738_v47 = vrot.slane %v11086_v23, 5  ;;  %v974_v29 = vsel %vm10701_vm2, %v771_v37, %v973_v14 }
  0xaa   : > { %v981_v12 = vsel %vm10701_vm2, %v788_v5, %v980_v54  ;;  %v11139_v16 = vsel %vm10652_vm3, %v8264_v25, %v1731_v58  ;;  %v11143_v22 = vsel %vm10652_vm3, %v1733_v15, %v1734_v40  ;;  %v1401_v50 = vshrl.u32 %v1097_v6, 16  ;;  %975 = vst [vmem:[#allocation2 + $0x30] sm:$0x11] %v974_v29  ;;  %v987_v58 = vld [vmem:[#allocation2 + $0x68] sm:$0x11] }
  0xab   : > { %v1404_v31 = vshll.u32 %v1097_v6, 16  ;;  %982 = vst [vmem:[#allocation2 + $0x8] sm:$0x11] %v981_v12  ;;  %v8469_v0 = vcombine.low %v11090_v20, %v11094_v53  ;;  %v1383_v37 = vor.u32 %v1382_v35, %v1379_v42  ;;  %v1410_v34 = vshll.u32 %v11120_v21, 16  ;;  %v1596_v53 = vld [vmem:[#allocation2 + $0xc0] sm:$0xee] }
  0xac   : > { %v1096_v7 = vld [vmem:[#allocation2 + $0x198] sm:$0x11]  ;;  %v1414_v24 = vshrl.u32 %v11120_v21, 16  ;;  %v11152_v55 = vsel %vm10646_vm1, %v1360_v39, %v11070_v9  ;;  %v11156_v57 = vsel %vm10646_vm1, %v1370_v18, %v1374_v1  ;;  %v1393_v5 = vor.u32 %v1392_v45, %v11124_v56 }
  0xad   : > { %6806 = vmatmul.mubr.bf16.gmra.mxu0 %v8451_v63  ;;  %v1595_v61 = vld [vmem:[#allocation2 + $0x198] sm:$0x11]  ;;  %v1396_v28 = vshll.u32 %v1096_v7, 16  ;;  %v8467_v8 = vcombine.low %v11104_v11, %v11109_v17  ;;  %v8488_v62 = vcombine.high %v11139_v16, %v11143_v22  ;;  %v8265_v23 = vrot.slane %v1593_v2, 9  ;;  %v1099_v9 = vld [vmem:[#allocation2 + $0xc8] sm:$0x11] }
  0xae   : > { %6813 = vmatprep.mubr.bf16.mxu0 %v8470_v19  ;;  %6645 = vmatmul.mubr.bf16.gmra.mxu1 %v8449_v49  ;;  %v1740_v20 = vrot.slane %v1738_v47, 4  ;;  %v1741_v41 = vrot.slane %v1595_v61, 5  ;;  %v1403_v27 = vrot.slane %v1401_v50, 4  ;;  %v1406_v52 = vrot.slane %v1404_v31, 5  ;;  %v1598_v36 = vld [vmem:[#allocation2 + $0xc8] sm:$0x11] }
  0xaf   : > { %6652 = vmatprep.mubr.bf16.mxu1 %v8468_v10  ;;  %v1745_v60 = vrot.slane %v11120_v21, 5  ;;  %v8486_v26 = vcombine.high %v11152_v55, %v11156_v57  ;;  %v1384_v63 = vrot.slane %v1383_v37, 4  ;;  %v1412_v38 = vrot.slane %v1410_v34, 5  ;;  %v11172_v19 = vld [vmem:[#allocation2 + $0x150] sm:$0xff]  ;;  %v1103_v7 = vld [vmem:[#allocation2 + $0xf8] sm:$0xff] }
  0xb0   : > { %v1416_v44 = vrot.slane %v1414_v24, 4  ;;  %v1394_v11 = vrot.slane %v1393_v5, 4  ;;  %v1398_v17 = vrot.slane %v1396_v28, 5  ;;  %v8487_v51 = vcombine.low %v11139_v16, %v11143_v22  ;;  %v11196_v16 = vld [vmem:[#allocation2 + $0x18] sm:$0xff] }
  0xb1   : > { %v11170_v3 = vsel %vm10652_vm3, %v8265_v23, %v1738_v47  ;;  %v1420_v14 = vshll.u32 %v1099_v9, 16  ;;  %v988_v39 = vsel %vm10701_vm2, %v805_v33, %v987_v58  ;;  %v1742_v25 = vsel %vm10652_vm3, %v1740_v20, %v1741_v41  ;;  %v1102_v37 = vld [vmem:[#allocation2 + $0x30] sm:$0x11] }
  0xb2   : > { %v1407_v15 = vor.u32 %v1406_v52, %v1403_v27  ;;  %v8266_v6 = vrot.slane %v1596_v53, 9  ;;  %v1747_v54 = vrot.slane %v1745_v60, 4  ;;  %989 = vst [vmem:[#allocation2 + $0x68] sm:$0x11] %v988_v39  ;;  %v1417_v59 = vor.u32 %v1416_v44, %v1412_v38  ;;  %v1105_v9 = vld [vmem:[#allocation2 + $0x8] sm:$0x11] }
  0xb3   : > { %v1748_v49 = vrot.slane %v1598_v36, 5  ;;  %v1425_v40 = vshrl.u32 %v1100_v4, 16  ;;  %v1428_v42 = vshll.u32 %v1100_v4, 16  ;;  %v1389_v21 = vsel %vm10646_vm1, %v1384_v63, %v11124_v56 }
  0xb4   : > { %v1399_v10 = vsel %vm10646_vm1, %v1394_v11, %v1398_v17  ;;  %v1434_v18 = vshll.u32 %v11172_v19, 16  ;;  %v1438_v35 = vshrl.u32 %v11172_v19, 16  ;;  %v8506_v1 = vcombine.high %v11170_v3, %v1742_v25  ;;  %v1106_v11 = vld [vmem:[#allocation2 + $0x60] sm:$0xff]  ;;  %v11214_v17 = vld [vmem:[#allocation2 + $0x70] sm:$0xff] }
  0xb5   : > { %6814 = vmatmul.mubr.bf16.gmra.mxu0 %v8469_v0  ;;  %v8485_v45 = vcombine.low %v11152_v55, %v11156_v57  ;;  %v1422_v13 = vrot.slane %v1420_v14, 5  ;;  %v11190_v33 = vsel %vm10652_vm3, %v8266_v6, %v1745_v60  ;;  %v8504_v47 = vcombine.high %v1389_v21, %v1399_v10  ;;  %v1599_v0 = vld [vmem:[#allocation2 + $0xf0] sm:$0xee]  ;;  %v1601_v55 = vld [vmem:[#allocation2 + $0x30] sm:$0x11] }
  0xb6   : > { %6821 = vmatprep.mubr.bf16.mxu0 %v8488_v62  ;;  %6653 = vmatmul.mubr.bf16.gmra.mxu1 %v8467_v8  ;;  %v1408_v56 = vrot.slane %v1407_v15, 4  ;;  %v1418_v29 = vrot.slane %v1417_v59, 4  ;;  %v11194_v12 = vsel %vm10652_vm3, %v1747_v54, %v1748_v49  ;;  %v1427_v22 = vrot.slane %v1425_v40, 4  ;;  %v1602_v15 = vld [vmem:[#allocation2 + $0xf8] sm:$0xee] }
  0xb7   : > { %6660 = vmatprep.mubr.bf16.mxu1 %v8486_v26  ;;  %v1430_v2 = vrot.slane %v1428_v42, 5  ;;  %v1436_v50 = vrot.slane %v1434_v18, 5  ;;  %v1440_v31 = vrot.slane %v1438_v35, 4  ;;  %v1752_v61 = vrot.slane %v11172_v19, 5  ;;  %v1604_v54 = vld [vmem:[#allocation2 + $0x8] sm:$0x11] }
  0xb8   : > { %v1449_v34 = vshrl.u32 %v1103_v7, 16  ;;  %v1452_v24 = vshll.u32 %v1103_v7, 16  ;;  %v1458_v57 = vshll.u32 %v11196_v16, 16  ;;  %v1462_v5 = vshrl.u32 %v11196_v16, 16  ;;  %v11235_v7 = vld [vmem:[#allocation2 + $0x160] sm:$0xff] }
  0xb9   : > { %v8505_v28 = vcombine.low %v11170_v3, %v1742_v25  ;;  %v11204_v58 = vsel %vm10646_vm1, %v1408_v56, %v1412_v38  ;;  %v11208_v8 = vsel %vm10646_vm1, %v1418_v29, %v1422_v13  ;;  %v8524_v62 = vcombine.high %v11190_v33, %v11194_v12  ;;  %v11233_v13 = vld [vmem:[#allocation2 + $0x48] sm:$0xff] }
  0xba   : > { %v1431_v23 = vor.u32 %v1430_v2, %v1427_v22  ;;  %v1441_v20 = vor.u32 %v1440_v31, %v1436_v50  ;;  %v1444_v53 = vshll.u32 %v1102_v37, 16  ;;  %v8267_v41 = vrot.slane %v1599_v0, 9  ;;  %v1605_v31 = vld [vmem:[#allocation2 + $0x60] sm:$0xee] }
  0xbb   : > { %v1754_v27 = vrot.slane %v1752_v61, 4  ;;  %v1755_v52 = vrot.slane %v1601_v55, 5  ;;  %v1451_v60 = vrot.slane %v1449_v34, 4  ;;  %v1454_v26 = vrot.slane %v1452_v24, 5 }
  0xbc   : > { %v8503_v63 = vcombine.low %v1389_v21, %v1399_v10  ;;  %v1460_v44 = vrot.slane %v1458_v57, 5  ;;  %v1464_v38 = vrot.slane %v1462_v5, 4  ;;  %v8522_v4 = vcombine.high %v11204_v58, %v11208_v8  ;;  %v1607_v5 = vld [vmem:[#allocation2 + $0x68] sm:$0x11] }
  0xbd   : > { %6822 = vmatmul.mubr.bf16.gmra.mxu0 %v8487_v51  ;;  %v1432_v36 = vrot.slane %v1431_v23, 4  ;;  %v1442_v51 = vrot.slane %v1441_v20, 4  ;;  %v1446_v3 = vrot.slane %v1444_v53, 5  ;;  %v1468_v14 = vshll.u32 %v1105_v9, 16 }
  0xbe   : > { %6829 = vmatprep.mubr.bf16.mxu0 %v8506_v1  ;;  %6661 = vmatmul.mubr.bf16.gmra.mxu1 %v8485_v45  ;;  %v11218_v19 = vsel %vm10652_vm3, %v8267_v41, %v1752_v61  ;;  %v11222_v39 = vsel %vm10652_vm3, %v1754_v27, %v1755_v52  ;;  %v1455_v25 = vor.u32 %v1454_v26, %v1451_v60  ;;  %v1759_v59 = vrot.slane %v11196_v16, 5  ;;  %v1901_v26 = vld [vmem:[#allocation2 + $0x128] sm:$0x11] }
  0xbf   : > { %6668 = vmatprep.mubr.bf16.mxu1 %v8504_v47  ;;  %v1465_v6 = vor.u32 %v1464_v38, %v1460_v44  ;;  %v1473_v49 = vshrl.u32 %v1106_v11, 16  ;;  %v1476_v40 = vshll.u32 %v1106_v11, 16  ;;  %v8523_v42 = vcombine.low %v11190_v33, %v11194_v12  ;;  %v1108_v12 = vld [vmem:[#allocation2 + $0x68] sm:$0x11] }
  0xc0   : > { %v1482_v21 = vshll.u32 %v11214_v17, 16  ;;  %v1486_v10 = vshrl.u32 %v11214_v17, 16  ;;  %v1437_v18 = vsel %vm10646_vm1, %v1432_v36, %v1436_v50  ;;  %v1447_v35 = vsel %vm10646_vm1, %v1442_v51, %v1446_v3  ;;  %v11256_v36 = vld [vmem:[#allocation2 + $0x40] sm:$0xff] }
  0xc1   : > { %v1470_v1 = vrot.slane %v1468_v14, 5  ;;  %v8268_v45 = vrot.slane %v1602_v15, 9  ;;  %v8521_v47 = vcombine.low %v11204_v58, %v11208_v8  ;;  %v8542_v33 = vcombine.high %v11218_v19, %v11222_v39 }
  0xc2   : > { %v1456_v56 = vrot.slane %v1455_v25, 4  ;;  %v1762_v29 = vrot.slane %v1604_v54, 5  ;;  %v1466_v16 = vrot.slane %v1465_v6, 4  ;;  %v1761_v22 = vrot.slane %v1759_v59, 4 }
  0xc3   : > { %v1475_v2 = vrot.slane %v1473_v49, 4  ;;  %v1478_v50 = vrot.slane %v1476_v40, 5  ;;  %v8540_v0 = vcombine.high %v1437_v18, %v1447_v35  ;;  %v1484_v37 = vrot.slane %v1482_v21, 5 }
  0xc4   : > { %v1488_v61 = vrot.slane %v1486_v10, 4  ;;  %v1766_v34 = vrot.slane %v11214_v17, 5  ;;  %v1948_v24 = vshrl.u32 %v11233_v13, 16  ;;  %v1951_v55 = vshll.u32 %v11233_v13, 16 }
  0xc5   : > { %6830 = vmatmul.mubr.bf16.gmra.mxu0 %v8505_v28  ;;  %v8541_v57 = vcombine.low %v11218_v19, %v11222_v39  ;;  %v1957_v28 = vshll.u32 %v11235_v7, 16  ;;  %v1961_v58 = vshrl.u32 %v11235_v7, 16  ;;  %v1461_v8 = vsel %vm10646_vm1, %v1456_v56, %v1460_v44  ;;  %v11258_v19 = vld [vmem:[#allocation2 + $0x178] sm:$0xff]  ;;  %v1904_v56 = vld [vmem:[#allocation2 + $0x108] sm:$0x11] }
  0xc6   : > { %6837 = vmatprep.mubr.bf16.mxu0 %v8524_v62  ;;  %6669 = vmatmul.mubr.bf16.gmra.mxu1 %v8503_v63  ;;  %v1760_v62 = vsel %vm10652_vm3, %v8268_v45, %v1759_v59  ;;  %v1763_v23 = vsel %vm10652_vm3, %v1761_v22, %v1762_v29  ;;  %v1492_v20 = vshll.u32 %v1108_v12, 16  ;;  %v1471_v53 = vsel %vm10646_vm1, %v1466_v16, %v1470_v1  ;;  %v11274_v29 = vld [vmem:[#allocation2 + $0x90] sm:$0xff] }
  0xc7   : > { %6676 = vmatprep.mubr.bf16.mxu1 %v8522_v4  ;;  %v1479_v41 = vor.u32 %v1478_v50, %v1475_v2  ;;  %v1489_v9 = vor.u32 %v1488_v61, %v1484_v37  ;;  %v8269_v27 = vrot.slane %v1605_v31, 9  ;;  %v1768_v52 = vrot.slane %v1766_v34, 4 }
  0xc8   : > { %v1769_v60 = vrot.slane %v1607_v5, 5  ;;  %v1950_v63 = vrot.slane %v1948_v24, 4  ;;  %v1953_v38 = vrot.slane %v1951_v55, 5  ;;  %v8560_v44 = vcombine.high %v1760_v62, %v1763_v23 }
  0xc9   : > { %v1959_v4 = vrot.slane %v1957_v28, 5  ;;  %v1963_v11 = vrot.slane %v1961_v58, 4  ;;  %v8539_v17 = vcombine.low %v1437_v18, %v1447_v35  ;;  %v8558_v51 = vcombine.high %v1461_v8, %v1471_v53  ;;  %v11268_v35 = vld [vmem:[#allocation2 + $0x110] sm:$0xff] }
  0xca   : > { %v1480_v3 = vrot.slane %v1479_v41, 4  ;;  %v1494_v14 = vrot.slane %v1492_v20, 5  ;;  %v1490_v39 = vrot.slane %v1489_v9, 4  ;;  %v1767_v25 = vsel %vm10652_vm3, %v8269_v27, %v1766_v34 }
  0xcb   : > { %v1770_v15 = vsel %vm10652_vm3, %v1768_v52, %v1769_v60  ;;  %v1954_v6 = vor.u32 %v1953_v38, %v1950_v63  ;;  %v1964_v54 = vor.u32 %v1963_v11, %v1959_v4  ;;  %v1967_v59 = vshll.u32 %v1901_v26, 16  ;;  %v11284_v60 = vld [vmem:[#allocation2 + $0x148] sm:$0xff]  ;;  %v11286_v26 = vld [vmem:[#allocation2 + $0x100] sm:$0xff] }
  0xcc   : > { %v1972_v49 = vshrl.u32 %v11256_v36, 16  ;;  %v1975_v40 = vshll.u32 %v11256_v36, 16  ;;  %v1985_v21 = vshrl.u32 %v11258_v19, 16  ;;  %v8557_v10 = vcombine.low %v1461_v8, %v1471_v53  ;;  %v1907_v8 = vld [vmem:[#allocation2 + $0x118] sm:$0x11] }
  0xcd   : > { %6838 = vmatmul.mubr.bf16.gmra.mxu0 %v8523_v42  ;;  %v1981_v42 = vshll.u32 %v11258_v19, 16  ;;  %v8559_v18 = vcombine.low %v1760_v62, %v1763_v23  ;;  %v1485_v1 = vsel %vm10646_vm1, %v1480_v3, %v1484_v37  ;;  %v1495_v45 = vsel %vm10646_vm1, %v1490_v39, %v1494_v14 }
  0xce   : > { %6845 = vmatprep.mubr.bf16.mxu0 %v8542_v33  ;;  %6677 = vmatmul.mubr.bf16.gmra.mxu1 %v8521_v47  ;;  %v8578_v47 = vcombine.high %v1767_v25, %v1770_v15  ;;  %v1955_v33 = vrot.slane %v1954_v6, 4  ;;  %v1965_v12 = vrot.slane %v1964_v54, 4  ;;  %v1969_v16 = vrot.slane %v1967_v59, 5  ;;  %v10033_v54 = vld [vmem:[%s13113_s2 + $0x338] sm:$0xff]  }
  0xcf   : > { %6684 = vmatprep.mubr.bf16.mxu1 %v8540_v0  ;;  %v1974_v22 = vrot.slane %v1972_v49, 4  ;;  %v1977_v2 = vrot.slane %v1975_v40, 5  ;;  %v1983_v50 = vrot.slane %v1981_v42, 5  ;;  %v1987_v31 = vrot.slane %v1985_v21, 4  ;;  %v1910_v42 = vld [vmem:[#allocation2 + $0x58] sm:$0x11] }
  0xd0   : > { %v1996_v0 = vshrl.u32 %v11268_v35, 16  ;;  %v1999_v61 = vshll.u32 %v11268_v35, 16  ;;  %v8576_v34 = vcombine.high %v1485_v1, %v1495_v45  ;;  %v2005_v37 = vshll.u32 %v11274_v29, 16 }
  0xd1   : > { %v2009_v24 = vshrl.u32 %v11274_v29, 16  ;;  %v1978_v55 = vor.u32 %v1977_v2, %v1974_v22  ;;  %v1960_v5 = vsel %vm10646_vm1, %v1955_v33, %v1959_v4  ;;  %v1970_v28 = vsel %vm10646_vm1, %v1965_v12, %v1969_v16  ;;  %v11312_v12 = vld [vmem:[#allocation2 + $0xd8] sm:$0xff]  ;;  %v11316_v22 = vld [vmem:[#allocation2 + $0x180] sm:$0xff] }
  0xd2   : > { %v1988_v58 = vor.u32 %v1987_v31, %v1983_v50  ;;  %v1998_v62 = vrot.slane %v1996_v0, 4  ;;  %v2001_v23 = vrot.slane %v1999_v61, 5  ;;  %v2007_v20 = vrot.slane %v2005_v37, 5  ;;  %v10031_v2 = vld [vmem:[%s13113_s2 + $0x2b8] sm:$0xff]  }
  0xd3   : > { %v2011_v53 = vrot.slane %v2009_v24, 4  ;;  %v8577_v41 = vcombine.low %v1767_v25, %v1770_v15  ;;  %v8312_v9 = vcombine.high %v1960_v5, %v1970_v28  ;;  %v1979_v27 = vrot.slane %v1978_v55, 4  ;;  %v10036_v24 = vld [vmem:[%s13113_s2 + $0x2f0] sm:$0xff]  }
  0xd4   : > { %v8575_v63 = vcombine.low %v1485_v1, %v1495_v45  ;;  %v1989_v38 = vrot.slane %v1988_v58, 4  ;;  %v8310_v4 = vcombine.high %v11233_v13, %v11235_v7  ;;  %v2002_v11 = vor.u32 %v2001_v23, %v1998_v62  ;;  %v10039_v58 = vld [vmem:[%s13113_s2 + $0x330] sm:$0xff]  }
  0xd5   : > { %6846 = vmatmul.mubr.bf16.gmra.mxu0 %v8541_v57  ;;  %v1991_v57 = vshll.u32 %v1904_v56, 16  ;;  %v2023_v3 = vshll.u32 %v11284_v60, 16  ;;  %v2029_v14 = vshll.u32 %v11286_v26, 16  ;;  %v2033_v39 = vshrl.u32 %v11286_v26, 16 }
  0xd6   : > { %6853 = vmatprep.mubr.bf16.mxu0 %v8560_v44  ;;  %6685 = vmatmul.mubr.bf16.gmra.mxu1 %v8539_v17  ;;  %v2015_v44 = vshll.u32 %v1907_v8, 16  ;;  %v2012_v17 = vor.u32 %v2011_v53, %v2007_v20  ;;  %v11296_v25 = vsel %vm10646_vm1, %v1979_v27, %v1983_v50  ;;  %v2003_v59 = vrot.slane %v2002_v11, 4  ;;  %v10037_v53 = vld [vmem:[%s13113_s2 + $0x2b0] sm:$0xff]   ;;  %v10047_v11 = vld [vmem:[%s13113_s2 + $0x328] sm:$0xff]  }
  0xd7   : > { %6692 = vmatprep.mubr.bf16.mxu1 %v8558_v51  ;;  %v1993_v52 = vrot.slane %v1991_v57, 5  ;;  %v2020_v51 = vshrl.u32 %v11284_v60, 16  ;;  %v8311_v40 = vcombine.low %v1960_v5, %v1970_v28  ;;  %v11310_v33 = vrot.slane %v2029_v14, 5 }
  0xd8   : > { %v2017_v6 = vrot.slane %v2015_v44, 5  ;;  %v2013_v49 = vrot.slane %v2012_v17, 4  ;;  %v2035_v56 = vrot.slane %v2033_v39, 4  ;;  %v8309_v16 = vcombine.low %v11233_v13, %v11235_v7  ;;  %v1913_v44 = vld [vmem:[#allocation2 + $0x130] sm:$0x11]  ;;  %v11366_v39 = vld [vmem:[#allocation2 + $0x138] sm:$0xff] }
  0xd9   : > { %v11300_v15 = vsel %vm10646_vm1, %v1989_v38, %v1993_v52  ;;  %v2022_v21 = vrot.slane %v2020_v51, 4  ;;  %v8328_v0 = vcombine.high %v11256_v36, %v11258_v19  ;;  %v11325_v61 = vsel %vm10646_vm1, %v2003_v59, %v2007_v20 }
  0xda   : > { %v8330_v45 = vcombine.high %v11296_v25, %v11300_v15  ;;  %v2039_v13 = vshll.u32 %v1910_v42, 16  ;;  %v2044_v57 = vshrl.u32 %v11312_v12, 16  ;;  %v2036_v8 = vor.u32 %v2035_v56, %v11310_v33  ;;  %v10045_v42 = vld [vmem:[%s13113_s2 + $0x2a8] sm:$0xff]  }
  0xdb   : > { %v2047_v62 = vshll.u32 %v11312_v12, 16  ;;  %v2053_v23 = vshll.u32 %v11316_v22, 16  ;;  %v2057_v20 = vshrl.u32 %v11316_v22, 16  ;;  %v8329_v52 = vcombine.low %v11296_v25, %v11300_v15  ;;  %v10050_v25 = vld [vmem:[%s13113_s2 + $0x360] sm:$0xff]  }
  0xdc   : > { %v2041_v38 = vrot.slane %v2039_v13, 5  ;;  %v2046_v14 = vrot.slane %v2044_v57, 4  ;;  %v2068_v13 = vshrl.u32 %v11366_v39, 16  ;;  %v11403_v57 = vld [vmem:[#allocation2 + $0x1a0] sm:$0x11] }
  0xdd   : > { %6854 = vmatmul.mubr.bf16.gmra.mxu0 %v8559_v18  ;;  %v2049_v59 = vrot.slane %v2047_v62, 5 }
  0xde   : > { %6861 = vmatprep.mubr.bf16.mxu0 %v8578_v47  ;;  %6693 = vmatmul.mubr.bf16.gmra.mxu1 %v8557_v10  ;;  %v2025_v10 = vrot.slane %v2023_v3, 5  ;;  %v10038_v47 = vld [vmem:[%s13113_s2 + $0x370] sm:$0xff]  }
  0xdf   : > { %6700 = vmatprep.mubr.bf16.mxu1 %v8576_v34  ;;  %v11329_v34 = vsel %vm10646_vm1, %v2013_v49, %v2017_v6  ;;  %v11371_v49 = vrot.slane %v2053_v23, 5 }
  0xe0   : > { %v2026_v55 = vor.u32 %v2025_v10, %v2022_v21  ;;  %v8327_v21 = vcombine.low %v11256_v36, %v11258_v19  ;;  %v10048_v36 = vld [vmem:[%s13113_s2 + $0x2e0] sm:$0xff]  }
  0xe2   : > { %v2027_v3 = vrot.slane %v2026_v55, 4 }
  0xe5   : > { %6862 = vmatmul.mubr.bf16.gmra.mxu0 %v8577_v41  ;;  %v10046_v41 = vld [vmem:[%s13113_s2 + $0x368] sm:$0xff]  }
  0xe6   : > { %7063 = vmatprep.mubr.bf16.mxu0 %v8312_v9  ;;  %6701 = vmatmul.mubr.bf16.gmra.mxu1 %v8575_v63  ;;  %v8348_v63 = vcombine.high %v11325_v61, %v11329_v34 }
  0xe7   : > { %6902 = vmatprep.mubr.bf16.mxu1 %v8310_v4  ;;  %v10044_v4 = vld [vmem:[%s13113_s2 + $0x2e8] sm:$0xff]  }
  0xed   : > { %v8915_v18 = vpop.f32.mrf.mxu0  ;;  %v8963_v1 = vpop.f32.mrf.mxu1  ;;  %7064 = vmatmul.mubr.bf16.vlgmr.msra.gmra.mxu0 %v8311_v40  ;;  %v2059_v40 = vrot.slane %v2057_v20, 4  ;;  %v11411_v20 = vld [vmem:[#allocation2 + $0x158] sm:$0xff] }
  0xee   : > { %9572 = vmatpush3.bf16.msra.mxu0 %v10033_v54  ;;  %7071 = vmatprep.mubr.bf16.mxu0 %v8330_v45  ;;  %v2037_v54 = vrot.slane %v2036_v8, 4  ;;  %v2063_v45 = vshll.u32 %v1913_v44, 16 }
  0xef   : > { %v8916_v50 = vpop.f32.mrf.mxu0  ;;  %v8964_v31 = vpop.f32.mrf.mxu1  ;;  %6903 = vmatmul.mubr.bf16.vlgmr.msra.gmra.mxu1 %v8309_v16  ;;  %9573 = vmatprep.subr.bf16.mxu0 %v10038_v47  ;;  %v11380_v47 = vld [vmem:[#allocation2 + $0x78] sm:$0xff]  ;;  %v2060_v55 = vor.u32 %v2059_v40, %v11371_v49  ;;  %v8364_v40 = vcombine.high %v11284_v60, %v11286_v26 }
  0xf0   : > { %v11331_v7 = vadd.f32 %v8916_v50, %v8915_v18  ;;  %v11333_v37 = vadd.f32 %v8964_v31, %v8963_v1  ;;  %9460 = vmatpush3.bf16.msra.mxu1 %v10031_v2  ;;  %6910 = vmatprep.mubr.bf16.mxu1 %v8328_v0  ;;  %v8346_v1 = vcombine.high %v11268_v35, %v11274_v29  ;;  %v2065_v23 = vrot.slane %v2063_v45, 5 }
  0xf1   : > { %v8918_v5 = vpop.f32.mrf.mxu0  ;;  %v8966_v28 = vpop.f32.mrf.mxu1  ;;  %9461 = vmatprep.subr.bf16.mxu1 %v10036_v24  ;;  %v11392_v50 = vsel %vm10646_vm1, %v2027_v3, %v11310_v33  ;;  %v11396_v31 = vsel %vm10646_vm1, %v2037_v54, %v2041_v38  ;;  %v2050_v0 = vor.u32 %v2049_v59, %v2046_v14  ;;  %v10051_v24 = vld [vmem:[%s13113_s2 + $0x320] sm:$0xff]   ;;  %v2071_v33 = vshll.u32 %v11366_v39, 16  ;;  %v11428_v38 = vld [vmem:[#allocation2 + $0x98] sm:$0xff] }
  0xf2   : > { %9574 = vmatpush3.bf16.msra.mxu0 %v10039_v58  ;;  %v10058_v58 = vld [vmem:[%s13113_s2 + $0x358] sm:$0xff]   ;;  %v8366_v3 = vcombine.high %v11392_v50, %v11396_v31  ;;  %v2092_v45 = vshrl.u32 %v11411_v20, 16 }
  0xf3   : > { %v8919_v9 = vpop.f32.mrf.mxu0  ;;  %v8967_v27 = vpop.f32.mrf.mxu1  ;;  %9575 = vmatprep.subr.bf16.mxu0 %v10046_v41  ;;  %v10056_v41 = vld [vmem:[%s13113_s2 + $0x2d8] sm:$0xff]   ;;  %v2051_v14 = vrot.slane %v2050_v0, 4 }
  0xf4   : > { %v11362_v17 = vadd.f32 %v8919_v9, %v8918_v5  ;;  %v11364_v51 = vadd.f32 %v8967_v27, %v8966_v28  ;;  %9462 = vmatpush3.bf16.msra.mxu1 %v10037_v53  ;;  %v2077_v5 = vshll.u32 %v11380_v47, 16  ;;  %v2081_v28 = vshrl.u32 %v11380_v47, 16  ;;  %v10049_v53 = vld [vmem:[%s13113_s2 + $0x2a0] sm:$0xff]   ;;  %v10059_v9 = vld [vmem:[%s13113_s2 + $0x318] sm:$0xff]  }
  0xf5   : > { %v8921_v15 = vpop.f32.mrf.mxu0  ;;  %v8969_v6 = vpop.f32.mrf.mxu1  ;;  %7072 = vmatmul.mubr.bf16.gmra.mxu0 %v8329_v52  ;;  %9463 = vmatprep.subr.bf16.mxu1 %v10044_v4 }
  0xf6   : > { %7079 = vmatprep.mubr.bf16.mxu0 %v8348_v63  ;;  %9576 = vmatpush3.bf16.msra.mxu0 %v10047_v11  ;;  %v8347_v63 = vcombine.low %v11325_v61, %v11329_v34  ;;  %v8345_v11 = vcombine.low %v11268_v35, %v11274_v29  ;;  %v2073_v61 = vrot.slane %v2071_v33, 5  ;;  %v11437_v34 = vrot.slane %v2077_v5, 5  ;;  %v10064_v35 = vld [vmem:[%s13113_s2 + $0x2d0] sm:$0xff]  }
  0xf7   : > { %v8922_v10 = vpop.f32.mrf.mxu0  ;;  %v8970_v18 = vpop.f32.mrf.mxu1  ;;  %6911 = vmatmul.mubr.bf16.gmra.mxu1 %v8327_v21  ;;  %9577 = vmatprep.subr.bf16.mxu0 %v10050_v25  ;;  %v2070_v25 = vrot.slane %v2068_v13, 4  ;;  %v2083_v54 = vrot.slane %v2081_v28, 4  ;;  %v10066_v21 = vld [vmem:[%s13113_s2 + $0x350] sm:$0xff]   ;;  %v2101_v13 = vshll.u32 %v11428_v38, 16  ;;  %v1919_v28 = vld [vmem:[#allocation2 + $0xe8] sm:$0x11] }
  0xf8   : > { %v11382_v56 = vadd.f32 %v8922_v10, %v8921_v15  ;;  %v11384_v16 = vadd.f32 %v8970_v18, %v8969_v6  ;;  %6918 = vmatprep.mubr.bf16.mxu1 %v8346_v1  ;;  %9464 = vmatpush3.bf16.msra.mxu1 %v10045_v42  ;;  %v10057_v15 = vld [vmem:[%s13113_s2 + $0x298] sm:$0xff]   ;;  %v2061_v6 = vrot.slane %v2060_v55, 4  ;;  %v2087_v42 = vshll.u32 %v11403_v57, 16  ;;  %v10067_v10 = vld [vmem:[%s13113_s2 + $0x310] sm:$0xff]  }
  0xf9   : > { %v8924_v19 = vpop.f32.mrf.mxu0  ;;  %v8972_v2 = vpop.f32.mrf.mxu1  ;;  %9465 = vmatprep.subr.bf16.mxu1 %v10048_v36  ;;  %v2095_v36 = vshll.u32 %v11411_v20, 16  ;;  %v11465_v55 = vsel %vm10646_vm1, %v2051_v14, %v11371_v49  ;;  %v2074_v33 = vor.u32 %v2073_v61, %v2070_v25  ;;  %v2084_v5 = vor.u32 %v2083_v54, %v11437_v34  ;;  %v10065_v49 = vld [vmem:[%s13113_s2 + $0x290] sm:$0xff]   ;;  %v10071_v14 = vld [vmem:[%s13113_s2 + $0x288] sm:$0xff]  }
  0xfa   : > { %13134 = vst [vmem:[#allocation4_spill] sm:$0xff] %v11384_v16  ;;  %9578 = vmatpush3.bf16.msra.mxu0 %v10051_v24  ;;  %v2105_v24 = vshrl.u32 %v11428_v38, 16  ;;  %v11469_v57 = vsel %vm10646_vm1, %v2061_v6, %v2065_v23  ;;  %v10070_v23 = vld [vmem:[%s13113_s2 + $0x2c8] sm:$0xff]   ;;  %v2089_v54 = vrot.slane %v2087_v42, 5 }
  0xfb   : > { %v8925_v8 = vpop.f32.mrf.mxu0  ;;  %v8973_v62 = vpop.f32.mrf.mxu1  ;;  %9579 = vmatprep.subr.bf16.mxu0 %v10058_v58  ;;  %v10073_v25 = vld [vmem:[%s13113_s2 + $0x308] sm:$0xff]   ;;  %v2075_v6 = vrot.slane %v2074_v33, 4  ;;  %v2085_v61 = vrot.slane %v2084_v5, 4 }
  0xfc   : > { %v11422_v27 = vadd.f32 %v8925_v8, %v8924_v19  ;;  %v11424_v52 = vadd.f32 %v8973_v62, %v8972_v2  ;;  %9466 = vmatpush3.bf16.msra.mxu1 %v10049_v53  ;;  %v10072_v19 = vld [vmem:[%s13113_s2 + $0x348] sm:$0xff]   ;;  %v8365_v62 = vcombine.low %v11392_v50, %v11396_v31  ;;  %v11474_v53 = vld [vmem:[#allocation2 + $0x80] sm:$0xff]  ;;  %v8384_v31 = vcombine.high %v11465_v55, %v11469_v57 }
  0xfd   : > { %v8927_v44 = vpop.f32.mrf.mxu0  ;;  %v8975_v4 = vpop.f32.mrf.mxu1  ;;  %7080 = vmatmul.mubr.bf16.gmra.mxu0 %v8347_v63  ;;  %9467 = vmatprep.subr.bf16.mxu1 %v10056_v41  ;;  %v2094_v63 = vrot.slane %v2092_v45, 4  ;;  %v2116_v42 = vshrl.u32 %v11474_v53, 16  ;;  %v2119_v45 = vshll.u32 %v11474_v53, 16  ;;  %v11523_v5 = vsel %vm10646_vm1, %v2075_v6, %v11437_v34  ;;  %v10077_v34 = vld [vmem:[%s13113_s2 + $0x280] sm:$0xff]  }
  0xfe   : > { %13135 = vst [vmem:[#allocation5_spill] sm:$0xff] %v11424_v52  ;;  %7087 = vmatprep.mubr.bf16.mxu0 %v8366_v3  ;;  %9580 = vmatpush3.bf16.msra.mxu0 %v10059_v9  ;;  %v11490_v3 = vld [vmem:[#allocation2 + $0xa8] sm:$0xff] }
  0xff   : > { %v8928_v29 = vpop.f32.mrf.mxu0  ;;  %v8976_v59 = vpop.f32.mrf.mxu1  ;;  %6919 = vmatmul.mubr.bf16.gmra.mxu1 %v8345_v11  ;;  %9581 = vmatprep.subr.bf16.mxu0 %v10066_v21  ;;  %v2107_v11 = vrot.slane %v2105_v24, 4  ;;  %v2111_v21 = vshll.u32 %v1919_v28, 16  ;;  %v10079_v24 = vld [vmem:[%s13113_s2 + $0x300] sm:$0xff]   ;;  %v11527_v28 = vsel %vm10646_vm1, %v2085_v61, %v2089_v54 }
 0x100   : > { %v11451_v18 = vadd.f32 %v8928_v29, %v8927_v44  ;;  %v11453_v1 = vadd.f32 %v8976_v59, %v8975_v4  ;;  %6926 = vmatprep.mubr.bf16.mxu1 %v8364_v40  ;;  %9468 = vmatpush3.bf16.msra.mxu1 %v10057_v15  ;;  %v2097_v44 = vrot.slane %v2095_v36, 5  ;;  %v11488_v4 = vrot.slane %v2101_v13, 5 }
 0x101   : > { %v8930_v2 = vpop.f32.mrf.mxu0  ;;  %v8978_v0 = vpop.f32.mrf.mxu1  ;;  %9469 = vmatprep.subr.bf16.mxu1 %v10064_v35  ;;  %v8363_v15 = vcombine.low %v11284_v60, %v11286_v26  ;;  %v10078_v35 = vld [vmem:[%s13113_s2 + $0x340] sm:$0xff]   ;;  %v8382_v40 = vcombine.high %v11312_v12, %v11316_v22  ;;  %v2129_v13 = vshrl.u32 %v11490_v3, 16 }
 0x102   : > { %13136 = vst [vmem:[#allocation6_spill] sm:$0xff] %v11453_v1  ;;  %9582 = vmatpush3.bf16.msra.mxu0 %v10067_v10  ;;  %v10076_v10 = vld [vmem:[%s13113_s2 + $0x2c0] sm:$0xff]   ;;  %v2098_v26 = vor.u32 %v2097_v44, %v2094_v63  ;;  %v1922_v63 = vld [vmem:[#allocation2 + $0x28] sm:$0x11] }
 0x103   : > { %v8931_v58 = vpop.f32.mrf.mxu0  ;;  %v8979_v8 = vpop.f32.mrf.mxu1  ;;  %9583 = vmatprep.subr.bf16.mxu0 %v10072_v19  ;;  %v2131_v61 = vrot.slane %v2129_v13, 4 }
 0x104   : > { %v11482_v41 = vadd.f32 %v8931_v58, %v8930_v2  ;;  %v11484_v9 = vadd.f32 %v8979_v8, %v8978_v0  ;;  %9470 = vmatpush3.bf16.msra.mxu1 %v10065_v49  ;;  %v2108_v2 = vor.u32 %v2107_v11, %v11488_v4  ;;  %v2125_v0 = vshll.u32 %v11490_v3, 16  ;;  %v10084_v58 = vld [vmem:[%s13113_s2 + $0x478] sm:$0xff]  }
 0x105   : > { %v8933_v50 = vpop.f32.mrf.mxu0  ;;  %v8981_v29 = vpop.f32.mrf.mxu1  ;;  %7088 = vmatmul.mubr.bf16.gmra.mxu0 %v8365_v62  ;;  %9471 = vmatprep.subr.bf16.mxu1 %v10070_v23  ;;  %v8383_v49 = vcombine.low %v11465_v55, %v11469_v57  ;;  %v2113_v23 = vrot.slane %v2111_v21, 5  ;;  %v2121_v11 = vrot.slane %v2119_v45, 5  ;;  %v8402_v55 = vcombine.high %v11523_v5, %v11527_v28  ;;  %v11552_v21 = vld [vmem:[#allocation2 + $0x168] sm:$0xff] }
 0x106   : > { %13137 = vst [vmem:[#allocation7_spill] sm:$0xff] %v11484_v9  ;;  %7095 = vmatprep.mubr.bf16.mxu0 %v8384_v31  ;;  %9584 = vmatpush3.bf16.msra.mxu0 %v10073_v25  ;;  %v2118_v31 = vrot.slane %v2116_v42, 4  ;;  %v10082_v25 = vld [vmem:[%s13113_s2 + $0x3f8] sm:$0xff]   ;;  %v2109_v57 = vrot.slane %v2108_v2, 4  ;;  %v2149_v13 = vshll.u32 %v11552_v21, 16 }
 0x107   : > { %v8934_v59 = vpop.f32.mrf.mxu0  ;;  %v8982_v36 = vpop.f32.mrf.mxu1  ;;  %6927 = vmatmul.mubr.bf16.gmra.mxu1 %v8363_v15  ;;  %9585 = vmatprep.subr.bf16.mxu0 %v10078_v35  ;;  %v8381_v35 = vcombine.low %v11312_v12, %v11316_v22  ;;  %v2135_v12 = vshll.u32 %v1922_v63, 16 }
 0x108   : > { %v11508_v60 = vadd.f32 %v8934_v59, %v8933_v50  ;;  %v11518_v33 = vadd.f32 %v8982_v36, %v8981_v29  ;;  %6934 = vmatprep.mubr.bf16.mxu1 %v8382_v40  ;;  %9472 = vmatpush3.bf16.msra.mxu1 %v10071_v14  ;;  %v2099_v50 = vrot.slane %v2098_v26, 4  ;;  %v2127_v14 = vrot.slane %v2125_v0, 5  ;;  %v11548_v29 = vld [vmem:[#allocation2] sm:$0xff] }
 0x109   : > { %v8936_v19 = vpop.f32.mrf.mxu0  ;;  %v8984_v8 = vpop.f32.mrf.mxu1  ;;  %9473 = vmatprep.subr.bf16.mxu1 %v10076_v10  ;;  %v8400_v40 = vcombine.high %v11366_v39, %v11380_v47  ;;  %v2122_v42 = vor.u32 %v2121_v11, %v2118_v31  ;;  %v11563_v45 = vsel %vm10646_vm1, %v2109_v57, %v2113_v23  ;;  %v2143_v2 = vshll.u32 %v11548_v29, 16  ;;  %v1925_v31 = vld [vmem:[#allocation2 + $0xb8] sm:$0x11]  ;;  %v11579_v11 = vld [vmem:[#allocation2 + $0x140] sm:$0xff] }
 0x10a   : > { %13138 = vst [vmem:[#allocation8_spill] sm:$0xff] %v11518_v33  ;;  %9586 = vmatpush3.bf16.msra.mxu0 %v10079_v24  ;;  %v11559_v26 = vsel %vm10646_vm1, %v2099_v50, %v11488_v4  ;;  %v2132_v36 = vor.u32 %v2131_v61, %v2127_v14  ;;  %v2153_v4 = vshrl.u32 %v11552_v21, 16  ;;  %v2137_v50 = vrot.slane %v2135_v12, 5 }
 0x10b   : > { %v8937_v62 = vpop.f32.mrf.mxu0  ;;  %v8985_v15 = vpop.f32.mrf.mxu1  ;;  %9795 = vmatprep.subr.bf16.mxu0 %v10084_v58  ;;  %v8399_v58 = vcombine.low %v11366_v39, %v11380_v47  ;;  %v8420_v63 = vcombine.high %v11559_v26, %v11563_v45 }
 0x10c   : > { %v11537_v44 = vadd.f32 %v8937_v62, %v8936_v19  ;;  %v11544_v54 = vadd.f32 %v8985_v15, %v8984_v8  ;;  %9474 = vmatpush3.bf16.msra.mxu1 %v10077_v34  ;;  %v2140_v19 = vshrl.u32 %v11548_v29, 16  ;;  %v8401_v8 = vcombine.low %v11523_v5, %v11527_v28  ;;  %v11573_v62 = vld [vmem:[#allocation2 + $0x1a8] sm:$0xff] }
 0x10d   : > { %v8939_v6 = vpop.f32.mrf.mxu0  ;;  %7096 = vmatmul.mubr.bf16.gmra.mxu0 %v8383_v49  ;;  %9683 = vmatprep.subr.bf16.mxu1 %v10082_v25  ;;  %v8987_v0 = vpop.f32.mrf.mxu1  ;;  %v2123_v34 = vrot.slane %v2122_v42, 4  ;;  %v2133_v47 = vrot.slane %v2132_v36, 4  ;;  %v11583_v28 = vrot.slane %v2149_v13, 5  ;;  %v2164_v57 = vshrl.u32 %v11573_v62, 16 }
 0x10e   : > { %13139 = vst [vmem:[#allocation9_spill] sm:$0xff] %v11544_v54  ;;  %7103 = vmatprep.mubr.bf16.mxu0 %v8402_v55  ;;  %v2142_v15 = vrot.slane %v2140_v19, 4  ;;  %v2155_v55 = vrot.slane %v2153_v4, 4  ;;  %v2167_v61 = vshll.u32 %v11573_v62, 16  ;;  %v2177_v42 = vshrl.u32 %v11579_v11, 16 }
 0x10f   : > { %v8940_v59 = vpop.f32.mrf.mxu0  ;;  %6935 = vmatmul.mubr.bf16.gmra.mxu1 %v8381_v35  ;;  %v8988_v49 = vpop.f32.mrf.mxu1  ;;  %v2159_v13 = vshll.u32 %v1925_v31, 16  ;;  %v8417_v31 = vcombine.low %v11411_v20, %v11428_v38 }
 0x110   : > { %v11554_v10 = vadd.f32 %v8940_v59, %v8939_v6  ;;  %6942 = vmatprep.mubr.bf16.mxu1 %v8400_v40  ;;  %v11581_v25 = vadd.f32 %v8988_v49, %v8987_v0  ;;  %v2145_v6 = vrot.slane %v2143_v2, 5  ;;  %v8418_v59 = vcombine.high %v11411_v20, %v11428_v38  ;;  %v354_v38 = vld [vmem:[%s10267_s20 + $0x78] sm:$0xf] }
 0x111   : > { %v8942_v22 = vpop.f32.mrf.mxu0  ;;  %v8990_v5 = vpop.f32.mrf.mxu1  ;;  %v2173_v40 = vshll.u32 %v11579_v11, 16  ;;  %v11597_v2 = vsel %vm10646_vm1, %v2123_v34, %v2127_v14  ;;  %v11601_v0 = vsel %vm10646_vm1, %v2133_v47, %v2137_v50  ;;  %v2166_v49 = vrot.slane %v2164_v57, 4 }
 0x112   : > { %13140 = vst [vmem:[#allocation10_spill] sm:$0xff] %v11581_v25  ;;  %v8419_v50 = vcombine.low %v11559_v26, %v11563_v45  ;;  %v8436_v47 = vcombine.high %v11474_v53, %v11490_v3  ;;  %v2161_v45 = vrot.slane %v2159_v13, 5 }
 0x113   : > { %v8943_v24 = vpop.f32.mrf.mxu0  ;;  %v8991_v12 = vpop.f32.mrf.mxu1 }
 0x114   : > { %v11575_v23 = vadd.f32 %v8943_v24, %v8942_v22  ;;  %v11593_v36 = vadd.f32 %v8991_v12, %v8990_v5  ;;  %v2146_v24 = vor.u32 %v2145_v6, %v2142_v15  ;;  %v2179_v12 = vrot.slane %v2177_v42, 4  ;;  %v11618_v6 = vld [vmem:[#allocation2 + $0x170] sm:$0xff] }
 0x115   : > { %v8945_v39 = vpop.f32.mrf.mxu0  ;;  %7104 = vmatmul.mubr.bf16.gmra.mxu0 %v8401_v8  ;;  %v8993_v4 = vpop.f32.mrf.mxu1  ;;  %v2156_v8 = vor.u32 %v2155_v55, %v11583_v28  ;;  %v8438_v15 = vcombine.high %v11597_v2, %v11601_v0  ;;  %v2201_v13 = vshrl.u32 %v11618_v6, 16 }
 0x116   : > { %13141 = vst [vmem:[#allocation11_spill] sm:$0xff] %v11593_v36  ;;  %7111 = vmatprep.mubr.bf16.mxu0 %v8420_v63  ;;  %v2175_v63 = vrot.slane %v2173_v40, 5  ;;  %v11604_v36 = vld [vmem:[#allocation2 + $0xa0] sm:$0xff] }
 0x117   : > { %v8946_v35 = vpop.f32.mrf.mxu0  ;;  %6943 = vmatmul.mubr.bf16.gmra.mxu1 %v8399_v58  ;;  %v8994_v14 = vpop.f32.mrf.mxu1  ;;  %v2157_v26 = vrot.slane %v2156_v8, 4  ;;  %v2191_v20 = vshll.u32 %v11604_v36, 16  ;;  %v386_v8 = vld [vmem:[%s10273_s22 + $0x78] sm:$0xf] }
 0x118   : > { %v11591_v22 = vadd.f32 %v8946_v35, %v8945_v39  ;;  %v2169_v39 = vrot.slane %v2167_v61, 5  ;;  %6950 = vmatprep.mubr.bf16.mxu1 %v8418_v59  ;;  %v1928_v35 = vld [vmem:[#allocation2 + $0x50] sm:$0x11]  ;;  %v11610_v58 = vadd.f32 %v8994_v14, %v8993_v4  ;;  %v2147_v61 = vrot.slane %v2146_v24, 4  ;;  %v355_v4 = vld [vmem:[%s10267_s20 + $0x7c] sm:$0xf]  ;;  %s13055_s20 = scalar_lea.vmem %s13115_s4, %s10255_s9 }
 0x119   : > { %v8948_v19 = vpop.f32.mrf.mxu0  ;;  %v8996_v55 = vpop.f32.mrf.mxu1  ;;  %v2180_v40 = vor.u32 %v2179_v12, %v2175_v63  ;;  %v2183_v42 = vshll.u32 %v1928_v35, 16  ;;  %v2197_v24 = vshll.u32 %v11618_v6, 16  ;;  %v8454_v12 = vcombine.high %v11548_v29, %v11552_v21  ;;  %v1931_v35 = vld [vmem:[#allocation2 + $0x198] sm:$0x11] }
 0x11a   : > { %13142 = vst [vmem:[#allocation12_spill] sm:$0xff] %v11610_v58  ;;  %v2170_v59 = vor.u32 %v2169_v39, %v2166_v49  ;;  %v8435_v58 = vcombine.low %v11474_v53, %v11490_v3  ;;  %v8437_v3 = vcombine.low %v11597_v2, %v11601_v0  ;;  %v2203_v2 = vrot.slane %v2201_v13, 4 }
 0x11b   : > { %v8949_v5 = vpop.f32.mrf.mxu0  ;;  %v11649_v9 = vrot.slane %v2197_v24, 5  ;;  %v8252_v0 = vcombine.low %v354_v38, %v386_v8 }
 0x11c   : > { %v11606_v34 = vadd.f32 %v8949_v5, %v8948_v19  ;;  %v2188_v19 = vshrl.u32 %v11604_v36, 16  ;;  %v8997_v5 = vpop.f32.mrf.mxu1 }
 0x11d   : > { %v8951_v57 = vpop.f32.mrf.mxu0  ;;  %7112 = vmatmul.mubr.bf16.gmra.mxu0 %v8419_v50  ;;  %v11629_v49 = vadd.f32 %v8997_v5, %v8996_v55  ;;  %v387_v50 = vld [vmem:[%s10273_s22 + $0x7c] sm:$0xf]  ;;  %v11643_v55 = vsel %vm10646_vm1, %v2147_v61, %v11583_v28  ;;  %v2181_v5 = vrot.slane %v2180_v40, 4  ;;  %v2204_v8 = vor.u32 %v2203_v2, %v11649_v9  ;;  %v994_v2 = vld [vmem:[#allocation2 + $0x88] sm:$0x11] }
 0x11e   : > { %7119 = vmatprep.mubr.bf16.mxu0 %v8438_v15  ;;  %v8999_v25 = vpop.f32.mrf.mxu1  ;;  %v11647_v15 = vsel %vm10646_vm1, %v2157_v26, %v2161_v45  ;;  %v8253_v1 = vcombine.low %v355_v4, %v387_v50  ;;  %v11659_v45 = vld [vmem:[#allocation2 + $0xc0] sm:$0xff]  ;;  %v2207_v4 = vshll.u32 %v1931_v35, 16 }
 0x11f   : > { %v8952_v14 = vpop.f32.mrf.mxu0  ;;  %13143 = vst [vmem:[#allocation13_spill] sm:$0xff] %v11629_v49  ;;  %6951 = vmatmul.mubr.bf16.gmra.mxu1 %v8417_v31  ;;  %v2190_v49 = vrot.slane %v2188_v19, 4  ;;  %v2193_v31 = vrot.slane %v2191_v20, 5  ;;  %v807_v19 = vshrl.u32 %v8252_v0, 16  ;;  %v2215_v26 = vshll.u32 %v11659_v45, 16 }
 0x120   : > { %v11631_v39 = vadd.f32 %v8952_v14, %v8951_v57  ;;  %v2171_v57 = vrot.slane %v2170_v59, 4  ;;  %6958 = vmatprep.mubr.bf16.mxu1 %v8436_v47  ;;  %v2185_v14 = vrot.slane %v2183_v42, 5  ;;  %v9000_v54 = vpop.f32.mrf.mxu1  ;;  %v8456_v47 = vcombine.high %v11643_v55, %v11647_v15  ;;  %v11665_v42 = vld [vmem:[#allocation2 + $0x190] sm:$0xff] }
 0x121   : > { %v8954_v53 = vpop.f32.mrf.mxu0  ;;  %v11651_v28 = vadd.f32 %v9000_v54, %v8999_v25  ;;  %v810_v54 = vshll.u32 %v8252_v0, 16  ;;  %v815_v25 = vshrl.u32 %v8253_v1, 16  ;;  %v2194_v38 = vor.u32 %v2193_v31, %v2190_v49 }
 0x122   : > { %v9002_v59 = vpop.f32.mrf.mxu1  ;;  %v11663_v40 = vsel %vm10646_vm1, %v2171_v57, %v2175_v63  ;;  %v11669_v20 = vsel %vm10646_vm1, %v2181_v5, %v2185_v14  ;;  %v818_v24 = vshll.u32 %v8253_v1, 16  ;;  %v2212_v63 = vshrl.u32 %v11659_v45, 16 }
 0x123   : > { %v8955_v33 = vpop.f32.mrf.mxu0  ;;  %13144 = vst [vmem:[#allocation14_spill] sm:$0xff] %v11651_v28  ;;  %v809_v50 = vrot.slane %v807_v19, 7  ;;  %v2221_v5 = vshll.u32 %v11665_v42, 16  ;;  %v2225_v49 = vshrl.u32 %v11665_v42, 16  ;;  %v2205_v52 = vrot.slane %v2204_v8, 4 }
 0x124   : > { %v11653_v61 = vadd.f32 %v8955_v33, %v8954_v53  ;;  %v9003_v13 = vpop.f32.mrf.mxu1  ;;  %v817_v53 = vrot.slane %v815_v25, 7  ;;  %v2209_v25 = vrot.slane %v2207_v4, 5  ;;  %v2214_v16 = vrot.slane %v2212_v63, 4 }
 0x125   : > { %v8957_v33 = vpop.f32.mrf.mxu0  ;;  %7120 = vmatmul.mubr.bf16.gmra.mxu0 %v8437_v3  ;;  %v11673_v57 = vadd.f32 %v9003_v13, %v9002_v59  ;;  %v812_v3 = vor.u32 %v810_v54, %v809_v50  ;;  %v813_v14 = vrot.slane %v809_v50, 4  ;;  %v8474_v59 = vcombine.high %v11663_v40, %v11669_v20  ;;  %v11682_v13 = vld [vmem:[#allocation2 + $0xf0] sm:$0xff] }
 0x126   : > { %7127 = vmatprep.mubr.bf16.mxu0 %v8456_v47  ;;  %v9005_v35 = vpop.f32.mrf.mxu1  ;;  %v820_v31 = vor.u32 %v818_v24, %v817_v53  ;;  %v2195_v47 = vrot.slane %v2194_v38, 4  ;;  %v2217_v4 = vrot.slane %v2215_v26, 5  ;;  %v11696_v50 = vrot.slane %v2221_v5, 5 }
 0x127   : > { %13145 = vst [vmem:[#allocation15_spill] sm:$0xff] %v11673_v57  ;;  %v8958_v0 = vpop.f32.mrf.mxu0  ;;  %6959 = vmatmul.mubr.bf16.gmra.mxu1 %v8435_v58  ;;  %v822_v57 = vrot.slane %v817_v53, 4  ;;  %v11684_v58 = vld [vmem:[#allocation2 + $0x150] sm:$0xff]  ;;  %v1934_v53 = vld [vmem:[#allocation2 + $0xc8] sm:$0x11]  ;;  %v2227_v30 = vrot.slane %v2225_v49, 4  ;;  %v8472_v5 = vcombine.high %v11573_v62, %v11579_v11 }
 0x128   : > { %v11678_v1 = vadd.f32 %v8958_v0, %v8957_v33  ;;  %6966 = vmatprep.mubr.bf16.mxu1 %v8454_v12  ;;  %v9006_v28 = vpop.f32.mrf.mxu1  ;;  %v11688_v54 = vsel %vm10305_vm9, %v813_v14, %v820_v31  ;;  %v10133_v33 = vld [vmem:[#allocation2 + $0xb0] sm:$0xff]  ;;  %v2236_v0 = vshrl.u32 %v11682_v13, 16  ;;  %v11716_v49 = vsel %vm10646_vm1, %v2195_v47, %v11649_v9  ;;  %v11721_v14 = vld [vmem:[%s13114_s3] ss:$0 sm:$0xff] }
 0x129   : > { %v8960_v19 = vpop.f32.mrf.mxu0  ;;  %v11692_v12 = vsel %vm10297_vm8, %v812_v3, %v10133_v33  ;;  %v11694_v24 = vadd.f32 %v9006_v28, %v9005_v35  ;;  %993 = vst [vmem:[#allocation2 + $0x20] sm:$0xff] %v11688_v54  ;;  %v995_v32 = vsel %vm10701_vm2, %v822_v57, %v994_v2  ;;  %v2239_v28 = vshll.u32 %v11682_v13, 16 }
 0x12a   : > { %992 = vst [vmem:[#allocation2 + $0x38] sm:$0xff] %v11692_v12  ;;  %v9008_v8 = vpop.f32.mrf.mxu1  ;;  %996 = vst [vmem:[#allocation2 + $0x88] sm:$0x11] %v995_v32  ;;  %v2245_v35 = vshll.u32 %v11684_v58, 16  ;;  %v2249_v3 = vshrl.u32 %v11684_v58, 16  ;;  %v13146_v57 = vcombine.low %v11643_v55, %v11647_v15  ;;  %v2218_v55 = vor.u32 %v2217_v4, %v2214_v16 }
 0x12b   : > { %v8961_v38 = vpop.f32.mrf.mxu0  ;;  %v2231_v15 = vshll.u32 %v1934_v53, 16  ;;  %v13148_v9 = vcombine.low %v11548_v29, %v11552_v21  ;;  %v2238_v32 = vrot.slane %v2236_v0, 4  ;;  %v1937_v4 = vld [vmem:[#allocation2 + $0x30] sm:$0x11]  ;;  %v8471_v53 = vcombine.low %v11573_v62, %v11579_v11 }
 0x12c   : > { %v11702_v63 = vadd.f32 %v8961_v38, %v8960_v19  ;;  %v9009_v48 = vpop.f32.mrf.mxu1  ;;  %v11727_v19 = vsel %vm10646_vm1, %v2205_v52, %v2209_v25  ;;  %v2228_v38 = vor.u32 %v2227_v30, %v11696_v50  ;;  %v6422_v52 = vadd.f32 %v11331_v7, %v11721_v14 }
 0x12d   : > { %v9139_v26 = vpop.f32.mrf.mxu0  ;;  %7128 = vmatmul.mubr.bf16.gmra.mxu0 %v13146_v57  ;;  %v11723_v31 = vadd.f32 %v9009_v48, %v9008_v8  ;;  %v2241_v57 = vrot.slane %v2239_v28, 5  ;;  %v11733_v48 = vrot.slane %v2245_v35, 5  ;;  %v8473_v25 = vcombine.low %v11663_v40, %v11669_v20  ;;  %v11743_v28 = vld [vmem:[#allocation2 + $0xf8] sm:$0xff] }
 0x12e   : > { %7135 = vmatprep.mubr.bf16.mxu0 %v8474_v59  ;;  %v9027_v33 = vpop.f32.mrf.mxu1  ;;  %v2251_v59 = vrot.slane %v2249_v3, 4  ;;  %v8492_v30 = vcombine.high %v11716_v49, %v11727_v19  ;;  %v2233_v0 = vrot.slane %v2231_v15, 5  ;;  %v2219_v35 = vrot.slane %v2218_v55, 4 }
 0x12f   : > { %13147 = vst [vmem:[#allocation16_spill] sm:$0xff] %v11723_v31  ;;  %v9140_v2 = vpop.f32.mrf.mxu0  ;;  %6967 = vmatmul.mubr.bf16.gmra.mxu1 %v13148_v9  ;;  %v2229_v3 = vrot.slane %v2228_v38, 4  ;;  %v8490_v20 = vcombine.high %v11604_v36, %v11618_v6  ;;  %v2255_v62 = vshll.u32 %v1937_v4, 16  ;;  %v2260_v15 = vshrl.u32 %v11743_v28, 16 }
 0x130   : > { %v9141_v47 = vadd.f32 %v9140_v2, %v9139_v26  ;;  %6974 = vmatprep.mubr.bf16.mxu1 %v8472_v5  ;;  %v9028_v16 = vpop.f32.mrf.mxu1  ;;  %v11745_v26 = vld [vmem:[#allocation2 + $0x18] sm:$0xff]  ;;  %v2242_v2 = vor.u32 %v2241_v57, %v2238_v32  ;;  %v6425_v38 = vadd.f32 %v11362_v17, %v11721_v14 }
 0x131   : > { %v9142_v8 = vpop.f32.mrf.mxu0  ;;  %v9029_v29 = vadd.f32 %v9028_v16, %v9027_v33  ;;  %v2252_v33 = vor.u32 %v2251_v59, %v11733_v48  ;;  %v2263_v16 = vshll.u32 %v11743_v28, 16  ;;  %v2269_v31 = vshll.u32 %v11745_v26, 16 }
 0x132   : > { %v9030_v5 = vpop.f32.mrf.mxu1  ;;  %v2273_v55 = vshrl.u32 %v11745_v26, 16  ;;  %v11767_v4 = vsel %vm10646_vm1, %v2229_v3, %v2233_v0  ;;  %v2243_v17 = vrot.slane %v2242_v2, 4  ;;  %v11775_v2 = vld [vmem:[#allocation2 + $0x60] sm:$0xff] }
 0x133   : > { %v9143_v21 = vpop.f32.mrf.mxu0  ;;  %v6583_v40 = vadd.f32 %v9029_v29, %v6422_v52  ;;  %v8491_v52 = vcombine.low %v11716_v49, %v11727_v19  ;;  %v2265_v49 = vrot.slane %v2263_v16, 5  ;;  %v2271_v19 = vrot.slane %v2269_v31, 5 }
 0x134   : > { %v9144_v7 = vadd.f32 %v9143_v21, %v9142_v8  ;;  %v9031_v11 = vpop.f32.mrf.mxu1  ;;  %v2253_v21 = vrot.slane %v2252_v33, 4  ;;  %v8489_v31 = vcombine.low %v11604_v36, %v11618_v6 }
 0x135   : > { %v9145_v9 = vpop.f32.mrf.mxu0  ;;  %7136 = vmatmul.mubr.bf16.gmra.mxu0 %v8473_v25  ;;  %v11756_v32 = vadd.f32 %v9141_v47, %v6583_v40  ;;  %v9032_v57 = vadd.f32 %v9031_v11, %v9030_v5  ;;  %v11763_v25 = vsel %vm10646_vm1, %v2219_v35, %v11696_v50  ;;  %v1940_v40 = vld [vmem:[#allocation2 + $0x8] sm:$0x11]  ;;  %v2262_v11 = vrot.slane %v2260_v15, 4 }
 0x136   : > { %7143 = vmatprep.mubr.bf16.mxu0 %v8492_v30  ;;  %v9033_v8 = vpop.f32.mrf.mxu1  ;;  %v2257_v30 = vrot.slane %v2255_v62, 5  ;;  %v6430_v50 = vadd.f32 %v11382_v56, %v11721_v14  ;;  %v8510_v3 = vcombine.high %v11763_v25, %v11767_v4  ;;  %v11786_v56 = vsel %vm10646_vm1, %v2243_v17, %v11733_v48 }
 0x137   : > { %13149 = vst [vmem:[#allocation17_spill] sm:$0xff] %v11756_v32  ;;  %6975 = vmatmul.mubr.bf16.gmra.mxu1 %v8471_v53  ;;  %v9146_v59 = vpop.f32.mrf.mxu0  ;;  %v6586_v47 = vadd.f32 %v9032_v57, %v6425_v38  ;;  %v2275_v32 = vrot.slane %v2273_v55, 4  ;;  %v2279_v55 = vshll.u32 %v1940_v40, 16  ;;  %v2266_v36 = vor.u32 %v2265_v49, %v2262_v11 }
 0x138   : > { %v9147_v29 = vadd.f32 %v9146_v59, %v9145_v9  ;;  %6982 = vmatprep.mubr.bf16.mxu1 %v8490_v20  ;;  %v9034_v53 = vpop.f32.mrf.mxu1  ;;  %v6433_v20 = vadd.f32 %v11422_v27, %v11721_v14  ;;  %v8508_v9 = vcombine.high %v11659_v45, %v11665_v42  ;;  %v11792_v27 = vsel %vm10646_vm1, %v2253_v21, %v2257_v30 }
 0x139   : > { %v9148_v5 = vpop.f32.mrf.mxu0  ;;  %v11771_v35 = vadd.f32 %v9144_v7, %v6586_v47  ;;  %v9035_v0 = vadd.f32 %v9034_v53, %v9033_v8  ;;  %v11788_v7 = vld [vmem:[#allocation2 + $0x70] sm:$0xff]  ;;  %v2276_v6 = vor.u32 %v2275_v32, %v2271_v19  ;;  %v2284_v8 = vshrl.u32 %v11775_v2, 16 }
 0x13a   : > { %v9036_v33 = vpop.f32.mrf.mxu1  ;;  %v2287_v59 = vshll.u32 %v11775_v2, 16  ;;  %v2293_v47 = vshll.u32 %v11788_v7, 16  ;;  %v2297_v53 = vshrl.u32 %v11788_v7, 16  ;;  %v6438_v21 = vadd.f32 %v11451_v18, %v11721_v14 }
 0x13b   : > { %v9149_v62 = vpop.f32.mrf.mxu0  ;;  %v6591_v15 = vadd.f32 %v9035_v0, %v6430_v50  ;;  %v8509_v32 = vcombine.low %v11763_v25, %v11767_v4  ;;  %v2281_v11 = vrot.slane %v2279_v55, 5  ;;  %v2267_v0 = vrot.slane %v2266_v36, 4 }
 0x13c   : > { %v9150_v16 = vadd.f32 %v9149_v62, %v9148_v5  ;;  %v9037_v38 = vpop.f32.mrf.mxu1  ;;  %v2289_v62 = vrot.slane %v2287_v59, 5  ;;  %v8526_v55 = vcombine.high %v11682_v13, %v11684_v58  ;;  %v6441_v36 = vadd.f32 %v11482_v41, %v11721_v14 }
 0x13d   : > { %v9151_v57 = vpop.f32.mrf.mxu0  ;;  %7144 = vmatmul.mubr.bf16.gmra.mxu0 %v8491_v52  ;;  %v11796_v48 = vadd.f32 %v9147_v29, %v6591_v15  ;;  %v9038_v17 = vadd.f32 %v9037_v38, %v9036_v33  ;;  %v8528_v29 = vcombine.high %v11786_v56, %v11792_v27  ;;  %v2286_v33 = vrot.slane %v2284_v8, 4  ;;  %v1943_v15 = vld [vmem:[#allocation2 + $0x68] sm:$0x11] }
 0x13e   : > { %7151 = vmatprep.mubr.bf16.mxu0 %v8510_v3  ;;  %v9039_v30 = vpop.f32.mrf.mxu1  ;;  %v2277_v3 = vrot.slane %v2276_v6, 4  ;;  %v2295_v38 = vrot.slane %v2293_v47, 5  ;;  %v11816_v8 = vsel %vm10646_vm1, %v2267_v0, %v2271_v19  ;;  %v2317_v19 = vshll.u32 %v11688_v54, 16 }
 0x13f   : > { %13150 = vst [vmem:[#allocation18_spill] sm:$0xff] %v11796_v48  ;;  %6983 = vmatmul.mubr.bf16.gmra.mxu1 %v8489_v31  ;;  %v9152_v52 = vpop.f32.mrf.mxu0  ;;  %v6594_v5 = vadd.f32 %v9038_v17, %v6433_v20  ;;  %v2299_v48 = vrot.slane %v2297_v53, 4  ;;  %v8507_v20 = vcombine.low %v11659_v45, %v11665_v42  ;;  %v2303_v45 = vshll.u32 %v1943_v15, 16 }
 0x140   : > { %v9153_v40 = vadd.f32 %v9152_v52, %v9151_v57  ;;  %6990 = vmatprep.mubr.bf16.mxu1 %v8508_v9  ;;  %v9040_v49 = vpop.f32.mrf.mxu1  ;;  %v11820_v59 = vsel %vm10646_vm1, %v2277_v3, %v2281_v11  ;;  %v2290_v47 = vor.u32 %v2289_v62, %v2286_v33  ;;  %v2311_v52 = vshll.u32 %v11692_v12, 16 }
 0x141   : > { %v9154_v50 = vpop.f32.mrf.mxu0  ;;  %v11806_v18 = vadd.f32 %v9150_v16, %v6594_v5  ;;  %v9041_v31 = vadd.f32 %v9040_v49, %v9039_v30  ;;  %v2300_v53 = vor.u32 %v2299_v48, %v2295_v38  ;;  %v2308_v30 = vshrl.u32 %v11692_v12, 16 }
 0x142   : > { %v9042_v25 = vpop.f32.mrf.mxu1  ;;  %v6446_v5 = vadd.f32 %v11508_v60, %v11721_v14  ;;  %v8525_v48 = vcombine.low %v11682_v13, %v11684_v58  ;;  %v8546_v0 = vcombine.high %v11816_v8, %v11820_v59  ;;  %v2305_v3 = vrot.slane %v2303_v45, 5 }
 0x143   : > { %v9155_v4 = vpop.f32.mrf.mxu0  ;;  %v6599_v9 = vadd.f32 %v9041_v31, %v6438_v21  ;;  %v2291_v31 = vrot.slane %v2290_v47, 4  ;;  %v2301_v60 = vrot.slane %v2300_v53, 4  ;;  %v8544_v58 = vcombine.high %v11743_v28, %v11745_v26 }
 0x144   : > { %v9156_v57 = vadd.f32 %v9155_v4, %v9154_v50  ;;  %v9043_v6 = vpop.f32.mrf.mxu1  ;;  %v8527_v50 = vcombine.low %v11786_v56, %v11792_v27  ;;  %v2310_v4 = vrot.slane %v2308_v30, 4  ;;  %v1946_v56 = vld [vmem:[#allocation2 + $0x88] sm:$0x11] }
 0x145   : > { %v9157_v16 = vpop.f32.mrf.mxu0  ;;  %7152 = vmatmul.mubr.bf16.gmra.mxu0 %v8509_v32  ;;  %v11822_v42 = vadd.f32 %v9153_v40, %v6599_v9  ;;  %v9044_v17 = vadd.f32 %v9043_v6, %v9042_v25  ;;  %v2321_v32 = vshrl.u32 %v11688_v54, 16  ;;  %v2319_v9 = vrot.slane %v2317_v19, 5 }
 0x146   : > { %7159 = vmatprep.mubr.bf16.mxu0 %v8528_v29  ;;  %v9045_v21 = vpop.f32.mrf.mxu1 }
 0x147   : > { %6991 = vmatmul.mubr.bf16.gmra.mxu1 %v8507_v20  ;;  %v9158_v41 = vpop.f32.mrf.mxu0  ;;  %v6602_v40 = vadd.f32 %v9044_v17, %v6441_v36  ;;  %v2313_v20 = vrot.slane %v2311_v52, 5  ;;  %v2296_v17 = vsel %vm10646_vm1, %v2291_v31, %v2295_v38  ;;  %v2327_v52 = vshll.u32 %v1946_v56, 16 }
 0x148   : > { %v9159_v11 = vadd.f32 %v9158_v41, %v9157_v16  ;;  %6998 = vmatprep.mubr.bf16.mxu1 %v8526_v55  ;;  %v9046_v29 = vpop.f32.mrf.mxu1  ;;  %v2323_v55 = vrot.slane %v2321_v32, 4  ;;  %v6454_v38 = vadd.f32 %v11554_v10, %v11721_v14  ;;  %v6457_v10 = vadd.f32 %v11575_v23, %v11721_v14 }
 0x149   : > { %v9160_v49 = vpop.f32.mrf.mxu0  ;;  %v11836_v33 = vadd.f32 %v9156_v57, %v6602_v40  ;;  %v9047_v62 = vadd.f32 %v9046_v29, %v9045_v21  ;;  %v6449_v57 = vadd.f32 %v11537_v44, %v11721_v14  ;;  %v2306_v21 = vsel %vm10646_vm1, %v2301_v60, %v2305_v3 }
 0x14a   : > { %v9048_v15 = vpop.f32.mrf.mxu1  ;;  %v2314_v41 = vor.u32 %v2313_v20, %v2310_v4  ;;  %v2324_v30 = vor.u32 %v2323_v55, %v2319_v9  ;;  %v8545_v40 = vcombine.low %v11816_v8, %v11820_v59  ;;  %v2329_v31 = vrot.slane %v2327_v52, 5  ;;  %v2396_v55 = vld [vmem:[#allocation2 + $0x160] sm:$0xff]  ;;  %v2397_v52 = vld [vmem:[#allocation2 + $0x128] sm:$0x11] }
 0x14b   : > { %v9161_v25 = vpop.f32.mrf.mxu0  ;;  %v6607_v36 = vadd.f32 %v9047_v62, %v6446_v5  ;;  %v8562_v8 = vcombine.high %v11775_v2, %v11788_v7  ;;  %v8563_v23 = vcombine.low %v2296_v17, %v2306_v21 }
 0x14c   : > { %v9162_v13 = vadd.f32 %v9161_v25, %v9160_v49  ;;  %v9049_v27 = vpop.f32.mrf.mxu1  ;;  %v8564_v49 = vcombine.high %v2296_v17, %v2306_v21  ;;  %v2315_v3 = vrot.slane %v2314_v41, 4  ;;  %v2325_v62 = vrot.slane %v2324_v30, 4  ;;  %v2395_v30 = vld [vmem:[#allocation2 + $0x48] sm:$0xee] }
 0x14d   : > { %v9163_v6 = vpop.f32.mrf.mxu0  ;;  %7160 = vmatmul.mubr.bf16.gmra.mxu0 %v8527_v50  ;;  %v11842_v16 = vadd.f32 %v9159_v11, %v6607_v36  ;;  %v9050_v45 = vadd.f32 %v9049_v27, %v9048_v15  ;;  %v8580_v17 = vcombine.high %v11692_v12, %v11688_v54 }
 0x14e   : > { %7167 = vmatprep.mubr.bf16.mxu0 %v8546_v0  ;;  %v9051_v47 = vpop.f32.mrf.mxu1  ;;  %v8543_v0 = vcombine.low %v11743_v28, %v11745_v26  ;;  %v2320_v36 = vsel %vm10646_vm1, %v2315_v3, %v2319_v9  ;;  %v11880_v3 = vld [vmem:[#allocation2 + $0x178] sm:$0xff] }
 0x14f   : > { %6999 = vmatmul.mubr.bf16.gmra.mxu1 %v8525_v48  ;;  %v9164_v53 = vpop.f32.mrf.mxu0  ;;  %v6610_v19 = vadd.f32 %v9050_v45, %v6449_v57  ;;  %v2493_v57 = vrot.slane %v2396_v55, 5  ;;  %v6462_v45 = vadd.f32 %v11591_v22, %v11721_v14  ;;  %v8270_v22 = vrot.slane %v2395_v30, 9 }
 0x150   : > { %v9165_v32 = vadd.f32 %v9164_v53, %v9163_v6  ;;  %7006 = vmatprep.mubr.bf16.mxu1 %v8544_v58  ;;  %v9052_v44 = vpop.f32.mrf.mxu1  ;;  %v6473_v30 = vadd.f32 %v11653_v61, %v11721_v14 }
 0x151   : > { %v9166_v5 = vpop.f32.mrf.mxu0  ;;  %v11852_v11 = vadd.f32 %v9162_v13, %v6610_v19  ;;  %v9053_v29 = vadd.f32 %v9052_v44, %v9051_v47  ;;  %v2330_v13 = vsel %vm10646_vm1, %v2325_v62, %v2329_v31 }
 0x152   : > { %v9054_v48 = vpop.f32.mrf.mxu1  ;;  %v8582_v41 = vcombine.high %v2320_v36, %v2330_v13 }
 0x153   : > { %v9167_v50 = vpop.f32.mrf.mxu0  ;;  %v6615_v60 = vadd.f32 %v9053_v29, %v6454_v38  ;;  %v2495_v38 = vrot.slane %v2493_v57, 4  ;;  %v2496_v29 = vrot.slane %v2397_v52, 5 }
 0x154   : > { %v9168_v15 = vadd.f32 %v9167_v50, %v9166_v5  ;;  %v9055_v59 = vpop.f32.mrf.mxu1 }
 0x155   : > { %v9169_v25 = vpop.f32.mrf.mxu0  ;;  %7168 = vmatmul.mubr.bf16.gmra.mxu0 %v8545_v40  ;;  %v11860_v4 = vadd.f32 %v9165_v32, %v6615_v60  ;;  %v9056_v20 = vadd.f32 %v9055_v59, %v9054_v48  ;;  %v8561_v32 = vcombine.low %v11775_v2, %v11788_v7  ;;  %v11878_v7 = vld [vmem:[#allocation2 + $0x40] sm:$0xff]  ;;  %v11888_v59 = vsel %vm10652_vm3, %v2495_v38, %v2496_v29 }
 0x156   : > { %7175 = vmatprep.mubr.bf16.mxu0 %v8564_v49  ;;  %v9057_v28 = vpop.f32.mrf.mxu1  ;;  %v6465_v49 = vadd.f32 %v11606_v34, %v11721_v14  ;;  %v11884_v34 = vsel %vm10652_vm3, %v8270_v22, %v2493_v57  ;;  %v6478_v29 = vadd.f32 %v11678_v1, %v11721_v14  ;;  %v10090_v1 = vld [vmem:[%s13113_s2 + $0x470] sm:$0xff]  }
 0x157   : > { %7007 = vmatmul.mubr.bf16.gmra.mxu1 %v8543_v0  ;;  %v9170_v26 = vpop.f32.mrf.mxu0  ;;  %v6618_v58 = vadd.f32 %v9056_v20, %v6457_v10  ;;  %v6470_v10 = vadd.f32 %v11631_v39, %v11721_v14 }
 0x158   : > { %v9171_v56 = vadd.f32 %v9170_v26, %v9169_v25  ;;  %7014 = vmatprep.mubr.bf16.mxu1 %v8562_v8  ;;  %v9058_v27 = vpop.f32.mrf.mxu1  ;;  %v8581_v8 = vcombine.low %v2320_v36, %v2330_v13  ;;  %v2500_v25 = vrot.slane %v11880_v3, 5  ;;  %v2398_v26 = vld [vmem:[#allocation2 + $0x40] sm:$0xee]  ;;  %v2400_v36 = vld [vmem:[#allocation2 + $0x108] sm:$0x11] }
 0x159   : > { %v9172_v6 = vpop.f32.mrf.mxu0  ;;  %v11868_v47 = vadd.f32 %v9168_v15, %v6618_v58  ;;  %v9059_v53 = vadd.f32 %v9058_v27, %v9057_v28  ;;  %v8316_v28 = vcombine.high %v11878_v7, %v11880_v3 }
 0x15a   : > { %v9060_v9 = vpop.f32.mrf.mxu1 }
 0x15b   : > { %v9173_v19 = vpop.f32.mrf.mxu0  ;;  %v6623_v44 = vadd.f32 %v9059_v53, %v6462_v45  ;;  %v8271_v45 = vrot.slane %v2398_v26, 9  ;;  %v2502_v53 = vrot.slane %v2500_v25, 4 }
 0x15c   : > { %v9174_v5 = vadd.f32 %v9173_v19, %v9172_v6  ;;  %v9061_v21 = vpop.f32.mrf.mxu1 }
 0x15d   : > { %v9175_v40 = vpop.f32.mrf.mxu0  ;;  %7176 = vmatmul.mubr.bf16.gmra.mxu0 %v8563_v23  ;;  %v11876_v48 = vadd.f32 %v9171_v56, %v6623_v44  ;;  %v9062_v50 = vadd.f32 %v9061_v21, %v9060_v9  ;;  %v8579_v56 = vcombine.low %v11692_v12, %v11688_v54  ;;  %v8314_v23 = vcombine.high %v11884_v34, %v11888_v59  ;;  %v11905_v12 = vld [vmem:[#allocation2 + $0x110] sm:$0xff] }
 0x15e   : > { %7183 = vmatprep.mubr.bf16.mxu0 %v8582_v41  ;;  %v9063_v0 = vpop.f32.mrf.mxu1  ;;  %v2503_v41 = vrot.slane %v2400_v36, 5  ;;  %v11913_v61 = vsel %vm10652_vm3, %v8271_v45, %v2500_v25  ;;  %v10083_v25 = vld [vmem:[%s13113_s2 + $0x3b8] sm:$0xff]  }
 0x15f   : > { %7015 = vmatmul.mubr.bf16.gmra.mxu1 %v8561_v32  ;;  %v9176_v2 = vpop.f32.mrf.mxu0  ;;  %v6626_v62 = vadd.f32 %v9062_v50, %v6465_v49  ;;  %v11907_v32 = vld [vmem:[#allocation2 + $0x90] sm:$0xff] }
 0x160   : > { %v9177_v31 = vadd.f32 %v9176_v2, %v9175_v40  ;;  %7022 = vmatprep.mubr.bf16.mxu1 %v8580_v17  ;;  %v9064_v60 = vpop.f32.mrf.mxu1  ;;  %v8315_v40 = vcombine.low %v11878_v7, %v11880_v3  ;;  %v11917_v22 = vsel %vm10652_vm3, %v2502_v53, %v2503_v41  ;;  %v2507_v38 = vrot.slane %v11907_v32, 5  ;;  %v2401_v7 = vld [vmem:[#allocation2 + $0x110] sm:$0xee]  ;;  %v2403_v3 = vld [vmem:[#allocation2 + $0x118] sm:$0x11] }
 0x161   : > { %v9178_v15 = vpop.f32.mrf.mxu0  ;;  %v11893_v20 = vadd.f32 %v9174_v5, %v6626_v62  ;;  %v9065_v55 = vadd.f32 %v9064_v60, %v9063_v0  ;;  %v10085_v0 = vld [vmem:[%s13113_s2 + $0x438] sm:$0xff]   ;;  %v8334_v2 = vcombine.high %v11905_v12, %v11907_v32  ;;  %v8313_v60 = vcombine.low %v11884_v34, %v11888_v59  ;;  %v10088_v34 = vld [vmem:[%s13113_s2 + $0x3f0] sm:$0xff]  }
 0x162   : > { %v9066_v13 = vpop.f32.mrf.mxu1  ;;  %v8272_v26 = vrot.slane %v2401_v7, 9  ;;  %v2509_v36 = vrot.slane %v2507_v38, 4  ;;  %v6481_v59 = vadd.f32 %v11702_v63, %v11721_v14  ;;  %v10096_v63 = vld [vmem:[%s13113_s2 + $0x468] sm:$0xff]   ;;  %v10089_v41 = vld [vmem:[%s13113_s2 + $0x3b0] sm:$0xff]   ;;  %v8331_v7 = vcombine.low %v11913_v61, %v11917_v22 }
 0x163   : > { %v9179_v58 = vpop.f32.mrf.mxu0  ;;  %v6631_v27 = vadd.f32 %v9065_v55, %v6470_v10  ;;  %v8332_v10 = vcombine.high %v11913_v61, %v11917_v22 }
 0x164   : > { %v9180_v6 = vadd.f32 %v9179_v58, %v9178_v15  ;;  %v9067_v57 = vpop.f32.mrf.mxu1 }
 0x165   : > { %v9181_v39 = vpop.f32.mrf.mxu0  ;;  %7184 = vmatmul.mubr.bf16.gmra.mxu0 %v8581_v8  ;;  %v11903_v52 = vadd.f32 %v9177_v31, %v6631_v27  ;;  %v9068_v9 = vadd.f32 %v9067_v57, %v9066_v13  ;;  %v2510_v13 = vrot.slane %v2403_v3, 5  ;;  %v10091_v27 = vld [vmem:[%s13113_s2 + $0x430] sm:$0xff]   ;;  %v11949_v57 = vld [vmem:[#allocation2 + $0x148] sm:$0xff] }
 0x166   : > { %7385 = vmatprep.mubr.bf16.mxu0 %v8316_v28  ;;  %v9069_v19 = vpop.f32.mrf.mxu1 }
 0x167   : > { %7023 = vmatmul.mubr.bf16.gmra.mxu1 %v8579_v56  ;;  %v9182_v54 = vpop.f32.mrf.mxu0  ;;  %v6634_v44 = vadd.f32 %v9068_v9, %v6473_v30 }
 0x168   : > { %v9183_v5 = vadd.f32 %v9182_v54, %v9181_v39  ;;  %7224 = vmatprep.mubr.bf16.mxu1 %v8314_v23  ;;  %v9070_v17 = vpop.f32.mrf.mxu1  ;;  %v11951_v39 = vld [vmem:[#allocation2 + $0x100] sm:$0xff]  ;;  %v11963_v54 = vsel %vm10652_vm3, %v8272_v26, %v2507_v38  ;;  %v2404_v38 = vld [vmem:[#allocation2 + $0x148] sm:$0xee] }
 0x169   : > { %v9184_v21 = vpop.f32.mrf.mxu0  ;;  %v11922_v49 = vadd.f32 %v9180_v6, %v6634_v44  ;;  %v9071_v50 = vadd.f32 %v9070_v17, %v9069_v19  ;;  %v8333_v19 = vcombine.low %v11905_v12, %v11907_v32  ;;  %v11967_v44 = vsel %vm10652_vm3, %v2509_v36, %v2510_v13  ;;  %v10094_v17 = vld [vmem:[%s13113_s2 + $0x3e8] sm:$0xff]   ;;  %v10103_v26 = vld [vmem:[%s13113_s2 + $0x420] sm:$0xff]  }
 0x16a   : > { %v9072_v62 = vpop.f32.mrf.mxu1  ;;  %v8352_v32 = vcombine.high %v11949_v57, %v11951_v39 }
 0x16b   : > { %v9185_v31 = vpop.f32.mrf.mxu0  ;;  %v6639_v15 = vadd.f32 %v9071_v50, %v6478_v29  ;;  %v2406_v29 = vld [vmem:[#allocation2 + $0x58] sm:$0x11]  ;;  %v10097_v50 = vld [vmem:[%s13113_s2 + $0x428] sm:$0xff]  }
 0x16c   : > { %v9186_v8 = vadd.f32 %v9185_v31, %v9184_v21  ;;  %v9073_v55 = vpop.f32.mrf.mxu1  ;;  %v6486_v21 = vadd.f32 %v11333_v37, %v11721_v14  ;;  %v10102_v37 = vld [vmem:[%s13113_s2 + $0x460] sm:$0xff]   ;;  %v8350_v31 = vcombine.high %v11963_v54, %v11967_v44  ;;  %v2517_v22 = vrot.slane %v2406_v29, 5 }
 0x16d   : > { %v9187_v28 = vpop.f32.mrf.mxu0  ;;  %7386 = vmatmul.mubr.bf16.vlgmr.msra.gmra.mxu0 %v8315_v40  ;;  %v11944_v58 = vadd.f32 %v9183_v5, %v6639_v15  ;;  %v9074_v56 = vadd.f32 %v9073_v55, %v9072_v62  ;;  %v2514_v5 = vrot.slane %v11951_v39, 5 }
 0x16e   : > { %9796 = vmatpush3.bf16.msra.mxu0 %v10085_v0  ;;  %7393 = vmatprep.mubr.bf16.mxu0 %v8334_v2  ;;  %v9075_v6 = vpop.f32.mrf.mxu1 }
 0x16f   : > { %7225 = vmatmul.mubr.bf16.vlgmr.msra.gmra.mxu1 %v8313_v60  ;;  %v9188_v23 = vpop.f32.mrf.mxu0  ;;  %9797 = vmatprep.subr.bf16.mxu0 %v10090_v1  ;;  %v6642_v45 = vadd.f32 %v9074_v56, %v6481_v59  ;;  %v10095_v60 = vld [vmem:[%s13113_s2 + $0x3a8] sm:$0xff]   ;;  %v2516_v61 = vrot.slane %v2514_v5, 4  ;;  %v12004_v59 = vld [vmem:[#allocation2 + $0x180] sm:$0xff] }
 0x170   : > { %9684 = vmatpush3.bf16.msra.mxu1 %v10083_v25  ;;  %v9189_v53 = vadd.f32 %v9188_v23, %v9187_v28  ;;  %7232 = vmatprep.mubr.bf16.mxu1 %v8332_v10  ;;  %v9076_v30 = vpop.f32.mrf.mxu1  ;;  %v10100_v25 = vld [vmem:[%s13113_s2 + $0x3e0] sm:$0xff]   ;;  %v6489_v10 = vadd.f32 %v11364_v51, %v11721_v14  ;;  %v10110_v51 = vld [vmem:[%s13113_s2 + $0x458] sm:$0xff]  }
 0x171   : > { %v9190_v9 = vpop.f32.mrf.mxu0  ;;  %9685 = vmatprep.subr.bf16.mxu1 %v10088_v34  ;;  %v11975_v40 = vadd.f32 %v9186_v8, %v6642_v45  ;;  %v9077_v12 = vadd.f32 %v9076_v30, %v9075_v6  ;;  %v8273_v8 = vrot.slane %v2404_v38, 9  ;;  %v12002_v34 = vld [vmem:[#allocation2 + $0xd8] sm:$0xff]  ;;  %v10101_v6 = vld [vmem:[%s13113_s2 + $0x3a0] sm:$0xff]   ;;  %v8351_v45 = vcombine.low %v11949_v57, %v11951_v39 }
 0x172   : > { %9798 = vmatpush3.bf16.msra.mxu0 %v10091_v27  ;;  %v9078_v0 = vpop.f32.mrf.mxu1  ;;  %v2521_v30 = vrot.slane %v12004_v59, 5  ;;  %v8370_v39 = vcombine.high %v12002_v34, %v12004_v59 }
 0x173   : > { %v9191_v2 = vpop.f32.mrf.mxu0  ;;  %9799 = vmatprep.subr.bf16.mxu0 %v10096_v63  ;;  %v6647_v3 = vadd.f32 %v9077_v12, %v6486_v21  ;;  %v2409_v12 = vld [vmem:[#allocation2 + $0x130] sm:$0x11] }
 0x174   : > { %v9192_v62 = vadd.f32 %v9191_v2, %v9190_v9  ;;  %9686 = vmatpush3.bf16.msra.mxu1 %v10089_v41  ;;  %v9079_v1 = vpop.f32.mrf.mxu1  ;;  %v12020_v41 = vsel %vm10652_vm3, %v2516_v61, %v2517_v22  ;;  %v10108_v9 = vld [vmem:[%s13113_s2 + $0x3d8] sm:$0xff]  }
 0x175   : > { %v9193_v15 = vpop.f32.mrf.mxu0  ;;  %7394 = vmatmul.mubr.bf16.gmra.mxu0 %v8333_v19  ;;  %9687 = vmatprep.subr.bf16.mxu1 %v10094_v17  ;;  %v11997_v55 = vadd.f32 %v9189_v53, %v6647_v3  ;;  %v9080_v28 = vadd.f32 %v9079_v1, %v9078_v0  ;;  %v12016_v53 = vsel %vm10652_vm3, %v8273_v8, %v2514_v5  ;;  %v13151_v19 = vld [vmem:[#allocation4_spill] sm:$0xff]  ;;  %v2407_v5 = vld [vmem:[#allocation2 + $0xd8] sm:$0xee] }
 0x176   : > { %7401 = vmatprep.mubr.bf16.mxu0 %v8352_v32  ;;  %9800 = vmatpush3.bf16.msra.mxu0 %v10097_v50  ;;  %v9081_v36 = vpop.f32.mrf.mxu1  ;;  %v6494_v17 = vadd.f32 %v13151_v19, %v11721_v14  ;;  %v10111_v32 = vld [vmem:[%s13113_s2 + $0x418] sm:$0xff]   ;;  %v8349_v50 = vcombine.low %v11963_v54, %v11967_v44  ;;  %v10118_v0 = vld [vmem:[%s13113_s2 + $0x450] sm:$0xff]   ;;  %v2523_v54 = vrot.slane %v2521_v30, 4  ;;  %v2524_v44 = vrot.slane %v2409_v12, 5  ;;  %v2412_v12 = vld [vmem:[#allocation2 + $0x1a0] sm:$0x11] }
 0x177   : > { %7233 = vmatmul.mubr.bf16.gmra.mxu1 %v8331_v7  ;;  %v9194_v13 = vpop.f32.mrf.mxu0  ;;  %9801 = vmatprep.subr.bf16.mxu0 %v10102_v37  ;;  %v6650_v56 = vadd.f32 %v9080_v28, %v6489_v10  ;;  %v8368_v37 = vcombine.high %v12016_v53, %v12020_v41  ;;  %v10109_v3 = vld [vmem:[%s13113_s2 + $0x398] sm:$0xff]   ;;  %v10116_v1 = vld [vmem:[%s13113_s2 + $0x3d0] sm:$0xff]  }
 0x178   : > { %v9195_v27 = vadd.f32 %v9194_v13, %v9193_v15  ;;  %7240 = vmatprep.mubr.bf16.mxu1 %v8350_v31  ;;  %9688 = vmatpush3.bf16.msra.mxu1 %v10095_v60  ;;  %v9082_v23 = vpop.f32.mrf.mxu1  ;;  %v8274_v60 = vrot.slane %v2407_v5, 9  ;;  %v13152_v15 = vld [vmem:[#allocation5_spill] sm:$0xff]  ;;  %v10122_v13 = vld [vmem:[%s13113_s2 + $0x448] sm:$0xff]  }
 0x179   : > { %v9196_v63 = vpop.f32.mrf.mxu0  ;;  %9689 = vmatprep.subr.bf16.mxu1 %v10100_v25  ;;  %v12028_v21 = vadd.f32 %v9192_v62, %v6650_v56  ;;  %v9083_v57 = vadd.f32 %v9082_v23, %v9081_v36  ;;  %v6497_v8 = vadd.f32 %v13152_v15, %v11721_v14  ;;  %v10119_v25 = vld [vmem:[%s13113_s2 + $0x410] sm:$0xff]   ;;  %v12057_v36 = vld [vmem:[#allocation2 + $0x78] sm:$0xff] }
 0x17a   : > { %9802 = vmatpush3.bf16.msra.mxu0 %v10103_v26  ;;  %v9084_v38 = vpop.f32.mrf.mxu1  ;;  %v12055_v26 = vld [vmem:[#allocation2 + $0x138] sm:$0xff]  ;;  %v2528_v19 = vrot.slane %v12057_v36, 5 }
 0x17b   : > { %v9197_v29 = vpop.f32.mrf.mxu0  ;;  %9803 = vmatprep.subr.bf16.mxu0 %v10110_v51  ;;  %v6655_v2 = vadd.f32 %v9083_v57, %v6494_v17  ;;  %v10120_v17 = vld [vmem:[%s13113_s2 + $0x3c8] sm:$0xff]   ;;  %v13153_v57 = vld [vmem:[#allocation6_spill] sm:$0xff] }
 0x17c   : > { %v9198_v7 = vadd.f32 %v9197_v29, %v9196_v63  ;;  %9690 = vmatpush3.bf16.msra.mxu1 %v10101_v6  ;;  %v9085_v62 = vpop.f32.mrf.mxu1  ;;  %v8369_v63 = vcombine.low %v12002_v34, %v12004_v59  ;;  %v8388_v59 = vcombine.high %v12055_v26, %v12057_v36 }
 0x17d   : > { %v9199_v31 = vpop.f32.mrf.mxu0  ;;  %7402 = vmatmul.mubr.bf16.gmra.mxu0 %v8351_v45  ;;  %9691 = vmatprep.subr.bf16.mxu1 %v10108_v9  ;;  %v12050_v61 = vadd.f32 %v9195_v27, %v6655_v2  ;;  %v9086_v22 = vadd.f32 %v9085_v62, %v9084_v38  ;;  %v10117_v27 = vld [vmem:[%s13113_s2 + $0x390] sm:$0xff]   ;;  %v12069_v45 = vsel %vm10652_vm3, %v8274_v60, %v2521_v30  ;;  %v2410_v30 = vld [vmem:[#allocation2 + $0x138] sm:$0xee] }
 0x17e   : > { %7409 = vmatprep.mubr.bf16.mxu0 %v8370_v39  ;;  %9804 = vmatpush3.bf16.msra.mxu0 %v10111_v32  ;;  %v9087_v10 = vpop.f32.mrf.mxu1  ;;  %v12073_v9 = vsel %vm10652_vm3, %v2523_v54, %v2524_v44  ;;  %v6502_v39 = vadd.f32 %v13153_v57, %v11721_v14  ;;  %v10123_v32 = vld [vmem:[%s13113_s2 + $0x408] sm:$0xff]   ;;  %v8275_v60 = vrot.slane %v2410_v30, 9  ;;  %v10128_v54 = vld [vmem:[%s13113_s2 + $0x3c0] sm:$0xff]  }
 0x17f   : > { %7241 = vmatmul.mubr.bf16.gmra.mxu1 %v8349_v50  ;;  %v9200_v28 = vpop.f32.mrf.mxu0  ;;  %9805 = vmatprep.subr.bf16.mxu0 %v10118_v0  ;;  %v6658_v51 = vadd.f32 %v9086_v22, %v6497_v8  ;;  %v8367_v50 = vcombine.low %v12016_v53, %v12020_v41  ;;  %v10130_v0 = vld [vmem:[%s13113_s2 + $0x440] sm:$0xff]   ;;  %v2530_v53 = vrot.slane %v2528_v19, 4  ;;  %v2531_v41 = vrot.slane %v2412_v12, 5  ;;  %v13154_v44 = vld [vmem:[#allocation7_spill] sm:$0xff] }
 0x180   : > { %v9201_v56 = vadd.f32 %v9200_v28, %v9199_v31  ;;  %7248 = vmatprep.mubr.bf16.mxu1 %v8368_v37  ;;  %9692 = vmatpush3.bf16.msra.mxu1 %v10109_v3  ;;  %v9088_v6 = vpop.f32.mrf.mxu1  ;;  %v8386_v37 = vcombine.high %v12069_v45, %v12073_v9  ;;  %v10121_v3 = vld [vmem:[%s13113_s2 + $0x388] sm:$0xff]   ;;  %v10131_v22 = vld [vmem:[%s13113_s2 + $0x400] sm:$0xff]   ;;  %v12108_v28 = vld [vmem:[#allocation2 + $0x158] sm:$0xff] }
 0x181   : > { %v9202_v23 = vpop.f32.mrf.mxu0  ;;  %9693 = vmatprep.subr.bf16.mxu1 %v10116_v1  ;;  %v12081_v5 = vadd.f32 %v9198_v7, %v6658_v51  ;;  %v9089_v34 = vadd.f32 %v9088_v6, %v9087_v10  ;;  %v6505_v1 = vadd.f32 %v13154_v44, %v11721_v14  ;;  %v12123_v57 = vsel %vm10652_vm3, %v2530_v53, %v2531_v41  ;;  %v2680_v44 = vld [vmem:[#allocation2 + $0x80] sm:$0xff] }
 0x182   : > { %9806 = vmatpush3.bf16.msra.mxu0 %v10119_v25  ;;  %v9090_v38 = vpop.f32.mrf.mxu1 }
 0x183   : > { %v9203_v29 = vpop.f32.mrf.mxu0  ;;  %9807 = vmatprep.subr.bf16.mxu0 %v10122_v13  ;;  %v6663_v2 = vadd.f32 %v9089_v34, %v6502_v39  ;;  %v12110_v13 = vld [vmem:[#allocation2 + $0x98] sm:$0xff]  ;;  %v13155_v34 = vld [vmem:[#allocation8_spill] sm:$0xff] }
 0x184   : > { %v9204_v7 = vadd.f32 %v9203_v29, %v9202_v23  ;;  %9694 = vmatpush3.bf16.msra.mxu1 %v10117_v27  ;;  %v9091_v62 = vpop.f32.mrf.mxu1  ;;  %v2535_v39 = vrot.slane %v12110_v13, 5  ;;  %v8385_v29 = vcombine.low %v12069_v45, %v12073_v9 }
 0x185   : > { %v9205_v31 = vpop.f32.mrf.mxu0  ;;  %7410 = vmatmul.mubr.bf16.gmra.mxu0 %v8369_v63  ;;  %9695 = vmatprep.subr.bf16.mxu1 %v10120_v17  ;;  %v12103_v15 = vadd.f32 %v9201_v56, %v6663_v2  ;;  %v9092_v8 = vadd.f32 %v9091_v62, %v9090_v38  ;;  %v10129_v56 = vld [vmem:[%s13113_s2 + $0x380] sm:$0xff]   ;;  %v8387_v63 = vcombine.low %v12055_v26, %v12057_v36  ;;  %v2413_v36 = vld [vmem:[#allocation2 + $0x158] sm:$0xee] }
 0x186   : > { %7417 = vmatprep.mubr.bf16.mxu0 %v8388_v59  ;;  %9808 = vmatpush3.bf16.msra.mxu0 %v10123_v32  ;;  %v9093_v25 = vpop.f32.mrf.mxu1  ;;  %v12119_v17 = vsel %vm10652_vm3, %v8275_v60, %v2528_v19  ;;  %v6510_v59 = vadd.f32 %v13155_v34, %v11721_v14  ;;  %v8406_v26 = vcombine.high %v12108_v28, %v12110_v13  ;;  %v2415_v32 = vld [vmem:[#allocation2 + $0xe8] sm:$0x11]  ;;  %v13156_v60 = vld [vmem:[#allocation9_spill] sm:$0xff] }
 0x187   : > { %7249 = vmatmul.mubr.bf16.gmra.mxu1 %v8367_v50  ;;  %v9206_v10 = vpop.f32.mrf.mxu0  ;;  %9809 = vmatprep.subr.bf16.mxu0 %v10130_v0  ;;  %v6666_v51 = vadd.f32 %v9092_v8, %v6505_v1  ;;  %v8404_v2 = vcombine.high %v12119_v17, %v12123_v57  ;;  %v2538_v62 = vrot.slane %v2415_v32, 5  ;;  %v2681_v1 = vld [vmem:[#allocation2 + $0xa8] sm:$0xff] }
 0x188   : > { %v9207_v27 = vadd.f32 %v9206_v10, %v9205_v31  ;;  %7256 = vmatprep.mubr.bf16.mxu1 %v8386_v37  ;;  %9696 = vmatpush3.bf16.msra.mxu1 %v10121_v3  ;;  %v9094_v6 = vpop.f32.mrf.mxu1  ;;  %v8276_v37 = vrot.slane %v2413_v36, 9  ;;  %v2537_v3 = vrot.slane %v2535_v39, 4  ;;  %v12139_v31 = vld [vmem:[%s13114_s3] ss:$0 sm:$0xff]  ;;  %v2418_v36 = vld [vmem:[#allocation2 + $0x28] sm:$0x11] }
 0x189   : > { %v9208_v23 = vpop.f32.mrf.mxu0  ;;  %9697 = vmatprep.subr.bf16.mxu1 %v10128_v54  ;;  %v12128_v30 = vadd.f32 %v9204_v7, %v6666_v51  ;;  %v9095_v12 = vadd.f32 %v9094_v6, %v9093_v25  ;;  %v6513_v45 = vadd.f32 %v12139_v31, %v13156_v60  ;;  %v8405_v51 = vcombine.low %v12108_v28, %v12110_v13 }
 0x18a   : > { %9810 = vmatpush3.bf16.msra.mxu0 %v10131_v22  ;;  %v9096_v19 = vpop.f32.mrf.mxu1  ;;  %v2542_v6 = vrot.slane %v2681_v1, 5  ;;  %v8403_v28 = vcombine.low %v12119_v17, %v12123_v57  ;;  %v2682_v17 = vld [vmem:[#allocation2] sm:$0xff]  ;;  %v2683_v57 = vld [vmem:[#allocation2 + $0x168] sm:$0xff] }
 0x18b   : > { %v9209_v38 = vpop.f32.mrf.mxu0  ;;  %v6671_v50 = vadd.f32 %v9095_v12, %v6510_v59  ;;  %v8424_v12 = vcombine.high %v2680_v44, %v2681_v1 }
 0x18c   : > { %v9210_v0 = vadd.f32 %v9209_v38, %v9208_v23  ;;  %9698 = vmatpush3.bf16.msra.mxu1 %v10129_v56  ;;  %v9097_v14 = vpop.f32.mrf.mxu1  ;;  %v2536_v56 = vsel %vm10652_vm3, %v8276_v37, %v2535_v39  ;;  %v13157_v23 = vld [vmem:[#allocation10_spill] sm:$0xff] }
 0x18d   : > { %v9211_v7 = vpop.f32.mrf.mxu0  ;;  %7418 = vmatmul.mubr.bf16.gmra.mxu0 %v8387_v63  ;;  %v12143_v9 = vadd.f32 %v9207_v27, %v6671_v50  ;;  %v9098_v53 = vadd.f32 %v9097_v14, %v9096_v19  ;;  %v2539_v27 = vsel %vm10652_vm3, %v2537_v3, %v2538_v62  ;;  %v6518_v63 = vadd.f32 %v12139_v31, %v13157_v23  ;;  %v13159_v23 = vld [vmem:[#allocation12_spill] sm:$0xff] }
 0x18e   : > { %7425 = vmatprep.mubr.bf16.mxu0 %v8406_v26  ;;  %v9099_v41 = vpop.f32.mrf.mxu1  ;;  %v2416_v26 = vld [vmem:[#allocation2 + $0x80] sm:$0xee]  ;;  %v8422_v38 = vcombine.high %v2536_v56, %v2539_v27  ;;  %v2544_v14 = vrot.slane %v2542_v6, 4 }
 0x18f   : > { %7257 = vmatmul.mubr.bf16.gmra.mxu1 %v8385_v29  ;;  %v9212_v54 = vpop.f32.mrf.mxu0  ;;  %v6674_v8 = vadd.f32 %v9098_v53, %v6513_v45 }
 0x190   : > { %v9213_v22 = vadd.f32 %v9212_v54, %v9211_v7  ;;  %7264 = vmatprep.mubr.bf16.mxu1 %v8404_v2  ;;  %v9100_v25 = vpop.f32.mrf.mxu1  ;;  %v8277_v2 = vrot.slane %v2416_v26, 9  ;;  %v2545_v7 = vrot.slane %v2418_v36, 5  ;;  %v8442_v26 = vcombine.high %v2682_v17, %v2683_v57  ;;  %v2419_v36 = vld [vmem:[#allocation2] sm:$0xee] }
 0x191   : > { %v9214_v10 = vpop.f32.mrf.mxu0  ;;  %v12153_v34 = vadd.f32 %v9210_v0, %v6674_v8  ;;  %v9101_v59 = vadd.f32 %v9100_v25, %v9099_v41  ;;  %v13158_v0 = vld [vmem:[#allocation11_spill] sm:$0xff]  ;;  %v8423_v25 = vcombine.low %v2680_v44, %v2681_v1 }
 0x192   : > { %v9102_v32 = vpop.f32.mrf.mxu1  ;;  %v6521_v37 = vadd.f32 %v12139_v31, %v13158_v0 }
 0x193   : > { %v9215_v19 = vpop.f32.mrf.mxu0  ;;  %v6679_v13 = vadd.f32 %v9101_v59, %v6518_v63  ;;  %v6526_v63 = vadd.f32 %v12139_v31, %v13159_v23 }
 0x194   : > { %v9216_v39 = vadd.f32 %v9215_v19, %v9214_v10  ;;  %v9103_v29 = vpop.f32.mrf.mxu1  ;;  %v2543_v10 = vsel %vm10652_vm3, %v8277_v2, %v2542_v6 }
 0x195   : > { %v9217_v50 = vpop.f32.mrf.mxu0  ;;  %7426 = vmatmul.mubr.bf16.gmra.mxu0 %v8405_v51  ;;  %v12159_v3 = vadd.f32 %v9213_v22, %v6679_v13  ;;  %v9104_v62 = vadd.f32 %v9103_v29, %v9102_v32  ;;  %v2546_v22 = vsel %vm10652_vm3, %v2544_v14, %v2545_v7  ;;  %v2549_v51 = vrot.slane %v2683_v57, 5  ;;  %v2421_v32 = vld [vmem:[#allocation2 + $0xb8] sm:$0x11] }
 0x196   : > { %7433 = vmatprep.mubr.bf16.mxu0 %v8424_v12  ;;  %v9105_v60 = vpop.f32.mrf.mxu1  ;;  %v8421_v13 = vcombine.low %v2536_v56, %v2539_v27  ;;  %v2552_v14 = vrot.slane %v2421_v32, 5  ;;  %v13161_v7 = vld [vmem:[#allocation13_spill] sm:$0xff]  ;;  %v2684_v56 = vld [vmem:[#allocation2 + $0x1a8] sm:$0xff]  ;;  %v2685_v27 = vld [vmem:[#allocation2 + $0x140] sm:$0xff] }
 0x197   : > { %7265 = vmatmul.mubr.bf16.gmra.mxu1 %v8403_v28  ;;  %v9218_v45 = vpop.f32.mrf.mxu0  ;;  %v6682_v53 = vadd.f32 %v9104_v62, %v6521_v37  ;;  %v2551_v2 = vrot.slane %v2549_v51, 4 }
 0x198   : > { %v9219_v41 = vadd.f32 %v9218_v45, %v9217_v50  ;;  %7272 = vmatprep.mubr.bf16.mxu1 %v8422_v38  ;;  %v9106_v54 = vpop.f32.mrf.mxu1  ;;  %v8440_v38 = vcombine.high %v2543_v10, %v2546_v22  ;;  %v8278_v50 = vrot.slane %v2419_v36, 9 }
 0x199   : > { %v9220_v8 = vpop.f32.mrf.mxu0  ;;  %v12167_v59 = vadd.f32 %v9216_v39, %v6682_v53  ;;  %v9107_v12 = vadd.f32 %v9106_v54, %v9105_v60  ;;  %v6529_v39 = vadd.f32 %v12139_v31, %v13161_v7 }
 0x19a   : > { %v9108_v19 = vpop.f32.mrf.mxu1  ;;  %v2550_v23 = vsel %vm10652_vm3, %v8278_v50, %v2549_v51 }
 0x19b   : > { %13160 = vst [vmem:[#allocation4_spill] sm:$0xff] %v12167_v59  ;;  %v9221_v28 = vpop.f32.mrf.mxu0  ;;  %v6687_v44 = vadd.f32 %v9107_v12, %v6526_v63  ;;  %v2556_v63 = vrot.slane %v2685_v27, 5  ;;  %v13163_v12 = vld [vmem:[#allocation14_spill] sm:$0xff] }
 0x19c   : > { %v9222_v1 = vadd.f32 %v9221_v28, %v9220_v8  ;;  %v9109_v6 = vpop.f32.mrf.mxu1  ;;  %v2422_v28 = vld [vmem:[#allocation2 + $0x1a8] sm:$0xee] }
 0x19d   : > { %v9223_v29 = vpop.f32.mrf.mxu0  ;;  %7434 = vmatmul.mubr.bf16.gmra.mxu0 %v8423_v25  ;;  %v12171_v0 = vadd.f32 %v9219_v41, %v6687_v44  ;;  %v9110_v37 = vadd.f32 %v9109_v6, %v9108_v19  ;;  %v8441_v25 = vcombine.low %v2682_v17, %v2683_v57  ;;  %v2553_v41 = vsel %vm10652_vm3, %v2551_v2, %v2552_v14 }
 0x19e   : > { %7441 = vmatprep.mubr.bf16.mxu0 %v8442_v26  ;;  %v9111_v62 = vpop.f32.mrf.mxu1  ;;  %v6534_v26 = vadd.f32 %v12139_v31, %v13163_v12  ;;  %v8460_v19 = vcombine.high %v2684_v56, %v2685_v27  ;;  %v8439_v6 = vcombine.low %v2543_v10, %v2546_v22  ;;  %v8279_v2 = vrot.slane %v2422_v28, 9  ;;  %v2686_v10 = vld [vmem:[#allocation2 + $0xa0] sm:$0xff]  ;;  %v2687_v22 = vld [vmem:[#allocation2 + $0x170] sm:$0xff] }
 0x19f   : > { %13162 = vst [vmem:[#allocation5_spill] sm:$0xff] %v12171_v0  ;;  %7273 = vmatmul.mubr.bf16.gmra.mxu1 %v8421_v13  ;;  %v9224_v60 = vpop.f32.mrf.mxu0  ;;  %v6690_v45 = vadd.f32 %v9110_v37, %v6529_v39  ;;  %v2424_v13 = vld [vmem:[#allocation2 + $0x50] sm:$0x11]  ;;  %v2558_v14 = vrot.slane %v2556_v63, 4  ;;  %v13165_v39 = vld [vmem:[#allocation15_spill] sm:$0xff]  ;;  %v2563_v28 = vrot.slane %v2687_v22, 5 }
 0x1a0   : > { %v9225_v53 = vadd.f32 %v9224_v60, %v9223_v29  ;;  %7280 = vmatprep.mubr.bf16.mxu1 %v8440_v38  ;;  %v9112_v54 = vpop.f32.mrf.mxu1  ;;  %v8458_v29 = vcombine.high %v2550_v23, %v2553_v41  ;;  %v2559_v7 = vrot.slane %v2424_v13, 5 }
 0x1a1   : > { %v9226_v8 = vpop.f32.mrf.mxu0  ;;  %v12179_v36 = vadd.f32 %v9222_v1, %v6690_v45  ;;  %v9113_v32 = vadd.f32 %v9112_v54, %v9111_v62  ;;  %v6537_v1 = vadd.f32 %v12139_v31, %v13165_v39 }
 0x1a2   : > { %v9114_v44 = vpop.f32.mrf.mxu1 }
 0x1a3   : > { %13164 = vst [vmem:[#allocation6_spill] sm:$0xff] %v12179_v36  ;;  %v9227_v38 = vpop.f32.mrf.mxu0  ;;  %v6695_v17 = vadd.f32 %v9113_v32, %v6534_v26  ;;  %v8459_v26 = vcombine.low %v2684_v56, %v2685_v27  ;;  %v2557_v32 = vsel %vm10652_vm3, %v8279_v2, %v2556_v63 }
 0x1a4   : > { %v9228_v57 = vadd.f32 %v9227_v38, %v9226_v8  ;;  %v9115_v51 = vpop.f32.mrf.mxu1  ;;  %v8478_v38 = vcombine.high %v2686_v10, %v2687_v22 }
 0x1a5   : > { %v9229_v50 = vpop.f32.mrf.mxu0  ;;  %7442 = vmatmul.mubr.bf16.gmra.mxu0 %v8441_v25  ;;  %v12183_v37 = vadd.f32 %v9225_v53, %v6695_v17  ;;  %v9116_v62 = vadd.f32 %v9115_v51, %v9114_v44  ;;  %v2560_v53 = vsel %vm10652_vm3, %v2558_v14, %v2559_v7  ;;  %v2427_v17 = vld [vmem:[#allocation2 + $0x198] sm:$0x11]  ;;  %v2565_v7 = vrot.slane %v2563_v28, 4 }
 0x1a6   : > { %7449 = vmatprep.mubr.bf16.mxu0 %v8460_v19  ;;  %v9117_v60 = vpop.f32.mrf.mxu1  ;;  %v6542_v19 = vadd.f32 %v12139_v31, %v11694_v24  ;;  %v8476_v39 = vcombine.high %v2557_v32, %v2560_v53 }
 0x1a7   : > { %13166 = vst [vmem:[#allocation7_spill] sm:$0xff] %v12183_v37  ;;  %7281 = vmatmul.mubr.bf16.gmra.mxu1 %v8439_v6  ;;  %v9230_v45 = vpop.f32.mrf.mxu0  ;;  %v6698_v54 = vadd.f32 %v9116_v62, %v6537_v1  ;;  %v2425_v6 = vld [vmem:[#allocation2 + $0xa0] sm:$0xee]  ;;  %v2566_v1 = vrot.slane %v2427_v17, 5  ;;  %v13168_v62 = vld [vmem:[#allocation16_spill] sm:$0xff]  ;;  %v12278_v37 = vld [vmem:[#allocation2 + $0x38] sm:$0xff] }
 0x1a8   : > { %v9231_v8 = vadd.f32 %v9230_v45, %v9229_v50  ;;  %7288 = vmatprep.mubr.bf16.mxu1 %v8458_v29  ;;  %v9118_v12 = vpop.f32.mrf.mxu1  ;;  %v8457_v50 = vcombine.low %v2550_v23, %v2553_v41  ;;  %v8280_v14 = vrot.slane %v2425_v6, 9  ;;  %v6545_v24 = vadd.f32 %v12139_v31, %v13168_v62  ;;  %v2688_v23 = vld [vmem:[#allocation2 + $0xc0] sm:$0xff]  ;;  %v2689_v41 = vld [vmem:[#allocation2 + $0x190] sm:$0xff] }
 0x1a9   : > { %v9232_v25 = vpop.f32.mrf.mxu0  ;;  %v12191_v13 = vadd.f32 %v9228_v57, %v6698_v54  ;;  %v9119_v44 = vadd.f32 %v9118_v12, %v9117_v60  ;;  %v2567_v31 = vsel %vm10652_vm3, %v2565_v7, %v2566_v1 }
 0x1aa   : > { %v9120_v29 = vpop.f32.mrf.mxu1  ;;  %v2564_v6 = vsel %vm10652_vm3, %v8280_v14, %v2563_v28 }
 0x1ab   : > { %13167 = vst [vmem:[#allocation8_spill] sm:$0xff] %v12191_v13  ;;  %v9233_v51 = vpop.f32.mrf.mxu0  ;;  %v6703_v56 = vadd.f32 %v9119_v44, %v6542_v19  ;;  %v8477_v44 = vcombine.low %v2686_v10, %v2687_v22  ;;  %v8494_v10 = vcombine.high %v2564_v6, %v2567_v31 }
 0x1ac   : > { %v9234_v27 = vadd.f32 %v9233_v51, %v9232_v25  ;;  %v9121_v63 = vpop.f32.mrf.mxu1  ;;  %v2428_v51 = vld [vmem:[#allocation2 + $0xc0] sm:$0xee] }
 0x1ad   : > { %v9363_v2 = vpop.f32.mrf.mxu0  ;;  %7450 = vmatmul.mubr.bf16.gmra.mxu0 %v8459_v26  ;;  %v12195_v57 = vadd.f32 %v9231_v8, %v6703_v56  ;;  %v9122_v60 = vadd.f32 %v9121_v63, %v9120_v29  ;;  %v2570_v8 = vrot.slane %v2689_v41, 5  ;;  %v8496_v29 = vcombine.high %v2688_v23, %v2689_v41 }
 0x1ae   : > { %7457 = vmatprep.mubr.bf16.mxu0 %v8478_v38  ;;  %v8281_v28 = vrot.slane %v2428_v51, 9 }
 0x1af   : > { %13169 = vst [vmem:[#allocation9_spill] sm:$0xff] %v12195_v57  ;;  %v9251_v45 = vpop.f32.mrf.mxu1  ;;  %7289 = vmatmul.mubr.bf16.gmra.mxu1 %v8457_v50  ;;  %v9364_v54 = vpop.f32.mrf.mxu0  ;;  %v6706_v12 = vadd.f32 %v9122_v60, %v6545_v24  ;;  %v2430_v50 = vld [vmem:[#allocation2 + $0xc8] sm:$0x11]  ;;  %v2572_v14 = vrot.slane %v2570_v8, 4 }
 0x1b0   : > { %v9365_v25 = vadd.f32 %v9364_v54, %v9363_v2  ;;  %7296 = vmatprep.mubr.bf16.mxu1 %v8476_v39  ;;  %v8475_v2 = vcombine.low %v2557_v32, %v2560_v53  ;;  %v13171_v39 = vld [vmem:[#allocation17_spill] sm:$0xff]  ;;  %v2573_v7 = vrot.slane %v2430_v50, 5  ;;  %v12208_v32 = vld [vmem:[#allocation2 + $0x150] sm:$0xff] }
 0x1b1   : > { %v9252_v19 = vpop.f32.mrf.mxu1  ;;  %v9366_v26 = vpop.f32.mrf.mxu0  ;;  %v12201_v17 = vadd.f32 %v9234_v27, %v6706_v12  ;;  %v12206_v12 = vld [vmem:[#allocation2 + $0xf0] sm:$0xff]  ;;  %v2577_v51 = vrot.slane %v12208_v32, 5 }
 0x1b2   : > { %v9253_v38 = vadd.f32 %v9252_v19, %v9251_v45 }
 0x1b3   : > { %13170 = vst [vmem:[#allocation10_spill] sm:$0xff] %v12201_v17  ;;  %v9254_v56 = vpop.f32.mrf.mxu1  ;;  %v9367_v63 = vpop.f32.mrf.mxu0 }
 0x1b4   : > { %v6905_v62 = vadd.f32 %v9253_v38, %v13171_v39  ;;  %v9368_v24 = vadd.f32 %v9367_v63, %v9366_v26  ;;  %v8495_v38 = vcombine.low %v2688_v23, %v2689_v41  ;;  %v2431_v63 = vld [vmem:[#allocation2 + $0xf0] sm:$0xee]  ;;  %v8493_v41 = vcombine.low %v2564_v6, %v2567_v31  ;;  %v2434_v6 = vld [vmem:[#allocation2 + $0xf8] sm:$0xee] }
 0x1b5   : > { %v9255_v22 = vpop.f32.mrf.mxu1  ;;  %v9369_v60 = vpop.f32.mrf.mxu0  ;;  %7458 = vmatmul.mubr.bf16.gmra.mxu0 %v8477_v44 }
 0x1b6   : > { %v12204_v1 = vadd.f32 %v9365_v25, %v6905_v62  ;;  %v9256_v27 = vadd.f32 %v9255_v22, %v9254_v56  ;;  %7465 = vmatprep.mubr.bf16.mxu0 %v8496_v29  ;;  %v12213_v25 = vsel %vm10652_vm3, %v8281_v28, %v2570_v8  ;;  %v12217_v29 = vsel %vm10652_vm3, %v2572_v14, %v2573_v7  ;;  %v13174_v62 = vld [vmem:[#allocation18_spill] sm:$0xff] }
 0x1b7   : > { %v9257_v45 = vpop.f32.mrf.mxu1  ;;  %7297 = vmatmul.mubr.bf16.gmra.mxu1 %v8475_v2  ;;  %v9370_v54 = vpop.f32.mrf.mxu0  ;;  %v2433_v2 = vld [vmem:[#allocation2 + $0x30] sm:$0x11]  ;;  %v8512_v22 = vcombine.high %v12213_v25, %v12217_v29  ;;  %v2579_v14 = vrot.slane %v2577_v51, 4 }
 0x1b8   : > { %13172 = vst [vmem:[#allocation11_spill] sm:$0xff] %v12204_v1  ;;  %v6908_v53 = vadd.f32 %v9256_v27, %v11771_v35  ;;  %v9371_v19 = vadd.f32 %v9370_v54, %v9369_v60  ;;  %7304 = vmatprep.mubr.bf16.mxu1 %v8494_v10  ;;  %v8514_v35 = vcombine.high %v12206_v12, %v12208_v32  ;;  %v2580_v7 = vrot.slane %v2433_v2, 5  ;;  %v12227_v27 = vld [vmem:[#allocation2 + $0x18] sm:$0xff] }
 0x1b9   : > { %v9258_v26 = vpop.f32.mrf.mxu1  ;;  %v9372_v44 = vpop.f32.mrf.mxu0  ;;  %v2584_v31 = vrot.slane %v12227_v27, 5  ;;  %v8513_v2 = vcombine.low %v12206_v12, %v12208_v32 }
 0x1ba   : > { %v12220_v50 = vadd.f32 %v9368_v24, %v6908_v53  ;;  %v9259_v56 = vadd.f32 %v9258_v26, %v9257_v45  ;;  %v8282_v24 = vrot.slane %v2431_v63, 9  ;;  %v12231_v53 = vld [vmem:[#allocation2 + $0xf8] sm:$0xff] }
 0x1bb   : > { %v9260_v39 = vpop.f32.mrf.mxu1  ;;  %v9373_v23 = vpop.f32.mrf.mxu0  ;;  %v2586_v32 = vrot.slane %v2584_v31, 4 }
 0x1bc   : > { %13173 = vst [vmem:[#allocation12_spill] sm:$0xff] %v12220_v50  ;;  %v6913_v8 = vadd.f32 %v9259_v56, %v13174_v62  ;;  %v9374_v10 = vadd.f32 %v9373_v23, %v9372_v44  ;;  %v2436_v56 = vld [vmem:[#allocation2 + $0x8] sm:$0x11]  ;;  %v12243_v62 = vsel %vm10652_vm3, %v8282_v24, %v2577_v51  ;;  %v8511_v51 = vcombine.low %v12213_v25, %v12217_v29  ;;  %v12266_v29 = vld [vmem:[#allocation2 + $0x178] sm:$0xff] }
 0x1bd   : > { %v9261_v60 = vpop.f32.mrf.mxu1  ;;  %v9375_v28 = vpop.f32.mrf.mxu0  ;;  %7466 = vmatmul.mubr.bf16.gmra.mxu0 %v8495_v38  ;;  %v8531_v24 = vcombine.low %v12231_v53, %v12227_v27  ;;  %v2442_v50 = vld [vmem:[#allocation2 + $0x88] sm:$0x11] }
 0x1be   : > { %v12229_v45 = vadd.f32 %v9371_v19, %v6913_v8  ;;  %v9262_v54 = vadd.f32 %v9261_v60, %v9260_v39  ;;  %7473 = vmatprep.mubr.bf16.mxu0 %v8514_v35  ;;  %v12237_v19 = vld [vmem:[#allocation2 + $0x60] sm:$0xff]  ;;  %v12239_v39 = vld [vmem:[#allocation2 + $0x70] sm:$0xff]  ;;  %v8283_v8 = vrot.slane %v2434_v6, 9  ;;  %v2587_v60 = vrot.slane %v2436_v56, 5 }
 0x1bf   : > { %v9263_v26 = vpop.f32.mrf.mxu1  ;;  %7305 = vmatmul.mubr.bf16.gmra.mxu1 %v8493_v41  ;;  %v9376_v44 = vpop.f32.mrf.mxu0  ;;  %v12247_v41 = vsel %vm10652_vm3, %v2579_v14, %v2580_v7  ;;  %v2439_v7 = vld [vmem:[#allocation2 + $0x68] sm:$0x11]  ;;  %v12260_v6 = vld [vmem:[#allocation2 + $0x20] sm:$0xff] }
 0x1c0   : > { %13175 = vst [vmem:[#allocation13_spill] sm:$0xff] %v12229_v45  ;;  %v6916_v38 = vadd.f32 %v9262_v54, %v11806_v18  ;;  %v9377_v63 = vadd.f32 %v9376_v44, %v9375_v28  ;;  %7312 = vmatprep.mubr.bf16.mxu1 %v8512_v22  ;;  %v8532_v18 = vcombine.high %v12231_v53, %v12227_v27  ;;  %v2437_v28 = vld [vmem:[#allocation2 + $0x60] sm:$0xee]  ;;  %v2598_v25 = vrot.slane %v12260_v6, 5 }
 0x1c1   : > { %v9264_v35 = vpop.f32.mrf.mxu1  ;;  %v9378_v23 = vpop.f32.mrf.mxu0  ;;  %v2732_v54 = vld [vmem:[#allocation2 + $0x40] sm:$0xff]  ;;  %v12270_v14 = vsel %vm10652_vm3, %v8283_v8, %v2584_v31  ;;  %v2594_v17 = vrot.slane %v2439_v7, 5  ;;  %v2790_v8 = vshll.u32 %v12266_v29, 16  ;;  %v8550_v7 = vcombine.high %v12237_v19, %v12239_v39 }
 0x1c2   : > { %v12251_v22 = vadd.f32 %v9374_v10, %v6916_v38  ;;  %v9265_v12 = vadd.f32 %v9264_v35, %v9263_v26  ;;  %v2591_v10 = vrot.slane %v12239_v39, 5  ;;  %v8530_v38 = vcombine.high %v12243_v62, %v12247_v41  ;;  %v2440_v35 = vld [vmem:[#allocation2 + $0x38] sm:$0xee] }
 0x1c3   : > { %v9266_v44 = vpop.f32.mrf.mxu1  ;;  %v9379_v45 = vpop.f32.mrf.mxu0  ;;  %v2781_v1 = vshrl.u32 %v2732_v54, 16  ;;  %v8285_v31 = vrot.slane %v2440_v35, 9 }
 0x1c4   : > { %13176 = vst [vmem:[#allocation14_spill] sm:$0xff] %v12251_v22  ;;  %v6921_v26 = vadd.f32 %v9265_v12, %v11822_v42  ;;  %v9380_v56 = vadd.f32 %v9379_v45, %v9378_v23  ;;  %v8284_v22 = vrot.slane %v2437_v28, 9  ;;  %v2784_v42 = vshll.u32 %v2732_v54, 16 }
 0x1c5   : > { %v9267_v27 = vpop.f32.mrf.mxu1  ;;  %v9381_v53 = vpop.f32.mrf.mxu0  ;;  %7474 = vmatmul.mubr.bf16.gmra.mxu0 %v8513_v2  ;;  %v12276_v12 = vsel %vm10652_vm3, %v2586_v32, %v2587_v60  ;;  %v2593_v13 = vrot.slane %v2591_v10, 4  ;;  %v2794_v28 = vshrl.u32 %v12266_v29, 16 }
 0x1c6   : > { %v12272_v45 = vadd.f32 %v9377_v63, %v6921_v26  ;;  %v9268_v23 = vadd.f32 %v9267_v27, %v9266_v44  ;;  %7481 = vmatprep.mubr.bf16.mxu0 %v8532_v18  ;;  %v2600_v18 = vrot.slane %v2598_v25, 4  ;;  %v2601_v44 = vrot.slane %v2442_v50, 5  ;;  %v2734_v50 = vld [vmem:[#allocation2 + $0x108] sm:$0x11] }
 0x1c7   : > { %v9269_v57 = vpop.f32.mrf.mxu1  ;;  %7313 = vmatmul.mubr.bf16.gmra.mxu1 %v8511_v51  ;;  %v9382_v2 = vpop.f32.mrf.mxu0  ;;  %v8529_v51 = vcombine.low %v12243_v62, %v12247_v41  ;;  %v2783_v26 = vrot.slane %v2781_v1, 4  ;;  %v2786_v35 = vrot.slane %v2784_v42, 5  ;;  %v12295_v62 = vsel %vm10652_vm3, %v8284_v22, %v2591_v10 }
 0x1c8   : > { %13177 = vst [vmem:[#allocation15_spill] sm:$0xff] %v12272_v45  ;;  %v6924_v63 = vadd.f32 %v9268_v23, %v11836_v33  ;;  %v9383_v54 = vadd.f32 %v9382_v2, %v9381_v53  ;;  %7320 = vmatprep.mubr.bf16.mxu1 %v8530_v38  ;;  %v8548_v33 = vcombine.high %v12270_v14, %v12276_v12  ;;  %v12301_v41 = vrot.slane %v2790_v8, 5 }
 0x1c9   : > { %v9270_v32 = vpop.f32.mrf.mxu1  ;;  %v9384_v60 = vpop.f32.mrf.mxu0  ;;  %v12299_v1 = vsel %vm10652_vm3, %v2593_v13, %v2594_v17  ;;  %v12306_v2 = vsel %vm10652_vm3, %v8285_v31, %v2598_v25  ;;  %v8547_v13 = vcombine.low %v12270_v14, %v12276_v12  ;;  %v8568_v17 = vcombine.high %v12278_v37, %v12260_v6  ;;  %v12324_v12 = vld [vmem:[#allocation2 + $0xb0] sm:$0xff] }
 0x1ca   : > { %v12287_v27 = vadd.f32 %v9380_v56, %v6924_v63  ;;  %v9271_v45 = vadd.f32 %v9270_v32, %v9269_v57  ;;  %v2796_v57 = vrot.slane %v2794_v28, 4  ;;  %v12310_v63 = vsel %vm10652_vm3, %v2600_v18, %v2601_v44  ;;  %v2735_v18 = vld [vmem:[#allocation2 + $0x110] sm:$0xff] }
 0x1cb   : > { %v9272_v53 = vpop.f32.mrf.mxu1  ;;  %v9385_v23 = vpop.f32.mrf.mxu0  ;;  %v2787_v8 = vor.u32 %v2786_v35, %v2783_v26  ;;  %v8566_v31 = vcombine.high %v12295_v62, %v12299_v1  ;;  %v2805_v25 = vshrl.u32 %v2735_v18, 16 }
 0x1cc   : > { %13178 = vst [vmem:[#allocation16_spill] sm:$0xff] %v12287_v27  ;;  %v6929_v56 = vadd.f32 %v9271_v45, %v11842_v16  ;;  %v9386_v42 = vadd.f32 %v9385_v23, %v9384_v60  ;;  %v2800_v16 = vshll.u32 %v2734_v50, 16  ;;  %v2797_v32 = vor.u32 %v2796_v57, %v12301_v41  ;;  %v3230_v23 = vld [vmem:[#allocation2 + $0x108] sm:$0x11] }
 0x1cd   : > { %v9273_v22 = vpop.f32.mrf.mxu1  ;;  %v9387_v10 = vpop.f32.mrf.mxu0  ;;  %7482 = vmatmul.mubr.bf16.gmra.mxu0 %v8531_v24  ;;  %v3326_v60 = vrot.slane %v12266_v29, 5  ;;  %v2788_v14 = vrot.slane %v2787_v8, 4  ;;  %v2808_v29 = vshll.u32 %v2735_v18, 16  ;;  %v3329_v36 = vrot.slane %v3230_v23, 5 }
 0x1ce   : > { %v12316_v45 = vadd.f32 %v9383_v54, %v6929_v56  ;;  %v9274_v28 = vadd.f32 %v9273_v22, %v9272_v53  ;;  %7489 = vmatprep.mubr.bf16.mxu0 %v8550_v7  ;;  %v12330_v7 = vld [vmem:[#allocation2 + $0x90] sm:$0xff]  ;;  %v3228_v53 = vld [vmem:[#allocation2 + $0x40] sm:$0xee]  ;;  %v2802_v57 = vrot.slane %v2800_v16, 5  ;;  %v2738_v54 = vld [vmem:[#allocation2 + $0x148] sm:$0xff]  ;;  %v2798_v50 = vrot.slane %v2797_v32, 4 }
 0x1cf   : > { %v9275_v24 = vpop.f32.mrf.mxu1  ;;  %7321 = vmatmul.mubr.bf16.gmra.mxu1 %v8529_v51  ;;  %v9388_v44 = vpop.f32.mrf.mxu0  ;;  %v3328_v27 = vrot.slane %v3326_v60, 4  ;;  %v2829_v18 = vshrl.u32 %v2738_v54, 16  ;;  %v2832_v0 = vshll.u32 %v2738_v54, 16 }
 0x1d0   : > { %13179 = vst [vmem:[#allocation17_spill] sm:$0xff] %v12316_v45  ;;  %v6932_v26 = vadd.f32 %v9274_v28, %v11852_v11  ;;  %v9389_v35 = vadd.f32 %v9388_v44, %v9387_v10  ;;  %7328 = vmatprep.mubr.bf16.mxu1 %v8548_v33  ;;  %v2814_v33 = vshll.u32 %v12330_v7, 16  ;;  %v2818_v10 = vshrl.u32 %v12330_v7, 16  ;;  %v12341_v28 = vld [vmem:[#allocation2 + $0x100] sm:$0xff] }
 0x1d1   : > { %v9276_v56 = vpop.f32.mrf.mxu1  ;;  %v9390_v22 = vpop.f32.mrf.mxu0  ;;  %v8286_v45 = vrot.slane %v3228_v53, 9  ;;  %v2838_v59 = vshll.u32 %v12341_v28, 16  ;;  %v2842_v32 = vshrl.u32 %v12341_v28, 16 }
 0x1d2   : > { %v12337_v38 = vadd.f32 %v9386_v42, %v6932_v26  ;;  %v9277_v11 = vadd.f32 %v9276_v56, %v9275_v24  ;;  %v13181_v24 = vcombine.low %v12237_v19, %v12239_v39  ;;  %v2807_v56 = vrot.slane %v2805_v25, 4 }
 0x1d3   : > { %v9278_v44 = vpop.f32.mrf.mxu1  ;;  %v9391_v51 = vpop.f32.mrf.mxu0  ;;  %v12356_v19 = vsel %vm10646_vm1, %v2788_v14, %v12301_v41  ;;  %v12360_v39 = vsel %vm10652_vm3, %v8286_v45, %v3326_v60  ;;  %v12364_v25 = vsel %vm10652_vm3, %v3328_v27, %v3329_v36  ;;  %v2834_v41 = vrot.slane %v2832_v0, 5 }
 0x1d4   : > { %13180 = vst [vmem:[#allocation18_spill] sm:$0xff] %v12337_v38  ;;  %v6937_v8 = vadd.f32 %v9277_v11, %v11860_v4  ;;  %v9392_v16 = vadd.f32 %v9391_v51, %v9390_v22  ;;  %v2810_v38 = vrot.slane %v2808_v29, 5  ;;  %v12351_v4 = vrot.slane %v2814_v33, 5  ;;  %v3231_v11 = vld [vmem:[#allocation2 + $0x110] sm:$0xee] }
 0x1d5   : > { %v9279_v42 = vpop.f32.mrf.mxu1  ;;  %v9393_v26 = vpop.f32.mrf.mxu0  ;;  %7490 = vmatmul.mubr.bf16.gmra.mxu0 %v13181_v24  ;;  %v2820_v51 = vrot.slane %v2818_v10, 4  ;;  %v3233_v33 = vld [vmem:[#allocation2 + $0x118] sm:$0x11]  ;;  %v2831_v10 = vrot.slane %v2829_v18, 4  ;;  %v12370_v45 = vsel %vm10646_vm1, %v2798_v50, %v2802_v57  ;;  %v12372_v36 = vrot.slane %v2838_v59, 5 }
 0x1d6   : > { %v12349_v53 = vadd.f32 %v9389_v35, %v6937_v8  ;;  %v9280_v23 = vadd.f32 %v9279_v42, %v9278_v44  ;;  %7497 = vmatprep.mubr.bf16.mxu0 %v8568_v17  ;;  %v2737_v17 = vld [vmem:[#allocation2 + $0x118] sm:$0x11]  ;;  %v3333_v35 = vrot.slane %v12330_v7, 5  ;;  %v2811_v60 = vor.u32 %v2810_v38, %v2807_v56 }
 0x1d7   : > { %v9281_v54 = vpop.f32.mrf.mxu1  ;;  %7329 = vmatmul.mubr.bf16.gmra.mxu1 %v8547_v13  ;;  %v9394_v22 = vpop.f32.mrf.mxu0  ;;  %v2844_v27 = vrot.slane %v2842_v32, 4  ;;  %v2740_v42 = vld [vmem:[#allocation2 + $0x58] sm:$0x11]  ;;  %v8319_v0 = vcombine.low %v12360_v39, %v12364_v25  ;;  %v8320_v50 = vcombine.high %v12360_v39, %v12364_v25  ;;  %v8287_v57 = vrot.slane %v3231_v11, 9 }
 0x1d8   : > { %v6940_v29 = vadd.f32 %v9280_v23, %v11868_v47  ;;  %v9395_v13 = vadd.f32 %v9394_v22, %v9393_v26  ;;  %7336 = vmatprep.mubr.bf16.mxu1 %v8566_v31  ;;  %v2821_v47 = vor.u32 %v2820_v51, %v12351_v4  ;;  %v2824_v31 = vshll.u32 %v2737_v17, 16  ;;  %v2741_v32 = vld [vmem:[#allocation2 + $0xd8] sm:$0xff] }
 0x1d9   : > { %v9282_v14 = vpop.f32.mrf.mxu1  ;;  %v9396_v44 = vpop.f32.mrf.mxu0  ;;  %v3336_v38 = vrot.slane %v3233_v33, 5  ;;  %v2835_v56 = vor.u32 %v2834_v41, %v2831_v10  ;;  %v2812_v17 = vrot.slane %v2811_v60, 4  ;;  %v2848_v11 = vshll.u32 %v2740_v42, 16 }
 0x1da   : > { %v12374_v8 = vadd.f32 %v9392_v16, %v6940_v29  ;;  %v9283_v7 = vadd.f32 %v9282_v14, %v9281_v54  ;;  %v3335_v16 = vrot.slane %v3333_v35, 4  ;;  %v13182_v54 = vcombine.low %v12278_v37, %v12260_v6 }
 0x1db   : > { %v9284_v26 = vpop.f32.mrf.mxu1  ;;  %v9397_v18 = vpop.f32.mrf.mxu0  ;;  %v2845_v29 = vor.u32 %v2844_v27, %v12372_v36  ;;  %v13183_v10 = vcombine.high %v12324_v12, %v12324_v12  ;;  %v2822_v41 = vrot.slane %v2821_v47, 4  ;;  %v2826_v14 = vrot.slane %v2824_v31, 5 }
 0x1dc   : > { %v6945_v59 = vadd.f32 %v9283_v7, %v11876_v48  ;;  %v9398_v24 = vadd.f32 %v9397_v18, %v9396_v44  ;;  %v12393_v44 = vld [vmem:[#allocation2 + $0x180] sm:$0xff]  ;;  %v13184_v6 = vcombine.low %v12295_v62, %v12299_v1  ;;  %v8318_v27 = vcombine.high %v12356_v19, %v12370_v45  ;;  %v3234_v18 = vld [vmem:[#allocation2 + $0x148] sm:$0xee] }
 0x1dd   : > { %v9285_v23 = vpop.f32.mrf.mxu1  ;;  %v9399_v51 = vpop.f32.mrf.mxu0  ;;  %7498 = vmatmul.mubr.bf16.gmra.mxu0 %v13182_v54  ;;  %v2853_v7 = vshrl.u32 %v2741_v32, 16  ;;  %v2856_v42 = vshll.u32 %v2741_v32, 16  ;;  %v12410_v62 = vsel %vm10652_vm3, %v3335_v16, %v3336_v38  ;;  %v2836_v1 = vrot.slane %v2835_v56, 4 }
 0x1de   : > { %v12388_v33 = vadd.f32 %v9395_v13, %v6945_v59  ;;  %v9286_v48 = vadd.f32 %v9285_v23, %v9284_v26  ;;  %7505 = vmatprep.mubr.bf16.mxu0 %v13183_v10  ;;  %v12402_v13 = vsel %vm10652_vm3, %v8287_v57, %v3333_v35  ;;  %v13185_v26 = vcombine.high %v12306_v2, %v12310_v63 }
 0x1df   : > { %v9287_v37 = vpop.f32.mrf.mxu1  ;;  %7337 = vmatmul.mubr.bf16.gmra.mxu1 %v13184_v6  ;;  %v9400_v60 = vpop.f32.mrf.mxu0  ;;  %v2846_v54 = vrot.slane %v2845_v29, 4  ;;  %v2850_v35 = vrot.slane %v2848_v11, 5  ;;  %v2862_v57 = vshll.u32 %v12393_v44, 16  ;;  %v2866_v32 = vshrl.u32 %v12393_v44, 16 }
 0x1e0   : > { %v6948_v47 = vadd.f32 %v9286_v48, %v11893_v20  ;;  %v9401_v31 = vadd.f32 %v9400_v60, %v9399_v51  ;;  %7344 = vmatprep.mubr.bf16.mxu1 %v13185_v26  ;;  %v12419_v48 = vsel %vm10646_vm1, %v2812_v17, %v12351_v4  ;;  %v12423_v38 = vsel %vm10646_vm1, %v2822_v41, %v2826_v14  ;;  %v3236_v17 = vld [vmem:[#allocation2 + $0x58] sm:$0x11] }
 0x1e1   : > { %v9288_v59 = vpop.f32.mrf.mxu1  ;;  %v9402_v23 = vpop.f32.mrf.mxu0  ;;  %v8288_v29 = vrot.slane %v3234_v18, 9  ;;  %v3340_v11 = vrot.slane %v12341_v28, 5  ;;  %v2855_v10 = vrot.slane %v2853_v7, 4  ;;  %v2858_v6 = vrot.slane %v2856_v42, 5  ;;  %v2743_v7 = vld [vmem:[#allocation2 + $0x130] sm:$0x11] }
 0x1e2   : > { %v12414_v20 = vadd.f32 %v9398_v24, %v6948_v47  ;;  %v9289_v51 = vadd.f32 %v9288_v59, %v9287_v37  ;;  %v8338_v4 = vcombine.high %v12402_v13, %v12410_v62  ;;  %v13186_v14 = vcombine.low %v12324_v12, %v12324_v12 }
 0x1e3   : > { %v9290_v16 = vpop.f32.mrf.mxu1  ;;  %v9403_v56 = vpop.f32.mrf.mxu0  ;;  %v12437_v28 = vsel %vm10646_vm1, %v2836_v1, %v12372_v36  ;;  %v12443_v42 = vrot.slane %v2862_v57, 5  ;;  %v2868_v26 = vrot.slane %v2866_v32, 4  ;;  %v8336_v36 = vcombine.high %v12419_v48, %v12423_v38  ;;  %v2744_v1 = vld [vmem:[#allocation2 + $0x138] sm:$0xff] }
 0x1e4   : > { %v6953_v24 = vadd.f32 %v9289_v51, %v11903_v52  ;;  %v9404_v60 = vadd.f32 %v9403_v56, %v9402_v23  ;;  %v12441_v52 = vsel %vm10646_vm1, %v2846_v54, %v2850_v35  ;;  %v13187_v54 = vcombine.low %v12306_v2, %v12310_v63  ;;  %v3237_v51 = vld [vmem:[#allocation2 + $0xd8] sm:$0xee] }
 0x1e5   : > { %v9291_v47 = vpop.f32.mrf.mxu1  ;;  %v9405_v41 = vpop.f32.mrf.mxu0  ;;  %7506 = vmatmul.mubr.bf16.gmra.mxu0 %v13186_v14  ;;  %v3342_v57 = vrot.slane %v3340_v11, 4  ;;  %v3343_v32 = vrot.slane %v3236_v17, 5  ;;  %v12464_v14 = vld [vmem:[#allocation2 + $0x78] sm:$0xff]  ;;  %v2877_v17 = vshrl.u32 %v2744_v1, 16  ;;  %v13189_v39 = vcombine.low %v12356_v19, %v12370_v45 }
 0x1e6   : > { %v12445_v18 = vadd.f32 %v9401_v31, %v6953_v24  ;;  %v9292_v59 = vadd.f32 %v9291_v47, %v9290_v16  ;;  %7707 = vmatprep.mubr.bf16.mxu0 %v8320_v50  ;;  %v12459_v31 = vsel %vm10652_vm3, %v8288_v29, %v3340_v11  ;;  %v2859_v50 = vor.u32 %v2858_v6, %v2855_v10  ;;  %v3239_v29 = vld [vmem:[#allocation2 + $0x130] sm:$0x11] }
 0x1e7   : > { %v9293_v23 = vpop.f32.mrf.mxu1  ;;  %7345 = vmatmul.mubr.bf16.gmra.mxu1 %v13187_v54  ;;  %v9406_v35 = vpop.f32.mrf.mxu0  ;;  %v2872_v47 = vshll.u32 %v2743_v7, 16  ;;  %v2869_v54 = vor.u32 %v2868_v26, %v12443_v42  ;;  %v3347_v11 = vrot.slane %v12393_v44, 5  ;;  %v2880_v10 = vshll.u32 %v2744_v1, 16 }
 0x1e8   : > { %v6956_v16 = vadd.f32 %v9292_v59, %v11922_v49  ;;  %v9407_v56 = vadd.f32 %v9406_v35, %v9405_v41  ;;  %7546 = vmatprep.mubr.bf16.mxu1 %v8318_v27  ;;  %v8289_v41 = vrot.slane %v3237_v51, 9  ;;  %v12474_v35 = vsel %vm10652_vm3, %v3342_v57, %v3343_v32 }
 0x1e9   : > { %v9294_v2 = vpop.f32.mrf.mxu1  ;;  %v9408_v63 = vpop.f32.mrf.mxu0  ;;  %v2860_v24 = vrot.slane %v2859_v50, 4  ;;  %v2886_v26 = vshll.u32 %v12464_v14, 16  ;;  %v2890_v44 = vshrl.u32 %v12464_v14, 16  ;;  %v2870_v51 = vrot.slane %v2869_v54, 4  ;;  %v3242_v54 = vld [vmem:[#allocation2 + $0x1a0] sm:$0x11] }
 0x1ea   : > { %v12468_v6 = vadd.f32 %v9404_v60, %v6956_v16  ;;  %v9295_v49 = vadd.f32 %v9294_v2, %v9293_v23  ;;  %v2874_v16 = vrot.slane %v2872_v47, 5  ;;  %v3350_v23 = vrot.slane %v3239_v29, 5  ;;  %v2747_v2 = vld [vmem:[#allocation2 + $0x158] sm:$0xff] }
 0x1eb   : > { %v9296_v59 = vpop.f32.mrf.mxu1  ;;  %v9409_v7 = vpop.f32.mrf.mxu0  ;;  %v3349_v57 = vrot.slane %v3347_v11, 4  ;;  %v2879_v32 = vrot.slane %v2877_v17, 4  ;;  %v2882_v50 = vrot.slane %v2880_v10, 5  ;;  %v12488_v47 = vsel %vm10652_vm3, %v8289_v41, %v3347_v11  ;;  %v3240_v29 = vld [vmem:[#allocation2 + $0x138] sm:$0xee] }
 0x1ec   : > { %v6961_v1 = vadd.f32 %v9295_v49, %v11944_v58  ;;  %v9410_v60 = vadd.f32 %v9409_v7, %v9408_v63  ;;  %v8356_v58 = vcombine.high %v12459_v31, %v12474_v35  ;;  %v2746_v63 = vld [vmem:[#allocation2 + $0x1a0] sm:$0x11]  ;;  %v12498_v11 = vsel %vm10646_vm1, %v2860_v24, %v12443_v42  ;;  %v12500_v41 = vld [vmem:[#allocation2 + $0x98] sm:$0xff] }
 0x1ed   : > { %v9297_v12 = vpop.f32.mrf.mxu1  ;;  %v9411_v27 = vpop.f32.mrf.mxu0  ;;  %7708 = vmatmul.mubr.bf16.vlgmr.msra.gmra.mxu0 %v8319_v0  ;;  %v2888_v0 = vrot.slane %v2886_v26, 5  ;;  %v2904_v19 = vshll.u32 %v2747_v2, 16  ;;  %v12504_v7 = vsel %vm10646_vm1, %v2870_v51, %v2874_v16  ;;  %v8290_v42 = vrot.slane %v3240_v29, 9 }
 0x1ee   : > { %v12482_v37 = vadd.f32 %v9407_v56, %v6961_v1  ;;  %v9298_v22 = vadd.f32 %v9297_v12, %v9296_v59  ;;  %7715 = vmatprep.mubr.bf16.mxu0 %v8338_v4  ;;  %v2892_v56 = vrot.slane %v2890_v44, 4  ;;  %v3354_v4 = vrot.slane %v12464_v14, 5 }
 0x1ef   : > { %v9299_v49 = vpop.f32.mrf.mxu1  ;;  %7547 = vmatmul.mubr.bf16.vlgmr.msra.gmra.mxu1 %v13189_v39  ;;  %v9412_v25 = vpop.f32.mrf.mxu0  ;;  %v2901_v12 = vshrl.u32 %v2747_v2, 16  ;;  %v12508_v14 = vsel %vm10652_vm3, %v3349_v57, %v3350_v23  ;;  %v3357_v24 = vrot.slane %v3242_v54, 5  ;;  %v2914_v23 = vshrl.u32 %v12500_v41, 16 }
 0x1f0   : > { %13188 = vst [vmem:[#allocation19_spill] sm:$0xff] %v12482_v37  ;;  %v6964_v17 = vadd.f32 %v9298_v22, %v11975_v40  ;;  %v9413_v10 = vadd.f32 %v9412_v25, %v9411_v27  ;;  %7554 = vmatprep.mubr.bf16.mxu1 %v8336_v36  ;;  %v2883_v40 = vor.u32 %v2882_v50, %v2879_v32  ;;  %v2896_v22 = vshll.u32 %v2746_v63, 16 }
 0x1f1   : > { %v9300_v45 = vpop.f32.mrf.mxu1  ;;  %v9414_v59 = vpop.f32.mrf.mxu0  ;;  %v2893_v1 = vor.u32 %v2892_v56, %v2888_v0  ;;  %v3356_v2 = vrot.slane %v3354_v4, 4  ;;  %v2903_v39 = vrot.slane %v2901_v12, 4  ;;  %v2910_v25 = vshll.u32 %v12500_v41, 16 }
 0x1f2   : > { %v12510_v36 = vadd.f32 %v9410_v60, %v6964_v17  ;;  %v9301_v27 = vadd.f32 %v9300_v45, %v9299_v49  ;;  %v2906_v37 = vrot.slane %v2904_v19, 5  ;;  %v13190_v60 = vcombine.low %v12402_v13, %v12410_v62  ;;  %v2750_v13 = vld [vmem:[#allocation2 + $0x80] sm:$0xff] }
 0x1f3   : > { %v9302_v26 = vpop.f32.mrf.mxu1  ;;  %v9415_v44 = vpop.f32.mrf.mxu0  ;;  %v8355_v50 = vcombine.low %v12459_v31, %v12474_v35  ;;  %v8373_v63 = vcombine.low %v12488_v47, %v12508_v14  ;;  %v8374_v29 = vcombine.high %v12488_v47, %v12508_v14  ;;  %v8371_v54 = vcombine.low %v12498_v11, %v12504_v7 }
 0x1f4   : > { %v6969_v16 = vadd.f32 %v9301_v27, %v11997_v55  ;;  %v9416_v51 = vadd.f32 %v9415_v44, %v9414_v59  ;;  %v2884_v55 = vrot.slane %v2883_v40, 4  ;;  %v2898_v12 = vrot.slane %v2896_v22, 5  ;;  %v3243_v27 = vld [vmem:[#allocation2 + $0x158] sm:$0xee] }
 0x1f5   : > { %v9303_v57 = vpop.f32.mrf.mxu1  ;;  %v9417_v32 = vpop.f32.mrf.mxu0  ;;  %7716 = vmatmul.mubr.bf16.gmra.mxu0 %v13190_v60  ;;  %v13191_v31 = vcombine.low %v12419_v48, %v12423_v38  ;;  %v2894_v17 = vrot.slane %v2893_v1, 4  ;;  %v12533_v19 = vsel %vm10652_vm3, %v8290_v42, %v3354_v4  ;;  %v13192_v40 = vcombine.high %v12437_v28, %v12441_v52  ;;  %v2749_v48 = vld [vmem:[#allocation2 + $0xe8] sm:$0x11] }
 0x1f6   : > { %v12524_v49 = vadd.f32 %v9413_v10, %v6969_v16  ;;  %v9304_v56 = vadd.f32 %v9303_v57, %v9302_v26  ;;  %7723 = vmatprep.mubr.bf16.mxu0 %v8356_v58  ;;  %v12537_v10 = vsel %vm10652_vm3, %v3356_v2, %v3357_v24  ;;  %v2912_v58 = vrot.slane %v2910_v25, 5 }
 0x1f7   : > { %v9305_v62 = vpop.f32.mrf.mxu1  ;;  %7555 = vmatmul.mubr.bf16.gmra.mxu1 %v13191_v31  ;;  %v9418_v35 = vpop.f32.mrf.mxu0  ;;  %v2907_v38 = vor.u32 %v2906_v37, %v2903_v39  ;;  %v2916_v22 = vrot.slane %v2914_v23, 4  ;;  %v8372_v4 = vcombine.high %v12498_v11, %v12504_v7  ;;  %v12547_v42 = vsel %vm10646_vm1, %v2884_v55, %v2888_v0  ;;  %v12555_v39 = vld [vmem:[#allocation2 + $0xa8] sm:$0xff]  ;;  %v2755_v11 = vld [vmem:[#allocation2 + $0xb8] sm:$0x11] }
 0x1f8   : > { %v6972_v45 = vadd.f32 %v9304_v56, %v12028_v21  ;;  %v9419_v59 = vadd.f32 %v9418_v35, %v9417_v32  ;;  %7562 = vmatprep.mubr.bf16.mxu1 %v13192_v40  ;;  %v2925_v24 = vshrl.u32 %v2750_v13, 16  ;;  %v2928_v21 = vshll.u32 %v2750_v13, 16 }
 0x1f9   : > { %v9306_v26 = vpop.f32.mrf.mxu1  ;;  %v9420_v44 = vpop.f32.mrf.mxu0  ;;  %v8392_v37 = vcombine.high %v12533_v19, %v12537_v10  ;;  %v12559_v57 = vsel %vm10646_vm1, %v2894_v17, %v2898_v12  ;;  %v2920_v0 = vshll.u32 %v2749_v48, 16  ;;  %v8291_v32 = vrot.slane %v3243_v27, 9 }
 0x1fa   : > { %v12549_v1 = vadd.f32 %v9416_v51, %v6972_v45  ;;  %v9307_v2 = vadd.f32 %v9306_v26, %v9305_v62  ;;  %v3361_v51 = vrot.slane %v12500_v41, 5  ;;  %v2908_v56 = vrot.slane %v2907_v38, 4  ;;  %v3245_v62 = vld [vmem:[#allocation2 + $0xe8] sm:$0x11] }
 0x1fb   : > { %v9308_v16 = vpop.f32.mrf.mxu1  ;;  %v9421_v23 = vpop.f32.mrf.mxu0  ;;  %v2917_v13 = vor.u32 %v2916_v22, %v2912_v58  ;;  %v2927_v45 = vrot.slane %v2925_v24, 4  ;;  %v2930_v40 = vrot.slane %v2928_v21, 5  ;;  %v2934_v26 = vshll.u32 %v12555_v39, 16  ;;  %v2753_v21 = vld [vmem:[#allocation2] sm:$0xff] }
 0x1fc   : > { %v6977_v60 = vadd.f32 %v9307_v2, %v12050_v61  ;;  %v9422_v55 = vadd.f32 %v9421_v23, %v9420_v44  ;;  %v2938_v12 = vshrl.u32 %v12555_v39, 16  ;;  %v8390_v41 = vcombine.high %v12547_v42, %v12559_v57  ;;  %v12584_v61 = vld [vmem:[#allocation2 + $0x168] sm:$0xff] }
 0x1fd   : > { %v9309_v31 = vpop.f32.mrf.mxu1  ;;  %v9423_v35 = vpop.f32.mrf.mxu0  ;;  %7724 = vmatmul.mubr.bf16.gmra.mxu0 %v8355_v50  ;;  %v13193_v50 = vcombine.low %v12437_v28, %v12441_v52  ;;  %v2922_v27 = vrot.slane %v2920_v0, 5  ;;  %v3363_v44 = vrot.slane %v3361_v51, 4  ;;  %v3364_v24 = vrot.slane %v3245_v62, 5  ;;  %v3246_v28 = vld [vmem:[#allocation2 + $0x80] sm:$0xee] }
 0x1fe   : > { %v12565_v17 = vadd.f32 %v9419_v59, %v6977_v60  ;;  %v9310_v48 = vadd.f32 %v9309_v31, %v9308_v16  ;;  %7731 = vmatprep.mubr.bf16.mxu0 %v8374_v29  ;;  %v3368_v59 = vrot.slane %v12555_v39, 5  ;;  %v12578_v16 = vsel %vm10646_vm1, %v2908_v56, %v2912_v58  ;;  %v3248_v52 = vld [vmem:[#allocation2 + $0x28] sm:$0x11] }
 0x1ff   : > { %v9311_v38 = vpop.f32.mrf.mxu1  ;;  %7563 = vmatmul.mubr.bf16.gmra.mxu1 %v13193_v50  ;;  %v9424_v22 = vpop.f32.mrf.mxu0  ;;  %v12582_v23 = vsel %vm10652_vm3, %v8291_v32, %v3361_v51  ;;  %v2918_v62 = vrot.slane %v2917_v13, 4  ;;  %v2931_v31 = vor.u32 %v2930_v40, %v2927_v45  ;;  %v2936_v39 = vrot.slane %v2934_v26, 5 }
 0x200   : > { %v6980_v29 = vadd.f32 %v9310_v48, %v12081_v5  ;;  %v9425_v2 = vadd.f32 %v9424_v22, %v9423_v35  ;;  %7570 = vmatprep.mubr.bf16.mxu1 %v8372_v4  ;;  %v2940_v50 = vrot.slane %v2938_v12, 4  ;;  %v2752_v35 = vld [vmem:[#allocation2 + $0x28] sm:$0x11]  ;;  %v2949_v58 = vshrl.u32 %v2753_v21, 16 }
 0x201   : > { %v9312_v0 = vpop.f32.mrf.mxu1  ;;  %v9426_v60 = vpop.f32.mrf.mxu0  ;;  %v2952_v56 = vshll.u32 %v2753_v21, 16  ;;  %v12590_v32 = vsel %vm10652_vm3, %v3363_v44, %v3364_v24  ;;  %v8292_v51 = vrot.slane %v3246_v28, 9  ;;  %v3370_v25 = vrot.slane %v3368_v59, 4 }
 0x202   : > { %v12586_v5 = vadd.f32 %v9422_v55, %v6980_v29  ;;  %v9313_v4 = vadd.f32 %v9312_v0, %v9311_v38  ;;  %v3371_v13 = vrot.slane %v3248_v52, 5  ;;  %v2958_v26 = vshll.u32 %v12584_v61, 16 }
 0x203   : > { %v9314_v48 = vpop.f32.mrf.mxu1  ;;  %v9427_v22 = vpop.f32.mrf.mxu0  ;;  %v2962_v55 = vshrl.u32 %v12584_v61, 16  ;;  %v12600_v44 = vsel %vm10646_vm1, %v2918_v62, %v2922_v27  ;;  %v2932_v24 = vrot.slane %v2931_v31, 4  ;;  %v2941_v21 = vor.u32 %v2940_v50, %v2936_v39  ;;  %v2756_v31 = vld [vmem:[#allocation2 + $0x1a8] sm:$0xff] }
 0x204   : > { %v6985_v45 = vadd.f32 %v9313_v4, %v12103_v15  ;;  %v9428_v40 = vadd.f32 %v9427_v22, %v9426_v60  ;;  %v2944_v29 = vshll.u32 %v2752_v35, 16  ;;  %v2951_v52 = vrot.slane %v2949_v58, 4  ;;  %v12633_v22 = vld [vmem:[#allocation2 + $0x140] sm:$0xff] }
 0x205   : > { %v9315_v12 = vpop.f32.mrf.mxu1  ;;  %v9429_v38 = vpop.f32.mrf.mxu0  ;;  %7732 = vmatmul.mubr.bf16.gmra.mxu0 %v8373_v63  ;;  %v2954_v0 = vrot.slane %v2952_v56, 5  ;;  %v8409_v14 = vcombine.low %v12582_v23, %v12590_v32  ;;  %v8410_v63 = vcombine.high %v12582_v23, %v12590_v32  ;;  %v12616_v27 = vsel %vm10652_vm3, %v8292_v51, %v3368_v59 }
 0x206   : > { %v12602_v28 = vadd.f32 %v9425_v2, %v6985_v45  ;;  %v9316_v15 = vadd.f32 %v9315_v12, %v9314_v48  ;;  %7739 = vmatprep.mubr.bf16.mxu0 %v8392_v37  ;;  %v12620_v37 = vsel %vm10652_vm3, %v3370_v25, %v3371_v13  ;;  %v2960_v7 = vrot.slane %v2958_v26, 5 }
 0x207   : > { %v9317_v60 = vpop.f32.mrf.mxu1  ;;  %7571 = vmatmul.mubr.bf16.gmra.mxu1 %v8371_v54  ;;  %v9430_v47 = vpop.f32.mrf.mxu0  ;;  %v2964_v54 = vrot.slane %v2962_v55, 4  ;;  %v8407_v35 = vcombine.low %v12578_v16, %v12600_v44  ;;  %v8408_v59 = vcombine.high %v12578_v16, %v12600_v44  ;;  %v2942_v58 = vrot.slane %v2941_v21, 4  ;;  %v3249_v55 = vld [vmem:[#allocation2] sm:$0xee] }
 0x208   : > { %v6988_v2 = vadd.f32 %v9316_v15, %v12128_v30  ;;  %v9431_v62 = vadd.f32 %v9430_v47, %v9429_v38  ;;  %7578 = vmatprep.mubr.bf16.mxu1 %v8390_v41  ;;  %v2946_v56 = vrot.slane %v2944_v29, 5  ;;  %v12631_v30 = vsel %vm10646_vm1, %v2932_v24, %v2936_v39  ;;  %v3251_v15 = vld [vmem:[#allocation2 + $0xb8] sm:$0x11] }
 0x209   : > { %v9318_v50 = vpop.f32.mrf.mxu1  ;;  %v9432_v4 = vpop.f32.mrf.mxu0  ;;  %v2955_v41 = vor.u32 %v2954_v0, %v2951_v52  ;;  %v8427_v45 = vcombine.low %v12616_v27, %v12620_v37  ;;  %v2968_v26 = vshll.u32 %v2755_v11, 16  ;;  %v2973_v12 = vshrl.u32 %v2756_v31, 16 }
 0x20a   : > { %v12627_v25 = vadd.f32 %v9428_v40, %v6988_v2  ;;  %v9319_v48 = vadd.f32 %v9318_v50, %v9317_v60  ;;  %v2976_v38 = vshll.u32 %v2756_v31, 16  ;;  %v2965_v29 = vor.u32 %v2964_v54, %v2960_v7 }
 0x20b   : > { %v9320_v51 = vpop.f32.mrf.mxu1  ;;  %v9433_v13 = vpop.f32.mrf.mxu0  ;;  %v3375_v39 = vrot.slane %v12584_v61, 5  ;;  %v13194_v0 = vcombine.low %v12533_v19, %v12537_v10  ;;  %v12644_v60 = vsel %vm10646_vm1, %v2942_v58, %v2946_v56  ;;  %v8428_v47 = vcombine.high %v12616_v27, %v12620_v37  ;;  %v3257_v27 = vld [vmem:[#allocation2 + $0x198] sm:$0x11] }
 0x20c   : > { %v6993_v40 = vadd.f32 %v9319_v48, %v12143_v9  ;;  %v9434_v21 = vadd.f32 %v9433_v13, %v9432_v4  ;;  %v2982_v9 = vshll.u32 %v12633_v22, 16  ;;  %v2986_v2 = vshrl.u32 %v12633_v22, 16 }
 0x20d   : > { %v9321_v24 = vpop.f32.mrf.mxu1  ;;  %v9435_v52 = vpop.f32.mrf.mxu0  ;;  %7740 = vmatmul.mubr.bf16.gmra.mxu0 %v13194_v0  ;;  %v2956_v54 = vrot.slane %v2955_v41, 4  ;;  %v8293_v31 = vrot.slane %v3249_v55, 9  ;;  %v13195_v19 = vcombine.low %v12547_v42, %v12559_v57  ;;  %v2970_v4 = vrot.slane %v2968_v26, 5 }
 0x20e   : > { %v12650_v11 = vadd.f32 %v9431_v62, %v6993_v40  ;;  %v9322_v61 = vadd.f32 %v9321_v24, %v9320_v51  ;;  %7747 = vmatprep.mubr.bf16.mxu0 %v8410_v63  ;;  %v3378_v58 = vrot.slane %v3251_v15, 5  ;;  %v2975_v56 = vrot.slane %v2973_v12, 4  ;;  %v2759_v51 = vld [vmem:[#allocation2 + $0xa0] sm:$0xff]  ;;  %v12670_v24 = vld [vmem:[#allocation2 + $0x170] sm:$0xff] }
 0x20f   : > { %v9323_v50 = vpop.f32.mrf.mxu1  ;;  %7579 = vmatmul.mubr.bf16.gmra.mxu1 %v13195_v19  ;;  %v9436_v10 = vpop.f32.mrf.mxu0  ;;  %v2978_v48 = vrot.slane %v2976_v38, 5  ;;  %v2966_v62 = vrot.slane %v2965_v29, 4  ;;  %v3377_v40 = vrot.slane %v3375_v39, 4  ;;  %v8425_v55 = vcombine.low %v12631_v30, %v12644_v60  ;;  %v2758_v38 = vld [vmem:[#allocation2 + $0x50] sm:$0x11] }
 0x210   : > { %v6996_v13 = vadd.f32 %v9322_v61, %v12153_v34  ;;  %v9437_v0 = vadd.f32 %v9436_v10, %v9435_v52  ;;  %7586 = vmatprep.mubr.bf16.mxu1 %v8408_v59  ;;  %v8426_v42 = vcombine.high %v12631_v30, %v12644_v60  ;;  %v2984_v57 = vrot.slane %v2982_v9, 5  ;;  %v3252_v29 = vld [vmem:[#allocation2 + $0x1a8] sm:$0xee]  ;;  %v3254_v9 = vld [vmem:[#allocation2 + $0x50] sm:$0x11] }
 0x211   : > { %v9324_v63 = vpop.f32.mrf.mxu1  ;;  %v9438_v41 = vpop.f32.mrf.mxu0  ;;  %v2988_v26 = vrot.slane %v2986_v2, 4  ;;  %v12664_v34 = vsel %vm10646_vm1, %v2956_v54, %v2960_v7  ;;  %v12668_v59 = vsel %vm10652_vm3, %v8293_v31, %v3375_v39  ;;  %v2979_v19 = vor.u32 %v2978_v48, %v2975_v56 }
 0x212   : > { %v12660_v15 = vadd.f32 %v9434_v21, %v6996_v13  ;;  %v9325_v12 = vadd.f32 %v9324_v63, %v9323_v50  ;;  %v3382_v21 = vrot.slane %v12633_v22, 5  ;;  %v2997_v2 = vshrl.u32 %v2759_v51, 16 }
 0x213   : > { %v9326_v52 = vpop.f32.mrf.mxu1  ;;  %v9439_v61 = vpop.f32.mrf.mxu0  ;;  %v3000_v50 = vshll.u32 %v2759_v51, 16  ;;  %v12676_v54 = vsel %vm10646_vm1, %v2966_v62, %v2970_v4  ;;  %v12680_v39 = vsel %vm10652_vm3, %v3377_v40, %v3378_v58  ;;  %v2989_v22 = vor.u32 %v2988_v26, %v2984_v57  ;;  %v13196_v26 = vld [vmem:[#allocation4_spill] sm:$0xff] }
 0x214   : > { %v7001_v10 = vadd.f32 %v9325_v12, %v12159_v3  ;;  %v9440_v7 = vadd.f32 %v9439_v61, %v9438_v41  ;;  %v2992_v56 = vshll.u32 %v2758_v38, 16  ;;  %v3006_v48 = vshll.u32 %v12670_v24, 16 }
 0x215   : > { %v9327_v31 = vpop.f32.mrf.mxu1  ;;  %v9441_v13 = vpop.f32.mrf.mxu0  ;;  %7748 = vmatmul.mubr.bf16.gmra.mxu0 %v8409_v14  ;;  %v3010_v3 = vshrl.u32 %v12670_v24, 16  ;;  %v8294_v62 = vrot.slane %v3252_v29, 9  ;;  %v3385_v63 = vrot.slane %v3254_v9, 5  ;;  %v2980_v23 = vrot.slane %v2979_v19, 4  ;;  %v2762_v19 = vld [vmem:[#allocation2 + $0xc0] sm:$0xff] }
 0x216   : > { %v12687_v51 = vadd.f32 %v9437_v0, %v7001_v10  ;;  %v9328_v4 = vadd.f32 %v9327_v31, %v9326_v52  ;;  %7755 = vmatprep.mubr.bf16.mxu0 %v8428_v47  ;;  %v3384_v32 = vrot.slane %v3382_v21, 4  ;;  %v2999_v14 = vrot.slane %v2997_v2, 4  ;;  %v2761_v10 = vld [vmem:[#allocation2 + $0x198] sm:$0x11] }
 0x217   : > { %v9329_v58 = vpop.f32.mrf.mxu1  ;;  %7587 = vmatmul.mubr.bf16.gmra.mxu1 %v8407_v35  ;;  %v9442_v40 = vpop.f32.mrf.mxu0  ;;  %v3002_v41 = vrot.slane %v3000_v50, 5  ;;  %v8446_v47 = vcombine.high %v12668_v59, %v12680_v39  ;;  %v2990_v61 = vrot.slane %v2989_v22, 4  ;;  %v2994_v16 = vrot.slane %v2992_v56, 5 }
 0x218   : > { %v7004_v12 = vadd.f32 %v9328_v4, %v13196_v26  ;;  %v9443_v38 = vadd.f32 %v9442_v40, %v9441_v13  ;;  %7594 = vmatprep.mubr.bf16.mxu1 %v8426_v42  ;;  %v3008_v44 = vrot.slane %v3006_v48, 5  ;;  %v3012_v35 = vrot.slane %v3010_v3, 4  ;;  %v13197_v48 = vld [vmem:[#allocation5_spill] sm:$0xff]  ;;  %v3255_v40 = vld [vmem:[#allocation2 + $0xa0] sm:$0xee]  ;;  %v12716_v26 = vld [vmem:[#allocation2 + $0x190] sm:$0xff] }
 0x219   : > { %v9330_v29 = vpop.f32.mrf.mxu1  ;;  %v9444_v52 = vpop.f32.mrf.mxu0  ;;  %v8444_v42 = vcombine.high %v12664_v34, %v12676_v54  ;;  %v12705_v4 = vsel %vm10646_vm1, %v2980_v23, %v2984_v57  ;;  %v12709_v22 = vsel %vm10652_vm3, %v8294_v62, %v3382_v21  ;;  %v3003_v56 = vor.u32 %v3002_v41, %v2999_v14 }
 0x21a   : > { %v12697_v9 = vadd.f32 %v9440_v7, %v7004_v12  ;;  %v9331_v2 = vadd.f32 %v9330_v29, %v9329_v58  ;;  %v12713_v7 = vsel %vm10652_vm3, %v3384_v32, %v3385_v63  ;;  %v3021_v12 = vshrl.u32 %v2762_v19, 16 }
 0x21b   : > { %v9332_v31 = vpop.f32.mrf.mxu1  ;;  %v9445_v13 = vpop.f32.mrf.mxu0  ;;  %v3024_v29 = vshll.u32 %v2762_v19, 16  ;;  %v12723_v21 = vsel %vm10646_vm1, %v2990_v61, %v2994_v16  ;;  %v3013_v62 = vor.u32 %v3012_v35, %v3008_v44  ;;  %v3016_v63 = vshll.u32 %v2761_v10, 16 }
 0x21c   : > { %v7009_v3 = vadd.f32 %v9331_v2, %v13197_v48  ;;  %v9446_v58 = vadd.f32 %v9445_v13, %v9444_v52  ;;  %v3389_v23 = vrot.slane %v12670_v24, 5  ;;  %v8464_v52 = vcombine.high %v12709_v22, %v12713_v7 }
 0x21d   : > { %v9333_v50 = vpop.f32.mrf.mxu1  ;;  %v9447_v57 = vpop.f32.mrf.mxu0  ;;  %7756 = vmatmul.mubr.bf16.gmra.mxu0 %v8427_v45  ;;  %v3004_v61 = vrot.slane %v3003_v56, 4  ;;  %v8295_v16 = vrot.slane %v3255_v40, 9  ;;  %v3030_v24 = vshll.u32 %v12716_v26, 16  ;;  %v3023_v2 = vrot.slane %v3021_v12, 4  ;;  %v3260_v56 = vld [vmem:[#allocation2 + $0xc8] sm:$0x11] }
 0x21e   : > { %v12726_v32 = vadd.f32 %v9443_v38, %v7009_v3  ;;  %v9334_v14 = vadd.f32 %v9333_v50, %v9332_v31  ;;  %7763 = vmatprep.mubr.bf16.mxu0 %v8446_v47  ;;  %v3034_v38 = vshrl.u32 %v12716_v26, 16  ;;  %v13199_v47 = vld [vmem:[#allocation6_spill] sm:$0xff]  ;;  %v3026_v50 = vrot.slane %v3024_v29, 5 }
 0x21f   : > { %v9335_v37 = vpop.f32.mrf.mxu1  ;;  %7595 = vmatmul.mubr.bf16.gmra.mxu1 %v8425_v55  ;;  %v9448_v45 = vpop.f32.mrf.mxu0  ;;  %v3014_v13 = vrot.slane %v3013_v62, 4  ;;  %v3018_v48 = vrot.slane %v3016_v63, 5  ;;  %v3391_v3 = vrot.slane %v3389_v23, 4  ;;  %v3392_v30 = vrot.slane %v3257_v27, 5  ;;  %v12752_v27 = vld [vmem:[#allocation2 + $0x150] sm:$0xff] }
 0x220   : > { %13198 = vst [vmem:[#allocation4_spill] sm:$0xff] %v12726_v32  ;;  %v7012_v35 = vadd.f32 %v9334_v14, %v13199_v47  ;;  %v9449_v19 = vadd.f32 %v9448_v45, %v9447_v57  ;;  %7602 = vmatprep.mubr.bf16.mxu1 %v8444_v42  ;;  %v8462_v40 = vcombine.high %v12705_v4, %v12723_v21  ;;  %v2765_v14 = vld [vmem:[#allocation2 + $0xf0] sm:$0xff]  ;;  %v3032_v62 = vrot.slane %v3030_v24, 5 }
 0x221   : > { %v9336_v10 = vpop.f32.mrf.mxu1  ;;  %v9450_v31 = vpop.f32.mrf.mxu0  ;;  %v12746_v12 = vsel %vm10646_vm1, %v3004_v61, %v3008_v44  ;;  %v12750_v29 = vsel %vm10652_vm3, %v8295_v16, %v3389_v23  ;;  %v3036_v63 = vrot.slane %v3034_v38, 4  ;;  %v3396_v41 = vrot.slane %v12716_v26, 5 }
 0x222   : > { %v12738_v60 = vadd.f32 %v9446_v58, %v7012_v35  ;;  %v9337_v55 = vadd.f32 %v9336_v10, %v9335_v37  ;;  %v2764_v58 = vld [vmem:[#allocation2 + $0xc8] sm:$0x11]  ;;  %v3027_v35 = vor.u32 %v3026_v50, %v3023_v2  ;;  %v3258_v10 = vld [vmem:[#allocation2 + $0xc0] sm:$0xee]  ;;  %v13202_v61 = vcombine.low %v12668_v59, %v12680_v39 }
 0x223   : > { %v9338_v57 = vpop.f32.mrf.mxu1  ;;  %v9451_v42 = vpop.f32.mrf.mxu0  ;;  %v13201_v37 = vld [vmem:[#allocation7_spill] sm:$0xff]  ;;  %v12761_v23 = vsel %vm10646_vm1, %v3014_v13, %v3018_v48  ;;  %v12765_v16 = vsel %vm10652_vm3, %v3391_v3, %v3392_v30  ;;  %v3045_v24 = vshrl.u32 %v2765_v14, 16  ;;  %v3048_v38 = vshll.u32 %v2765_v14, 16 }
 0x224   : > { %13200 = vst [vmem:[#allocation5_spill] sm:$0xff] %v12738_v60  ;;  %v7017_v45 = vadd.f32 %v9337_v55, %v13201_v37  ;;  %v9452_v47 = vadd.f32 %v9451_v42, %v9450_v31  ;;  %v3054_v26 = vshll.u32 %v12752_v27, 16  ;;  %v3058_v31 = vshrl.u32 %v12752_v27, 16  ;;  %v13205_v42 = vld [vmem:[#allocation8_spill] sm:$0xff] }
 0x225   : > { %v9339_v0 = vpop.f32.mrf.mxu1  ;;  %v9453_v44 = vpop.f32.mrf.mxu0  ;;  %7764 = vmatmul.mubr.bf16.gmra.mxu0 %v13202_v61  ;;  %v13204_v39 = vcombine.low %v12664_v34, %v12676_v54  ;;  %v3037_v48 = vor.u32 %v3036_v63, %v3032_v62  ;;  %v3040_v55 = vshll.u32 %v2764_v58, 16  ;;  %v8296_v3 = vrot.slane %v3258_v10, 9 }
 0x226   : > { %v12767_v2 = vadd.f32 %v9449_v19, %v7017_v45  ;;  %v9340_v50 = vadd.f32 %v9339_v0, %v9338_v57  ;;  %7771 = vmatprep.mubr.bf16.mxu0 %v8464_v52  ;;  %v3399_v30 = vrot.slane %v3260_v56, 5  ;;  %v3028_v0 = vrot.slane %v3027_v35, 4 }
 0x227   : > { %v9341_v59 = vpop.f32.mrf.mxu1  ;;  %7603 = vmatmul.mubr.bf16.gmra.mxu1 %v13204_v39  ;;  %v9454_v13 = vpop.f32.mrf.mxu0  ;;  %v3398_v52 = vrot.slane %v3396_v41, 4  ;;  %v8482_v34 = vcombine.high %v12750_v29, %v12765_v16  ;;  %v3047_v54 = vrot.slane %v3045_v24, 4  ;;  %v3050_v61 = vrot.slane %v3048_v38, 5  ;;  %v2767_v24 = vld [vmem:[#allocation2 + $0x30] sm:$0x11]  ;;  %v13207_v38 = vld [vmem:[#allocation9_spill] sm:$0xff] }
 0x228   : > { %13203 = vst [vmem:[#allocation6_spill] sm:$0xff] %v12767_v2  ;;  %v7020_v14 = vadd.f32 %v9340_v50, %v13205_v42  ;;  %v9455_v19 = vadd.f32 %v9454_v13, %v9453_v44  ;;  %7610 = vmatprep.mubr.bf16.mxu1 %v8462_v40  ;;  %v12781_v56 = vrot.slane %v3054_v26, 5  ;;  %v3060_v10 = vrot.slane %v3058_v31, 4  ;;  %v2768_v44 = vld [vmem:[#allocation2 + $0xf8] sm:$0xff] }
 0x229   : > { %v9342_v57 = vpop.f32.mrf.mxu1  ;;  %v9456_v37 = vpop.f32.mrf.mxu0  ;;  %v8480_v50 = vcombine.high %v12746_v12, %v12761_v23  ;;  %v3038_v39 = vrot.slane %v3037_v48, 4  ;;  %v3042_v13 = vrot.slane %v3040_v55, 5  ;;  %v12787_v42 = vsel %vm10652_vm3, %v8296_v3, %v3396_v41 }
 0x22a   : > { %v12779_v63 = vadd.f32 %v9452_v47, %v7020_v14  ;;  %v9343_v58 = vadd.f32 %v9342_v57, %v9341_v59  ;;  %v12792_v26 = vsel %vm10646_vm1, %v3028_v0, %v3032_v62  ;;  %v12796_v31 = vsel %vm10652_vm3, %v3398_v52, %v3399_v30  ;;  %v3261_v59 = vld [vmem:[#allocation2 + $0xf0] sm:$0xee]  ;;  %v12798_v57 = vld [vmem:[#allocation2 + $0x18] sm:$0xff] }
 0x22b   : > { %v9344_v40 = vpop.f32.mrf.mxu1  ;;  %v9457_v35 = vpop.f32.mrf.mxu0  ;;  %v13208_v41 = vcombine.low %v12709_v22, %v12713_v7  ;;  %v3051_v3 = vor.u32 %v3050_v61, %v3047_v54  ;;  %v3072_v62 = vshll.u32 %v2768_v44, 16  ;;  %v3061_v30 = vor.u32 %v3060_v10, %v12781_v56  ;;  %v13211_v54 = vld [vmem:[#allocation10_spill] sm:$0xff] }
 0x22c   : > { %13206 = vst [vmem:[#allocation7_spill] sm:$0xff] %v12779_v63  ;;  %v7025_v47 = vadd.f32 %v9343_v58, %v13207_v38  ;;  %v9458_v14 = vadd.f32 %v9457_v35, %v9456_v37  ;;  %v3263_v58 = vld [vmem:[#allocation2 + $0x30] sm:$0x11]  ;;  %v3403_v37 = vrot.slane %v12752_v27, 5  ;;  %v3069_v35 = vshrl.u32 %v2768_v44, 16 }
 0x22d   : > { %v9345_v48 = vpop.f32.mrf.mxu1  ;;  %v9587_v55 = vpop.f32.mrf.mxu0  ;;  %7772 = vmatmul.mubr.bf16.gmra.mxu0 %v13208_v41  ;;  %v3064_v52 = vshll.u32 %v2767_v24, 16  ;;  %v13210_v63 = vcombine.low %v12705_v4, %v12723_v21  ;;  %v12812_v7 = vsel %vm10646_vm1, %v3038_v39, %v3042_v13  ;;  %v8500_v27 = vcombine.high %v12787_v42, %v12796_v31 }
 0x22e   : > { %v12804_v0 = vadd.f32 %v9455_v19, %v7025_v47  ;;  %v9346_v38 = vadd.f32 %v9345_v48, %v9344_v40  ;;  %7779 = vmatprep.mubr.bf16.mxu0 %v8482_v34  ;;  %v3078_v19 = vshll.u32 %v12798_v57, 16  ;;  %v3082_v34 = vshrl.u32 %v12798_v57, 16 }
 0x22f   : > { %v9475_v45 = vpop.f32.mrf.mxu1  ;;  %7611 = vmatmul.mubr.bf16.gmra.mxu1 %v13210_v63  ;;  %v9588_v22 = vpop.f32.mrf.mxu0  ;;  %v8297_v44 = vrot.slane %v3261_v59, 9  ;;  %v3406_v40 = vrot.slane %v3263_v58, 5  ;;  %v3052_v63 = vrot.slane %v3051_v3, 4  ;;  %v3405_v24 = vrot.slane %v3403_v37, 4  ;;  %v13213_v3 = vld [vmem:[#allocation11_spill] sm:$0xff] }
 0x230   : > { %13209 = vst [vmem:[#allocation8_spill] sm:$0xff] %v12804_v0  ;;  %v7028_v61 = vadd.f32 %v9346_v38, %v13211_v54  ;;  %v9589_v10 = vadd.f32 %v9588_v22, %v9587_v55  ;;  %7618 = vmatprep.mubr.bf16.mxu1 %v8480_v50  ;;  %v3071_v47 = vrot.slane %v3069_v35, 4  ;;  %v3074_v39 = vrot.slane %v3072_v62, 5  ;;  %v2770_v62 = vld [vmem:[#allocation2 + $0x8] sm:$0x11] }
 0x231   : > { %v9476_v4 = vpop.f32.mrf.mxu1  ;;  %v9590_v21 = vpop.f32.mrf.mxu0  ;;  %v3062_v41 = vrot.slane %v3061_v30, 4  ;;  %v3066_v0 = vrot.slane %v3064_v52, 5  ;;  %v8479_v38 = vcombine.low %v12746_v12, %v12761_v23  ;;  %v8499_v50 = vcombine.low %v12787_v42, %v12796_v31  ;;  %v2771_v30 = vld [vmem:[#allocation2 + $0x60] sm:$0xff] }
 0x232   : > { %v12819_v13 = vadd.f32 %v9458_v14, %v7028_v61  ;;  %v9477_v48 = vadd.f32 %v9476_v4, %v9475_v45  ;;  %v12825_v59 = vrot.slane %v3078_v19, 5  ;;  %v3084_v55 = vrot.slane %v3082_v34, 4  ;;  %v12848_v19 = vld [vmem:[#allocation2 + $0x70] sm:$0xff]  ;;  %v3266_v4 = vld [vmem:[#allocation2 + $0x8] sm:$0x11] }
 0x233   : > { %v9478_v2 = vpop.f32.mrf.mxu1  ;;  %v9591_v60 = vpop.f32.mrf.mxu0  ;;  %v8498_v45 = vcombine.high %v12792_v26, %v12812_v7  ;;  %v13214_v12 = vcombine.low %v12750_v29, %v12765_v16  ;;  %v12838_v23 = vsel %vm10646_vm1, %v3052_v63, %v12781_v56  ;;  %v12846_v42 = vsel %vm10652_vm3, %v3405_v24, %v3406_v40  ;;  %v3264_v56 = vld [vmem:[#allocation2 + $0xf8] sm:$0xee] }
 0x234   : > { %13212 = vst [vmem:[#allocation9_spill] sm:$0xff] %v12819_v13  ;;  %v7227_v58 = vadd.f32 %v9477_v48, %v13213_v3  ;;  %v9592_v35 = vadd.f32 %v9591_v60, %v9590_v21  ;;  %v12842_v60 = vsel %vm10652_vm3, %v8297_v44, %v3403_v37  ;;  %v3075_v31 = vor.u32 %v3074_v39, %v3071_v47 }
 0x235   : > { %v9479_v52 = vpop.f32.mrf.mxu1  ;;  %v9593_v22 = vpop.f32.mrf.mxu0  ;;  %7780 = vmatmul.mubr.bf16.gmra.mxu0 %v13214_v12  ;;  %v12854_v16 = vsel %vm10646_vm1, %v3062_v41, %v3066_v0  ;;  %v3410_v54 = vrot.slane %v12798_v57, 5  ;;  %v3085_v44 = vor.u32 %v3084_v55, %v12825_v59  ;;  %v3088_v40 = vshll.u32 %v2770_v62, 16  ;;  %v2773_v12 = vld [vmem:[#allocation2 + $0x68] sm:$0x11] }
 0x236   : > { %v12850_v34 = vadd.f32 %v9589_v10, %v7227_v58  ;;  %v9480_v29 = vadd.f32 %v9479_v52, %v9478_v2  ;;  %7787 = vmatprep.mubr.bf16.mxu0 %v8500_v27  ;;  %v3093_v21 = vshrl.u32 %v2771_v30, 16  ;;  %v3096_v63 = vshll.u32 %v2771_v30, 16  ;;  %v13216_v10 = vld [vmem:[#allocation12_spill] sm:$0xff] }
 0x237   : > { %v9481_v37 = vpop.f32.mrf.mxu1  ;;  %7619 = vmatmul.mubr.bf16.gmra.mxu1 %v8479_v38  ;;  %v9594_v61 = vpop.f32.mrf.mxu0  ;;  %v3102_v27 = vshll.u32 %v12848_v19, 16  ;;  %v3106_v0 = vshrl.u32 %v12848_v19, 16  ;;  %v8516_v57 = vcombine.high %v12838_v23, %v12854_v16  ;;  %v8518_v48 = vcombine.high %v12842_v60, %v12846_v42 }
 0x238   : > { %13215 = vst [vmem:[#allocation10_spill] sm:$0xff] %v12850_v34  ;;  %v7230_v24 = vadd.f32 %v9480_v29, %v13216_v10  ;;  %v9595_v2 = vadd.f32 %v9594_v61, %v9593_v22  ;;  %7626 = vmatprep.mubr.bf16.mxu1 %v8498_v45  ;;  %v3076_v41 = vrot.slane %v3075_v31, 4  ;;  %v8298_v38 = vrot.slane %v3264_v56, 9  ;;  %v13217_v10 = vld [vmem:[#allocation13_spill] sm:$0xff] }
 0x239   : > { %v9482_v47 = vpop.f32.mrf.mxu1  ;;  %v9596_v39 = vpop.f32.mrf.mxu0  ;;  %v3412_v58 = vrot.slane %v3410_v54, 4  ;;  %v3413_v62 = vrot.slane %v3266_v4, 5  ;;  %v3086_v52 = vrot.slane %v3085_v44, 4  ;;  %v3090_v22 = vrot.slane %v3088_v40, 5  ;;  %v2774_v31 = vld [vmem:[#allocation2 + $0x38] sm:$0xff] }
 0x23a   : > { %v12865_v55 = vadd.f32 %v9592_v35, %v7230_v24  ;;  %v9483_v3 = vadd.f32 %v9482_v47, %v9481_v37  ;;  %v3095_v29 = vrot.slane %v3093_v21, 4  ;;  %v3098_v61 = vrot.slane %v3096_v63, 5 }
 0x23b   : > { %v9484_v45 = vpop.f32.mrf.mxu1  ;;  %v9597_v30 = vpop.f32.mrf.mxu0  ;;  %v12868_v13 = vrot.slane %v3102_v27, 5  ;;  %v3108_v32 = vrot.slane %v3106_v0, 4  ;;  %v8515_v37 = vcombine.low %v12838_v23, %v12854_v16  ;;  %v8517_v44 = vcombine.low %v12842_v60, %v12846_v42  ;;  %v3267_v16 = vld [vmem:[#allocation2 + $0x60] sm:$0xee] }
 0x23c   : > { %v7235_v14 = vadd.f32 %v9483_v3, %v13217_v10  ;;  %v9598_v34 = vadd.f32 %v9597_v30, %v9596_v39  ;;  %v12877_v40 = vsel %vm10646_vm1, %v3076_v41, %v12825_v59  ;;  %v12881_v4 = vsel %vm10652_vm3, %v8298_v38, %v3410_v54  ;;  %v12889_v60 = vld [vmem:[#allocation2 + $0x20] sm:$0xff]  ;;  %v3269_v41 = vld [vmem:[#allocation2 + $0x68] sm:$0x11] }
 0x23d   : > { %v9485_v56 = vpop.f32.mrf.mxu1  ;;  %v9599_v35 = vpop.f32.mrf.mxu0  ;;  %7788 = vmatmul.mubr.bf16.gmra.mxu0 %v8499_v50  ;;  %v12887_v50 = vsel %vm10652_vm3, %v3412_v58, %v3413_v62  ;;  %v3112_v23 = vshll.u32 %v2773_v12, 16  ;;  %v13218_v59 = vcombine.low %v12792_v26, %v12812_v7  ;;  %v3099_v54 = vor.u32 %v3098_v61, %v3095_v29  ;;  %v13219_v0 = vld [vmem:[#allocation14_spill] sm:$0xff] }
 0x23e   : > { %v12883_v21 = vadd.f32 %v9595_v2, %v7235_v14  ;;  %v9486_v63 = vadd.f32 %v9485_v56, %v9484_v45  ;;  %7795 = vmatprep.mubr.bf16.mxu0 %v8518_v48  ;;  %v12896_v14 = vsel %vm10646_vm1, %v3086_v52, %v3090_v22  ;;  %v3417_v2 = vrot.slane %v12848_v19, 5 }
 0x23f   : > { %v9487_v42 = vpop.f32.mrf.mxu1  ;;  %7627 = vmatmul.mubr.bf16.gmra.mxu1 %v13218_v59  ;;  %v9600_v24 = vpop.f32.mrf.mxu0  ;;  %v3117_v27 = vshrl.u32 %v2774_v31, 16  ;;  %v3109_v48 = vor.u32 %v3108_v32, %v12868_v13  ;;  %v3120_v38 = vshll.u32 %v2774_v31, 16  ;;  %v8536_v7 = vcombine.high %v12881_v4, %v12887_v50  ;;  %v13220_v31 = vld [vmem:[#allocation15_spill] sm:$0xff] }
 0x240   : > { %v7238_v47 = vadd.f32 %v9486_v63, %v13219_v0  ;;  %v9601_v39 = vadd.f32 %v9600_v24, %v9599_v35  ;;  %7634 = vmatprep.mubr.bf16.mxu1 %v8516_v57  ;;  %v8299_v58 = vrot.slane %v3267_v16, 9  ;;  %v3126_v62 = vshll.u32 %v12889_v60, 16 }
 0x241   : > { %v9488_v3 = vpop.f32.mrf.mxu1  ;;  %v9602_v26 = vpop.f32.mrf.mxu0  ;;  %v3130_v45 = vshrl.u32 %v12889_v60, 16  ;;  %v8534_v57 = vcombine.high %v12877_v40, %v12896_v14  ;;  %v3114_v52 = vrot.slane %v3112_v23, 5  ;;  %v3100_v12 = vrot.slane %v3099_v54, 4 }
 0x242   : > { %v12905_v19 = vadd.f32 %v9598_v34, %v7238_v47  ;;  %v9489_v30 = vadd.f32 %v9488_v3, %v9487_v42  ;;  %v3419_v29 = vrot.slane %v3417_v2, 4  ;;  %v3420_v61 = vrot.slane %v3269_v41, 5  ;;  %v2776_v47 = vld [vmem:[#allocation2 + $0x88] sm:$0x11] }
 0x243   : > { %v9490_v32 = vpop.f32.mrf.mxu1  ;;  %v9603_v22 = vpop.f32.mrf.mxu0  ;;  %v3119_v10 = vrot.slane %v3117_v27, 4  ;;  %v3110_v63 = vrot.slane %v3109_v48, 4  ;;  %v3122_v16 = vrot.slane %v3120_v38, 5  ;;  %v12910_v34 = vrot.slane %v3126_v62, 5 }
 0x244   : > { %v7243_v56 = vadd.f32 %v9489_v30, %v13220_v31  ;;  %v9604_v35 = vadd.f32 %v9603_v22, %v9602_v26  ;;  %v3132_v42 = vrot.slane %v3130_v45, 4  ;;  %v8535_v54 = vcombine.low %v12881_v4, %v12887_v50  ;;  %v13221_v50 = vld [vmem:[#allocation16_spill] sm:$0xff]  ;;  %v3270_v26 = vld [vmem:[#allocation2 + $0x38] sm:$0xee] }
 0x245   : > { %v9491_v59 = vpop.f32.mrf.mxu1  ;;  %v9605_v24 = vpop.f32.mrf.mxu0  ;;  %7796 = vmatmul.mubr.bf16.gmra.mxu0 %v8517_v44  ;;  %v12919_v48 = vsel %vm10646_vm1, %v3100_v12, %v12868_v13  ;;  %v12923_v44 = vsel %vm10652_vm3, %v8299_v58, %v3417_v2  ;;  %v3424_v4 = vrot.slane %v12889_v60, 5  ;;  %v3123_v13 = vor.u32 %v3122_v16, %v3119_v10  ;;  %v12936_v30 = vld [vmem:[#allocation2 + $0xb0] sm:$0xff] }
 0x246   : > { %v12912_v0 = vadd.f32 %v9601_v39, %v7243_v56  ;;  %v9492_v23 = vadd.f32 %v9491_v59, %v9490_v32  ;;  %7803 = vmatprep.mubr.bf16.mxu0 %v8536_v7  ;;  %v12927_v39 = vsel %vm10652_vm3, %v3419_v29, %v3420_v61  ;;  %v3272_v7 = vld [vmem:[#allocation2 + $0x88] sm:$0x11]  ;;  %v3133_v58 = vor.u32 %v3132_v42, %v12910_v34 }
 0x247   : > { %v9493_v27 = vpop.f32.mrf.mxu1  ;;  %7635 = vmatmul.mubr.bf16.gmra.mxu1 %v8515_v37  ;;  %v9606_v41 = vpop.f32.mrf.mxu0  ;;  %v12933_v37 = vsel %vm10646_vm1, %v3110_v63, %v3114_v52  ;;  %v3136_v45 = vshll.u32 %v2776_v47, 16  ;;  %v3141_v60 = vshrl.u32 %v12936_v30, 16  ;;  %v3144_v32 = vshll.u32 %v12936_v30, 16  ;;  %v13222_v63 = vld [vmem:[#allocation17_spill] sm:$0xff] }
 0x248   : > { %v7246_v38 = vadd.f32 %v9492_v23, %v13221_v50  ;;  %v9607_v3 = vadd.f32 %v9606_v41, %v9605_v24  ;;  %7642 = vmatprep.mubr.bf16.mxu1 %v8534_v57  ;;  %v8554_v52 = vcombine.high %v12923_v44, %v12927_v39  ;;  %v8533_v61 = vcombine.low %v12877_v40, %v12896_v14  ;;  %v2779_v14 = vld [vmem:[#allocation2 + $0x188] sm:$0x11] }
 0x249   : > { %v9494_v62 = vpop.f32.mrf.mxu1  ;;  %v9608_v2 = vpop.f32.mrf.mxu0  ;;  %v8300_v10 = vrot.slane %v3270_v26, 9  ;;  %v3426_v31 = vrot.slane %v3424_v4, 4  ;;  %v3427_v56 = vrot.slane %v3272_v7, 5  ;;  %v8552_v24 = vcombine.high %v12919_v48, %v12933_v37 }
 0x24a   : > { %v12940_v22 = vadd.f32 %v9604_v35, %v7246_v38  ;;  %v9495_v57 = vadd.f32 %v9494_v62, %v9493_v27  ;;  %v3124_v35 = vrot.slane %v3123_v13, 4  ;;  %v3134_v47 = vrot.slane %v3133_v58, 4 }
 0x24b   : > { %v9496_v12 = vpop.f32.mrf.mxu1  ;;  %v9609_v29 = vpop.f32.mrf.mxu0  ;;  %v3138_v27 = vrot.slane %v3136_v45, 5  ;;  %v3143_v41 = vrot.slane %v3141_v60, 4  ;;  %v3146_v50 = vrot.slane %v3144_v32, 5  ;;  %v3425_v62 = vsel %vm10652_vm3, %v8300_v10, %v3424_v4  ;;  %v3273_v32 = vld [vmem:[#allocation2 + $0xe0] sm:$0xee] }
 0x24c   : > { %v7251_v16 = vadd.f32 %v9495_v57, %v13222_v63  ;;  %v9610_v59 = vadd.f32 %v9609_v29, %v9608_v2  ;;  %v3428_v13 = vsel %vm10652_vm3, %v3426_v31, %v3427_v56  ;;  %v13223_v2 = vld [vmem:[#allocation18_spill] sm:$0xff]  ;;  %v3129_v60 = vsel %vm10646_vm1, %v3124_v35, %v12910_v34  ;;  %v3275_v57 = vld [vmem:[#allocation2 + $0x188] sm:$0x11] }
 0x24d   : > { %v9497_v42 = vpop.f32.mrf.mxu1  ;;  %v9611_v23 = vpop.f32.mrf.mxu0  ;;  %7804 = vmatmul.mubr.bf16.gmra.mxu0 %v8535_v54  ;;  %v3431_v54 = vrot.slane %v12936_v30, 5  ;;  %v3147_v29 = vor.u32 %v3146_v50, %v3143_v41  ;;  %v3160_v30 = vshll.u32 %v2779_v14, 16  ;;  %v8572_v31 = vcombine.high %v3425_v62, %v3428_v13 }
 0x24e   : > { %v12949_v38 = vadd.f32 %v9607_v3, %v7251_v16  ;;  %v9498_v40 = vadd.f32 %v9497_v42, %v9496_v12  ;;  %7811 = vmatprep.mubr.bf16.mxu0 %v8554_v52  ;;  %v8553_v3 = vcombine.low %v12923_v44, %v12927_v39  ;;  %v3139_v12 = vsel %vm10646_vm1, %v3134_v47, %v3138_v27 }
 0x24f   : > { %v9499_v26 = vpop.f32.mrf.mxu1  ;;  %7643 = vmatmul.mubr.bf16.gmra.mxu1 %v8533_v61  ;;  %v9612_v7 = vpop.f32.mrf.mxu0  ;;  %v8551_v44 = vcombine.low %v12919_v48, %v12933_v37  ;;  %v8301_v39 = vrot.slane %v3273_v32, 9  ;;  %v3433_v34 = vrot.slane %v3431_v54, 4  ;;  %v3434_v16 = vrot.slane %v3275_v57, 5 }
 0x250   : > { %v7254_v58 = vadd.f32 %v9498_v40, %v13223_v2  ;;  %v9613_v45 = vadd.f32 %v9612_v7, %v9611_v23  ;;  %7650 = vmatprep.mubr.bf16.mxu1 %v8552_v24  ;;  %v8570_v42 = vcombine.high %v3129_v60, %v3139_v12  ;;  %v3148_v27 = vrot.slane %v3147_v29, 4 }
 0x251   : > { %v9500_v52 = vpop.f32.mrf.mxu1  ;;  %v9614_v4 = vpop.f32.mrf.mxu0  ;;  %v3432_v48 = vsel %vm10652_vm3, %v8301_v39, %v3431_v54  ;;  %v8569_v29 = vcombine.low %v3129_v60, %v3139_v12 }
 0x252   : > { %v12964_v61 = vadd.f32 %v9610_v59, %v7254_v58  ;;  %v9501_v10 = vadd.f32 %v9500_v52, %v9499_v26  ;;  %v3162_v59 = vrot.slane %v3160_v30, 5 }
 0x253   : > { %v9502_v56 = vpop.f32.mrf.mxu1  ;;  %v9615_v63 = vpop.f32.mrf.mxu0 }
 0x254   : > { %v7259_v24 = vadd.f32 %v9501_v10, %v12349_v53  ;;  %v9616_v35 = vadd.f32 %v9615_v63, %v9614_v4  ;;  %v3435_v53 = vsel %vm10652_vm3, %v3433_v34, %v3434_v16  ;;  %v3163_v32 = vsel %vm10646_vm1, %v3148_v27, %v3162_v59 }
 0x255   : > { %v9503_v23 = vpop.f32.mrf.mxu1  ;;  %v9617_v47 = vpop.f32.mrf.mxu0  ;;  %7812 = vmatmul.mubr.bf16.gmra.mxu0 %v8553_v3  ;;  %v8571_v3 = vcombine.low %v3425_v62, %v3428_v13  ;;  %v8590_v54 = vcombine.high %v3432_v48, %v3435_v53  ;;  %v8589_v12 = vcombine.low %v3432_v48, %v3435_v53 }
 0x256   : > { %v12969_v41 = vadd.f32 %v9613_v45, %v7259_v24  ;;  %v9504_v40 = vadd.f32 %v9503_v23, %v9502_v56  ;;  %7819 = vmatprep.mubr.bf16.mxu0 %v8572_v31  ;;  %v3153_v45 = vsel %vm10646_vm1, %v3148_v27, %v3146_v50 }
 0x257   : > { %v9505_v14 = vpop.f32.mrf.mxu1  ;;  %7651 = vmatmul.mubr.bf16.gmra.mxu1 %v8551_v44  ;;  %v9618_v26 = vpop.f32.mrf.mxu0  ;;  %v8588_v10 = vcombine.high %v3153_v45, %v3163_v32 }
 0x258   : > { %v7262_v37 = vadd.f32 %v9504_v40, %v12374_v8  ;;  %v9619_v7 = vadd.f32 %v9618_v26, %v9617_v47  ;;  %7658 = vmatprep.mubr.bf16.mxu1 %v8570_v42 }
 0x259   : > { %v9506_v2 = vpop.f32.mrf.mxu1  ;;  %v9620_v58 = vpop.f32.mrf.mxu0 }
 0x25a   : > { %v12980_v57 = vadd.f32 %v9616_v35, %v7262_v37  ;;  %v9507_v52 = vadd.f32 %v9506_v2, %v9505_v14  ;;  %v8587_v35 = vcombine.low %v3153_v45, %v3163_v32 }
 0x25b   : > { %v9508_v4 = vpop.f32.mrf.mxu1  ;;  %v9621_v46 = vpop.f32.mrf.mxu0 }
 0x25c   : > { %v7267_v8 = vadd.f32 %v9507_v52, %v12388_v33  ;;  %v9622_v30 = vadd.f32 %v9621_v46, %v9620_v58 }
 0x25d   : > { %v9509_v31 = vpop.f32.mrf.mxu1  ;;  %v9623_v56 = vpop.f32.mrf.mxu0  ;;  %7820 = vmatmul.mubr.bf16.gmra.mxu0 %v8571_v3  ;;  %v13224_v3 = vld [vmem:[#allocation19_spill] sm:$0xff] }
 0x25e   : > { %v12983_v62 = vadd.f32 %v9619_v7, %v7267_v8  ;;  %v9510_v50 = vadd.f32 %v9509_v31, %v9508_v4  ;;  %7827 = vmatprep.mubr.bf16.mxu0 %v8590_v54 }
 0x25f   : > { %v9511_v43 = vpop.f32.mrf.mxu1  ;;  %7659 = vmatmul.mubr.bf16.gmra.mxu1 %v8569_v29  ;;  %v9624_v13 = vpop.f32.mrf.mxu0 }
 0x260   : > { %v7270_v63 = vadd.f32 %v9510_v50, %v12414_v20  ;;  %v9625_v44 = vadd.f32 %v9624_v13, %v9623_v56  ;;  %7666 = vmatprep.mubr.bf16.mxu1 %v8588_v10 }
 0x261   : > { %v9512_v39 = vpop.f32.mrf.mxu1  ;;  %v9626_v60 = vpop.f32.mrf.mxu0 }
 0x262   : > { %v12986_v33 = vadd.f32 %v9622_v30, %v7270_v63  ;;  %v9513_v34 = vadd.f32 %v9512_v39, %v9511_v43 }
 0x263   : > { %v9514_v16 = vpop.f32.mrf.mxu1  ;;  %v9627_v24 = vpop.f32.mrf.mxu0 }
 0x264   : > { %v7275_v42 = vadd.f32 %v9513_v34, %v12445_v18  ;;  %v9628_v23 = vadd.f32 %v9627_v24, %v9626_v60 }
 0x265   : > { %v9515_v47 = vpop.f32.mrf.mxu1  ;;  %v9629_v27 = vpop.f32.mrf.mxu0  ;;  %7828 = vmatmul.mubr.bf16.gmra.mxu0 %v8589_v12 }
 0x266   : > { %v12989_v59 = vadd.f32 %v9625_v44, %v7275_v42  ;;  %v9516_v20 = vadd.f32 %v9515_v47, %v9514_v16 }
 0x267   : > { %v9517_v40 = vpop.f32.mrf.mxu1  ;;  %7667 = vmatmul.mubr.bf16.gmra.mxu1 %v8587_v35  ;;  %v9630_v14 = vpop.f32.mrf.mxu0 }
 0x268   : > { %v7278_v26 = vadd.f32 %v9516_v20, %v12468_v6  ;;  %v9631_v48 = vadd.f32 %v9630_v14, %v9629_v27 }
 0x269   : > { %v9518_v53 = vpop.f32.mrf.mxu1  ;;  %v9632_v37 = vpop.f32.mrf.mxu0 }
 0x26a   : > { %v12992_v7 = vadd.f32 %v9628_v23, %v7278_v26  ;;  %v9519_v2 = vadd.f32 %v9518_v53, %v9517_v40 }
 0x26b   : > { %v9520_v58 = vpop.f32.mrf.mxu1  ;;  %v9633_v18 = vpop.f32.mrf.mxu0 }
 0x26c   : > { %v7283_v45 = vadd.f32 %v9519_v2, %v13224_v3  ;;  %v9634_v32 = vadd.f32 %v9633_v18, %v9632_v37 }
 0x26d   : > { %v9521_v52 = vpop.f32.mrf.mxu1  ;;  %v9635_v54 = vpop.f32.mrf.mxu0 }
 0x26e   : > { %v12995_v4 = vadd.f32 %v9631_v48, %v7283_v45  ;;  %v9522_v46 = vadd.f32 %v9521_v52, %v9520_v58 }
 0x26f   : > { %v9523_v29 = vpop.f32.mrf.mxu1  ;;  %v9636_v8 = vpop.f32.mrf.mxu0 }
 0x270   : > { %v7286_v6 = vadd.f32 %v9522_v46, %v12510_v36  ;;  %v9637_v30 = vadd.f32 %v9636_v8, %v9635_v54 }
 0x271   : > { %v9524_v10 = vpop.f32.mrf.mxu1  ;;  %v9638_v31 = vpop.f32.mrf.mxu0 }
 0x272   : > { %v12998_v56 = vadd.f32 %v9634_v32, %v7286_v6  ;;  %v9525_v50 = vadd.f32 %v9524_v10, %v9523_v29 }
 0x273   : > { %v9526_v43 = vpop.f32.mrf.mxu1  ;;  %v9639_v13 = vpop.f32.mrf.mxu0 }
 0x274   : > { %v7291_v63 = vadd.f32 %v9525_v50, %v12524_v49  ;;  %v9640_v44 = vadd.f32 %v9639_v13, %v9638_v31 }
 0x275   : > { %v9527_v39 = vpop.f32.mrf.mxu1  ;;  %v9641_v60 = vpop.f32.mrf.mxu0 }
 0x276   : > { %v13001_v12 = vadd.f32 %v9637_v30, %v7291_v63  ;;  %v9528_v34 = vadd.f32 %v9527_v39, %v9526_v43 }
 0x277   : > { %v9529_v16 = vpop.f32.mrf.mxu1  ;;  %v9642_v24 = vpop.f32.mrf.mxu0 }
 0x278   : > { %v7294_v36 = vadd.f32 %v9528_v34, %v12549_v1  ;;  %v9643_v35 = vadd.f32 %v9642_v24, %v9641_v60 }
 0x279   : > { %v9530_v42 = vpop.f32.mrf.mxu1  ;;  %v9644_v23 = vpop.f32.mrf.mxu0 }
 0x27a   : > { %v13004_v47 = vadd.f32 %v9640_v44, %v7294_v36  ;;  %v9531_v27 = vadd.f32 %v9530_v42, %v9529_v16 }
 0x27b   : > { %v9532_v20 = vpop.f32.mrf.mxu1  ;;  %v9645_v40 = vpop.f32.mrf.mxu0 }
 0x27c   : > { %v7299_v49 = vadd.f32 %v9531_v27, %v12565_v17  ;;  %v9646_v14 = vadd.f32 %v9645_v40, %v9644_v23 }
 0x27d   : > { %v9533_v26 = vpop.f32.mrf.mxu1  ;;  %v9647_v48 = vpop.f32.mrf.mxu0 }
 0x27e   : > { %v13007_v53 = vadd.f32 %v9643_v35, %v7299_v49  ;;  %v9534_v37 = vadd.f32 %v9533_v26, %v9532_v20 }
 0x27f   : > { %v9535_v2 = vpop.f32.mrf.mxu1  ;;  %v9648_v58 = vpop.f32.mrf.mxu0 }
 0x280   : > { %v7302_v1 = vadd.f32 %v9534_v37, %v12586_v5  ;;  %v9649_v18 = vadd.f32 %v9648_v58, %v9647_v48 }
 0x281   : > { %v9536_v3 = vpop.f32.mrf.mxu1  ;;  %v9650_v45 = vpop.f32.mrf.mxu0 }
 0x282   : > { %v13010_v32 = vadd.f32 %v9646_v14, %v7302_v1  ;;  %v9537_v52 = vadd.f32 %v9536_v3, %v9535_v2 }
 0x283   : > { %v9538_v54 = vpop.f32.mrf.mxu1  ;;  %v9651_v46 = vpop.f32.mrf.mxu0 }
 0x284   : > { %v7307_v17 = vadd.f32 %v9537_v52, %v12602_v28  ;;  %v9652_v29 = vadd.f32 %v9651_v46, %v9650_v45 }
 0x285   : > { %v9539_v8 = vpop.f32.mrf.mxu1  ;;  %v9653_v6 = vpop.f32.mrf.mxu0 }
 0x286   : > { %v13013_v30 = vadd.f32 %v9649_v18, %v7307_v17  ;;  %v9540_v10 = vadd.f32 %v9539_v8, %v9538_v54 }
 0x287   : > { %v9541_v31 = vpop.f32.mrf.mxu1  ;;  %v9654_v50 = vpop.f32.mrf.mxu0 }
 0x288   : > { %v7310_v5 = vadd.f32 %v9540_v10, %v12627_v25  ;;  %v9655_v43 = vadd.f32 %v9654_v50, %v9653_v6 }
 0x289   : > { %v9542_v13 = vpop.f32.mrf.mxu1  ;;  %v9656_v63 = vpop.f32.mrf.mxu0 }
 0x28a   : > { %v13016_v44 = vadd.f32 %v9652_v29, %v7310_v5  ;;  %v9543_v39 = vadd.f32 %v9542_v13, %v9541_v31  ;;  %v13225_v31 = vld [vmem:[#allocation4_spill] sm:$0xff] }
 0x28b   : > { %v9544_v60 = vpop.f32.mrf.mxu1  ;;  %v9657_v34 = vpop.f32.mrf.mxu0 }
 0x28c   : > { %v7315_v28 = vadd.f32 %v9543_v39, %v12650_v11  ;;  %v9658_v16 = vadd.f32 %v9657_v34, %v9656_v63  ;;  %v13226_v34 = vld [vmem:[#allocation5_spill] sm:$0xff] }
 0x28d   : > { %v9545_v24 = vpop.f32.mrf.mxu1  ;;  %v9659_v36 = vpop.f32.mrf.mxu0 }
 0x28e   : > { %v13019_v35 = vadd.f32 %v9655_v43, %v7315_v28  ;;  %v9546_v42 = vadd.f32 %v9545_v24, %v9544_v60 }
 0x28f   : > { %v9547_v23 = vpop.f32.mrf.mxu1  ;;  %v9660_v27 = vpop.f32.mrf.mxu0 }
 0x290   : > { %v7318_v25 = vadd.f32 %v9546_v42, %v12660_v15  ;;  %v9661_v20 = vadd.f32 %v9660_v27, %v9659_v36 }
 0x291   : > { %v9548_v40 = vpop.f32.mrf.mxu1  ;;  %v9662_v49 = vpop.f32.mrf.mxu0 }
 0x292   : > { %v13022_v14 = vadd.f32 %v9658_v16, %v7318_v25  ;;  %v9549_v26 = vadd.f32 %v9548_v40, %v9547_v23  ;;  %v13227_v25 = vld [vmem:[#allocation6_spill] sm:$0xff] }
 0x293   : > { %v9550_v48 = vpop.f32.mrf.mxu1  ;;  %v9663_v37 = vpop.f32.mrf.mxu0 }
 0x294   : > { %v7323_v11 = vadd.f32 %v9549_v26, %v12687_v51  ;;  %v9664_v2 = vadd.f32 %v9663_v37, %v9662_v49 }
 0x295   : > { %v9551_v58 = vpop.f32.mrf.mxu1  ;;  %v9665_v1 = vpop.f32.mrf.mxu0 }
 0x296   : > { %v13025_v18 = vadd.f32 %v9661_v20, %v7323_v11  ;;  %v9552_v3 = vadd.f32 %v9551_v58, %v9550_v48  ;;  %v13228_v58 = vld [vmem:[#allocation7_spill] sm:$0xff] }
 0x297   : > { %v9553_v45 = vpop.f32.mrf.mxu1  ;;  %v9666_v52 = vpop.f32.mrf.mxu0 }
 0x298   : > { %v7326_v15 = vadd.f32 %v9552_v3, %v12697_v9  ;;  %v9667_v54 = vadd.f32 %v9666_v52, %v9665_v1 }
 0x299   : > { %v9554_v46 = vpop.f32.mrf.mxu1  ;;  %v9668_v17 = vpop.f32.mrf.mxu0 }
 0x29a   : > { %v13028_v29 = vadd.f32 %v9664_v2, %v7326_v15  ;;  %v9555_v8 = vadd.f32 %v9554_v46, %v9553_v45 }
 0x29b   : > { %v9556_v6 = vpop.f32.mrf.mxu1  ;;  %v9669_v10 = vpop.f32.mrf.mxu0 }
 0x29c   : > { %v7331_v51 = vadd.f32 %v9555_v8, %v13225_v31  ;;  %v9670_v50 = vadd.f32 %v9669_v10, %v9668_v17  ;;  %v13229_v8 = vld [vmem:[#allocation8_spill] sm:$0xff] }
 0x29d   : > { %v9557_v5 = vpop.f32.mrf.mxu1  ;;  %v9671_v43 = vpop.f32.mrf.mxu0 }
 0x29e   : > { %v13031_v13 = vadd.f32 %v9667_v54, %v7331_v51  ;;  %v9558_v63 = vadd.f32 %v9557_v5, %v9556_v6 }
 0x29f   : > { %v9559_v39 = vpop.f32.mrf.mxu1  ;;  %v9672_v60 = vpop.f32.mrf.mxu0 }
 0x2a0   : > { %v7334_v9 = vadd.f32 %v9558_v63, %v13226_v34  ;;  %v9673_v28 = vadd.f32 %v9672_v60, %v9671_v43 }
 0x2a1   : > { %v9560_v16 = vpop.f32.mrf.mxu1  ;;  %v9674_v24 = vpop.f32.mrf.mxu0 }
 0x2a2   : > { %v13034_v36 = vadd.f32 %v9670_v50, %v7334_v9  ;;  %v9561_v42 = vadd.f32 %v9560_v16, %v9559_v39  ;;  %v13230_v39 = vld [vmem:[#allocation9_spill] sm:$0xff] }
 0x2a3   : > { %v9562_v23 = vpop.f32.mrf.mxu1  ;;  %v9675_v27 = vpop.f32.mrf.mxu0 }
 0x2a4   : > { %v7339_v20 = vadd.f32 %v9561_v42, %v13227_v25  ;;  %v9676_v40 = vadd.f32 %v9675_v27, %v9674_v24 }
 0x2a5   : > { %v9563_v49 = vpop.f32.mrf.mxu1  ;;  %v9677_v26 = vpop.f32.mrf.mxu0 }
 0x2a6   : > { %v13037_v48 = vadd.f32 %v9673_v28, %v7339_v20  ;;  %v9564_v37 = vadd.f32 %v9563_v49, %v9562_v23  ;;  %v13231_v23 = vld [vmem:[#allocation10_spill] sm:$0xff] }
 0x2a7   : > { %v9565_v11 = vpop.f32.mrf.mxu1  ;;  %v9678_v2 = vpop.f32.mrf.mxu0 }
 0x2a8   : > { %v7342_v1 = vadd.f32 %v9564_v37, %v13228_v58  ;;  %v9679_v3 = vadd.f32 %v9678_v2, %v9677_v26 }
 0x2a9   : > { %v9566_v45 = vpop.f32.mrf.mxu1  ;;  %v9680_v52 = vpop.f32.mrf.mxu0 }
 0x2aa   : > { %v13040_v15 = vadd.f32 %v9676_v40, %v7342_v1  ;;  %v9567_v54 = vadd.f32 %v9566_v45, %v9565_v11 }
 0x2ab   : > { %v9568_v46 = vpop.f32.mrf.mxu1  ;;  %v9681_v17 = vpop.f32.mrf.mxu0 }
 0x2ac   : > { %v7347_v6 = vadd.f32 %v9567_v54, %v13229_v8  ;;  %v9682_v10 = vadd.f32 %v9681_v17, %v9680_v52 }
 0x2ad   : > { %v9569_v31 = vpop.f32.mrf.mxu1  ;;  %v9811_v51 = vpop.f32.mrf.mxu0 }
 0x2ae   : > { %v13043_v50 = vadd.f32 %v9679_v3, %v7347_v6  ;;  %v9570_v5 = vadd.f32 %v9569_v31, %v9568_v46 }
 0x2af   : > { %v9699_v43 = vpop.f32.mrf.mxu1  ;;  %v9812_v63 = vpop.f32.mrf.mxu0 }
 0x2b0   : > { %v7350_v60 = vadd.f32 %v9570_v5, %v13230_v39  ;;  %v9813_v25 = vadd.f32 %v9812_v63, %v9811_v51 }
 0x2b1   : > { %v9700_v34 = vpop.f32.mrf.mxu1  ;;  %v9814_v9 = vpop.f32.mrf.mxu0 }
 0x2b2   : > { %v13046_v28 = vadd.f32 %v9682_v10, %v7350_v60  ;;  %v9701_v16 = vadd.f32 %v9700_v34, %v9699_v43 }
 0x2b3   : > { %v9702_v24 = vpop.f32.mrf.mxu1  ;;  %v9815_v42 = vpop.f32.mrf.mxu0 }
 0x2b4   : > { %v7549_v27 = vadd.f32 %v9701_v16, %v13231_v23  ;;  %v9816_v58 = vadd.f32 %v9815_v42, %v9814_v9 }
 0x2b5   : > { %v9703_v20 = vpop.f32.mrf.mxu1  ;;  %v9817_v40 = vpop.f32.mrf.mxu0 }
 0x2b6   : > { %v7710_v49 = vadd.f32 %v9813_v25, %v7549_v27  ;;  %v9704_v26 = vadd.f32 %v9703_v20, %v9702_v24 }
 0x2b7   : > { %v9705_v37 = vpop.f32.mrf.mxu1  ;;  %v9818_v11 = vpop.f32.mrf.mxu0 }
 0x2b8   : > { %v7552_v2 = vadd.f32 %v9704_v26, %v12865_v55  ;;  %v7868_v45 = vmul.f32 0.01, %v7710_v49  ;;  %vm7836_vm6 = vcmp.ge.f32.partialorder %v7710_v49, 0.0  ;;  %v9819_v10 = vadd.f32 %v9818_v11, %v9817_v40 }
 0x2b9   : > { %v9706_v1 = vpop.f32.mrf.mxu1  ;;  %v9820_v3 = vpop.f32.mrf.mxu0 }
 0x2ba   : > { %v7713_v52 = vadd.f32 %v9816_v58, %v7552_v2  ;;  %v9707_v54 = vadd.f32 %v9706_v1, %v9705_v37  ;;  %v7900_v5 = vsel %vm7836_vm6, %v7710_v49, %v7868_v45 }
 0x2bb   : > { %v9708_v46 = vpop.f32.mrf.mxu1  ;;  %v9821_v17 = vpop.f32.mrf.mxu0 }
 0x2bc   : > { %vm7837_vm7 = vcmp.ge.f32.partialorder %v7713_v52, 0.0  ;;  %v7869_v8 = vmul.f32 0.01, %v7713_v52  ;;  %v7557_v6 = vadd.f32 %v9707_v54, %v12883_v21  ;;  %v9822_v16 = vadd.f32 %v9821_v17, %v9820_v3 }
 0x2bd   : > { %v9709_v31 = vpop.f32.mrf.mxu1  ;;  %v9823_v51 = vpop.f32.mrf.mxu0 }
 0x2be   : > { %v7901_v55 = vsel %vm7837_vm7, %v7713_v52, %v7869_v8  ;;  %v7718_v43 = vadd.f32 %v9819_v10, %v7557_v6  ;;  %v9710_v63 = vadd.f32 %v9709_v31, %v9708_v46 }
 0x2bf   : > { %v8807_v39 = vpack.c.bf16 %v7901_v55, %v7900_v5  ;;  %v9711_v60 = vpop.f32.mrf.mxu1  ;;  %v9824_v34 = vpop.f32.mrf.mxu0 }
 0x2c0   : > { %v7560_v9 = vadd.f32 %v9710_v63, %v12905_v19  ;;  %v7870_v42 = vmul.f32 0.01, %v7718_v43  ;;  %vm7838_vm8 = vcmp.ge.f32.partialorder %v7718_v43, 0.0  ;;  %v9825_v26 = vadd.f32 %v9824_v34, %v9823_v51 }
 0x2c1   : > { %8808 = vst [vmem:[%s13055_s20] sm:$0xff] %v8807_v39   ;;  %v9712_v21 = vpop.f32.mrf.mxu1  ;;  %v9826_v24 = vpop.f32.mrf.mxu0 }
 0x2c2   : > { %v7721_v23 = vadd.f32 %v9822_v16, %v7560_v9  ;;  %v9713_v27 = vadd.f32 %v9712_v21, %v9711_v60  ;;  %v7902_v2 = vsel %vm7838_vm8, %v7718_v43, %v7870_v42 }
 0x2c3   : > { %v9714_v25 = vpop.f32.mrf.mxu1  ;;  %v9827_v20 = vpop.f32.mrf.mxu0 }
 0x2c4   : > { %vm7839_vm9 = vcmp.ge.f32.partialorder %v7721_v23, 0.0  ;;  %v7871_v40 = vmul.f32 0.01, %v7721_v23  ;;  %v7565_v49 = vadd.f32 %v9713_v27, %v12912_v0  ;;  %v9828_v46 = vadd.f32 %v9827_v20, %v9826_v24 }
 0x2c5   : > { %v9715_v37 = vpop.f32.mrf.mxu1  ;;  %v9829_v11 = vpop.f32.mrf.mxu0 }
 0x2c6   : > { %v7903_v19 = vsel %vm7839_vm9, %v7721_v23, %v7871_v40  ;;  %v7726_v58 = vadd.f32 %v9825_v26, %v7565_v49  ;;  %v9716_v1 = vadd.f32 %v9715_v37, %v9714_v25 }
 0x2c7   : > { %v8812_v3 = vpack.c.bf16 %v7903_v19, %v7902_v2  ;;  %v9717_v45 = vpop.f32.mrf.mxu1  ;;  %v9830_v52 = vpop.f32.mrf.mxu0 }
 0x2c8   : > { %v7568_v54 = vadd.f32 %v9716_v1, %v12940_v22  ;;  %v7872_v6 = vmul.f32 0.01, %v7726_v58  ;;  %vm7840_vm10 = vcmp.ge.f32.partialorder %v7726_v58, 0.0  ;;  %v9831_v43 = vadd.f32 %v9830_v52, %v9829_v11 }
 0x2c9   : > { %8884 = vst [vmem:[%s13055_s20 + $0x8] sm:$0xff] %v8812_v3   ;;  %v9718_v17 = vpop.f32.mrf.mxu1  ;;  %v9832_v8 = vpop.f32.mrf.mxu0 }
 0x2ca   : > { %v7729_v10 = vadd.f32 %v9828_v46, %v7568_v54  ;;  %v9719_v31 = vadd.f32 %v9718_v17, %v9717_v45  ;;  %v7904_v60 = vsel %vm7840_vm10, %v7726_v58, %v7872_v6 }
 0x2cb   : > { %v9720_v0 = vpop.f32.mrf.mxu1  ;;  %v9833_v51 = vpop.f32.mrf.mxu0 }
 0x2cc   : > { %vm7841_vm11 = vcmp.ge.f32.partialorder %v7729_v10, 0.0  ;;  %v7873_v5 = vmul.f32 0.01, %v7729_v10  ;;  %v7573_v55 = vadd.f32 %v9719_v31, %v12949_v38  ;;  %v9834_v23 = vadd.f32 %v9833_v51, %v9832_v8 }
 0x2cd   : > { %v9721_v63 = vpop.f32.mrf.mxu1  ;;  %v9835_v39 = vpop.f32.mrf.mxu0 }
 0x2ce   : > { %v7905_v22 = vsel %vm7841_vm11, %v7729_v10, %v7873_v5  ;;  %v7734_v34 = vadd.f32 %v9831_v43, %v7573_v55  ;;  %v9722_v9 = vadd.f32 %v9721_v63, %v9720_v0 }
 0x2cf   : > { %v8817_v16 = vpack.c.bf16 %v7905_v22, %v7904_v60  ;;  %v9723_v21 = vpop.f32.mrf.mxu1  ;;  %v9836_v24 = vpop.f32.mrf.mxu0 }
 0x2d0   : > { %v7576_v42 = vadd.f32 %v9722_v9, %v12964_v61  ;;  %v7874_v20 = vmul.f32 0.01, %v7734_v34  ;;  %vm7842_vm12 = vcmp.ge.f32.partialorder %v7734_v34, 0.0  ;;  %v9837_v2 = vadd.f32 %v9836_v24, %v9835_v39 }
 0x2d1   : > { %8885 = vst [vmem:[%s13055_s20 + $0x10] sm:$0xff] %v8817_v16   ;;  %v9724_v27 = vpop.f32.mrf.mxu1  ;;  %v9838_v25 = vpop.f32.mrf.mxu0 }
 0x2d2   : > { %v7737_v40 = vadd.f32 %v9834_v23, %v7576_v42  ;;  %v9725_v49 = vadd.f32 %v9724_v27, %v9723_v21  ;;  %v7906_v1 = vsel %vm7842_vm12, %v7734_v34, %v7874_v20 }
 0x2d3   : > { %v9726_v38 = vpop.f32.mrf.mxu1  ;;  %v9839_v26 = vpop.f32.mrf.mxu0 }
 0x2d4   : > { %vm7843_vm13 = vcmp.ge.f32.partialorder %v7737_v40, 0.0  ;;  %v7875_v37 = vmul.f32 0.01, %v7737_v40  ;;  %v7581_v11 = vadd.f32 %v9725_v49, %v12969_v41  ;;  %v9840_v8 = vadd.f32 %v9839_v26, %v9838_v25 }
 0x2d5   : > { %v9727_v19 = vpop.f32.mrf.mxu1  ;;  %v9841_v58 = vpop.f32.mrf.mxu0 }
 0x2d6   : > { %v7907_v61 = vsel %vm7843_vm13, %v7737_v40, %v7875_v37  ;;  %v7742_v3 = vadd.f32 %v9837_v2, %v7581_v11  ;;  %v9728_v45 = vadd.f32 %v9727_v19, %v9726_v38 }
 0x2d7   : > { %v8822_v52 = vpack.c.bf16 %v7907_v61, %v7906_v1  ;;  %v9729_v54 = vpop.f32.mrf.mxu1  ;;  %v9842_v46 = vpop.f32.mrf.mxu0 }
 0x2d8   : > { %v7584_v17 = vadd.f32 %v9728_v45, %v12980_v57  ;;  %v7876_v31 = vmul.f32 0.01, %v7742_v3  ;;  %vm7844_vm14 = vcmp.ge.f32.partialorder %v7742_v3, 0.0  ;;  %v9843_v63 = vadd.f32 %v9842_v46, %v9841_v58 }
 0x2d9   : > { %8886 = vst [vmem:[%s13055_s20 + $0x18] sm:$0xff] %v8822_v52   ;;  %v9730_v6 = vpop.f32.mrf.mxu1  ;;  %v9844_v10 = vpop.f32.mrf.mxu0 }
 0x2da   : > { %v7745_v0 = vadd.f32 %v9840_v8, %v7584_v17  ;;  %v9731_v51 = vadd.f32 %v9730_v6, %v9729_v54  ;;  %v7908_v22 = vsel %vm7844_vm14, %v7742_v3, %v7876_v31 }
 0x2db   : > { %v9732_v41 = vpop.f32.mrf.mxu1  ;;  %v9845_v5 = vpop.f32.mrf.mxu0 }
 0x2dc   : > { %vm7845_vm15 = vcmp.ge.f32.partialorder %v7745_v0, 0.0  ;;  %v7877_v55 = vmul.f32 0.01, %v7745_v0  ;;  %v7589_v43 = vadd.f32 %v9731_v51, %v12983_v62  ;;  %v9846_v23 = vadd.f32 %v9845_v5, %v9844_v10 }
 0x2dd   : > { %v9733_v39 = vpop.f32.mrf.mxu1  ;;  %v9847_v60 = vpop.f32.mrf.mxu0 }
 0x2de   : > { %v7909_v57 = vsel %vm7845_vm15, %v7745_v0, %v7877_v55  ;;  %v7750_v34 = vadd.f32 %v9843_v63, %v7589_v43  ;;  %v9734_v9 = vadd.f32 %v9733_v39, %v9732_v41 }
 0x2df   : > { %v8827_v16 = vpack.c.bf16 %v7909_v57, %v7908_v22  ;;  %v9735_v21 = vpop.f32.mrf.mxu1  ;;  %v9848_v24 = vpop.f32.mrf.mxu0 }
 0x2e0   : > { %v7592_v42 = vadd.f32 %v9734_v9, %v12986_v33  ;;  %v7878_v20 = vmul.f32 0.01, %v7750_v34  ;;  %vm7846_vm0 = vcmp.ge.f32.partialorder %v7750_v34, 0.0  ;;  %v9849_v11 = vadd.f32 %v9848_v24, %v9847_v60 }
 0x2e1   : > { %8887 = vst [vmem:[%s13055_s20 + $0x20] sm:$0xff] %v8827_v16   ;;  %v9736_v27 = vpop.f32.mrf.mxu1  ;;  %v9850_v25 = vpop.f32.mrf.mxu0 }
 0x2e2   : > { %v7753_v40 = vadd.f32 %v9846_v23, %v7592_v42  ;;  %v9737_v49 = vadd.f32 %v9736_v27, %v9735_v21  ;;  %v7910_v58 = vsel %vm7846_vm0, %v7750_v34, %v7878_v20 }
 0x2e3   : > { %v9738_v62 = vpop.f32.mrf.mxu1  ;;  %v9851_v38 = vpop.f32.mrf.mxu0 }
 0x2e4   : > { %vm7847_vm1 = vcmp.ge.f32.partialorder %v7753_v40, 0.0  ;;  %v7879_v26 = vmul.f32 0.01, %v7753_v40  ;;  %v7597_v37 = vadd.f32 %v9737_v49, %v12989_v59  ;;  %v9852_v46 = vadd.f32 %v9851_v38, %v9850_v25 }
 0x2e5   : > { %v9739_v2 = vpop.f32.mrf.mxu1  ;;  %v9853_v19 = vpop.f32.mrf.mxu0 }
 0x2e6   : > { %v7911_v33 = vsel %vm7847_vm1, %v7753_v40, %v7879_v26  ;;  %v7758_v1 = vadd.f32 %v9849_v11, %v7597_v37  ;;  %v9740_v61 = vadd.f32 %v9739_v2, %v9738_v62 }
 0x2e7   : > { %v8832_v3 = vpack.c.bf16 %v7911_v33, %v7910_v58  ;;  %v9741_v45 = vpop.f32.mrf.mxu1  ;;  %v9854_v52 = vpop.f32.mrf.mxu0 }
 0x2e8   : > { %v7600_v54 = vadd.f32 %v9740_v61, %v12992_v7  ;;  %v7880_v6 = vmul.f32 0.01, %v7758_v1  ;;  %vm7848_vm3 = vcmp.ge.f32.partialorder %v7758_v1, 0.0  ;;  %v9855_v5 = vadd.f32 %v9854_v52, %v9853_v19 }
 0x2e9   : > { %8888 = vst [vmem:[%s13055_s20 + $0x28] sm:$0xff] %v8832_v3   ;;  %v9742_v17 = vpop.f32.mrf.mxu1  ;;  %v9856_v8 = vpop.f32.mrf.mxu0 }
 0x2ea   : > { %v7761_v10 = vadd.f32 %v9852_v46, %v7600_v54  ;;  %v9743_v31 = vadd.f32 %v9742_v17, %v9741_v45  ;;  %v7912_v63 = vsel %vm7848_vm3, %v7758_v1, %v7880_v6 }
 0x2eb   : > { %v9744_v59 = vpop.f32.mrf.mxu1  ;;  %v9857_v0 = vpop.f32.mrf.mxu0 }
 0x2ec   : > { %vm7849_vm4 = vcmp.ge.f32.partialorder %v7761_v10, 0.0  ;;  %v7881_v51 = vmul.f32 0.01, %v7761_v10  ;;  %v7605_v41 = vadd.f32 %v9743_v31, %v12995_v4  ;;  %v9858_v16 = vadd.f32 %v9857_v0, %v9856_v8 }
 0x2ed   : > { %v9745_v55 = vpop.f32.mrf.mxu1  ;;  %v9859_v43 = vpop.f32.mrf.mxu0 }
 0x2ee   : > { %v7913_v7 = vsel %vm7849_vm4, %v7761_v10, %v7881_v51  ;;  %v7766_v39 = vadd.f32 %v9855_v5, %v7605_v41  ;;  %v9746_v60 = vadd.f32 %v9745_v55, %v9744_v59 }
 0x2ef   : > { %v8837_v22 = vpack.c.bf16 %v7913_v7, %v7912_v63  ;;  %v9747_v57 = vpop.f32.mrf.mxu1  ;;  %v9860_v34 = vpop.f32.mrf.mxu0 }
 0x2f0   : > { %v7608_v9 = vadd.f32 %v9746_v60, %v12998_v56  ;;  %v7882_v42 = vmul.f32 0.01, %v7766_v39  ;;  %vm7850_vm5 = vcmp.ge.f32.partialorder %v7766_v39, 0.0  ;;  %v9861_v49 = vadd.f32 %v9860_v34, %v9859_v43 }
 0x2f1   : > { %8889 = vst [vmem:[%s13055_s20 + $0x30] sm:$0xff] %v8837_v22   ;;  %v9748_v21 = vpop.f32.mrf.mxu1  ;;  %v9862_v24 = vpop.f32.mrf.mxu0 }
 0x2f2   : > { %v7769_v23 = vadd.f32 %v9858_v16, %v7608_v9  ;;  %v9749_v27 = vadd.f32 %v9748_v21, %v9747_v57  ;;  %v7914_v26 = vsel %vm7850_vm5, %v7766_v39, %v7882_v42 }
 0x2f3   : > { %v9750_v4 = vpop.f32.mrf.mxu1  ;;  %v9863_v25 = vpop.f32.mrf.mxu0 }
 0x2f4   : > { %vm7851_vm2 = vcmp.ge.f32.partialorder %v7769_v23, 0.0  ;;  %v7883_v20 = vmul.f32 0.01, %v7769_v23  ;;  %v7613_v40 = vadd.f32 %v9749_v27, %v13001_v12  ;;  %v9864_v1 = vadd.f32 %v9863_v25, %v9862_v24 }
 0x2f5   : > { %v9751_v62 = vpop.f32.mrf.mxu1  ;;  %v9865_v38 = vpop.f32.mrf.mxu0 }
 0x2f6   : > { %v7915_v56 = vsel %vm7851_vm2, %v7769_v23, %v7883_v20  ;;  %v7774_v37 = vadd.f32 %v9861_v49, %v7613_v40  ;;  %v9752_v11 = vadd.f32 %v9751_v62, %v9750_v4 }
 0x2f7   : > { %v8842_v2 = vpack.c.bf16 %v7915_v56, %v7914_v26  ;;  %v9753_v19 = vpop.f32.mrf.mxu1  ;;  %v9866_v58 = vpop.f32.mrf.mxu0 }
 0x2f8   : > { %v7616_v33 = vadd.f32 %v9752_v11, %v13004_v47  ;;  %v7884_v45 = vmul.f32 0.01, %v7774_v37  ;;  %vm7852_vm6 = vcmp.ge.f32.partialorder %v7774_v37, 0.0  ;;  %v9867_v6 = vadd.f32 %v9866_v58, %v9865_v38 }
 0x2f9   : > { %8890 = vst [vmem:[%s13055_s20 + $0x38] sm:$0xff] %v8842_v2   ;;  %v9754_v61 = vpop.f32.mrf.mxu1  ;;  %v9868_v3 = vpop.f32.mrf.mxu0 }
 0x2fa   : > { %v7777_v52 = vadd.f32 %v9864_v1, %v7616_v33  ;;  %v9755_v54 = vadd.f32 %v9754_v61, %v9753_v19  ;;  %v7916_v59 = vsel %vm7852_vm6, %v7774_v37, %v7884_v45 }
 0x2fb   : > { %v9756_v12 = vpop.f32.mrf.mxu1  ;;  %v9869_v46 = vpop.f32.mrf.mxu0 }
 0x2fc   : > { %vm7853_vm7 = vcmp.ge.f32.partialorder %v7777_v52, 0.0  ;;  %v7885_v17 = vmul.f32 0.01, %v7777_v52  ;;  %v7621_v8 = vadd.f32 %v9755_v54, %v13007_v53  ;;  %v9870_v63 = vadd.f32 %v9869_v46, %v9868_v3 }
 0x2fd   : > { %v9757_v10 = vpop.f32.mrf.mxu1  ;;  %v9871_v31 = vpop.f32.mrf.mxu0 }
 0x2fe   : > { %v7917_v47 = vsel %vm7853_vm7, %v7777_v52, %v7885_v17  ;;  %v7782_v0 = vadd.f32 %v9867_v6, %v7621_v8  ;;  %v9758_v51 = vadd.f32 %v9757_v10, %v9756_v12 }
 0x2ff   : > { %v8847_v41 = vpack.c.bf16 %v7917_v47, %v7916_v59  ;;  %v9759_v5 = vpop.f32.mrf.mxu1  ;;  %v9872_v55 = vpop.f32.mrf.mxu0 }
 0x300   : > { %v7624_v43 = vadd.f32 %v9758_v51, %v13010_v32  ;;  %v7886_v60 = vmul.f32 0.01, %v7782_v0  ;;  %vm7854_vm8 = vcmp.ge.f32.partialorder %v7782_v0, 0.0  ;;  %v9873_v21 = vadd.f32 %v9872_v55, %v9871_v31 }
 0x301   : > { %8891 = vst [vmem:[%s13055_s20 + $0x40] sm:$0xff] %v8847_v41   ;;  %v9760_v7 = vpop.f32.mrf.mxu1  ;;  %v9874_v39 = vpop.f32.mrf.mxu0 }
 0x302   : > { %v7785_v22 = vadd.f32 %v9870_v63, %v7624_v43  ;;  %v9761_v57 = vadd.f32 %v9760_v7, %v9759_v5  ;;  %v7918_v23 = vsel %vm7854_vm8, %v7782_v0, %v7886_v60 }
 0x303   : > { %v9762_v53 = vpop.f32.mrf.mxu1  ;;  %v9875_v34 = vpop.f32.mrf.mxu0 }
 0x304   : > { %vm7855_vm9 = vcmp.ge.f32.partialorder %v7785_v22, 0.0  ;;  %v7887_v9 = vmul.f32 0.01, %v7785_v22  ;;  %v7629_v16 = vadd.f32 %v9761_v57, %v13013_v30  ;;  %v9876_v62 = vadd.f32 %v9875_v34, %v9874_v39 }
 0x305   : > { %v9763_v24 = vpop.f32.mrf.mxu1  ;;  %v9877_v42 = vpop.f32.mrf.mxu0 }
 0x306   : > { %v7919_v32 = vsel %vm7855_vm9, %v7785_v22, %v7887_v9  ;;  %v7790_v27 = vadd.f32 %v9873_v21, %v7629_v16  ;;  %v9764_v4 = vadd.f32 %v9763_v24, %v9762_v53 }
 0x307   : > { %v8852_v25 = vpack.c.bf16 %v7919_v32, %v7918_v23  ;;  %v9765_v20 = vpop.f32.mrf.mxu1  ;;  %v9878_v40 = vpop.f32.mrf.mxu0 }
 0x308   : > { %v7632_v49 = vadd.f32 %v9764_v4, %v13016_v44  ;;  %v7888_v56 = vmul.f32 0.01, %v7790_v27  ;;  %vm7856_vm10 = vcmp.ge.f32.partialorder %v7790_v27, 0.0  ;;  %v9879_v33 = vadd.f32 %v9878_v40, %v9877_v42 }
 0x309   : > { %8892 = vst [vmem:[%s13055_s20 + $0x48] sm:$0xff] %v8852_v25   ;;  %v9766_v38 = vpop.f32.mrf.mxu1  ;;  %v9880_v26 = vpop.f32.mrf.mxu0 }
 0x30a   : > { %v7793_v37 = vadd.f32 %v9876_v62, %v7632_v49  ;;  %v9767_v11 = vadd.f32 %v9766_v38, %v9765_v20  ;;  %v7920_v3 = vsel %vm7856_vm10, %v7790_v27, %v7888_v56 }
 0x30b   : > { %v9768_v30 = vpop.f32.mrf.mxu1  ;;  %v9881_v2 = vpop.f32.mrf.mxu0 }
 0x30c   : > { %vm7857_vm11 = vcmp.ge.f32.partialorder %v7793_v37, 0.0  ;;  %v7889_v19 = vmul.f32 0.01, %v7793_v37  ;;  %v7637_v58 = vadd.f32 %v9767_v11, %v13019_v35  ;;  %v9882_v8 = vadd.f32 %v9881_v2, %v9880_v26 }
 0x30d   : > { %v9769_v1 = vpop.f32.mrf.mxu1  ;;  %v9883_v61 = vpop.f32.mrf.mxu0 }
 0x30e   : > { %v7921_v44 = vsel %vm7857_vm11, %v7793_v37, %v7889_v19  ;;  %v7798_v45 = vadd.f32 %v9879_v33, %v7637_v58  ;;  %v9770_v52 = vadd.f32 %v9769_v1, %v9768_v30 }
 0x30f   : > { %v8857_v54 = vpack.c.bf16 %v7921_v44, %v7920_v3  ;;  %v9771_v12 = vpop.f32.mrf.mxu1  ;;  %v9884_v46 = vpop.f32.mrf.mxu0 }
 0x310   : > { %v7640_v17 = vadd.f32 %v9770_v52, %v13022_v14  ;;  %v7890_v31 = vmul.f32 0.01, %v7798_v45  ;;  %vm7858_vm12 = vcmp.ge.f32.partialorder %v7798_v45, 0.0  ;;  %v9885_v5 = vadd.f32 %v9884_v46, %v9883_v61 }
 0x311   : > { %8893 = vst [vmem:[%s13055_s20 + $0x50] sm:$0xff] %v8857_v54   ;;  %v9772_v6 = vpop.f32.mrf.mxu1  ;;  %v9886_v10 = vpop.f32.mrf.mxu0 }
 0x312   : > { %v7801_v59 = vadd.f32 %v9882_v8, %v7640_v17  ;;  %v9773_v47 = vadd.f32 %v9772_v6, %v9771_v12  ;;  %v7922_v63 = vsel %vm7858_vm12, %v7798_v45, %v7890_v31 }
 0x313   : > { %v9774_v35 = vpop.f32.mrf.mxu1  ;;  %v9887_v0 = vpop.f32.mrf.mxu0 }
 0x314   : > { %vm7859_vm13 = vcmp.ge.f32.partialorder %v7801_v59, 0.0  ;;  %v7891_v51 = vmul.f32 0.01, %v7801_v59  ;;  %v7645_v41 = vadd.f32 %v9773_v47, %v13025_v18  ;;  %v9888_v34 = vadd.f32 %v9887_v0, %v9886_v10 }
 0x315   : > { %v9775_v55 = vpop.f32.mrf.mxu1  ;;  %v9889_v43 = vpop.f32.mrf.mxu0 }
 0x316   : > { %v7923_v14 = vsel %vm7859_vm13, %v7801_v59, %v7891_v51  ;;  %v7806_v7 = vadd.f32 %v9885_v5, %v7645_v41  ;;  %v9776_v39 = vadd.f32 %v9775_v55, %v9774_v35 }
 0x317   : > { %v8862_v60 = vpack.c.bf16 %v7923_v14, %v7922_v63  ;;  %v9777_v22 = vpop.f32.mrf.mxu1  ;;  %v9890_v57 = vpop.f32.mrf.mxu0 }
 0x318   : > { %v7648_v53 = vadd.f32 %v9776_v39, %v13028_v29  ;;  %v7892_v21 = vmul.f32 0.01, %v7806_v7  ;;  %vm7860_vm14 = vcmp.ge.f32.partialorder %v7806_v7, 0.0  ;;  %v9891_v4 = vadd.f32 %v9890_v57, %v9889_v43 }
 0x319   : > { %8894 = vst [vmem:[%s13055_s20 + $0x58] sm:$0xff] %v8862_v60   ;;  %v9778_v9 = vpop.f32.mrf.mxu1  ;;  %v9892_v16 = vpop.f32.mrf.mxu0 }
 0x31a   : > { %v7809_v24 = vadd.f32 %v9888_v34, %v7648_v53  ;;  %v9779_v42 = vadd.f32 %v9778_v9, %v9777_v22  ;;  %v7924_v40 = vsel %vm7860_vm14, %v7806_v7, %v7892_v21 }
 0x31b   : > { %v9780_v18 = vpop.f32.mrf.mxu1  ;;  %v9893_v23 = vpop.f32.mrf.mxu0 }
 0x31c   : > { %vm7861_vm15 = vcmp.ge.f32.partialorder %v7809_v24, 0.0  ;;  %v7893_v32 = vmul.f32 0.01, %v7809_v24  ;;  %v7653_v27 = vadd.f32 %v9779_v42, %v13031_v13  ;;  %v9894_v11 = vadd.f32 %v9893_v23, %v9892_v16 }
 0x31d   : > { %v9781_v25 = vpop.f32.mrf.mxu1  ;;  %v9895_v20 = vpop.f32.mrf.mxu0 }
 0x31e   : > { %v7925_v29 = vsel %vm7861_vm15, %v7809_v24, %v7893_v32  ;;  %v7814_v49 = vadd.f32 %v9891_v4, %v7653_v27  ;;  %v9782_v62 = vadd.f32 %v9781_v25, %v9780_v18 }
 0x31f   : > { %v8867_v38 = vpack.c.bf16 %v7925_v29, %v7924_v40  ;;  %v9783_v26 = vpop.f32.mrf.mxu1  ;;  %v9896_v56 = vpop.f32.mrf.mxu0 }
 0x320   : > { %v7656_v37 = vadd.f32 %v9782_v62, %v13034_v36  ;;  %v7894_v19 = vmul.f32 0.01, %v7814_v49  ;;  %vm7862_vm0 = vcmp.ge.f32.partialorder %v7814_v49, 0.0  ;;  %v9897_v44 = vadd.f32 %v9896_v56, %v9895_v20 }
 0x321   : > { %8895 = vst [vmem:[%s13055_s20 + $0x60] sm:$0xff] %v8867_v38   ;;  %v9784_v30 = vpop.f32.mrf.mxu1  ;;  %v9898_v2 = vpop.f32.mrf.mxu0 }
 0x322   : > { %v7817_v58 = vadd.f32 %v9894_v11, %v7656_v37  ;;  %v9785_v33 = vadd.f32 %v9784_v30, %v9783_v26  ;;  %v7926_v54 = vsel %vm7862_vm0, %v7814_v49, %v7894_v19 }
 0x323   : > { %v9786_v13 = vpop.f32.mrf.mxu1  ;;  %v9899_v1 = vpop.f32.mrf.mxu0 }
 0x324   : > { %vm7863_vm1 = vcmp.ge.f32.partialorder %v7817_v58, 0.0  ;;  %v7895_v61 = vmul.f32 0.01, %v7817_v58  ;;  %v7661_v3 = vadd.f32 %v9785_v33, %v13037_v48  ;;  %v9900_v31 = vadd.f32 %v9899_v1, %v9898_v2 }
 0x325   : > { %v9787_v45 = vpop.f32.mrf.mxu1  ;;  %v9901_v52 = vpop.f32.mrf.mxu0 }
 0x326   : > { %v7927_v36 = vsel %vm7863_vm1, %v7817_v58, %v7895_v61  ;;  %v7822_v12 = vadd.f32 %v9897_v44, %v7661_v3  ;;  %v9788_v46 = vadd.f32 %v9787_v45, %v9786_v13 }
 0x327   : > { %v8872_v17 = vpack.c.bf16 %v7927_v36, %v7926_v54  ;;  %v9789_v8 = vpop.f32.mrf.mxu1  ;;  %v9902_v6 = vpop.f32.mrf.mxu0 }
 0x328   : > { %v7664_v10 = vadd.f32 %v9788_v46, %v13040_v15  ;;  %v7896_v35 = vmul.f32 0.01, %v7822_v12  ;;  %vm7864_vm3 = vcmp.ge.f32.partialorder %v7822_v12, 0.0  ;;  %v9903_v55 = vadd.f32 %v9902_v6, %v9901_v52 }
 0x329   : > { %8896 = vst [vmem:[%s13055_s20 + $0x68] sm:$0xff] %v8872_v17   ;;  %v9790_v59 = vpop.f32.mrf.mxu1  ;;  %v9904_v47 = vpop.f32.mrf.mxu0 }
 0x32a   : > { %v7825_v0 = vadd.f32 %v9900_v31, %v7664_v10  ;;  %v9791_v51 = vadd.f32 %v9790_v59, %v9789_v8  ;;  %v7928_v14 = vsel %vm7864_vm3, %v7822_v12, %v7896_v35 }
 0x32b   : > { %v9792_v48 = vpop.f32.mrf.mxu1  ;;  %v9905_v63 = vpop.f32.mrf.mxu0 }
 0x32c   : > { %vm7865_vm4 = vcmp.ge.f32.partialorder %v7825_v0, 0.0  ;;  %v7897_v41 = vmul.f32 0.01, %v7825_v0  ;;  %v7669_v5 = vadd.f32 %v9791_v51, %v13043_v50  ;;  %v9906_v57 = vadd.f32 %v9905_v63, %v9904_v47 }
 0x32d   : > { %v9793_v43 = vpop.f32.mrf.mxu1 }
 0x32e   : > { %v7929_v15 = vsel %vm7865_vm4, %v7825_v0, %v7897_v41  ;;  %v7830_v7 = vadd.f32 %v9903_v55, %v7669_v5  ;;  %v9794_v39 = vadd.f32 %v9793_v43, %v9792_v48 }
 0x32f   : > { %v8877_v60 = vpack.c.bf16 %v7929_v15, %v7928_v14 }
 0x330   : > { %v7672_v22 = vadd.f32 %v9794_v39, %v13046_v28  ;;  %v7898_v53 = vmul.f32 0.01, %v7830_v7  ;;  %vm7866_vm5 = vcmp.ge.f32.partialorder %v7830_v7, 0.0 }
 0x331   : > { %8897 = vst [vmem:[%s13055_s20 + $0x70] sm:$0xff] %v8877_v60  }
 0x332   : > { %v7833_v34 = vadd.f32 %v9906_v57, %v7672_v22  ;;  %v7930_v16 = vsel %vm7866_vm5, %v7830_v7, %v7898_v53 }
 0x334   : > { %vm7867_vm2 = vcmp.ge.f32.partialorder %v7833_v34, 0.0  ;;  %v7899_v9 = vmul.f32 0.01, %v7833_v34 }
 0x336   : > { %v7931_v50 = vsel %vm7867_vm2, %v7833_v34, %v7899_v9 }
 0x337   : > { %v8882_v21 = vpack.c.bf16 %v7931_v50, %v7930_v16 }
 0x339   : > { %8898 = vst [vmem:[%s13055_s20 + $0x78] sm:$0xff] %v8882_v21  }
 0x33a PF: > { %s14_s17 = sadd.s32 1, %s10159_s17   ;;  %s13232_s15 = smov %s10155_s16 }
 0x33b   : > { %p11_p5 = scmp.ge.s32.totalorder %s14_s17, 4   ;;  %s13233_s16 = smov %s13235_s18 }
 0x33d   :  { %13 = sbr.rel (!%p11_p5) target bundleno = 2 (0x2), region = 77 }

</bundles_post_ra>
